<compile_context>
chip_gen: v5e
topology: v5e:2x2
jax: 0.10.0
libtpu: 0.0.40
codegen_flags: <defaults>
</compile_context>

<pallas_src>
import functools

import jax
import jax.numpy as jnp
from jax.experimental import pallas as pl
from jax.experimental.pallas import tpu as pltpu

C_IN, C_MID, C_OUT = 8, 8, 16   # reference: 512, 512, 1024


# ----------------------------------------------------------------------------
# Pallas kernels
# ----------------------------------------------------------------------------
def _conv3x3_kernel(x_ref, w_ref, b_ref, o_ref, *, pool):
    """Fused im2col Conv2d(3x3, valid) + bias + ReLU (+ optional 2x2 ceil max-pool).

    x_ref: (1, H, W, Cin)       activation block (one image per grid step)
    w_ref: (9, Cin, Cout) bf16  weights, tap-major (kh*3 + kw)
    b_ref: (1, Cout) f32        bias
    o_ref: (1, Hout, Wout, Cout)
    """
    x = x_ref[0]                                    # (H, W, Cin)
    H, W, Cin = x.shape
    Ho, Wo = H - 2, W - 2

    # 9 shifted views -> 9 accumulating MXU dots (bf16 operands, f32 acc).
    acc = None
    for di in range(3):
        for dj in range(3):
            patch = x[di:di + Ho, dj:dj + Wo, :].reshape(Ho * Wo, Cin)
            patch = patch.astype(jnp.bfloat16)
            part = jnp.dot(patch, w_ref[di * 3 + dj],
                           preferred_element_type=jnp.float32)
            acc = part if acc is None else acc + part

    acc = jnp.maximum(acc + b_ref[...], 0.0)        # (Ho*Wo, Cout) f32
    Co = acc.shape[-1]
    y = acc.reshape(Ho, Wo, Co)

    if pool:
        # MaxPool2d(kernel=2, stride=2, ceil_mode=True) fused into the epilogue.
        if Ho % 2:                                  # ceil-mode tail (static; not hit at demo shapes)
            y = jnp.concatenate(
                [y, jnp.full((1, Wo, Co), -jnp.inf, y.dtype)], axis=0)
        if Wo % 2:
            y = jnp.concatenate(
                [y, jnp.full((y.shape[0], 1, Co), -jnp.inf, y.dtype)], axis=1)
        Hp, Wp = y.shape[0] // 2, y.shape[1] // 2
        y = jnp.max(y.reshape(Hp, 2, 2 * Wp, Co), axis=1)   # pool along H
        y = jnp.max(y.reshape(Hp, Wp, 2, Co), axis=2)       # pool along W

    o_ref[0] = y.astype(o_ref.dtype)


def _gram_kernel(x_ref, o_ref):
    """Per-loc outer products: (tl, AB) -> (tl, AB, AB), broadcast done in-kernel."""
    x = x_ref[...]                                  # (tl, AB) lane-dense load
    o_ref[...] = x[:, :, None] * x[:, None, :]


# ----------------------------------------------------------------------------
# Wrappers
# ----------------------------------------------------------------------------
def _conv3x3(x_nhwc, w_oihw, b, *, pool, out_dtype):
    """Conv2d(k=3, s=1, valid) + ReLU (+ optional fused 2x2 ceil max-pool)."""
    N, H, W, Cin = x_nhwc.shape
    Co = w_oihw.shape[0]
    Ho, Wo = H - 2, W - 2
    if pool:
        Hout, Wout = -(-Ho // 2), -(-Wo // 2)
    else:
        Hout, Wout = Ho, Wo

    # OIHW -> (kh, kw, Cin, Cout) -> (9, Cin, Cout); bf16 halves weight traffic.
    w_r = jnp.transpose(w_oihw, (2, 3, 1, 0)).reshape(9, Cin, Co).astype(jnp.bfloat16)
    b2 = b.reshape(1, Co).astype(jnp.float32)

    flops = 2 * N * Ho * Wo * 9 * Cin * Co
    bytes_acc = (N * H * W * Cin * x_nhwc.dtype.itemsize
                 + 9 * Cin * Co * 2 + Co * 4
                 + N * Hout * Wout * Co * jnp.dtype(out_dtype).itemsize)

    return pl.pallas_call(
        functools.partial(_conv3x3_kernel, pool=pool),
        out_shape=jax.ShapeDtypeStruct((N, Hout, Wout, Co), out_dtype),
        grid=(N,),
        in_specs=[
            pl.BlockSpec((1, H, W, Cin), lambda n: (n, 0, 0, 0)),
            pl.BlockSpec((9, Cin, Co), lambda n: (0, 0, 0)),
            pl.BlockSpec((1, Co), lambda n: (0, 0)),
        ],
        out_specs=pl.BlockSpec((1, Hout, Wout, Co), lambda n: (n, 0, 0, 0)),
        compiler_params=pltpu.CompilerParams(
            dimension_semantics=("parallel",),
            vmem_limit_bytes=32 * 1024 * 1024),
        cost_estimate=pl.CostEstimate(flops=int(flops), transcendentals=0,
                                      bytes_accessed=int(bytes_acc)),
    )(x_nhwc, w_r, b2)


def build_gram_matrix(x_nchw, *, tl=8):
    """Mirror of build_Gram_Matrix: x.view(c*d, a*b), per-row outer product.

    # TODO(synk): the reference calls torch.mm on 1-D rows (a RuntimeError in
    # PyTorch); interpreted here as the per-loc outer product r @ r.T.
    """
    a, b, c, d = x_nchw.shape
    L, AB = c * d, a * b
    x2d = x_nchw.reshape(L, AB).astype(jnp.float32)   # same memory order as torch .view

    Lp = ((L + tl - 1) // tl) * tl                    # pad tiny L to the tile (zeros -> zero gram rows)
    x2p = jnp.pad(x2d, ((0, Lp - L), (0, 0)))

    out = pl.pallas_call(
        _gram_kernel,
        out_shape=jax.ShapeDtypeStruct((Lp, AB, AB), jnp.float32),
        grid=(Lp // tl,),
        in_specs=[pl.BlockSpec((tl, AB), lambda i: (i, 0))],
        out_specs=pl.BlockSpec((tl, AB, AB), lambda i: (i, 0, 0)),
        compiler_params=pltpu.CompilerParams(dimension_semantics=("parallel",)),
    )(x2p)
    return out[:L]


def attention_branch_forward(x_nchw, w1, b1, w2, b2):
    # basicMode (conv1+relu+pool fused in one kernel; conv2+relu in a second)
    x = jnp.transpose(x_nchw, (0, 2, 3, 1))                       # NCHW -> NHWC (f32)
    p1 = _conv3x3(x, w1, b1, pool=True, out_dtype=jnp.bfloat16)   # (N, ceil((H-2)/2), ..., C_MID) bf16
    y2 = _conv3x3(p1, w2, b2, pool=False, out_dtype=jnp.float32)  # (N, H2, W2, C_OUT) f32
    # build_Gram_Matrix expects NCHW memory order
    x_out = jnp.transpose(y2, (0, 3, 1, 2))                       # (a,b,c,d) = (N, C_OUT, H2, W2)
    gram = build_gram_matrix(x_out)                               # (c*d, a*b, a*b)
    # TODO(synk): rebuild_features() in the reference is an empty loop returning
    # None (so forward() returns None); we return the stacked Gram matrices instead.
    return gram


# ----------------------------------------------------------------------------
# Pure-JAX reference (f32) for a tolerance check
# ----------------------------------------------------------------------------
def _reference_forward(x_nchw, w1, b1, w2, b2):
    x = jnp.transpose(x_nchw, (0, 2, 3, 1))

    def conv(xx, w, b):
        N, H, W, C = xx.shape
        Ho, Wo = H - 2, W - 2
        cols = [xx[:, di:di + Ho, dj:dj + Wo, :] for di in range(3) for dj in range(3)]
        p = jnp.concatenate(cols, axis=-1).reshape(N * Ho * Wo, 9 * C)
        wm = jnp.transpose(w, (2, 3, 1, 0)).reshape(9 * C, w.shape[0])
        y = jnp.maximum(p @ wm + b, 0.0)
        return y.reshape(N, Ho, Wo, -1)

    y1 = conv(x, w1, b1)
    N, Ho, Wo, C = y1.shape
    p1 = jnp.max(y1.reshape(N, Ho // 2, 2, Wo // 2, 2, C), axis=(2, 4))  # dims even at demo shapes
    y2 = conv(p1, w2, b2)
    xo = jnp.transpose(y2, (0, 3, 1, 2))
    a, b_, c, d = xo.shape
    x2d = xo.reshape(c * d, a * b_)
    return x2d[:, :, None] * x2d[:, None, :]


if __name__ == "__main__":
    key = jax.random.PRNGKey(0)
    kx, k1, k2, k3, k4 = jax.random.split(key, 5)
    N, H, W = 2, 16, 16
    x = jax.random.normal(kx, (N, C_IN, H, W), dtype=jnp.float32)        # NCHW input
    w1 = 0.1 * jax.random.normal(k1, (C_MID, C_IN, 3, 3), dtype=jnp.float32)
    b1 = 0.1 * jax.random.normal(k2, (C_MID,), dtype=jnp.float32)
    w2 = 0.1 * jax.random.normal(k3, (C_OUT, C_MID, 3, 3), dtype=jnp.float32)
    b2 = 0.1 * jax.random.normal(k4, (C_OUT,), dtype=jnp.float32)

    gram = jax.jit(attention_branch_forward)(x, w1, b1, w2, b2)
    jax.block_until_ready(gram)
    assert gram.shape == (5 * 5, N * C_OUT, N * C_OUT)

    # Correctness check against an f32 XLA reference (bf16 matmul operands -> loose tol).
    ref = _reference_forward(x, w1, b1, w2, b2)
    err = float(jnp.max(jnp.abs(gram - ref)))
    rel = err / (float(jnp.max(jnp.abs(ref))) + 1e-6)
    assert rel < 0.05, f"relative error too large: {rel} (abs {err})"

    print("KERNEL_OK")
</pallas_src>

<mosaic_0001>
module attributes {stable_mosaic.version = 11 : i64} {
  func.func @_conv3x3_kernel(%arg0: i32, %arg1: memref<1x16x16x8xf32, #tpu.memory_space<vmem>>, %arg2: memref<9x8x8xbf16, #tpu.memory_space<vmem>>, %arg3: memref<1x8xf32, #tpu.memory_space<vmem>>, %arg4: memref<1x7x7x8xbf16, #tpu.memory_space<vmem>>) attributes {dimension_semantics = [#tpu.dimension_semantics<parallel>], iteration_bounds = array<i64: 2>, scalar_prefetch = 0 : i64, scratch_operands = 0 : i64, tpu.core_type = #tpu.core_type<tc>, window_params = [{transform_indices = @transform_0, window_bounds = array<i64: 1, 16, 16, 8>}, {pipeline_mode = #tpu.pipeline_mode<synchronous>, transform_indices = @transform_1, window_bounds = array<i64: 9, 8, 8>}, {pipeline_mode = #tpu.pipeline_mode<synchronous>, transform_indices = @transform_2, window_bounds = array<i64: 1, 8>}, {transform_indices = @transform_3, window_bounds = array<i64: 1, 7, 7, 8>}]} {
    %c0 = arith.constant 0 : index
    %c0_0 = arith.constant 0 : index
    %c0_1 = arith.constant 0 : index
    %c0_2 = arith.constant 0 : index
    %0 = vector.load %arg1[%c0, %c0_0, %c0_1, %c0_2] : memref<1x16x16x8xf32, #tpu.memory_space<vmem>>, vector<1x16x16x8xf32>
    %1 = vector.shape_cast %0 : vector<1x16x16x8xf32> to vector<16x16x8xf32>
    %2 = vector.extract_strided_slice %1 {offsets = [0, 0, 0], sizes = [14, 14, 8], strides = [1, 1, 1]} : vector<16x16x8xf32> to vector<14x14x8xf32>
    %3 = vector.shape_cast %2 : vector<14x14x8xf32> to vector<196x8xf32>
    %4 = arith.truncf %3 : vector<196x8xf32> to vector<196x8xbf16>
    %c0_3 = arith.constant 0 : index
    %c0_4 = arith.constant 0 : index
    %c0_5 = arith.constant 0 : index
    %5 = vector.load %arg2[%c0_3, %c0_4, %c0_5] : memref<9x8x8xbf16, #tpu.memory_space<vmem>>, vector<1x8x8xbf16>
    %6 = vector.shape_cast %5 : vector<1x8x8xbf16> to vector<8x8xbf16>
    %cst = arith.constant dense<0.000000e+00> : vector<196x8xf32>
    %7 = tpu.matmul %4, %6, %cst {dimension_numbers = #tpu.dot_dimension_numbers<[1], [0], [0], [1], [0, 0, 1, 1], [], []>} : vector<196x8xbf16>, vector<8x8xbf16>, vector<196x8xf32> -> vector<196x8xf32>
    %8 = vector.extract_strided_slice %1 {offsets = [0, 1, 0], sizes = [14, 14, 8], strides = [1, 1, 1]} : vector<16x16x8xf32> to vector<14x14x8xf32>
    %9 = vector.shape_cast %8 : vector<14x14x8xf32> to vector<196x8xf32>
    %10 = arith.truncf %9 : vector<196x8xf32> to vector<196x8xbf16>
    %c1 = arith.constant 1 : index
    %c0_6 = arith.constant 0 : index
    %c0_7 = arith.constant 0 : index
    %11 = vector.load %arg2[%c1, %c0_6, %c0_7] : memref<9x8x8xbf16, #tpu.memory_space<vmem>>, vector<1x8x8xbf16>
    %12 = vector.shape_cast %11 : vector<1x8x8xbf16> to vector<8x8xbf16>
    %cst_8 = arith.constant dense<0.000000e+00> : vector<196x8xf32>
    %13 = tpu.matmul %10, %12, %cst_8 {dimension_numbers = #tpu.dot_dimension_numbers<[1], [0], [0], [1], [0, 0, 1, 1], [], []>} : vector<196x8xbf16>, vector<8x8xbf16>, vector<196x8xf32> -> vector<196x8xf32>
    %14 = arith.addf %7, %13 : vector<196x8xf32>
    %15 = vector.extract_strided_slice %1 {offsets = [0, 2, 0], sizes = [14, 14, 8], strides = [1, 1, 1]} : vector<16x16x8xf32> to vector<14x14x8xf32>
    %16 = vector.shape_cast %15 : vector<14x14x8xf32> to vector<196x8xf32>
    %17 = arith.truncf %16 : vector<196x8xf32> to vector<196x8xbf16>
    %c2 = arith.constant 2 : index
    %c0_9 = arith.constant 0 : index
    %c0_10 = arith.constant 0 : index
    %18 = vector.load %arg2[%c2, %c0_9, %c0_10] : memref<9x8x8xbf16, #tpu.memory_space<vmem>>, vector<1x8x8xbf16>
    %19 = vector.shape_cast %18 : vector<1x8x8xbf16> to vector<8x8xbf16>
    %cst_11 = arith.constant dense<0.000000e+00> : vector<196x8xf32>
    %20 = tpu.matmul %17, %19, %cst_11 {dimension_numbers = #tpu.dot_dimension_numbers<[1], [0], [0], [1], [0, 0, 1, 1], [], []>} : vector<196x8xbf16>, vector<8x8xbf16>, vector<196x8xf32> -> vector<196x8xf32>
    %21 = arith.addf %14, %20 : vector<196x8xf32>
    %22 = vector.extract_strided_slice %1 {offsets = [1, 0, 0], sizes = [14, 14, 8], strides = [1, 1, 1]} : vector<16x16x8xf32> to vector<14x14x8xf32>
    %23 = vector.shape_cast %22 : vector<14x14x8xf32> to vector<196x8xf32>
    %24 = arith.truncf %23 : vector<196x8xf32> to vector<196x8xbf16>
    %c3 = arith.constant 3 : index
    %c0_12 = arith.constant 0 : index
    %c0_13 = arith.constant 0 : index
    %25 = vector.load %arg2[%c3, %c0_12, %c0_13] : memref<9x8x8xbf16, #tpu.memory_space<vmem>>, vector<1x8x8xbf16>
    %26 = vector.shape_cast %25 : vector<1x8x8xbf16> to vector<8x8xbf16>
    %cst_14 = arith.constant dense<0.000000e+00> : vector<196x8xf32>
    %27 = tpu.matmul %24, %26, %cst_14 {dimension_numbers = #tpu.dot_dimension_numbers<[1], [0], [0], [1], [0, 0, 1, 1], [], []>} : vector<196x8xbf16>, vector<8x8xbf16>, vector<196x8xf32> -> vector<196x8xf32>
    %28 = arith.addf %21, %27 : vector<196x8xf32>
    %29 = vector.extract_strided_slice %1 {offsets = [1, 1, 0], sizes = [14, 14, 8], strides = [1, 1, 1]} : vector<16x16x8xf32> to vector<14x14x8xf32>
    %30 = vector.shape_cast %29 : vector<14x14x8xf32> to vector<196x8xf32>
    %31 = arith.truncf %30 : vector<196x8xf32> to vector<196x8xbf16>
    %c4 = arith.constant 4 : index
    %c0_15 = arith.constant 0 : index
    %c0_16 = arith.constant 0 : index
    %32 = vector.load %arg2[%c4, %c0_15, %c0_16] : memref<9x8x8xbf16, #tpu.memory_space<vmem>>, vector<1x8x8xbf16>
    %33 = vector.shape_cast %32 : vector<1x8x8xbf16> to vector<8x8xbf16>
    %cst_17 = arith.constant dense<0.000000e+00> : vector<196x8xf32>
    %34 = tpu.matmul %31, %33, %cst_17 {dimension_numbers = #tpu.dot_dimension_numbers<[1], [0], [0], [1], [0, 0, 1, 1], [], []>} : vector<196x8xbf16>, vector<8x8xbf16>, vector<196x8xf32> -> vector<196x8xf32>
    %35 = arith.addf %28, %34 : vector<196x8xf32>
    %36 = vector.extract_strided_slice %1 {offsets = [1, 2, 0], sizes = [14, 14, 8], strides = [1, 1, 1]} : vector<16x16x8xf32> to vector<14x14x8xf32>
    %37 = vector.shape_cast %36 : vector<14x14x8xf32> to vector<196x8xf32>
    %38 = arith.truncf %37 : vector<196x8xf32> to vector<196x8xbf16>
    %c5 = arith.constant 5 : index
    %c0_18 = arith.constant 0 : index
    %c0_19 = arith.constant 0 : index
    %39 = vector.load %arg2[%c5, %c0_18, %c0_19] : memref<9x8x8xbf16, #tpu.memory_space<vmem>>, vector<1x8x8xbf16>
    %40 = vector.shape_cast %39 : vector<1x8x8xbf16> to vector<8x8xbf16>
    %cst_20 = arith.constant dense<0.000000e+00> : vector<196x8xf32>
    %41 = tpu.matmul %38, %40, %cst_20 {dimension_numbers = #tpu.dot_dimension_numbers<[1], [0], [0], [1], [0, 0, 1, 1], [], []>} : vector<196x8xbf16>, vector<8x8xbf16>, vector<196x8xf32> -> vector<196x8xf32>
    %42 = arith.addf %35, %41 : vector<196x8xf32>
    %43 = vector.extract_strided_slice %1 {offsets = [2, 0, 0], sizes = [14, 14, 8], strides = [1, 1, 1]} : vector<16x16x8xf32> to vector<14x14x8xf32>
    %44 = vector.shape_cast %43 : vector<14x14x8xf32> to vector<196x8xf32>
    %45 = arith.truncf %44 : vector<196x8xf32> to vector<196x8xbf16>
    %c6 = arith.constant 6 : index
    %c0_21 = arith.constant 0 : index
    %c0_22 = arith.constant 0 : index
    %46 = vector.load %arg2[%c6, %c0_21, %c0_22] : memref<9x8x8xbf16, #tpu.memory_space<vmem>>, vector<1x8x8xbf16>
    %47 = vector.shape_cast %46 : vector<1x8x8xbf16> to vector<8x8xbf16>
    %cst_23 = arith.constant dense<0.000000e+00> : vector<196x8xf32>
    %48 = tpu.matmul %45, %47, %cst_23 {dimension_numbers = #tpu.dot_dimension_numbers<[1], [0], [0], [1], [0, 0, 1, 1], [], []>} : vector<196x8xbf16>, vector<8x8xbf16>, vector<196x8xf32> -> vector<196x8xf32>
    %49 = arith.addf %42, %48 : vector<196x8xf32>
    %50 = vector.extract_strided_slice %1 {offsets = [2, 1, 0], sizes = [14, 14, 8], strides = [1, 1, 1]} : vector<16x16x8xf32> to vector<14x14x8xf32>
    %51 = vector.shape_cast %50 : vector<14x14x8xf32> to vector<196x8xf32>
    %52 = arith.truncf %51 : vector<196x8xf32> to vector<196x8xbf16>
    %c7 = arith.constant 7 : index
    %c0_24 = arith.constant 0 : index
    %c0_25 = arith.constant 0 : index
    %53 = vector.load %arg2[%c7, %c0_24, %c0_25] : memref<9x8x8xbf16, #tpu.memory_space<vmem>>, vector<1x8x8xbf16>
    %54 = vector.shape_cast %53 : vector<1x8x8xbf16> to vector<8x8xbf16>
    %cst_26 = arith.constant dense<0.000000e+00> : vector<196x8xf32>
    %55 = tpu.matmul %52, %54, %cst_26 {dimension_numbers = #tpu.dot_dimension_numbers<[1], [0], [0], [1], [0, 0, 1, 1], [], []>} : vector<196x8xbf16>, vector<8x8xbf16>, vector<196x8xf32> -> vector<196x8xf32>
    %56 = arith.addf %49, %55 : vector<196x8xf32>
    %57 = vector.extract_strided_slice %1 {offsets = [2, 2, 0], sizes = [14, 14, 8], strides = [1, 1, 1]} : vector<16x16x8xf32> to vector<14x14x8xf32>
    %58 = vector.shape_cast %57 : vector<14x14x8xf32> to vector<196x8xf32>
    %59 = arith.truncf %58 : vector<196x8xf32> to vector<196x8xbf16>
    %c8 = arith.constant 8 : index
    %c0_27 = arith.constant 0 : index
    %c0_28 = arith.constant 0 : index
    %60 = vector.load %arg2[%c8, %c0_27, %c0_28] : memref<9x8x8xbf16, #tpu.memory_space<vmem>>, vector<1x8x8xbf16>
    %61 = vector.shape_cast %60 : vector<1x8x8xbf16> to vector<8x8xbf16>
    %cst_29 = arith.constant dense<0.000000e+00> : vector<196x8xf32>
    %62 = tpu.matmul %59, %61, %cst_29 {dimension_numbers = #tpu.dot_dimension_numbers<[1], [0], [0], [1], [0, 0, 1, 1], [], []>} : vector<196x8xbf16>, vector<8x8xbf16>, vector<196x8xf32> -> vector<196x8xf32>
    %63 = arith.addf %56, %62 : vector<196x8xf32>
    %c0_30 = arith.constant 0 : index
    %c0_31 = arith.constant 0 : index
    %64 = vector.load %arg3[%c0_30, %c0_31] : memref<1x8xf32, #tpu.memory_space<vmem>>, vector<1x8xf32>
    %65 = vector.broadcast %64 : vector<1x8xf32> to vector<196x8xf32>
    %66 = arith.addf %63, %65 : vector<196x8xf32>
    %cst_32 = arith.constant 0.000000e+00 : f32
    %67 = vector.broadcast %cst_32 : f32 to vector<196x8xf32>
    %68 = arith.maximumf %66, %67 : vector<196x8xf32>
    %69 = vector.shape_cast %68 : vector<196x8xf32> to vector<14x14x8xf32>
    %70 = vector.shape_cast %69 : vector<14x14x8xf32> to vector<7x2x14x8xf32>
    %cst_33 = arith.constant dense<0xFF800000> : vector<7x14x8xf32>
    %71 = vector.multi_reduction <maximumf>, %70, %cst_33 [1] : vector<7x2x14x8xf32> to vector<7x14x8xf32>
    %72 = vector.shape_cast %71 : vector<7x14x8xf32> to vector<7x7x2x8xf32>
    %cst_34 = arith.constant dense<0xFF800000> : vector<7x7x8xf32>
    %73 = vector.multi_reduction <maximumf>, %72, %cst_34 [2] : vector<7x7x2x8xf32> to vector<7x7x8xf32>
    %74 = arith.truncf %73 : vector<7x7x8xf32> to vector<7x7x8xbf16>
    %c0_35 = arith.constant 0 : index
    %c0_36 = arith.constant 0 : index
    %c0_37 = arith.constant 0 : index
    %c0_38 = arith.constant 0 : index
    %75 = vector.load %arg4[%c0_35, %c0_36, %c0_37, %c0_38] : memref<1x7x7x8xbf16, #tpu.memory_space<vmem>>, vector<1x7x7x8xbf16>
    %76 = vector.shape_cast %75 : vector<1x7x7x8xbf16> to vector<7x7x8xbf16>
    %77 = vector.shape_cast %74 : vector<7x7x8xbf16> to vector<1x7x7x8xbf16>
    tpu.vector_store %arg4[%c0_35, %c0_36, %c0_37, %c0_38], %77 {strides = array<i32>} : memref<1x7x7x8xbf16, #tpu.memory_space<vmem>>, vector<1x7x7x8xbf16>,
    return
  }
  func.func @transform_0(%arg0: i32) -> (i32, i32, i32, i32) {
    %c0_i32 = arith.constant 0 : i32
    %c0_i32_0 = arith.constant 0 : i32
    %c0_i32_1 = arith.constant 0 : i32
    %c0_i32_2 = arith.constant 0 : i32
    return %arg0, %c0_i32, %c0_i32_0, %c0_i32_1 : i32, i32, i32, i32
  }
  func.func @transform_1(%arg0: i32) -> (i32, i32, i32) {
    %c0_i32 = arith.constant 0 : i32
    %c0_i32_0 = arith.constant 0 : i32
    %c0_i32_1 = arith.constant 0 : i32
    %c0_i32_2 = arith.constant 0 : i32
    return %c0_i32, %c0_i32_0, %c0_i32_1 : i32, i32, i32
  }
  func.func @transform_2(%arg0: i32) -> (i32, i32) {
    %c0_i32 = arith.constant 0 : i32
    %c0_i32_0 = arith.constant 0 : i32
    %c0_i32_1 = arith.constant 0 : i32
    return %c0_i32, %c0_i32_0 : i32, i32
  }
  func.func @transform_3(%arg0: i32) -> (i32, i32, i32, i32) {
    %c0_i32 = arith.constant 0 : i32
    %c0_i32_0 = arith.constant 0 : i32
    %c0_i32_1 = arith.constant 0 : i32
    %c0_i32_2 = arith.constant 0 : i32
    return %arg0, %c0_i32, %c0_i32_0, %c0_i32_1 : i32, i32, i32, i32
  }
}

module attributes {stable_mosaic.version = 11 : i64} {
  func.func @_gram_kernel(%arg0: i32, %arg1: memref<8x32xf32, #tpu.memory_space<vmem>>, %arg2: memref<8x32x32xf32, #tpu.memory_space<vmem>>) attributes {dimension_semantics = [#tpu.dimension_semantics<parallel>], iteration_bounds = array<i64: 4>, scalar_prefetch = 0 : i64, scratch_operands = 0 : i64, tpu.core_type = #tpu.core_type<tc>, window_params = [{transform_indices = @transform_0, window_bounds = array<i64: 8, 32>}, {transform_indices = @transform_1, window_bounds = array<i64: 8, 32, 32>}]} {
    %c0 = arith.constant 0 : index
    %c0_0 = arith.constant 0 : index
    %0 = vector.load %arg1[%c0, %c0_0] : memref<8x32xf32, #tpu.memory_space<vmem>>, vector<8x32xf32>
    %1 = vector.shape_cast %0 : vector<8x32xf32> to vector<8x32x1xf32>
    %2 = vector.shape_cast %0 : vector<8x32xf32> to vector<8x1x32xf32>
    %3 = vector.broadcast %1 : vector<8x32x1xf32> to vector<8x32x32xf32>
    %4 = vector.broadcast %2 : vector<8x1x32xf32> to vector<8x32x32xf32>
    %5 = arith.mulf %3, %4 : vector<8x32x32xf32>
    %c0_1 = arith.constant 0 : index
    %c0_2 = arith.constant 0 : index
    %c0_3 = arith.constant 0 : index
    %6 = vector.load %arg2[%c0_1, %c0_2, %c0_3] : memref<8x32x32xf32, #tpu.memory_space<vmem>>, vector<8x32x32xf32>
    tpu.vector_store %arg2[%c0_1, %c0_2, %c0_3], %5 {strides = array<i32>} : memref<8x32x32xf32, #tpu.memory_space<vmem>>, vector<8x32x32xf32>,
    return
  }
  func.func @transform_0(%arg0: i32) -> (i32, i32) {
    %c0_i32 = arith.constant 0 : i32
    %c0_i32_0 = arith.constant 0 : i32
    return %arg0, %c0_i32 : i32, i32
  }
  func.func @transform_1(%arg0: i32) -> (i32, i32, i32) {
    %c0_i32 = arith.constant 0 : i32
    %c0_i32_0 = arith.constant 0 : i32
    %c0_i32_1 = arith.constant 0 : i32
    return %arg0, %c0_i32, %c0_i32_0 : i32, i32, i32
  }
}

module attributes {stable_mosaic.version = 11 : i64} {
  func.func @_conv3x3_kernel(%arg0: i32, %arg1: memref<1x7x7x8xbf16, #tpu.memory_space<vmem>>, %arg2: memref<9x8x16xbf16, #tpu.memory_space<vmem>>, %arg3: memref<1x16xf32, #tpu.memory_space<vmem>>, %arg4: memref<1x5x5x16xf32, #tpu.memory_space<vmem>>) attributes {dimension_semantics = [#tpu.dimension_semantics<parallel>], iteration_bounds = array<i64: 2>, scalar_prefetch = 0 : i64, scratch_operands = 0 : i64, tpu.core_type = #tpu.core_type<tc>, window_params = [{transform_indices = @transform_0, window_bounds = array<i64: 1, 7, 7, 8>}, {pipeline_mode = #tpu.pipeline_mode<synchronous>, transform_indices = @transform_1, window_bounds = array<i64: 9, 8, 16>}, {pipeline_mode = #tpu.pipeline_mode<synchronous>, transform_indices = @transform_2, window_bounds = array<i64: 1, 16>}, {transform_indices = @transform_3, window_bounds = array<i64: 1, 5, 5, 16>}]} {
    %c0 = arith.constant 0 : index
    %c0_0 = arith.constant 0 : index
    %c0_1 = arith.constant 0 : index
    %c0_2 = arith.constant 0 : index
    %0 = vector.load %arg1[%c0, %c0_0, %c0_1, %c0_2] : memref<1x7x7x8xbf16, #tpu.memory_space<vmem>>, vector<1x7x7x8xbf16>
    %1 = vector.shape_cast %0 : vector<1x7x7x8xbf16> to vector<7x7x8xbf16>
    %2 = vector.extract_strided_slice %1 {offsets = [0, 0, 0], sizes = [5, 5, 8], strides = [1, 1, 1]} : vector<7x7x8xbf16> to vector<5x5x8xbf16>
    %3 = vector.shape_cast %2 : vector<5x5x8xbf16> to vector<25x8xbf16>
    %c0_3 = arith.constant 0 : index
    %c0_4 = arith.constant 0 : index
    %c0_5 = arith.constant 0 : index
    %4 = vector.load %arg2[%c0_3, %c0_4, %c0_5] : memref<9x8x16xbf16, #tpu.memory_space<vmem>>, vector<1x8x16xbf16>
    %5 = vector.shape_cast %4 : vector<1x8x16xbf16> to vector<8x16xbf16>
    %cst = arith.constant dense<0.000000e+00> : vector<25x16xf32>
    %6 = tpu.matmul %3, %5, %cst {dimension_numbers = #tpu.dot_dimension_numbers<[1], [0], [0], [1], [0, 0, 1, 1], [], []>} : vector<25x8xbf16>, vector<8x16xbf16>, vector<25x16xf32> -> vector<25x16xf32>
    %7 = vector.extract_strided_slice %1 {offsets = [0, 1, 0], sizes = [5, 5, 8], strides = [1, 1, 1]} : vector<7x7x8xbf16> to vector<5x5x8xbf16>
    %8 = vector.shape_cast %7 : vector<5x5x8xbf16> to vector<25x8xbf16>
    %c1 = arith.constant 1 : index
    %c0_6 = arith.constant 0 : index
    %c0_7 = arith.constant 0 : index
    %9 = vector.load %arg2[%c1, %c0_6, %c0_7] : memref<9x8x16xbf16, #tpu.memory_space<vmem>>, vector<1x8x16xbf16>
    %10 = vector.shape_cast %9 : vector<1x8x16xbf16> to vector<8x16xbf16>
    %cst_8 = arith.constant dense<0.000000e+00> : vector<25x16xf32>
    %11 = tpu.matmul %8, %10, %cst_8 {dimension_numbers = #tpu.dot_dimension_numbers<[1], [0], [0], [1], [0, 0, 1, 1], [], []>} : vector<25x8xbf16>, vector<8x16xbf16>, vector<25x16xf32> -> vector<25x16xf32>
    %12 = arith.addf %6, %11 : vector<25x16xf32>
    %13 = vector.extract_strided_slice %1 {offsets = [0, 2, 0], sizes = [5, 5, 8], strides = [1, 1, 1]} : vector<7x7x8xbf16> to vector<5x5x8xbf16>
    %14 = vector.shape_cast %13 : vector<5x5x8xbf16> to vector<25x8xbf16>
    %c2 = arith.constant 2 : index
    %c0_9 = arith.constant 0 : index
    %c0_10 = arith.constant 0 : index
    %15 = vector.load %arg2[%c2, %c0_9, %c0_10] : memref<9x8x16xbf16, #tpu.memory_space<vmem>>, vector<1x8x16xbf16>
    %16 = vector.shape_cast %15 : vector<1x8x16xbf16> to vector<8x16xbf16>
    %cst_11 = arith.constant dense<0.000000e+00> : vector<25x16xf32>
    %17 = tpu.matmul %14, %16, %cst_11 {dimension_numbers = #tpu.dot_dimension_numbers<[1], [0], [0], [1], [0, 0, 1, 1], [], []>} : vector<25x8xbf16>, vector<8x16xbf16>, vector<25x16xf32> -> vector<25x16xf32>
    %18 = arith.addf %12, %17 : vector<25x16xf32>
    %19 = vector.extract_strided_slice %1 {offsets = [1, 0, 0], sizes = [5, 5, 8], strides = [1, 1, 1]} : vector<7x7x8xbf16> to vector<5x5x8xbf16>
    %20 = vector.shape_cast %19 : vector<5x5x8xbf16> to vector<25x8xbf16>
    %c3 = arith.constant 3 : index
    %c0_12 = arith.constant 0 : index
    %c0_13 = arith.constant 0 : index
    %21 = vector.load %arg2[%c3, %c0_12, %c0_13] : memref<9x8x16xbf16, #tpu.memory_space<vmem>>, vector<1x8x16xbf16>
    %22 = vector.shape_cast %21 : vector<1x8x16xbf16> to vector<8x16xbf16>
    %cst_14 = arith.constant dense<0.000000e+00> : vector<25x16xf32>
    %23 = tpu.matmul %20, %22, %cst_14 {dimension_numbers = #tpu.dot_dimension_numbers<[1], [0], [0], [1], [0, 0, 1, 1], [], []>} : vector<25x8xbf16>, vector<8x16xbf16>, vector<25x16xf32> -> vector<25x16xf32>
    %24 = arith.addf %18, %23 : vector<25x16xf32>
    %25 = vector.extract_strided_slice %1 {offsets = [1, 1, 0], sizes = [5, 5, 8], strides = [1, 1, 1]} : vector<7x7x8xbf16> to vector<5x5x8xbf16>
    %26 = vector.shape_cast %25 : vector<5x5x8xbf16> to vector<25x8xbf16>
    %c4 = arith.constant 4 : index
    %c0_15 = arith.constant 0 : index
    %c0_16 = arith.constant 0 : index
    %27 = vector.load %arg2[%c4, %c0_15, %c0_16] : memref<9x8x16xbf16, #tpu.memory_space<vmem>>, vector<1x8x16xbf16>
    %28 = vector.shape_cast %27 : vector<1x8x16xbf16> to vector<8x16xbf16>
    %cst_17 = arith.constant dense<0.000000e+00> : vector<25x16xf32>
    %29 = tpu.matmul %26, %28, %cst_17 {dimension_numbers = #tpu.dot_dimension_numbers<[1], [0], [0], [1], [0, 0, 1, 1], [], []>} : vector<25x8xbf16>, vector<8x16xbf16>, vector<25x16xf32> -> vector<25x16xf32>
    %30 = arith.addf %24, %29 : vector<25x16xf32>
    %31 = vector.extract_strided_slice %1 {offsets = [1, 2, 0], sizes = [5, 5, 8], strides = [1, 1, 1]} : vector<7x7x8xbf16> to vector<5x5x8xbf16>
    %32 = vector.shape_cast %31 : vector<5x5x8xbf16> to vector<25x8xbf16>
    %c5 = arith.constant 5 : index
    %c0_18 = arith.constant 0 : index
    %c0_19 = arith.constant 0 : index
    %33 = vector.load %arg2[%c5, %c0_18, %c0_19] : memref<9x8x16xbf16, #tpu.memory_space<vmem>>, vector<1x8x16xbf16>
    %34 = vector.shape_cast %33 : vector<1x8x16xbf16> to vector<8x16xbf16>
    %cst_20 = arith.constant dense<0.000000e+00> : vector<25x16xf32>
    %35 = tpu.matmul %32, %34, %cst_20 {dimension_numbers = #tpu.dot_dimension_numbers<[1], [0], [0], [1], [0, 0, 1, 1], [], []>} : vector<25x8xbf16>, vector<8x16xbf16>, vector<25x16xf32> -> vector<25x16xf32>
    %36 = arith.addf %30, %35 : vector<25x16xf32>
    %37 = vector.extract_strided_slice %1 {offsets = [2, 0, 0], sizes = [5, 5, 8], strides = [1, 1, 1]} : vector<7x7x8xbf16> to vector<5x5x8xbf16>
    %38 = vector.shape_cast %37 : vector<5x5x8xbf16> to vector<25x8xbf16>
    %c6 = arith.constant 6 : index
    %c0_21 = arith.constant 0 : index
    %c0_22 = arith.constant 0 : index
    %39 = vector.load %arg2[%c6, %c0_21, %c0_22] : memref<9x8x16xbf16, #tpu.memory_space<vmem>>, vector<1x8x16xbf16>
    %40 = vector.shape_cast %39 : vector<1x8x16xbf16> to vector<8x16xbf16>
    %cst_23 = arith.constant dense<0.000000e+00> : vector<25x16xf32>
    %41 = tpu.matmul %38, %40, %cst_23 {dimension_numbers = #tpu.dot_dimension_numbers<[1], [0], [0], [1], [0, 0, 1, 1], [], []>} : vector<25x8xbf16>, vector<8x16xbf16>, vector<25x16xf32> -> vector<25x16xf32>
    %42 = arith.addf %36, %41 : vector<25x16xf32>
    %43 = vector.extract_strided_slice %1 {offsets = [2, 1, 0], sizes = [5, 5, 8], strides = [1, 1, 1]} : vector<7x7x8xbf16> to vector<5x5x8xbf16>
    %44 = vector.shape_cast %43 : vector<5x5x8xbf16> to vector<25x8xbf16>
    %c7 = arith.constant 7 : index
    %c0_24 = arith.constant 0 : index
    %c0_25 = arith.constant 0 : index
    %45 = vector.load %arg2[%c7, %c0_24, %c0_25] : memref<9x8x16xbf16, #tpu.memory_space<vmem>>, vector<1x8x16xbf16>
    %46 = vector.shape_cast %45 : vector<1x8x16xbf16> to vector<8x16xbf16>
    %cst_26 = arith.constant dense<0.000000e+00> : vector<25x16xf32>
    %47 = tpu.matmul %44, %46, %cst_26 {dimension_numbers = #tpu.dot_dimension_numbers<[1], [0], [0], [1], [0, 0, 1, 1], [], []>} : vector<25x8xbf16>, vector<8x16xbf16>, vector<25x16xf32> -> vector<25x16xf32>
    %48 = arith.addf %42, %47 : vector<25x16xf32>
    %49 = vector.extract_strided_slice %1 {offsets = [2, 2, 0], sizes = [5, 5, 8], strides = [1, 1, 1]} : vector<7x7x8xbf16> to vector<5x5x8xbf16>
    %50 = vector.shape_cast %49 : vector<5x5x8xbf16> to vector<25x8xbf16>
    %c8 = arith.constant 8 : index
    %c0_27 = arith.constant 0 : index
    %c0_28 = arith.constant 0 : index
    %51 = vector.load %arg2[%c8, %c0_27, %c0_28] : memref<9x8x16xbf16, #tpu.memory_space<vmem>>, vector<1x8x16xbf16>
    %52 = vector.shape_cast %51 : vector<1x8x16xbf16> to vector<8x16xbf16>
    %cst_29 = arith.constant dense<0.000000e+00> : vector<25x16xf32>
    %53 = tpu.matmul %50, %52, %cst_29 {dimension_numbers = #tpu.dot_dimension_numbers<[1], [0], [0], [1], [0, 0, 1, 1], [], []>} : vector<25x8xbf16>, vector<8x16xbf16>, vector<25x16xf32> -> vector<25x16xf32>
    %54 = arith.addf %48, %53 : vector<25x16xf32>
    %c0_30 = arith.constant 0 : index
    %c0_31 = arith.constant 0 : index
    %55 = vector.load %arg3[%c0_30, %c0_31] : memref<1x16xf32, #tpu.memory_space<vmem>>, vector<1x16xf32>
    %56 = vector.broadcast %55 : vector<1x16xf32> to vector<25x16xf32>
    %57 = arith.addf %54, %56 : vector<25x16xf32>
    %cst_32 = arith.constant 0.000000e+00 : f32
    %58 = vector.broadcast %cst_32 : f32 to vector<25x16xf32>
    %59 = arith.maximumf %57, %58 : vector<25x16xf32>
    %60 = vector.shape_cast %59 : vector<25x16xf32> to vector<5x5x16xf32>
    %c0_33 = arith.constant 0 : index
    %c0_34 = arith.constant 0 : index
    %c0_35 = arith.constant 0 : index
    %c0_36 = arith.constant 0 : index
    %61 = vector.load %arg4[%c0_33, %c0_34, %c0_35, %c0_36] : memref<1x5x5x16xf32, #tpu.memory_space<vmem>>, vector<1x5x5x16xf32>
    %62 = vector.shape_cast %61 : vector<1x5x5x16xf32> to vector<5x5x16xf32>
    %63 = vector.shape_cast %60 : vector<5x5x16xf32> to vector<1x5x5x16xf32>
    tpu.vector_store %arg4[%c0_33, %c0_34, %c0_35, %c0_36], %63 {strides = array<i32>} : memref<1x5x5x16xf32, #tpu.memory_space<vmem>>, vector<1x5x5x16xf32>,
    return
  }
  func.func @transform_0(%arg0: i32) -> (i32, i32, i32, i32) {
    %c0_i32 = arith.constant 0 : i32
    %c0_i32_0 = arith.constant 0 : i32
    %c0_i32_1 = arith.constant 0 : i32
    %c0_i32_2 = arith.constant 0 : i32
    return %arg0, %c0_i32, %c0_i32_0, %c0_i32_1 : i32, i32, i32, i32
  }
  func.func @transform_1(%arg0: i32) -> (i32, i32, i32) {
    %c0_i32 = arith.constant 0 : i32
    %c0_i32_0 = arith.constant 0 : i32
    %c0_i32_1 = arith.constant 0 : i32
    %c0_i32_2 = arith.constant 0 : i32
    return %c0_i32, %c0_i32_0, %c0_i32_1 : i32, i32, i32
  }
  func.func @transform_2(%arg0: i32) -> (i32, i32) {
    %c0_i32 = arith.constant 0 : i32
    %c0_i32_0 = arith.constant 0 : i32
    %c0_i32_1 = arith.constant 0 : i32
    return %c0_i32, %c0_i32_0 : i32, i32
  }
  func.func @transform_3(%arg0: i32) -> (i32, i32, i32, i32) {
    %c0_i32 = arith.constant 0 : i32
    %c0_i32_0 = arith.constant 0 : i32
    %c0_i32_1 = arith.constant 0 : i32
    %c0_i32_2 = arith.constant 0 : i32
    return %arg0, %c0_i32, %c0_i32_0, %c0_i32_1 : i32, i32, i32, i32
  }
}

</mosaic_0001>

<bundles_post_ra>
// kernel: attention_branch_forward.5
= control target key start
LH: loop header
LB: loop body
LE: loop exit
PB: predicated region body
PF: predicated region fallthrough
CT: control target
= control target key end

     0   :  { %s533_s6 = smov 0   ;;  %s695_s0 = inlined_call_operand.vmem [shape: f32[32,32], index: 0, kind: input, shape index: {}]   ;;  %s696_s1 = inlined_call_operand.vmem [shape: f32[32,32,32], index: 1, kind: output, shape index: {}]  }
   0x1 LB: > { %s539_s7 = sadd.s32 4294967295, %s521_s6   ;;  %p469_p0 = scmp.ge.s32.totalorder %s521_s6, 1  ;;  %s521_s6 = sphi %s533_s6, %s11_s6  }
   0x2   : > { %p86_p1 = scmp.lt.s32.totalorder %s521_s6, 5 }
   0x4   : > { %p87_p2 = pnand %p469_p0, %p86_p1 }
   0x5   : > { %p106_p3 = scmp.lt.s32.totalorder (!%p87_p2), %s539_s7, 3  ;;  %s471_s13 = sshll.u32 (!%p87_p2), %s539_s7, 3 }
   0x6   : > { %90 = sbr.rel (%p87_p2) target bundleno = 335 (0x14f), region = 24  ;;  %p111_p4 = scmp.lt.s32.totalorder (!%p87_p2), %s471_s13, 31 }
   0xb   : > { %v119_v0 = vlaneseq  ;;  %s107_s8 = scalar_select %p106_p3, %s539_s7, 3  ;;  %vm374_vm0 = vcmask 261120  }
   0xc   : > { %s698_s13 = smov (!%p111_p4, %s471_s13), 31 }
   0xd   : > { %v544_v1 = vshrl.u32 %v119_v0, 7  ;;  %s470_s9 = sshll.u32 %s107_s8, 3  ;;  %s476_s14 = sshll.u32 %s698_s13, 5 }
   0xe   : > { %s109_s12 = scalar_lea.vmem %s695_s0, %s470_s9  ;;  %s595_s17 = scalar_lea.vmem %s696_s1, %s476_s14 }
   0xf   : > { %v548_v2 = vadd.s32 16, %v544_v1  ;;  %486 = vset.pattern.permute.xlu2 %v544_v1  ;;  %v555_v3 = vld [vmem:[%s109_s12] sm:$0xff]  ;;  %v563_v6 = vadd.s32 8, %v544_v1  ;;  %v567_v7 = vadd.s32 24, %v544_v1 }
  0x10   : > { %v558_v4 = vperm.slane %v555_v3, 0  ;;  %v143_v5 = vperm.slane %v555_v3, 1  ;;  %v193_v8 = vperm.slane %v555_v3, 3  ;;  %v168_v9 = vperm.slane %v555_v3, 2 }
  0x11   : > { %487 = vset.pattern.permute.xlu1 %v548_v2  ;;  %485 = vset.pattern.permute.xlu0 %v563_v6  ;;  %v218_v10 = vperm.slane %v555_v3, 4  ;;  %v243_v11 = vperm.slane %v555_v3, 5  ;;  %v319_v12 = vrot.slane %v555_v3, 1  ;;  %v293_v24 = vperm.slane %v555_v3, 7 }
  0x12   : > { %v320_v25 = vrot.slane %v555_v3, 2  ;;  %v268_v26 = vperm.slane %v555_v3, 6  ;;  %v321_v32 = vrot.slane %v555_v3, 3  ;;  %v322_v42 = vrot.slane %v555_v3, 4 }
  0x13   : > { %v327_v14 = vperm.slane %v319_v12, 0  ;;  %v323_v50 = vrot.slane %v555_v3, 5  ;;  %v324_v63 = vrot.slane %v555_v3, 6 }
  0x14   : > { %v619_v27 = vperm.slane %v320_v25, 0  ;;  %v329_v34 = vperm.slane %v321_v32, 0  ;;  %v330_v43 = vperm.slane %v322_v42, 0 }
  0x15   : > { %v331_v51 = vperm.slane %v323_v50, 0 }
  0x17   : > { %148 = vperm.xlu2 %486, %v143_v5  }
  0x19   : > { %135 = vperm.xlu1 %487, %v558_v4   ;;  %129 = vperm.xlu0 %485, %v558_v4  }
  0x1f   : > { %489 = vset.pattern.permute.xlu2 %v563_v6 }
  0x21   : > { %488 = vset.pattern.permute.xlu1 %v567_v7  ;;  %204 = vperm.xlu0 %485, %v193_v8  }
  0x27   : > { %154 = vperm.xlu2 %489, %v143_v5  }
  0x29   : > { %141 = vperm.xlu1 %488, %v558_v4   ;;  %500 = vset.pattern.permute.xlu0 %v548_v2 }
  0x2f   : > { %491 = vset.pattern.permute.xlu2 %v567_v7 }
  0x31   : > { %490 = vset.pattern.permute.xlu1 %v548_v2  ;;  %235 = vperm.xlu0 %500, %v218_v10  }
  0x37   : > { %166 = vperm.xlu2 %491, %v143_v5  }
  0x39   : > { %160 = vperm.xlu1 %490, %v143_v5   ;;  %505 = vset.pattern.permute.xlu0 %v567_v7 }
  0x3f   : > { %493 = vset.pattern.permute.xlu2 %v548_v2 }
  0x41   : > { %492 = vset.pattern.permute.xlu1 %v563_v6  ;;  %266 = vperm.xlu0 %505, %v243_v11  }
  0x47   : > { %185 = vperm.xlu2 %493, %v168_v9  }
  0x49   : > { %179 = vperm.xlu1 %492, %v168_v9   ;;  %506 = vset.pattern.permute.xlu0 %v544_v1 }
  0x4f   : > { %495 = vset.pattern.permute.xlu2 %v544_v1 }
  0x51   : > { %494 = vset.pattern.permute.xlu1 %v567_v7  ;;  %123 = vperm.xlu0 %506, %v558_v4  }
  0x57   : > { %198 = vperm.xlu2 %495, %v193_v8  }
  0x59   : > { %191 = vperm.xlu1 %494, %v168_v9   ;;  %173 = vperm.xlu0 %506, %v168_v9  }
  0x5f   : > { %497 = vset.pattern.permute.xlu2 %v567_v7 }
  0x61   : > { %496 = vset.pattern.permute.xlu1 %v548_v2  ;;  %298 = vperm.xlu0 %506, %v293_v24  }
  0x67   : > { %216 = vperm.xlu2 %497, %v193_v8  }
  0x69   : > { %210 = vperm.xlu1 %496, %v193_v8   ;;  %514 = vset.pattern.permute.xlu0 %v567_v7 }
  0x6f   : > { %499 = vset.pattern.permute.xlu2 %v563_v6 }
  0x71   : > { %498 = vset.pattern.permute.xlu1 %v544_v1  ;;  %v149_v13 = vpop.permute.xlu2 %148 }
  0x72   : > { %v346_v15 = vmul.f32 %v327_v14, %v149_v13 }
  0x74   : > { %379 = vst.msk [vmem:[%s595_s17 + $0x20] sm:$0xff] %vm374_vm0, %v346_v15 }
  0x77   : > { %229 = vperm.xlu2 %499, %v218_v10  }
  0x79   : > { %223 = vperm.xlu1 %498, %v218_v10  }
  0x7f   : > { %502 = vset.pattern.permute.xlu2 %v544_v1 }
  0x81   : > { %501 = vset.pattern.permute.xlu1 %v567_v7  ;;  %v155_v16 = vpop.permute.xlu2 %154 }
  0x82   : > { %v347_v17 = vmul.f32 %v327_v14, %v155_v16  ;;  %v325_v16 = vrot.slane %v555_v3, 7 }
  0x84   : > { %380 = vst.msk [vmem:[%s595_s17 + $0x28] sm:$0xff] %vm374_vm0, %v347_v17  ;;  %v333_v17 = vperm.slane %v325_v16, 0 }
  0x87   : > { %248 = vperm.xlu2 %502, %v243_v11  }
  0x89   : > { %241 = vperm.xlu1 %501, %v218_v10  }
  0x8b   : > { %v136_v18 = vpop.permute.xlu1 %135  ;;  %v130_v47 = vpop.permute.xlu0 %129 }
  0x8c   : > { %v344_v19 = vmul.f32 %v136_v18, %v558_v4  ;;  %v343_v49 = vmul.f32 %v130_v47, %v558_v4 }
  0x8e   : > { %377 = vst.msk [vmem:[%s595_s17 + $0x10] sm:$0xff] %vm374_vm0, %v344_v19 }
  0x8f   : > { %504 = vset.pattern.permute.xlu2 %v548_v2  ;;  %376 = vst.msk [vmem:[%s595_s17 + $0x8] sm:$0xff] %vm374_vm0, %v343_v49 }
  0x91   : > { %503 = vset.pattern.permute.xlu1 %v563_v6  ;;  %v167_v20 = vpop.permute.xlu2 %166 }
  0x92   : > { %v349_v21 = vmul.f32 %v327_v14, %v167_v20 }
  0x93   : > { %v205_v54 = vpop.permute.xlu0 %204 }
  0x94   : > { %382 = vst.msk [vmem:[%s595_s17 + $0x38] sm:$0xff] %vm374_vm0, %v349_v21  ;;  %v355_v55 = vmul.f32 %v329_v34, %v205_v54 }
  0x96   : > { %388 = vst.msk [vmem:[%s595_s17 + $0x68] sm:$0xff] %vm374_vm0, %v355_v55 }
  0x97   : > { %260 = vperm.xlu2 %504, %v243_v11  }
  0x99   : > { %254 = vperm.xlu1 %503, %v243_v11  }
  0x9b   : > { %v142_v22 = vpop.permute.xlu1 %141 }
  0x9c   : > { %v345_v23 = vmul.f32 %v142_v22, %v558_v4 }
  0x9e   : > { %378 = vst.msk [vmem:[%s595_s17 + $0x18] sm:$0xff] %vm374_vm0, %v345_v23 }
  0x9f   : > { %508 = vset.pattern.permute.xlu2 %v563_v6 }
  0xa1   : > { %507 = vset.pattern.permute.xlu1 %v544_v1  ;;  %v186_v28 = vpop.permute.xlu2 %185  ;;  %v332_v1 = vperm.slane %v324_v63, 0 }
  0xa2   : > { %v352_v29 = vmul.f32 %v619_v27, %v186_v28 }
  0xa3   : > { %v236_v61 = vpop.permute.xlu0 %235 }
  0xa4   : > { %385 = vst.msk [vmem:[%s595_s17 + $0x50] sm:$0xff] %vm374_vm0, %v352_v29  ;;  %v360_v0 = vmul.f32 %v330_v43, %v236_v61 }
  0xa6   : > { %393 = vst.msk [vmem:[%s595_s17 + $0x90] sm:$0xff] %vm374_vm0, %v360_v0 }
  0xa7   : > { %279 = vperm.xlu2 %508, %v268_v26  }
  0xa9   : > { %273 = vperm.xlu1 %507, %v268_v26  }
  0xab   : > { %v161_v30 = vpop.permute.xlu1 %160 }
  0xac   : > { %v348_v31 = vmul.f32 %v327_v14, %v161_v30 }
  0xae   : > { %381 = vst.msk [vmem:[%s595_s17 + $0x30] sm:$0xff] %vm374_vm0, %v348_v31 }
  0xaf   : > { %510 = vset.pattern.permute.xlu2 %v567_v7 }
  0xb1   : > { %509 = vset.pattern.permute.xlu1 %v548_v2  ;;  %v199_v33 = vpop.permute.xlu2 %198 }
  0xb2   : > { %v354_v37 = vmul.f32 %v329_v34, %v199_v33 }
  0xb4   : > { %387 = vst.msk [vmem:[%s595_s17 + $0x60] sm:$0xff] %vm374_vm0, %v354_v37 }
  0xb7   : > { %291 = vperm.xlu2 %510, %v268_v26  }
  0xb9   : > { %285 = vperm.xlu1 %509, %v268_v26  }
  0xbb   : > { %v180_v35 = vpop.permute.xlu1 %179 }
  0xbc   : > { %v351_v36 = vmul.f32 %v619_v27, %v180_v35 }
  0xbe   : > { %384 = vst.msk [vmem:[%s595_s17 + $0x48] sm:$0xff] %vm374_vm0, %v351_v36 }
  0xbf   : > { %512 = vset.pattern.permute.xlu2 %v548_v2 }
  0xc1   : > { %511 = vset.pattern.permute.xlu1 %v563_v6  ;;  %v217_v38 = vpop.permute.xlu2 %216  ;;  %v267_v6 = vpop.permute.xlu0 %266 }
  0xc2   : > { %v357_v39 = vmul.f32 %v329_v34, %v217_v38 }
  0xc4   : > { %390 = vst.msk [vmem:[%s595_s17 + $0x78] sm:$0xff] %vm374_vm0, %v357_v39 }
  0xc7   : > { %310 = vperm.xlu2 %512, %v293_v24  }
  0xc9   : > { %304 = vperm.xlu1 %511, %v293_v24   ;;  %v124_v9 = vpop.permute.xlu0 %123 }
  0xca   : > { %v342_v11 = vmul.f32 %v124_v9, %v558_v4 }
  0xcb   : > { %v192_v40 = vpop.permute.xlu1 %191 }
  0xcc   : > { %v353_v41 = vmul.f32 %v619_v27, %v192_v40  ;;  %375 = vst.msk [vmem:[%s595_s17] sm:$0xff] %vm374_vm0, %v342_v11 }
  0xce   : > { %386 = vst.msk [vmem:[%s595_s17 + $0x58] sm:$0xff] %vm374_vm0, %v353_v41 }
  0xd1   : > { %513 = vset.pattern.permute.xlu1 %v567_v7  ;;  %v230_v44 = vpop.permute.xlu2 %229  ;;  %v365_v7 = vmul.f32 %v331_v51, %v267_v6  ;;  %v174_v14 = vpop.permute.xlu0 %173 }
  0xd2   : > { %v359_v45 = vmul.f32 %v330_v43, %v230_v44  ;;  %v350_v15 = vmul.f32 %v619_v27, %v174_v14 }
  0xd3   : > { %398 = vst.msk [vmem:[%s595_s17 + $0xb8] sm:$0xff] %vm374_vm0, %v365_v7 }
  0xd4   : > { %392 = vst.msk [vmem:[%s595_s17 + $0x88] sm:$0xff] %vm374_vm0, %v359_v45 }
  0xd5   : > { %383 = vst.msk [vmem:[%s595_s17 + $0x40] sm:$0xff] %vm374_vm0, %v350_v15 }
  0xd9   : > { %316 = vperm.xlu1 %513, %v293_v24   ;;  %v299_v19 = vpop.permute.xlu0 %298 }
  0xda   : > { %v370_v20 = vmul.f32 %v333_v17, %v299_v19 }
  0xdb   : > { %v211_v46 = vpop.permute.xlu1 %210 }
  0xdc   : > { %v356_v48 = vmul.f32 %v329_v34, %v211_v46  ;;  %403 = vst.msk [vmem:[%s595_s17 + $0xe0] sm:$0xff] %vm374_vm0, %v370_v20 }
  0xde   : > { %389 = vst.msk [vmem:[%s595_s17 + $0x70] sm:$0xff] %vm374_vm0, %v356_v48 }
  0xe1   : > { %v249_v52 = vpop.permute.xlu2 %248 }
  0xe2   : > { %v362_v53 = vmul.f32 %v331_v51, %v249_v52 }
  0xe4   : > { %395 = vst.msk [vmem:[%s595_s17 + $0xa0] sm:$0xff] %vm374_vm0, %v362_v53 }
  0xeb   : > { %v224_v56 = vpop.permute.xlu1 %223 }
  0xec   : > { %v358_v57 = vmul.f32 %v330_v43, %v224_v56 }
  0xee   : > { %391 = vst.msk [vmem:[%s595_s17 + $0x80] sm:$0xff] %vm374_vm0, %v358_v57 }
  0xf1   : > { %v261_v58 = vpop.permute.xlu2 %260 }
  0xf2   : > { %v364_v59 = vmul.f32 %v331_v51, %v261_v58 }
  0xf4   : > { %397 = vst.msk [vmem:[%s595_s17 + $0xb0] sm:$0xff] %vm374_vm0, %v364_v59 }
  0xfb   : > { %v242_v60 = vpop.permute.xlu1 %241 }
  0xfc   : > { %v361_v62 = vmul.f32 %v330_v43, %v242_v60 }
  0xfe   : > { %394 = vst.msk [vmem:[%s595_s17 + $0x98] sm:$0xff] %vm374_vm0, %v361_v62 }
 0x101   : > { %v280_v2 = vpop.permute.xlu2 %279 }
 0x102   : > { %v367_v5 = vmul.f32 %v332_v1, %v280_v2 }
 0x104   : > { %400 = vst.msk [vmem:[%s595_s17 + $0xc8] sm:$0xff] %vm374_vm0, %v367_v5 }
 0x10b   : > { %v255_v8 = vpop.permute.xlu1 %254 }
 0x10c   : > { %v363_v10 = vmul.f32 %v331_v51, %v255_v8 }
 0x10e   : > { %396 = vst.msk [vmem:[%s595_s17 + $0xa8] sm:$0xff] %vm374_vm0, %v363_v10 }
 0x111   : > { %v292_v12 = vpop.permute.xlu2 %291 }
 0x112   : > { %v369_v13 = vmul.f32 %v332_v1, %v292_v12 }
 0x114   : > { %402 = vst.msk [vmem:[%s595_s17 + $0xd8] sm:$0xff] %vm374_vm0, %v369_v13 }
 0x11b   : > { %v274_v18 = vpop.permute.xlu1 %273 }
 0x11c   : > { %v366_v4 = vmul.f32 %v332_v1, %v274_v18 }
 0x11e   : > { %399 = vst.msk [vmem:[%s595_s17 + $0xc0] sm:$0xff] %vm374_vm0, %v366_v4 }
 0x121   : > { %v311_v21 = vpop.permute.xlu2 %310 }
 0x122   : > { %v372_v22 = vmul.f32 %v333_v17, %v311_v21 }
 0x124   : > { %405 = vst.msk [vmem:[%s595_s17 + $0xf0] sm:$0xff] %vm374_vm0, %v372_v22 }
 0x12b   : > { %v286_v23 = vpop.permute.xlu1 %285 }
 0x12c   : > { %v368_v24 = vmul.f32 %v332_v1, %v286_v23 }
 0x12e   : > { %401 = vst.msk [vmem:[%s595_s17 + $0xd0] sm:$0xff] %vm374_vm0, %v368_v24 }
 0x13b   : > { %v305_v3 = vpop.permute.xlu1 %304 }
 0x13c   : > { %v371_v25 = vmul.f32 %v333_v17, %v305_v3 }
 0x13e   : > { %404 = vst.msk [vmem:[%s595_s17 + $0xe8] sm:$0xff] %vm374_vm0, %v371_v25 }
 0x14b   : > { %v317_v26 = vpop.permute.xlu1 %316 }
 0x14c   : > { %v373_v27 = vmul.f32 %v333_v17, %v317_v26 }
 0x14e   : > { %406 = vst.msk [vmem:[%s595_s17 + $0xf8] sm:$0xff] %vm374_vm0, %v373_v27 }
 0x14f PF: > { %s11_s6 = sadd.s32 1, %s521_s6  }
 0x150   : > { %p8_p5 = scmp.ge.s32.totalorder %s11_s6, 6  }
 0x152   :  { %10 = sbr.rel (!%p8_p5) target bundleno = 1 (0x1), region = 54 }

// kernel: attention_branch_forward.4
= control target key start
LH: loop header
LB: loop body
LE: loop exit
PB: predicated region body
PF: predicated region fallthrough
CT: control target
= control target key end

     0   :  { %s1410_s12 = smov 0   ;;  %s1820_s0 = inlined_call_operand.vmem [shape: bf16[2,7,7,8], index: 0, kind: input, shape index: {}]   ;;  %s1821_s1 = inlined_call_operand.vmem [shape: bf16[9,8,16], index: 1, kind: input, shape index: {}]   ;;  %s1822_s2 = inlined_call_operand.vmem [shape: f32[1,16], index: 2, kind: input, shape index: {}]   ;;  %s1823_s3 = inlined_call_operand.vmem [shape: f32[2,5,5,16], index: 3, kind: output, shape index: {}]  }
   0x1 LB: > { %s1298_s13 = sadd.s32 4294967295, %s1388_s12   ;;  %p1302_p0 = scmp.ge.s32.totalorder %s1388_s12, 1  ;;  %s1388_s12 = sphi %s1410_s12, %s13_s12  }
   0x2   : > { %p137_p1 = scmp.lt.s32.totalorder %s1388_s12, 3 }
   0x4   : > { %p138_p2 = pnand %p1302_p0, %p137_p1 }
   0x5   : > { %p161_p3 = scmp.lt.s32.totalorder (!%p138_p2), %s1298_s13, 1 }
   0x6   : > { %141 = sbr.rel (%p138_p2) target bundleno = 523 (0x20b), region = 32 }
   0xb   : > { %v1305_v0 = vld [vmem:[%s1821_s1 + $0x4] sm:$0xf]  ;;  %vm328_vm0 = vcmask 1043456   ;;  %s1825_s13 = smov (!%p161_p3, %s1298_s13), 1  ;;  %vm194_vm1 = vcmask 1041409   ;;  %vm189_vm2 = vcmask 1040384  }
   0xc   : > { %v330_v1 = vsel %vm328_vm0, %v1305_v0, 0  ;;  %s1371_s16 = smul.u32 28, %s1825_s13  ;;  %vm198_vm3 = vcmask 1042434   ;;  %v267_v50 = vld [vmem:[%s1821_s1] sm:$0xf]  ;;  %vm323_vm4 = vcmask 64512  }
   0xd   : > { %1370 = vmatpush.bf16.msra.mxu1 %v330_v1  ;;  %339 = vmatpush.bf16.msra.mxu0 %v330_v1  ;;  %v404_v60 = vsel %vm328_vm0, %v267_v50, 0  ;;  %s1372_s11 = smul.u32 40, %s1825_s13  ;;  %vm1237_vm5 = vcmask 126976  }
   0xe   : > { %s1428_s19 = scalar_lea.vmem %s1820_s0, %s1371_s16 }
   0xf   : > { %v1431_v2 = vld [vmem:[%s1428_s19] sm:$0xf]  ;;  %v1434_v3 = vld [vmem:[%s1428_s19 + $0x4] sm:$0xf]  ;;  %v1437_v4 = vld [vmem:[%s1428_s19 + $0x8] sm:$0xf]  ;;  %s1798_s16 = scalar_lea.vmem %s1823_s3, %s1372_s11 }
  0x10   : > { %v1440_v5 = vld [vmem:[%s1428_s19 + $0xc] sm:$0xf]  ;;  %v184_v6 = vrot.slane %v1431_v2, 3  ;;  %v186_v7 = vrot.slane %v1437_v4, 3  ;;  %v185_v8 = vrot.slane %v1434_v3, 3 }
  0x11   : > { %v1446_v9 = vrot.slane %v1440_v5, 3  ;;  %v1461_v15 = vld [vmem:[%s1428_s19 + $0x10] sm:$0xf]  ;;  %v1503_v34 = vld [vmem:[%s1428_s19 + $0x14] sm:$0xf]  ;;  %413 = vmatpush.bf16.msrb.mxu1 %v404_v60 }
  0x12   : > { %v195_v10 = vsel %vm194_vm1, %v1431_v2, %v184_v6  ;;  %v1452_v11 = vsel %vm189_vm2, %v1431_v2, %v184_v6  ;;  %v199_v12 = vsel %vm198_vm3, %v1431_v2, %v184_v6  ;;  %v206_v13 = vsel %vm194_vm1, %v1434_v3, %v185_v8  ;;  %v1512_v41 = vld [vmem:[%s1428_s19 + $0x18] sm:$0xf] }
  0x13   : > { %v209_v14 = vsel %vm198_vm3, %v1434_v3, %v185_v8  ;;  %v1463_v16 = vrot.slane %v195_v10, 1  ;;  %v1465_v17 = vrot.slane %v206_v13, 1  ;;  %v216_v19 = vsel %vm194_vm1, %v1437_v4, %v186_v7 }
  0x14   : > { %v1467_v18 = vrot.slane %v209_v14, 2  ;;  %v1473_v20 = vsel %vm189_vm2, %v1434_v3, %v185_v8  ;;  %v1475_v21 = vrot.slane %v216_v19, 1  ;;  %v219_v22 = vsel %vm198_vm3, %v1437_v4, %v186_v7 }
  0x15   : > { %v1479_v23 = vrot.slane %v199_v12, 2  ;;  %v1483_v24 = vsel %vm189_vm2, %v1437_v4, %v186_v7  ;;  %v1485_v25 = vrot.slane %v219_v22, 2  ;;  %298 = vst [vmem:[#allocation1 + $0x3] ss:$9 sm:$0xff] %v1465_v17  ;;  %v188_v26 = vrot.slane %v1461_v15, 3 }
  0x16   : > { %v1492_v27 = vsel %vm189_vm2, %v1440_v5, %v1446_v9  ;;  %v243_v28 = vunpack.i.h.s16 %v1452_v11  ;;  %301 = vst [vmem:[#allocation1 + $0x4] ss:$9 sm:$0xff] %v1467_v18  ;;  %v245_v29 = vunpack.i.h.s16 %v1463_v16  ;;  %v248_v30 = vunpack.i.h.s16 %v1473_v20 }
  0x17   : > { %v239_v31 = vsel %vm198_vm3, %v1461_v15, %v188_v26  ;;  %v253_v32 = vunpack.i.h.s16 %v1483_v24  ;;  %v255_v33 = vunpack.i.h.s16 %v1475_v21  ;;  %v258_v35 = vunpack.i.h.s16 %v1492_v27 }
  0x18   : > { %v268_v36 = vunpack.i.h.s16 %v1479_v23  ;;  %v269_v37 = vunpack.i.h.s16 %v1467_v18  ;;  %v270_v38 = vunpack.i.h.s16 %v1485_v25  ;;  %v1306_v39 = vpack.i.b16 %v1463_v16, %v243_v28 }
  0x19   : > { %v1307_v40 = vpack.i.b16 %v1479_v23, %v245_v29  ;;  %v1514_v42 = vrot.slane %v239_v31, 2  ;;  %v1519_v44 = vpack.i.b16 %v1475_v21, %v253_v32  ;;  %v236_v45 = vsel %vm194_vm1, %v1461_v15, %v188_v26 }
  0x1a   : > { %v277_v43 = vpack.i.b16 %v248_v30, %v268_v36  ;;  %v1524_v46 = vpack.i.b16 %v1485_v25, %v255_v33  ;;  %289 = vst [vmem:[#allocation1] ss:$9 sm:$0xff] %v1306_v39  ;;  %v1527_v47 = vrot.slane %v1503_v34, 3  ;;  %v1531_v48 = vpack.i.b16 %v258_v35, %v270_v38 }
  0x1b   : > { %292 = vst [vmem:[#allocation1 + $0x1] ss:$9 sm:$0xff] %v1307_v40  ;;  %v1533_v49 = vpack.i.b16 %v253_v32, %v269_v37  ;;  %v872_v52 = vrot.slane %v1512_v41, 3  ;;  %v1546_v53 = vsel %vm189_vm2, %v1461_v15, %v188_v26  ;;  %v1548_v54 = vrot.slane %v236_v45, 1 }
  0x1c   : > { %295 = vst [vmem:[#allocation1 + $0x2] ss:$9 sm:$0xff] %v277_v43  ;;  %v1541_v51 = vsel %vm189_vm2, %v1503_v34, %v1527_v47  ;;  %v272_v55 = vunpack.i.h.s16 %v1514_v42  ;;  %v226_v61 = vsel %vm194_vm1, %v1440_v5, %v1446_v9  ;;  %v229_v1 = vsel %vm198_vm3, %v1440_v5, %v1446_v9 }
  0x1d   : > { %304 = vst [vmem:[#allocation1 + $0x5] ss:$9 sm:$0xff] %v1519_v44  ;;  %v584_v56 = vunpack.i.h.s16 %v1541_v51  ;;  %v1556_v57 = vsel %vm189_vm2, %v1512_v41, %v872_v52  ;;  %v877_v58 = vsel %vm194_vm1, %v1512_v41, %v872_v52  ;;  %v880_v59 = vsel %vm198_vm3, %v1512_v41, %v872_v52 }
  0x1e   : > { %307 = vst [vmem:[#allocation1 + $0x6] ss:$9 sm:$0xff] %v1524_v46  ;;  %v1567_v62 = vrot.slane %v877_v58, 1  ;;  %v884_v63 = vunpack.i.h.s16 %v1556_v57  ;;  %v263_v6 = vunpack.i.h.s16 %v1546_v53  ;;  %v265_v7 = vunpack.i.h.s16 %v1548_v54 }
  0x1f   : > { %310 = vst [vmem:[#allocation1 + $0x7] ss:$9 sm:$0xff] %v1531_v48  ;;  %v1572_v0 = vpack.i.b16 %v584_v56, %v272_v55  ;;  %v1579_v8 = vrot.slane %v880_v59, 2  ;;  %v1585_v13 = vrot.slane %v226_v61, 1  ;;  %v1587_v14 = vrot.slane %v229_v1, 2 }
  0x20   : > { %v886_v10 = vunpack.i.h.s16 %v1567_v62  ;;  %v1583_v12 = vpack.i.b16 %v1567_v62, %v884_v63  ;;  %v1595_v9 = vpack.i.b16 %v1548_v54, %v263_v6  ;;  %v1598_v22 = vpack.i.b16 %v1514_v42, %v265_v7 }
  0x21   : > { %v250_v28 = vunpack.i.h.s16 %v1465_v17  ;;  %v1314_v31 = vpack.i.b16 %v1473_v20, %v1479_v23  ;;  %v1614_v32 = vpack.i.b16 %v1465_v17, %v248_v30  ;;  %v1632_v23 = vpack.i.b16 %v1585_v13, %v258_v35 }
  0x22   : > { %v1590_v19 = vpack.i.b16 %v1579_v8, %v886_v10  ;;  %v266_v37 = vunpack.i.l.s16 %v1514_v42 }
  0x23   : > { %v1618_v33 = vpack.i.b16 %v1467_v18, %v250_v28 }
  0x26   : > { %v311_v26 = vld [vmem:[#allocation1] sm:$0xff] }
  0x27   : > { %313 = vst [vmem:[#allocation1] ss:$9 sm:$0xff] %v1585_v13  ;;  %1312 = vmatmul.msk.bf16.vlgmr.msra.gmra.mxu0 %vm323_vm4, %v311_v26 }
  0x28   : > { %315 = vst [vmem:[#allocation1 + $0x1] ss:$9 sm:$0xff] %v1587_v14 }
  0x29   : > { %317 = vst [vmem:[#allocation1 + $0x2] ss:$9 sm:$0xff] %v1595_v9 }
  0x2a   : > { %319 = vst [vmem:[#allocation1 + $0x3] ss:$9 sm:$0xff] %v1598_v22 }
  0x2b   : > { %321 = vst [vmem:[#allocation1 + $0x4] ss:$9 sm:$0xff] %v272_v55 }
  0x32   : > { %v322_v29 = vld [vmem:[#allocation1] sm:$0xff] }
  0x33   : > { %1313 = vmatmul.msk.bf16.vlgmr.msra.gmra.mxu1 %vm323_vm4, %v322_v29  ;;  %365 = vst [vmem:[#allocation1] ss:$9 sm:$0xff] %v1452_v11  ;;  %v1623_v11 = vpack.i.b16 %v1492_v27, %v1485_v25 }
  0x34   : > { %368 = vst [vmem:[#allocation1 + $0x1] ss:$9 sm:$0xff] %v1463_v16  ;;  %v260_v16 = vunpack.i.h.s16 %v1585_v13 }
  0x35   : > { %380 = vst [vmem:[#allocation1 + $0x5] ss:$9 sm:$0xff] %v1483_v24 }
  0x36   : > { %383 = vst [vmem:[#allocation1 + $0x6] ss:$9 sm:$0xff] %v1475_v21  ;;  %v1635_v30 = vpack.i.b16 %v1587_v14, %v260_v16  ;;  %v1331_v16 = vld [vmem:[%s1821_s1 + $0xc] sm:$0xf] }
  0x37   : > { %371 = vst [vmem:[#allocation1 + $0x2] ss:$9 sm:$0xff] %v1314_v31  ;;  %v1322_v31 = vld [vmem:[%s1821_s1 + $0x8] sm:$0xf] }
  0x38   : > { %374 = vst [vmem:[#allocation1 + $0x3] ss:$9 sm:$0xff] %v1614_v32 }
  0x39   : > { %377 = vst [vmem:[#allocation1 + $0x4] ss:$9 sm:$0xff] %v1618_v33 }
  0x3a   : > { %386 = vst [vmem:[#allocation1 + $0x7] ss:$9 sm:$0xff] %v1623_v11 }
  0x41   : > { %v387_v36 = vld [vmem:[#allocation1] sm:$0xff] }
  0x42   : > { %389 = vst [vmem:[#allocation1] ss:$9 sm:$0xff] %v1632_v23 }
  0x43   : > { %391 = vst [vmem:[#allocation1 + $0x1] ss:$9 sm:$0xff] %v1635_v30  ;;  %1320 = vmatmul.msk.bf16.vlgmr.msrb.gmra.mxu1 %vm323_vm4, %v387_v36 }
  0x44   : > { %393 = vst [vmem:[#allocation1 + $0x2] ss:$9 sm:$0xff] %v1546_v53 }
  0x45   : > { %395 = vst [vmem:[#allocation1 + $0x3] ss:$9 sm:$0xff] %v1548_v54 }
  0x46   : > { %397 = vst [vmem:[#allocation1 + $0x4] ss:$9 sm:$0xff] %v266_v37  ;;  %v546_v37 = vsel %vm328_vm0, %v1322_v31, 0 }
  0x47   : > { %435 = vst [vmem:[#allocation1 + $0x20] sm:$0xff] %v1434_v3  ;;  %555 = vmatpush.bf16.msra.mxu2 %v546_v37 }
  0x4d   : > { %v398_v35 = vld [vmem:[#allocation1] sm:$0xff] }
  0x4e   : > { %425 = vst [vmem:[#allocation1] sm:$0xff] %v1431_v2  ;;  %v437_v38 = vld [vmem:[#allocation1 + $0x21] ss:$4 sm:$0xff]  ;;  %v440_v39 = vld [vmem:[#allocation1 + $0x22] ss:$4 sm:$0xff] }
  0x4f   : > { %v443_v40 = vld [vmem:[#allocation1 + $0x23] ss:$4 sm:$0xff]  ;;  %v472_v59 = vunpack.i.h.s16 %v437_v38  ;;  %v474_v60 = vunpack.i.h.s16 %v440_v39 }
  0x50   : > { %452 = vst [vmem:[#allocation1 + $0x20] sm:$0xff] %v1440_v5 }
  0x51   : > { %v1324_v28 = vpack.i.b16 %v440_v39, %v472_v59  ;;  %v1325_v29 = vpack.i.b16 %v443_v40, %v474_v60  ;;  %v1332_v60 = vpack.i.b16 %v1483_v24, %v1467_v18  ;;  %v580_v18 = vsel %vm198_vm3, %v1503_v34, %v1527_v47 }
  0x53   : > { %1321 = vmatmul.msk.bf16.gmra.mxu1 %vm323_vm4, %v398_v35  ;;  %v631_v35 = vsel %vm328_vm0, %v1331_v16, 0 }
  0x54   : > { %640 = vmatpush.bf16.msra.mxu3 %v631_v35 }
  0x55   : > { %v427_v43 = vld [vmem:[#allocation1 + $0x1] ss:$4 sm:$0xff]  ;;  %v430_v45 = vld [vmem:[#allocation1 + $0x2] ss:$4 sm:$0xff]  ;;  %v433_v50 = vld [vmem:[#allocation1 + $0x3] ss:$4 sm:$0xff] }
  0x56   : > { %445 = vst [vmem:[#allocation1] sm:$0xff] %v1437_v4  ;;  %v1323_v1 = vpack.i.b16 %v437_v38, %v433_v50  ;;  %v1336_v50 = vld [vmem:[%s1821_s1 + $0x10] sm:$0xf] }
  0x57   : > { %v455_v2 = vld [vmem:[#allocation1 + $0x22] ss:$4 sm:$0xff]  ;;  %v457_v61 = vld [vmem:[#allocation1 + $0x23] ss:$4 sm:$0xff]  ;;  %v453_v63 = vld [vmem:[#allocation1 + $0x21] ss:$4 sm:$0xff] }
  0x58   : > { %v482_v38 = vunpack.i.h.s16 %v453_v63  ;;  %v484_v39 = vunpack.i.h.s16 %v455_v2 }
  0x5a   : > { %v1327_v40 = vpack.i.b16 %v455_v2, %v482_v38 }
  0x5d   : > { %v446_v52 = vld [vmem:[#allocation1 + $0x1] ss:$4 sm:$0xff]  ;;  %v448_v55 = vld [vmem:[#allocation1 + $0x2] ss:$4 sm:$0xff]  ;;  %v450_v58 = vld [vmem:[#allocation1 + $0x3] ss:$4 sm:$0xff] }
  0x5e   : > { %459 = vst [vmem:[#allocation1] sm:$0xff] %v1461_v15  ;;  %v1326_v36 = vpack.i.b16 %v453_v63, %v450_v58  ;;  %v1341_v58 = vld [vmem:[%s1821_s1 + $0x14] sm:$0xf] }
  0x65   : > { %v460_v7 = vld [vmem:[#allocation1 + $0x1] ss:$4 sm:$0xff]  ;;  %v462_v10 = vld [vmem:[#allocation1 + $0x2] ss:$4 sm:$0xff]  ;;  %v464_v26 = vld [vmem:[#allocation1 + $0x3] ss:$4 sm:$0xff] }
  0x66   : > { %507 = vst [vmem:[#allocation1] ss:$9 sm:$0xff] %v427_v43  ;;  %v1328_v43 = vpack.i.b16 %v457_v61, %v484_v39  ;;  %v490_v59 = vunpack.i.l.s16 %v464_v26  ;;  %v1333_v61 = vpack.i.b16 %v1546_v53, %v1587_v14 }
  0x67   : > { %510 = vst [vmem:[#allocation1 + $0x1] ss:$9 sm:$0xff] %v430_v45 }
  0x68   : > { %513 = vst [vmem:[#allocation1 + $0x2] ss:$9 sm:$0xff] %v1323_v1 }
  0x69   : > { %516 = vst [vmem:[#allocation1 + $0x3] ss:$9 sm:$0xff] %v1324_v28 }
  0x6a   : > { %519 = vst [vmem:[#allocation1 + $0x4] ss:$9 sm:$0xff] %v1325_v29 }
  0x6b   : > { %522 = vst [vmem:[#allocation1 + $0x5] ss:$9 sm:$0xff] %v446_v52  ;;  %v700_v52 = vsel %vm328_vm0, %v1336_v50, 0 }
  0x6c   : > { %525 = vst [vmem:[#allocation1 + $0x6] ss:$9 sm:$0xff] %v448_v55  ;;  %v846_v55 = vsel %vm328_vm0, %v1341_v58, 0  ;;  %709 = vmatpush.bf16.msrb.mxu0 %v700_v52 }
  0x6d   : > { %528 = vst [vmem:[#allocation1 + $0x7] ss:$9 sm:$0xff] %v1326_v36  ;;  %855 = vmatpush.bf16.msra.mxu1 %v846_v55 }
  0x74   : > { %v529_v45 = vld [vmem:[#allocation1] sm:$0xff] }
  0x75   : > { %531 = vst [vmem:[#allocation1] ss:$9 sm:$0xff] %v1327_v40  ;;  %1329 = vmatmul.msk.bf16.vlgmr.msra.gmra.mxu2 %vm323_vm4, %v529_v45 }
  0x76   : > { %533 = vst [vmem:[#allocation1 + $0x1] ss:$9 sm:$0xff] %v1328_v43 }
  0x77   : > { %535 = vst [vmem:[#allocation1 + $0x2] ss:$9 sm:$0xff] %v460_v7 }
  0x78   : > { %537 = vst [vmem:[#allocation1 + $0x3] ss:$9 sm:$0xff] %v462_v10 }
  0x79   : > { %539 = vst [vmem:[#allocation1 + $0x4] ss:$9 sm:$0xff] %v490_v59 }
  0x80   : > { %v540_v2 = vld [vmem:[#allocation1] sm:$0xff] }
  0x81   : > { %598 = vst [vmem:[#allocation1] ss:$9 sm:$0xff] %v1473_v20  ;;  %v1683_v20 = vrot.slane %v580_v18, 2 }
  0x82   : > { %600 = vst [vmem:[#allocation1 + $0x1] ss:$9 sm:$0xff] %v1465_v17  ;;  %v577_v17 = vsel %vm194_vm1, %v1503_v34, %v1527_v47 }
  0x83   : > { %603 = vst [vmem:[#allocation1 + $0x2] ss:$9 sm:$0xff] %v1332_v60  ;;  %v1685_v63 = vrot.slane %v577_v17, 1  ;;  %v587_v7 = vunpack.i.l.s16 %v1683_v20 }
  0x84   : > { %605 = vst [vmem:[#allocation1 + $0x3] ss:$9 sm:$0xff] %v1519_v44 }
  0x85   : > { %607 = vst [vmem:[#allocation1 + $0x4] ss:$9 sm:$0xff] %v1524_v46  ;;  %1330 = vmatmul.msk.bf16.gmra.mxu2 %vm323_vm4, %v540_v2  ;;  %v1350_v2 = vld [vmem:[%s1821_s1 + $0x18] sm:$0xf] }
  0x86   : > { %610 = vst [vmem:[#allocation1 + $0x5] ss:$9 sm:$0xff] %v1492_v27  ;;  %v271_v27 = vunpack.i.h.s16 %v1587_v14  ;;  %v925_v18 = vsel %vm328_vm0, %v1350_v2, 0 }
  0x87   : > { %612 = vst [vmem:[#allocation1 + $0x6] ss:$9 sm:$0xff] %v1585_v13  ;;  %934 = vmatpush.bf16.msrb.mxu2 %v925_v18 }
  0x88   : > { %615 = vst [vmem:[#allocation1 + $0x7] ss:$9 sm:$0xff] %v1333_v61  ;;  %v661_v10 = vpack.i.b16 %v263_v6, %v271_v27 }
  0x8f   : > { %v616_v1 = vld [vmem:[#allocation1] sm:$0xff] }
  0x90   : > { %1334 = vmatmul.msk.bf16.vlgmr.msra.gmra.mxu3 %vm323_vm4, %v616_v1  ;;  %617 = vst [vmem:[#allocation1] ss:$9 sm:$0xff] %v1595_v9 }
  0x91   : > { %618 = vst [vmem:[#allocation1 + $0x1] ss:$9 sm:$0xff] %v1598_v22 }
  0x92   : > { %620 = vst [vmem:[#allocation1 + $0x2] ss:$9 sm:$0xff] %v1541_v51 }
  0x93   : > { %622 = vst [vmem:[#allocation1 + $0x3] ss:$9 sm:$0xff] %v1685_v63 }
  0x94   : > { %624 = vst [vmem:[#allocation1 + $0x4] ss:$9 sm:$0xff] %v587_v7 }
  0x9b   : > { %v625_v47 = vld [vmem:[#allocation1] sm:$0xff] }
  0x9c   : > { %666 = vst [vmem:[#allocation1] ss:$9 sm:$0xff] %v1614_v32  ;;  %v586_v32 = vunpack.i.h.s16 %v1685_v63 }
  0x9d   : > { %668 = vst [vmem:[#allocation1 + $0x1] ss:$9 sm:$0xff] %v1618_v33 }
  0x9e   : > { %671 = vst [vmem:[#allocation1 + $0x2] ss:$9 sm:$0xff] %v1533_v49  ;;  %v1708_v49 = vpack.i.b16 %v1685_v63, %v584_v56  ;;  %v1711_v6 = vpack.i.b16 %v1683_v20, %v586_v32 }
  0x9f   : > { %673 = vst [vmem:[#allocation1 + $0x3] ss:$9 sm:$0xff] %v1475_v21 }
  0xa0   : > { %676 = vst [vmem:[#allocation1 + $0x4] ss:$9 sm:$0xff] %v1485_v25  ;;  %1335 = vmatmul.msk.bf16.gmra.mxu3 %vm323_vm4, %v625_v47  ;;  %v656_v25 = vunpack.i.h.s16 %v1683_v20 }
  0xa1   : > { %678 = vst [vmem:[#allocation1 + $0x5] ss:$9 sm:$0xff] %v1632_v23 }
  0xa2   : > { %680 = vst [vmem:[#allocation1 + $0x6] ss:$9 sm:$0xff] %v1635_v30 }
  0xa3   : > { %683 = vst [vmem:[#allocation1 + $0x7] ss:$9 sm:$0xff] %v661_v10  ;;  %v1354_v10 = vld [vmem:[%s1821_s1 + $0x1c] sm:$0xf] }
  0xaa   : > { %v684_v33 = vld [vmem:[#allocation1] sm:$0xff] }
  0xab   : > { %685 = vst [vmem:[#allocation1] ss:$9 sm:$0xff] %v1548_v54  ;;  %1339 = vmatmul.msk.bf16.vlgmr.msrb.gmra.mxu0 %vm323_vm4, %v684_v33  ;;  %v990_v33 = vsel %vm328_vm0, %v1354_v10, 0 }
  0xac   : > { %687 = vst [vmem:[#allocation1 + $0x1] ss:$9 sm:$0xff] %v1514_v42  ;;  %999 = vmatpush.bf16.msrb.mxu3 %v990_v33 }
  0xad   : > { %689 = vst [vmem:[#allocation1 + $0x2] ss:$9 sm:$0xff] %v1708_v49 }
  0xae   : > { %691 = vst [vmem:[#allocation1 + $0x3] ss:$9 sm:$0xff] %v1711_v6 }
  0xaf   : > { %693 = vst [vmem:[#allocation1 + $0x4] ss:$9 sm:$0xff] %v656_v25 }
  0xb0   : > { %735 = vst [vmem:[#allocation1 + $0x20] sm:$0xff] %v1437_v4 }
  0xb6   : > { %v694_v56 = vld [vmem:[#allocation1] sm:$0xff] }
  0xb7   : > { %725 = vst [vmem:[#allocation1] sm:$0xff] %v1434_v3  ;;  %v737_v26 = vld [vmem:[#allocation1 + $0x21] ss:$4 sm:$0xff]  ;;  %v740_v28 = vld [vmem:[#allocation1 + $0x22] ss:$4 sm:$0xff] }
  0xb8   : > { %v743_v29 = vld [vmem:[#allocation1 + $0x23] ss:$4 sm:$0xff]  ;;  %v772_v39 = vunpack.i.h.s16 %v737_v26  ;;  %v774_v40 = vunpack.i.h.s16 %v740_v28 }
  0xb9   : > { %752 = vst [vmem:[#allocation1 + $0x20] sm:$0xff] %v1461_v15 }
  0xba   : > { %v1343_v55 = vpack.i.b16 %v740_v28, %v772_v39  ;;  %v1344_v60 = vpack.i.b16 %v743_v29, %v774_v40 }
  0xbb   : > { %1340 = vmatmul.msk.bf16.gmra.mxu0 %vm323_vm4, %v694_v56  ;;  %v1351_v56 = vpack.i.b16 %v1541_v51, %v1514_v42 }
  0xbe   : > { %v727_v31 = vld [vmem:[#allocation1 + $0x1] ss:$4 sm:$0xff]  ;;  %v730_v16 = vld [vmem:[#allocation1 + $0x2] ss:$4 sm:$0xff]  ;;  %v733_v36 = vld [vmem:[#allocation1 + $0x3] ss:$4 sm:$0xff] }
  0xbf   : > { %745 = vst [vmem:[#allocation1] sm:$0xff] %v1440_v5  ;;  %v1342_v50 = vpack.i.b16 %v737_v26, %v733_v36  ;;  %v346_v36 = vpop.f32.mrf.mxu1 }
  0xc0   : > { %v755_v3 = vld [vmem:[#allocation1 + $0x22] ss:$4 sm:$0xff]  ;;  %v757_v43 = vld [vmem:[#allocation1 + $0x23] ss:$4 sm:$0xff]  ;;  %v753_v45 = vld [vmem:[#allocation1 + $0x21] ss:$4 sm:$0xff] }
  0xc1   : > { %v782_v17 = vunpack.i.h.s16 %v753_v45  ;;  %v784_v1 = vunpack.i.h.s16 %v755_v3 }
  0xc3   : > { %v1346_v7 = vpack.i.b16 %v755_v3, %v782_v17  ;;  %v1347_v27 = vpack.i.b16 %v757_v43, %v784_v1 }
  0xc6   : > { %v746_v37 = vld [vmem:[#allocation1 + $0x1] ss:$4 sm:$0xff]  ;;  %v748_v35 = vld [vmem:[#allocation1 + $0x2] ss:$4 sm:$0xff]  ;;  %v750_v38 = vld [vmem:[#allocation1 + $0x3] ss:$4 sm:$0xff] }
  0xc7   : > { %759 = vst [vmem:[#allocation1] sm:$0xff] %v1503_v34  ;;  %v1345_v61 = vpack.i.b16 %v753_v45, %v750_v38 }
  0xce   : > { %v760_v58 = vld [vmem:[#allocation1 + $0x1] ss:$4 sm:$0xff]  ;;  %v762_v59 = vld [vmem:[#allocation1 + $0x2] ss:$4 sm:$0xff]  ;;  %v764_v52 = vld [vmem:[#allocation1 + $0x3] ss:$4 sm:$0xff] }
  0xcf   : > { %807 = vst [vmem:[#allocation1] ss:$9 sm:$0xff] %v727_v31  ;;  %v790_v32 = vunpack.i.l.s16 %v764_v52 }
  0xd0   : > { %810 = vst [vmem:[#allocation1 + $0x1] ss:$9 sm:$0xff] %v730_v16 }
  0xd1   : > { %813 = vst [vmem:[#allocation1 + $0x2] ss:$9 sm:$0xff] %v1342_v50 }
  0xd2   : > { %816 = vst [vmem:[#allocation1 + $0x3] ss:$9 sm:$0xff] %v1343_v55 }
  0xd3   : > { %819 = vst [vmem:[#allocation1 + $0x4] ss:$9 sm:$0xff] %v1344_v60 }
  0xd4   : > { %822 = vst [vmem:[#allocation1 + $0x5] ss:$9 sm:$0xff] %v746_v37  ;;  %v1777_v37 = vpop.f32.mrf.mxu1 }
  0xd5   : > { %825 = vst [vmem:[#allocation1 + $0x6] ss:$9 sm:$0xff] %v748_v35  ;;  %v341_v35 = vpop.f32.mrf.mxu0 }
  0xd6   : > { %828 = vst [vmem:[#allocation1 + $0x7] ss:$9 sm:$0xff] %v1345_v61 }
  0xdc   : > { %v415_v38 = vpop.f32.mrf.mxu1 }
  0xdd   : > { %v829_v47 = vld [vmem:[#allocation1] sm:$0xff]  ;;  %v343_v39 = vpop.f32.mrf.mxu0  ;;  %v416_v2 = vadd.f32 %v415_v38, %v341_v35 }
  0xde   : > { %831 = vst [vmem:[#allocation1] ss:$9 sm:$0xff] %v1346_v7  ;;  %1348 = vmatmul.msk.bf16.vlgmr.msra.gmra.mxu1 %vm323_vm4, %v829_v47 }
  0xdf   : > { %833 = vst [vmem:[#allocation1 + $0x1] ss:$9 sm:$0xff] %v1347_v27 }
  0xe0   : > { %835 = vst [vmem:[#allocation1 + $0x2] ss:$9 sm:$0xff] %v760_v58 }
  0xe1   : > { %837 = vst [vmem:[#allocation1 + $0x3] ss:$9 sm:$0xff] %v762_v59 }
  0xe2   : > { %839 = vst [vmem:[#allocation1 + $0x4] ss:$9 sm:$0xff] %v790_v32 }
  0xe4   : > { %v417_v43 = vpop.f32.mrf.mxu1 }
  0xe5   : > { %v418_v7 = vadd.f32 %v417_v43, %v343_v39 }
  0xe9   : > { %v840_v25 = vld [vmem:[#allocation1] sm:$0xff] }
  0xea   : > { %894 = vst [vmem:[#allocation1] ss:$9 sm:$0xff] %v1483_v24  ;;  %v887_v24 = vunpack.i.l.s16 %v1579_v8 }
  0xeb   : > { %896 = vst [vmem:[#allocation1 + $0x1] ss:$9 sm:$0xff] %v1475_v21  ;;  %v1359_v21 = vld [vmem:[%s1821_s1 + $0x20] sm:$0xf] }
  0xec   : > { %898 = vst [vmem:[#allocation1 + $0x2] ss:$9 sm:$0xff] %v1623_v11  ;;  %v1136_v42 = vsel %vm328_vm0, %v1359_v21, 0  ;;  %v420_v59 = vpop.f32.mrf.mxu1 }
  0xed   : > { %900 = vst [vmem:[#allocation1 + $0x3] ss:$9 sm:$0xff] %v1632_v23  ;;  %1145 = vmatpush.bf16.msra.mxu0 %v1136_v42 }
  0xee   : > { %902 = vst [vmem:[#allocation1 + $0x4] ss:$9 sm:$0xff] %v1635_v30  ;;  %1349 = vmatmul.msk.bf16.gmra.mxu1 %vm323_vm4, %v840_v25 }
  0xef   : > { %904 = vst [vmem:[#allocation1 + $0x5] ss:$9 sm:$0xff] %v1546_v53 }
  0xf0   : > { %906 = vst [vmem:[#allocation1 + $0x6] ss:$9 sm:$0xff] %v1548_v54  ;;  %v950_v54 = vunpack.i.h.s16 %v1579_v8 }
  0xf1   : > { %909 = vst [vmem:[#allocation1 + $0x7] ss:$9 sm:$0xff] %v1351_v56 }
  0xf4   : > { %v1779_v61 = vpop.f32.mrf.mxu1 }
  0xf5   : > { %v423_v39 = vadd.f32 %v1779_v61, %v1777_v37 }
  0xf8   : > { %v910_v26 = vld [vmem:[#allocation1] sm:$0xff]  ;;  %v557_v40 = vpop.f32.mrf.mxu2 }
  0xf9   : > { %1352 = vmatmul.msk.bf16.vlgmr.msrb.gmra.mxu2 %vm323_vm4, %v910_v26  ;;  %911 = vst [vmem:[#allocation1] ss:$9 sm:$0xff] %v1708_v49  ;;  %v567_v18 = vadd.f32 %v557_v40, %v416_v2 }
  0xfa   : > { %912 = vst [vmem:[#allocation1 + $0x1] ss:$9 sm:$0xff] %v1711_v6 }
  0xfb   : > { %914 = vst [vmem:[#allocation1 + $0x2] ss:$9 sm:$0xff] %v1556_v57 }
  0xfc   : > { %916 = vst [vmem:[#allocation1 + $0x3] ss:$9 sm:$0xff] %v1567_v62 }
  0xfd   : > { %918 = vst [vmem:[#allocation1 + $0x4] ss:$9 sm:$0xff] %v887_v24 }
 0x100   : > { %v559_v50 = vpop.f32.mrf.mxu2 }
 0x101   : > { %v568_v10 = vadd.f32 %v559_v50, %v418_v7 }
 0x104   : > { %v919_v51 = vld [vmem:[#allocation1] sm:$0xff] }
 0x105   : > { %958 = vst [vmem:[#allocation1] ss:$9 sm:$0xff] %v1519_v44 }
 0x106   : > { %960 = vst [vmem:[#allocation1 + $0x1] ss:$9 sm:$0xff] %v1524_v46 }
 0x107   : > { %962 = vst [vmem:[#allocation1 + $0x2] ss:$9 sm:$0xff] %v1531_v48 }
 0x108   : > { %964 = vst [vmem:[#allocation1 + $0x3] ss:$9 sm:$0xff] %v1585_v13  ;;  %v562_v55 = vpop.f32.mrf.mxu2 }
 0x109   : > { %1353 = vmatmul.msk.bf16.gmra.mxu2 %vm323_vm4, %v919_v51  ;;  %966 = vst [vmem:[#allocation1 + $0x4] ss:$9 sm:$0xff] %v1587_v14 }
 0x10a   : > { %968 = vst [vmem:[#allocation1 + $0x5] ss:$9 sm:$0xff] %v1595_v9 }
 0x10b   : > { %970 = vst [vmem:[#allocation1 + $0x6] ss:$9 sm:$0xff] %v1598_v22 }
 0x10c   : > { %973 = vst [vmem:[#allocation1 + $0x7] ss:$9 sm:$0xff] %v1572_v0 }
 0x110   : > { %v1781_v1 = vpop.f32.mrf.mxu2 }
 0x113   : > { %v974_v53 = vld [vmem:[#allocation1] sm:$0xff]  ;;  %v642_v3 = vpop.f32.mrf.mxu3 }
 0x114   : > { %1357 = vmatmul.msk.bf16.vlgmr.msrb.gmra.mxu3 %vm323_vm4, %v974_v53  ;;  %975 = vst [vmem:[#allocation1] ss:$9 sm:$0xff] %v1685_v63  ;;  %v652_v27 = vadd.f32 %v642_v3, %v567_v18 }
 0x115   : > { %977 = vst [vmem:[#allocation1 + $0x1] ss:$9 sm:$0xff] %v1683_v20 }
 0x116   : > { %979 = vst [vmem:[#allocation1 + $0x2] ss:$9 sm:$0xff] %v1583_v12 }
 0x117   : > { %981 = vst [vmem:[#allocation1 + $0x3] ss:$9 sm:$0xff] %v1590_v19 }
 0x118   : > { %983 = vst [vmem:[#allocation1 + $0x4] ss:$9 sm:$0xff] %v950_v54  ;;  %v1790_v54 = vld [vmem:[%s1822_s2] ss:$0 sm:$0xff] }
 0x119   : > { %1025 = vst [vmem:[#allocation1 + $0x20] sm:$0xff] %v1440_v5 }
 0x11b   : > { %v644_v58 = vpop.f32.mrf.mxu3 }
 0x11c   : > { %v653_v26 = vadd.f32 %v644_v58, %v568_v10 }
 0x11f   : > { %v984_v44 = vld [vmem:[#allocation1] sm:$0xff] }
 0x120   : > { %1015 = vst [vmem:[#allocation1] sm:$0xff] %v1437_v4  ;;  %v1027_v46 = vld [vmem:[#allocation1 + $0x21] ss:$4 sm:$0xff]  ;;  %v1030_v48 = vld [vmem:[#allocation1 + $0x22] ss:$4 sm:$0xff] }
 0x121   : > { %v1033_v57 = vld [vmem:[#allocation1 + $0x23] ss:$4 sm:$0xff]  ;;  %v1062_v5 = vunpack.i.h.s16 %v1027_v46  ;;  %v1064_v19 = vunpack.i.h.s16 %v1030_v48 }
 0x122   : > { %1042 = vst [vmem:[#allocation1 + $0x20] sm:$0xff] %v1503_v34 }
 0x123   : > { %v1361_v20 = vpack.i.b16 %v1030_v48, %v1062_v5  ;;  %v1362_v63 = vpack.i.b16 %v1033_v57, %v1064_v19  ;;  %v647_v60 = vpop.f32.mrf.mxu3 }
 0x124   : > { %1358 = vmatmul.msk.bf16.gmra.mxu3 %vm323_vm4, %v984_v44 }
 0x127   : > { %v1017_v62 = vld [vmem:[#allocation1 + $0x1] ss:$4 sm:$0xff]  ;;  %v1020_v0 = vld [vmem:[#allocation1 + $0x2] ss:$4 sm:$0xff]  ;;  %v1023_v8 = vld [vmem:[#allocation1 + $0x3] ss:$4 sm:$0xff] }
 0x128   : > { %1035 = vst [vmem:[#allocation1] sm:$0xff] %v1461_v15  ;;  %v1360_v11 = vpack.i.b16 %v1027_v46, %v1023_v8  ;;  %v711_v45 = vpop.f32.mrf.mxu0 }
 0x129   : > { %v1045_v4 = vld [vmem:[#allocation1 + $0x22] ss:$4 sm:$0xff]  ;;  %v1047_v9 = vld [vmem:[#allocation1 + $0x23] ss:$4 sm:$0xff]  ;;  %v1043_v22 = vld [vmem:[#allocation1 + $0x21] ss:$4 sm:$0xff]  ;;  %v721_v32 = vadd.f32 %v711_v45, %v652_v27 }
 0x12a   : > { %v1074_v49 = vunpack.i.h.s16 %v1045_v4 }
 0x12b   : > { %v1783_v47 = vpop.f32.mrf.mxu3 }
 0x12c   : > { %v1365_v28 = vpack.i.b16 %v1047_v9, %v1074_v49 }
 0x12f   : > { %v1036_v12 = vld [vmem:[#allocation1 + $0x1] ss:$4 sm:$0xff]  ;;  %v1038_v13 = vld [vmem:[#allocation1 + $0x2] ss:$4 sm:$0xff]  ;;  %v1040_v14 = vld [vmem:[#allocation1 + $0x3] ss:$4 sm:$0xff] }
 0x130   : > { %1049 = vst [vmem:[#allocation1] sm:$0xff] %v1512_v41  ;;  %v1363_v15 = vpack.i.b16 %v1043_v22, %v1040_v14  ;;  %v1072_v41 = vunpack.i.h.s16 %v1043_v22  ;;  %v713_v52 = vpop.f32.mrf.mxu0 }
 0x131   : > { %v722_v42 = vadd.f32 %v713_v52, %v653_v26 }
 0x132   : > { %v1364_v6 = vpack.i.b16 %v1045_v4, %v1072_v41 }
 0x137   : > { %v1050_v23 = vld [vmem:[#allocation1 + $0x1] ss:$4 sm:$0xff]  ;;  %v1052_v34 = vld [vmem:[#allocation1 + $0x2] ss:$4 sm:$0xff]  ;;  %v1054_v30 = vld [vmem:[#allocation1 + $0x3] ss:$4 sm:$0xff] }
 0x138   : > { %1097 = vst [vmem:[#allocation1] ss:$9 sm:$0xff] %v1017_v62  ;;  %v1080_v31 = vunpack.i.l.s16 %v1054_v30  ;;  %v716_v17 = vpop.f32.mrf.mxu0 }
 0x139   : > { %1100 = vst [vmem:[#allocation1 + $0x1] ss:$9 sm:$0xff] %v1020_v0 }
 0x13a   : > { %1103 = vst [vmem:[#allocation1 + $0x2] ss:$9 sm:$0xff] %v1360_v11 }
 0x13b   : > { %1106 = vst [vmem:[#allocation1 + $0x3] ss:$9 sm:$0xff] %v1361_v20 }
 0x13c   : > { %1109 = vst [vmem:[#allocation1 + $0x4] ss:$9 sm:$0xff] %v1362_v63 }
 0x13d   : > { %1112 = vst [vmem:[#allocation1 + $0x5] ss:$9 sm:$0xff] %v1036_v12 }
 0x13e   : > { %1115 = vst [vmem:[#allocation1 + $0x6] ss:$9 sm:$0xff] %v1038_v13 }
 0x13f   : > { %1118 = vst [vmem:[#allocation1 + $0x7] ss:$9 sm:$0xff] %v1363_v15 }
 0x140   : > { %v1785_v25 = vpop.f32.mrf.mxu0 }
 0x146   : > { %v1119_v29 = vld [vmem:[#allocation1] sm:$0xff] }
 0x147   : > { %1366 = vmatmul.msk.bf16.vlgmr.msra.gmra.mxu0 %vm323_vm4, %v1119_v29  ;;  %1121 = vst [vmem:[#allocation1] ss:$9 sm:$0xff] %v1364_v6 }
 0x148   : > { %1123 = vst [vmem:[#allocation1 + $0x1] ss:$9 sm:$0xff] %v1365_v28 }
 0x149   : > { %1125 = vst [vmem:[#allocation1 + $0x2] ss:$9 sm:$0xff] %v1050_v23  ;;  %v421_v23 = vadd.f32 %v420_v59, %v346_v36 }
 0x14a   : > { %1127 = vst [vmem:[#allocation1 + $0x3] ss:$9 sm:$0xff] %v1052_v34 }
 0x14b   : > { %1129 = vst [vmem:[#allocation1 + $0x4] ss:$9 sm:$0xff] %v1080_v31  ;;  %v569_v30 = vadd.f32 %v562_v55, %v421_v23  ;;  %v570_v55 = vadd.f32 %v1781_v1, %v423_v39 }
 0x14d   : > { %v654_v15 = vadd.f32 %v647_v60, %v569_v30  ;;  %v655_v2 = vadd.f32 %v1783_v47, %v570_v55 }
 0x14f   : > { %v723_v29 = vadd.f32 %v716_v17, %v654_v15  ;;  %v724_v18 = vadd.f32 %v1785_v25, %v655_v2 }
 0x152   : > { %v1130_v16 = vld [vmem:[#allocation1] sm:$0xff] }
 0x157   : > { %1367 = vmatmul.msk.bf16.gmra.mxu0 %vm323_vm4, %v1130_v16 }
 0x15b   : > { %v857_v33 = vpop.f32.mrf.mxu1 }
 0x15c   : > { %v867_v56 = vadd.f32 %v857_v33, %v721_v32 }
 0x163   : > { %v859_v44 = vpop.f32.mrf.mxu1 }
 0x164   : > { %v868_v48 = vadd.f32 %v859_v44, %v722_v42 }
 0x16b   : > { %v862_v31 = vpop.f32.mrf.mxu1 }
 0x16c   : > { %v869_v36 = vadd.f32 %v862_v31, %v723_v29 }
 0x173   : > { %v864_v17 = vpop.f32.mrf.mxu1 }
 0x174   : > { %v870_v32 = vadd.f32 %v864_v17, %v724_v18 }
 0x17c   : > { %v936_v21 = vpop.f32.mrf.mxu2 }
 0x17d   : > { %v946_v51 = vadd.f32 %v936_v21, %v867_v56 }
 0x184   : > { %v938_v0 = vpop.f32.mrf.mxu2 }
 0x185   : > { %v947_v12 = vadd.f32 %v938_v0, %v868_v48 }
 0x18c   : > { %v941_v16 = vpop.f32.mrf.mxu2 }
 0x18d   : > { %v948_v38 = vadd.f32 %v941_v16, %v869_v36 }
 0x194   : > { %v943_v10 = vpop.f32.mrf.mxu2 }
 0x195   : > { %v949_v21 = vadd.f32 %v943_v10, %v870_v32 }
 0x197   : > { %v1001_v24 = vpop.f32.mrf.mxu3 }
 0x198   : > { %v1011_v53 = vadd.f32 %v1001_v24, %v946_v51 }
 0x19f   : > { %v1003_v8 = vpop.f32.mrf.mxu3 }
 0x1a0   : > { %v1012_v14 = vadd.f32 %v1003_v8, %v947_v12 }
 0x1a7   : > { %v1006_v35 = vpop.f32.mrf.mxu3 }
 0x1a8   : > { %v1013_v43 = vadd.f32 %v1006_v35, %v948_v38 }
 0x1af   : > { %v1008_v56 = vpop.f32.mrf.mxu3 }
 0x1b0   : > { %v1014_v25 = vadd.f32 %v1008_v56, %v949_v21 }
 0x1c4   : > { %v1147_v46 = vpop.f32.mrf.mxu0 }
 0x1c5   : > { %v1157_v57 = vadd.f32 %v1147_v46, %v1011_v53 }
 0x1c7   : > { %v1165_v62 = vadd.f32 %v1790_v54, %v1157_v57 }
 0x1c9   : > { %v1169_v13 = vmax.f32 %v1165_v62, 0.0 }
 0x1cb   : > { %v1177_v5 = vrot.slane %v1169_v13, 1  ;;  %v1178_v19 = vrot.slane %v1169_v13, 2  ;;  %v1179_v4 = vrot.slane %v1169_v13, 3  ;;  %1198 = vst [vmem:[#allocation1] ss:$9 sm:$0xff] %v1169_v13  ;;  %v1180_v9 = vrot.slane %v1169_v13, 4 }
 0x1cc   : > { %v1149_v22 = vpop.f32.mrf.mxu0  ;;  %v1183_v63 = vrot.slane %v1169_v13, 7  ;;  %v1181_v41 = vrot.slane %v1169_v13, 5  ;;  %v1182_v6 = vrot.slane %v1169_v13, 6 }
 0x1cd   : > { %1200 = vst [vmem:[#allocation1 + $0x1] ss:$9 sm:$0xff] %v1177_v5  ;;  %v1158_v11 = vadd.f32 %v1149_v22, %v1012_v14 }
 0x1ce   : > { %1202 = vst [vmem:[#allocation1 + $0x2] ss:$9 sm:$0xff] %v1178_v19 }
 0x1cf   : > { %1204 = vst [vmem:[#allocation1 + $0x3] ss:$9 sm:$0xff] %v1179_v4  ;;  %v1166_v34 = vadd.f32 %v1790_v54, %v1158_v11 }
 0x1d0   : > { %1206 = vst [vmem:[#allocation1 + $0x4] ss:$9 sm:$0xff] %v1180_v9 }
 0x1d1   : > { %v1170_v20 = vmax.f32 %v1166_v34, 0.0 }
 0x1d3   : > { %v1184_v28 = vrot.slane %v1170_v20, 1  ;;  %v1185_v40 = vrot.slane %v1170_v20, 2  ;;  %v1186_v45 = vrot.slane %v1170_v20, 3  ;;  %v1187_v58 = vrot.slane %v1170_v20, 4 }
 0x1d4   : > { %v1152_v3 = vpop.f32.mrf.mxu0  ;;  %v1188_v59 = vrot.slane %v1170_v20, 5  ;;  %v1189_v60 = vrot.slane %v1170_v20, 6  ;;  %v1190_v7 = vrot.slane %v1170_v20, 7 }
 0x1d5   : > { %v1159_v52 = vadd.f32 %v1152_v3, %v1013_v43 }
 0x1d7   : > { %v1207_v49 = vld [vmem:[#allocation1] sm:$0xff]  ;;  %v1167_v37 = vadd.f32 %v1790_v54, %v1159_v52 }
 0x1d8   : > { %1210 = vst [vmem:[#allocation1 + $0x2] ss:$9 sm:$0xff] %v1183_v63 }
 0x1d9   : > { %1208 = vst [vmem:[#allocation1] ss:$9 sm:$0xff] %v1181_v41  ;;  %v1171_v61 = vmax.f32 %v1167_v37, 0.0 }
 0x1da   : > { %1209 = vst [vmem:[#allocation1 + $0x1] ss:$9 sm:$0xff] %v1182_v6 }
 0x1db   : > { %1211 = vst [vmem:[#allocation1 + $0x3] ss:$9 sm:$0xff] %v1170_v20  ;;  %v1191_v1 = vrot.slane %v1171_v61, 1  ;;  %v1192_v33 = vrot.slane %v1171_v61, 2  ;;  %v1193_v26 = vrot.slane %v1171_v61, 3  ;;  %v1196_v42 = vrot.slane %v1171_v61, 6 }
 0x1dc   : > { %1212 = vst [vmem:[#allocation1 + $0x4] ss:$9 sm:$0xff] %v1184_v28  ;;  %v1154_v47 = vpop.f32.mrf.mxu0  ;;  %v1197_v51 = vrot.slane %v1171_v61, 7  ;;  %v1194_v46 = vrot.slane %v1171_v61, 4  ;;  %v1195_v48 = vrot.slane %v1171_v61, 5 }
 0x1dd   : > { %1238 = vst.msk [vmem:[%s1798_s16] sm:$0x1f] %vm1237_vm5, %v1207_v49  ;;  %v1160_v24 = vadd.f32 %v1154_v47, %v1014_v25 }
 0x1df   : > { %v1168_v44 = vadd.f32 %v1790_v54, %v1160_v24 }
 0x1e1   : > { %v1172_v57 = vmax.f32 %v1168_v44, 0.0 }
 0x1e3   : > { %v1213_v50 = vld [vmem:[#allocation1] sm:$0xff] }
 0x1e4   : > { %1214 = vst [vmem:[#allocation1] ss:$9 sm:$0xff] %v1185_v40 }
 0x1e5   : > { %1215 = vst [vmem:[#allocation1 + $0x1] ss:$9 sm:$0xff] %v1186_v45 }
 0x1e6   : > { %1216 = vst [vmem:[#allocation1 + $0x2] ss:$9 sm:$0xff] %v1187_v58 }
 0x1e7   : > { %1217 = vst [vmem:[#allocation1 + $0x3] ss:$9 sm:$0xff] %v1188_v59 }
 0x1e8   : > { %1218 = vst [vmem:[#allocation1 + $0x4] ss:$9 sm:$0xff] %v1189_v60 }
 0x1e9   : > { %1239 = vst.msk [vmem:[%s1798_s16 + $0x8] sm:$0x1f] %vm1237_vm5, %v1213_v50 }
 0x1ef   : > { %v1219_v27 = vld [vmem:[#allocation1] sm:$0xff] }
 0x1f0   : > { %1240 = vst.msk [vmem:[%s1798_s16 + $0x10] sm:$0x1f] %vm1237_vm5, %v1219_v27 }
 0x1f1   : > { %1220 = vst [vmem:[#allocation1] ss:$9 sm:$0xff] %v1190_v7 }
 0x1f2   : > { %1221 = vst [vmem:[#allocation1 + $0x1] ss:$9 sm:$0xff] %v1171_v61 }
 0x1f3   : > { %1222 = vst [vmem:[#allocation1 + $0x2] ss:$9 sm:$0xff] %v1191_v1 }
 0x1f4   : > { %1223 = vst [vmem:[#allocation1 + $0x3] ss:$9 sm:$0xff] %v1192_v33 }
 0x1f5   : > { %1224 = vst [vmem:[#allocation1 + $0x4] ss:$9 sm:$0xff] %v1193_v26 }
 0x1fc   : > { %v1225_v53 = vld [vmem:[#allocation1] sm:$0xff] }
 0x1fd   : > { %1228 = vst [vmem:[#allocation1 + $0x2] ss:$9 sm:$0xff] %v1196_v42 }
 0x1fe   : > { %1229 = vst [vmem:[#allocation1 + $0x3] ss:$9 sm:$0xff] %v1197_v51 }
 0x1ff   : > { %1241 = vst.msk [vmem:[%s1798_s16 + $0x18] sm:$0x1f] %vm1237_vm5, %v1225_v53 }
 0x200   : > { %1226 = vst [vmem:[#allocation1] ss:$9 sm:$0xff] %v1194_v46 }
 0x201   : > { %1227 = vst [vmem:[#allocation1 + $0x1] ss:$9 sm:$0xff] %v1195_v48 }
 0x202   : > { %1230 = vst [vmem:[#allocation1 + $0x4] ss:$9 sm:$0xff] %v1172_v57 }
 0x209   : > { %v1231_v62 = vld [vmem:[#allocation1] sm:$0xff] }
 0x20a   : > { %1242 = vst.msk [vmem:[%s1798_s16 + $0x20] sm:$0x1f] %vm1237_vm5, %v1231_v62 }
 0x20b PF: > { %s13_s12 = sadd.s32 1, %s1388_s12  }
 0x20c   : > { %p10_p4 = scmp.ge.s32.totalorder %s13_s12, 4  }
 0x20e   :  { %12 = sbr.rel (!%p10_p4) target bundleno = 1 (0x1), region = 155 }

// kernel: attention_branch_forward.3
= control target key start
LH: loop header
LB: loop body
LE: loop exit
PB: predicated region body
PF: predicated region fallthrough
CT: control target
= control target key end

     0   :  { %s5042_s12 = smov 0   ;;  %s8955_s0 = inlined_call_operand.vmem [shape: f32[2,16,16,8], index: 0, kind: input, shape index: {}]   ;;  %s8956_s1 = inlined_call_operand.vmem [shape: bf16[9,8,8], index: 1, kind: input, shape index: {}]   ;;  %s8957_s2 = inlined_call_operand.vmem [shape: f32[1,8], index: 2, kind: input, shape index: {}]   ;;  %s8958_s3 = inlined_call_operand.vmem [shape: bf16[2,7,7,8], index: 3, kind: output, shape index: {}]  }
   0x1 LB: > { %s4832_s13 = sadd.s32 4294967295, %s5020_s12   ;;  %p4836_p0 = scmp.ge.s32.totalorder %s5020_s12, 1  ;;  %s5020_s12 = sphi %s5042_s12, %s13_s12  }
   0x2   : > { %p137_p1 = scmp.lt.s32.totalorder %s5020_s12, 3 }
   0x4   : > { %p138_p2 = pnand %p4836_p0, %p137_p1 }
   0x6   : > { %141 = sbr.rel (%p138_p2) target bundleno = 2139 (0x85b), region = 32 }
   0xb   : > { %v4868_v0 = vld [vmem:[%s8956_s1 + $0x4] sm:$0xf]  ;;  %vm1010_vm0 = vcmask 1043456   ;;  %p161_p3 = scmp.lt.s32.totalorder %s4832_s13, 1  ;;  %vm485_vm1 = vcmask 1040384   ;;  %vm486_vm2 = vcmask 1042434  }
   0xc   : > { %v1012_v1 = vsel %vm1010_vm0, %v4868_v0, 0  ;;  %vm487_vm3 = vmor %vm485_vm1, %vm486_vm2  ;;  %vm488_vm4 = vcmask 1044484   ;;  %vm490_vm6 = vcmask 1046534   ;;  %vm970_vm8 = vcmask 64512  }
   0xd   : > { %5000 = vmatpush.bf16.msra.mxu1 %v1012_v1  ;;  %s10560_s13 = smov (!%p161_p3, %s4832_s13), 1  ;;  %5001 = vmatpush.bf16.msra.mxu2 %v1012_v1  ;;  %vm489_vm5 = vmor %vm487_vm3, %vm488_vm4  ;;  %vm4056_vm9 = vcmask 58368   ;;  %vm4694_vm10 = vcmask 1041409   ;;  %vm4697_vm11 = vcmask 1043459   ;;  %vm4700_vm12 = vcmask 1045509  }
   0xe   : > { %5002 = vmatpush.bf16.msra.mxu3 %v1012_v1  ;;  %1021 = vmatpush.bf16.msra.mxu0 %v1012_v1  ;;  %s4999_s16 = sshll.u32 %s10560_s13, 8  ;;  %vm5505_vm7 = vmor %vm489_vm5, %vm490_vm6  ;;  %vm4753_vm13 = vcmask 60416   ;;  %vm4754_vm14 = vsmask.f32 3328  ;;  %s5003_s11 = smul.u32 28, %s10560_s13 }
   0xf   : > { %s5060_s19 = scalar_lea.vmem %s8955_s0, %s4999_s16  ;;  %vm8706_vm15 = vmand %vm4753_vm13, %vm4754_vm14 }
  0x10   : > { %v5063_v2 = vld [vmem:[%s5060_s19] sm:$0xff]  ;;  %v5067_v4 = vld [vmem:[%s5060_s19 + $0x8] sm:$0xff]  ;;  %v5081_v9 = vld [vmem:[%s5060_s19 + $0x10] sm:$0xff]  ;;  %s8694_s15 = scalar_lea.vmem %s8958_s3, %s5003_s11 }
  0x11   : > { %v8961_v3 = vrot.slane %v5063_v2, 2  ;;  %9378 = vst [vmem:[#allocation2_spill] sm:$0xff] %v5067_v4  ;;  %v8960_v5 = vrot.slane %v5063_v2, 4  ;;  %v8959_v6 = vrot.slane %v5063_v2, 6  ;;  %v8963_v7 = vrot.slane %v5067_v4, 2  ;;  %v5099_v13 = vld [vmem:[%s5060_s19 + $0x18] sm:$0xff] }
  0x12   : > { %302 = vst [vmem:[#allocation1] ss:$4 sm:$0xff] %v5063_v2  ;;  %v8962_v8 = vrot.slane %v5067_v4, 4  ;;  %v5089_v10 = vrot.slane %v5081_v9, 2  ;;  %v5093_v11 = vrot.slane %v5081_v9, 4  ;;  %v5096_v12 = vrot.slane %v5081_v9, 6 }
  0x13   : > { %304 = vst [vmem:[#allocation1 + $0x1] ss:$4 sm:$0xff] %v8961_v3  ;;  %v5104_v15 = vrot.slane %v5099_v13, 2  ;;  %v5108_v16 = vrot.slane %v5099_v13, 4  ;;  %v5112_v17 = vld [vmem:[%s5060_s19 + $0x20] sm:$0xff]  ;;  %v5125_v20 = vld [vmem:[%s5060_s19 + $0x28] sm:$0xff] }
  0x14   : > { %306 = vst [vmem:[#allocation1 + $0x2] ss:$4 sm:$0xff] %v8960_v5  ;;  %v5116_v18 = vrot.slane %v5112_v17, 2  ;;  %v5128_v21 = vrot.slane %v5112_v17, 4  ;;  %v5132_v22 = vrot.slane %v5112_v17, 6  ;;  %v5135_v23 = vrot.slane %v5125_v20, 2 }
  0x15   : > { %308 = vst [vmem:[#allocation1 + $0x3] ss:$4 sm:$0xff] %v8959_v6  ;;  %v5140_v25 = vrot.slane %v5125_v20, 4  ;;  %v5144_v26 = vld [vmem:[%s5060_s19 + $0x30] sm:$0xff]  ;;  %v5160_v30 = vld [vmem:[%s5060_s19 + $0x38] sm:$0xff]  ;;  %v5168_v32 = vld [vmem:[%s5060_s19 + $0x40] sm:$0xff] }
  0x16   : > { %9379 = vst [vmem:[#allocation3_spill] sm:$0xff] %v5081_v9  ;;  %v5148_v27 = vrot.slane %v5144_v26, 2  ;;  %v5152_v28 = vrot.slane %v5144_v26, 4  ;;  %v5164_v31 = vrot.slane %v5144_v26, 6  ;;  %v5171_v33 = vrot.slane %v5160_v30, 2  ;;  %v5195_v40 = vld [vmem:[%s5060_s19 + $0x48] sm:$0xff] }
  0x17   : > { %310 = vst [vmem:[#allocation1 + $0x20] ss:$4 sm:$0xff] %v5067_v4  ;;  %v5174_v34 = vrot.slane %v5160_v30, 4  ;;  %v5180_v36 = vrot.slane %v5168_v32, 2  ;;  %v5184_v37 = vrot.slane %v5168_v32, 4  ;;  %v5188_v38 = vrot.slane %v5168_v32, 6 }
  0x18   : > { %312 = vst [vmem:[#allocation1 + $0x21] ss:$4 sm:$0xff] %v8963_v7  ;;  %v5201_v41 = vrot.slane %v5195_v40, 2  ;;  %v5204_v42 = vrot.slane %v5195_v40, 4  ;;  %v5207_v43 = vld [vmem:[%s5060_s19 + $0x50] sm:$0xff]  ;;  %v5227_v49 = vld [vmem:[%s5060_s19 + $0x58] sm:$0xff] }
  0x19   : > { %314 = vst [vmem:[#allocation1 + $0x22] ss:$4 sm:$0xff] %v8962_v8  ;;  %v5212_v45 = vrot.slane %v5207_v43, 2  ;;  %v5216_v46 = vrot.slane %v5207_v43, 4  ;;  %v5220_v47 = vrot.slane %v5207_v43, 6  ;;  %v5233_v50 = vld [vmem:[%s5060_s19 + $0x60] sm:$0xff] }
  0x1a   : > { %9380 = vst [vmem:[#allocation4_spill] sm:$0xff] %v5089_v10  ;;  %v5236_v51 = vrot.slane %v5227_v49, 2  ;;  %v5240_v52 = vrot.slane %v5227_v49, 4  ;;  %v5243_v53 = vrot.slane %v5233_v50, 2  ;;  %v5248_v55 = vrot.slane %v5233_v50, 4  ;;  %v5256_v57 = vld [vmem:[%s5060_s19 + $0x68] sm:$0xff] }
  0x1b   : > { %316 = vst [vmem:[#allocation1 + $0x23] ss:$4 sm:$0xff] %v5081_v9  ;;  %v5252_v56 = vrot.slane %v5233_v50, 6  ;;  %v5260_v58 = vrot.slane %v5256_v57, 2  ;;  %v5268_v60 = vld [vmem:[%s5060_s19 + $0x70] sm:$0xff]  ;;  %v5272_v61 = vrot.slane %v5256_v57, 4 }
  0x1c   : > { %9381 = vst [vmem:[#allocation5_spill] sm:$0xff] %v5093_v11  ;;  %v5101_v14 = vld.sshfl [vmem:[#allocation1] sm:$0xff pattern:$0x73625140]  ;;  %v5276_v62 = vrot.slane %v5268_v60, 2  ;;  %v5279_v63 = vld [vmem:[%s5060_s19 + $0x78] sm:$0xff] }
  0x1d   : > { %9382 = vst [vmem:[#allocation6_spill] sm:$0xff] %v5096_v12  ;;  %v5282_v0 = vrot.slane %v5268_v60, 4  ;;  %v5287_v6 = vrot.slane %v5268_v60, 6  ;;  %v5292_v5 = vrot.slane %v5279_v63, 2  ;;  %v5296_v3 = vrot.slane %v5279_v63, 4  ;;  %v5303_v7 = vld [vmem:[%s5060_s19 + $0x80] sm:$0xff] }
  0x1e   : > { %9383 = vst [vmem:[#allocation7_spill] sm:$0xff] %v5099_v13 }
  0x1f   : > { %9384 = vst [vmem:[#allocation8_spill] sm:$0xff] %v5101_v14 }
  0x20   : > { %9385 = vst [vmem:[#allocation9_spill] sm:$0xff] %v5104_v15 }
  0x21   : > { %319 = vst [vmem:[#allocation1] ss:$4 sm:$0xff] %v5089_v10 }
  0x22   : > { %9386 = vst [vmem:[#allocation10_spill] sm:$0xff] %v5108_v16  ;;  %v5118_v19 = vld.sshfl [vmem:[#allocation1 + $0x20] sm:$0xff pattern:$0x73625140] }
  0x23   : > { %320 = vst [vmem:[#allocation1 + $0x1] ss:$4 sm:$0xff] %v5093_v11 }
  0x24   : > { %9387 = vst [vmem:[#allocation11_spill] sm:$0xff] %v5112_v17 }
  0x25   : > { %321 = vst [vmem:[#allocation1 + $0x2] ss:$4 sm:$0xff] %v5096_v12 }
  0x26   : > { %9388 = vst [vmem:[#allocation12_spill] sm:$0xff] %v5116_v18 }
  0x27   : > { %9389 = vst [vmem:[#allocation13_spill] sm:$0xff] %v5118_v19  ;;  %v5351_v19 = vld [vmem:[%s5060_s19 + $0x98] sm:$0xff] }
  0x28   : > { %322 = vst [vmem:[#allocation1 + $0x3] ss:$4 sm:$0xff] %v5099_v13 }
  0x29   : > { %323 = vst [vmem:[#allocation1 + $0x20] ss:$4 sm:$0xff] %v5104_v15 }
  0x2a   : > { %324 = vst [vmem:[#allocation1 + $0x21] ss:$4 sm:$0xff] %v5108_v16 }
  0x2b   : > { %325 = vst [vmem:[#allocation1 + $0x22] ss:$4 sm:$0xff] %v5112_v17 }
  0x2c   : > { %9390 = vst [vmem:[#allocation14_spill] sm:$0xff] %v5125_v20 }
  0x2d   : > { %9391 = vst [vmem:[#allocation15_spill] sm:$0xff] %v5128_v21 }
  0x2e   : > { %326 = vst [vmem:[#allocation1 + $0x23] ss:$4 sm:$0xff] %v5116_v18 }
  0x2f   : > { %9392 = vst [vmem:[#allocation16_spill] sm:$0xff] %v5132_v22  ;;  %v5137_v24 = vld.sshfl [vmem:[#allocation1] sm:$0xff pattern:$0x73625140] }
  0x30   : > { %9393 = vst [vmem:[#allocation17_spill] sm:$0xff] %v5135_v23 }
  0x31   : > { %9394 = vst [vmem:[#allocation18_spill] sm:$0xff] %v5137_v24 }
  0x32   : > { %9395 = vst [vmem:[#allocation19_spill] sm:$0xff] %v5140_v25 }
  0x33   : > { %329 = vst [vmem:[#allocation1] ss:$4 sm:$0xff] %v5128_v21 }
  0x34   : > { %9396 = vst [vmem:[#allocation20_spill] sm:$0xff] %v5144_v26 }
  0x35   : > { %330 = vst [vmem:[#allocation1 + $0x1] ss:$4 sm:$0xff] %v5132_v22  ;;  %v5154_v29 = vld.sshfl [vmem:[#allocation1 + $0x20] sm:$0xff pattern:$0x73625140] }
  0x36   : > { %9397 = vst [vmem:[#allocation21_spill] sm:$0xff] %v5148_v27 }
  0x37   : > { %331 = vst [vmem:[#allocation1 + $0x2] ss:$4 sm:$0xff] %v5125_v20 }
  0x38   : > { %9398 = vst [vmem:[#allocation22_spill] sm:$0xff] %v5152_v28 }
  0x39   : > { %9399 = vst [vmem:[#allocation23_spill] sm:$0xff] %v5154_v29  ;;  %v5335_v29 = vld [vmem:[%s5060_s19 + $0x90] sm:$0xff] }
  0x3a   : > { %332 = vst [vmem:[#allocation1 + $0x3] ss:$4 sm:$0xff] %v5135_v23  ;;  %v5345_v24 = vrot.slane %v5335_v29, 4 }
  0x3b   : > { %333 = vst [vmem:[#allocation1 + $0x20] ss:$4 sm:$0xff] %v5140_v25 }
  0x3c   : > { %334 = vst [vmem:[#allocation1 + $0x21] ss:$4 sm:$0xff] %v5144_v26 }
  0x3d   : > { %9400 = vst [vmem:[#allocation24_spill] sm:$0xff] %v5160_v30 }
  0x3e   : > { %335 = vst [vmem:[#allocation1 + $0x22] ss:$4 sm:$0xff] %v5148_v27 }
  0x3f   : > { %9401 = vst [vmem:[#allocation25_spill] sm:$0xff] %v5164_v31 }
  0x40   : > { %336 = vst [vmem:[#allocation1 + $0x23] ss:$4 sm:$0xff] %v5152_v28 }
  0x41   : > { %9402 = vst [vmem:[#allocation26_spill] sm:$0xff] %v5168_v32  ;;  %v5176_v35 = vld.sshfl [vmem:[#allocation1] sm:$0xff pattern:$0x73625140] }
  0x42   : > { %9403 = vst [vmem:[#allocation27_spill] sm:$0xff] %v5171_v33 }
  0x43   : > { %9404 = vst [vmem:[#allocation28_spill] sm:$0xff] %v5174_v34 }
  0x44   : > { %9405 = vst [vmem:[#allocation29_spill] sm:$0xff] %v5176_v35 }
  0x45   : > { %339 = vst [vmem:[#allocation1] ss:$4 sm:$0xff] %v5164_v31 }
  0x46   : > { %9406 = vst [vmem:[#allocation30_spill] sm:$0xff] %v5180_v36 }
  0x47   : > { %340 = vst [vmem:[#allocation1 + $0x1] ss:$4 sm:$0xff] %v5160_v30  ;;  %v5190_v39 = vld.sshfl [vmem:[#allocation1 + $0x20] sm:$0xff pattern:$0x73625140] }
  0x48   : > { %9407 = vst [vmem:[#allocation31_spill] sm:$0xff] %v5184_v37 }
  0x49   : > { %341 = vst [vmem:[#allocation1 + $0x2] ss:$4 sm:$0xff] %v5171_v33 }
  0x4a   : > { %9408 = vst [vmem:[#allocation32_spill] sm:$0xff] %v5188_v38 }
  0x4b   : > { %9409 = vst [vmem:[#allocation33_spill] sm:$0xff] %v5190_v39 }
  0x4c   : > { %342 = vst [vmem:[#allocation1 + $0x3] ss:$4 sm:$0xff] %v5174_v34 }
  0x4d   : > { %343 = vst [vmem:[#allocation1 + $0x20] ss:$4 sm:$0xff] %v5168_v32 }
  0x4e   : > { %9410 = vst [vmem:[#allocation34_spill] sm:$0xff] %v5195_v40 }
  0x4f   : > { %344 = vst [vmem:[#allocation1 + $0x21] ss:$4 sm:$0xff] %v5180_v36 }
  0x50   : > { %345 = vst [vmem:[#allocation1 + $0x22] ss:$4 sm:$0xff] %v5184_v37 }
  0x51   : > { %346 = vst [vmem:[#allocation1 + $0x23] ss:$4 sm:$0xff] %v5188_v38 }
  0x52   : > { %9411 = vst [vmem:[#allocation35_spill] sm:$0xff] %v5201_v41 }
  0x53   : > { %9412 = vst [vmem:[#allocation36_spill] sm:$0xff] %v5204_v42  ;;  %v5209_v44 = vld.sshfl [vmem:[#allocation1] sm:$0xff pattern:$0x73625140] }
  0x54   : > { %9413 = vst [vmem:[#allocation37_spill] sm:$0xff] %v5207_v43 }
  0x55   : > { %9414 = vst [vmem:[#allocation38_spill] sm:$0xff] %v5209_v44 }
  0x56   : > { %9415 = vst [vmem:[#allocation39_spill] sm:$0xff] %v5212_v45 }
  0x57   : > { %349 = vst [vmem:[#allocation1] ss:$4 sm:$0xff] %v5195_v40 }
  0x58   : > { %9416 = vst [vmem:[#allocation40_spill] sm:$0xff] %v5216_v46  ;;  %v5223_v48 = vld.sshfl [vmem:[#allocation1 + $0x20] sm:$0xff pattern:$0x73625140] }
  0x59   : > { %350 = vst [vmem:[#allocation1 + $0x1] ss:$4 sm:$0xff] %v5201_v41 }
  0x5a   : > { %9417 = vst [vmem:[#allocation41_spill] sm:$0xff] %v5220_v47 }
  0x5b   : > { %351 = vst [vmem:[#allocation1 + $0x2] ss:$4 sm:$0xff] %v5204_v42 }
  0x5c   : > { %9418 = vst [vmem:[#allocation42_spill] sm:$0xff] %v5223_v48 }
  0x5d   : > { %352 = vst [vmem:[#allocation1 + $0x3] ss:$4 sm:$0xff] %v5207_v43 }
  0x5e   : > { %9419 = vst [vmem:[#allocation43_spill] sm:$0xff] %v5227_v49 }
  0x5f   : > { %353 = vst [vmem:[#allocation1 + $0x20] ss:$4 sm:$0xff] %v5212_v45 }
  0x60   : > { %354 = vst [vmem:[#allocation1 + $0x21] ss:$4 sm:$0xff] %v5216_v46 }
  0x61   : > { %355 = vst [vmem:[#allocation1 + $0x22] ss:$4 sm:$0xff] %v5220_v47 }
  0x62   : > { %9420 = vst [vmem:[#allocation44_spill] sm:$0xff] %v5233_v50 }
  0x63   : > { %9421 = vst [vmem:[#allocation45_spill] sm:$0xff] %v5236_v51 }
  0x64   : > { %356 = vst [vmem:[#allocation1 + $0x23] ss:$4 sm:$0xff] %v5227_v49  ;;  %v5245_v54 = vld.sshfl [vmem:[#allocation1] sm:$0xff pattern:$0x73625140] }
  0x65   : > { %9422 = vst [vmem:[#allocation46_spill] sm:$0xff] %v5240_v52 }
  0x66   : > { %9423 = vst [vmem:[#allocation47_spill] sm:$0xff] %v5243_v53 }
  0x67   : > { %9424 = vst [vmem:[#allocation48_spill] sm:$0xff] %v5245_v54  ;;  %v5318_v54 = vrot.slane %v5303_v7, 6 }
  0x68   : > { %9425 = vst [vmem:[#allocation49_spill] sm:$0xff] %v5248_v55 }
  0x69   : > { %359 = vst [vmem:[#allocation1] ss:$4 sm:$0xff] %v5236_v51 }
  0x6a   : > { %9426 = vst [vmem:[#allocation50_spill] sm:$0xff] %v5252_v56 }
  0x6b   : > { %360 = vst [vmem:[#allocation1 + $0x1] ss:$4 sm:$0xff] %v5240_v52  ;;  %v5262_v59 = vld.sshfl [vmem:[#allocation1 + $0x20] sm:$0xff pattern:$0x73625140] }
  0x6c   : > { %9427 = vst [vmem:[#allocation51_spill] sm:$0xff] %v5256_v57 }
  0x6d   : > { %361 = vst [vmem:[#allocation1 + $0x2] ss:$4 sm:$0xff] %v5233_v50 }
  0x6e   : > { %9428 = vst [vmem:[#allocation52_spill] sm:$0xff] %v5260_v58 }
  0x6f   : > { %9429 = vst [vmem:[#allocation53_spill] sm:$0xff] %v5262_v59  ;;  %v5312_v59 = vld [vmem:[%s5060_s19 + $0x88] sm:$0xff] }
  0x70   : > { %362 = vst [vmem:[#allocation1 + $0x3] ss:$4 sm:$0xff] %v5243_v53  ;;  %v5324_v44 = vrot.slane %v5312_v59, 2  ;;  %v5328_v39 = vrot.slane %v5312_v59, 4 }
  0x71   : > { %363 = vst [vmem:[#allocation1 + $0x20] ss:$4 sm:$0xff] %v5248_v55 }
  0x72   : > { %364 = vst [vmem:[#allocation1 + $0x21] ss:$4 sm:$0xff] %v5252_v56 }
  0x73   : > { %9430 = vst [vmem:[#allocation54_spill] sm:$0xff] %v5268_v60 }
  0x74   : > { %365 = vst [vmem:[#allocation1 + $0x22] ss:$4 sm:$0xff] %v5256_v57 }
  0x75   : > { %9431 = vst [vmem:[#allocation55_spill] sm:$0xff] %v5272_v61 }
  0x76   : > { %366 = vst [vmem:[#allocation1 + $0x23] ss:$4 sm:$0xff] %v5260_v58 }
  0x77   : > { %9432 = vst [vmem:[#allocation56_spill] sm:$0xff] %v5276_v62  ;;  %v5284_v1 = vld.sshfl [vmem:[#allocation1] sm:$0xff pattern:$0x73625140] }
  0x78   : > { %9433 = vst [vmem:[#allocation57_spill] sm:$0xff] %v5279_v63 }
  0x79   : > { %9434 = vst [vmem:[#allocation58_spill] sm:$0xff] %v5282_v0 }
  0x7a   : > { %9435 = vst [vmem:[#allocation59_spill] sm:$0xff] %v5284_v1  ;;  %v5309_v1 = vrot.slane %v5303_v7, 2 }
  0x7b   : > { %9436 = vst [vmem:[#allocation60_spill] sm:$0xff] %v5287_v6 }
  0x7c   : > { %369 = vst [vmem:[#allocation1] ss:$4 sm:$0xff] %v5272_v61 }
  0x7d   : > { %370 = vst [vmem:[#allocation1 + $0x1] ss:$4 sm:$0xff] %v5268_v60  ;;  %v5298_v8 = vld.sshfl [vmem:[#allocation1 + $0x20] sm:$0xff pattern:$0x73625140]  ;;  %v9496_v60 = vmov 0 }
  0x7e   : > { %9437 = vst [vmem:[#allocation61_spill] sm:$0xff] %v5292_v5  ;;  %v9497_v60 = vsel %vm5505_vm7, 4294967295, %v9496_v60 }
  0x7f   : > { %371 = vst [vmem:[#allocation1 + $0x2] ss:$4 sm:$0xff] %v5276_v62  ;;  %v4842_v62 = vrot.slane %v5081_v9, 9 }
  0x80   : > { %9438 = vst [vmem:[#allocation62_spill] sm:$0xff] %v5296_v3 }
  0x81   : > { %9439 = vst [vmem:[#allocation63_spill] sm:$0xff] %v5298_v8  ;;  %v5315_v8 = vrot.slane %v5303_v7, 4 }
  0x82   : > { %372 = vst [vmem:[#allocation1 + $0x3] ss:$4 sm:$0xff] %v5282_v0 }
  0x83   : > { %373 = vst [vmem:[#allocation1 + $0x20] ss:$4 sm:$0xff] %v5287_v6 }
  0x84   : > { %9440 = vst [vmem:[#allocation64_spill] sm:$0xff] %v5303_v7 }
  0x85   : > { %374 = vst [vmem:[#allocation1 + $0x21] ss:$4 sm:$0xff] %v5279_v63 }
  0x86   : > { %375 = vst [vmem:[#allocation1 + $0x22] ss:$4 sm:$0xff] %v5292_v5  ;;  %v516_v5 = vrot.slane %v5089_v10, 7 }
  0x87   : > { %376 = vst [vmem:[#allocation1 + $0x23] ss:$4 sm:$0xff] %v5296_v3 }
  0x88   : > { %9441 = vst [vmem:[#allocation65_spill] sm:$0xff] %v5309_v1 }
  0x89   : > { %9442 = vst [vmem:[#allocation66_spill] sm:$0xff] %v5312_v59  ;;  %v5320_v48 = vld.sshfl [vmem:[#allocation1] sm:$0xff pattern:$0x73625140] }
  0x8a   : > { %9443 = vst [vmem:[#allocation67_spill] sm:$0xff] %v5315_v8 }
  0x8b   : > { %9444 = vst [vmem:[#allocation68_spill] sm:$0xff] %v5318_v54 }
  0x8c   : > { %9445 = vst [vmem:[#allocation69_spill] sm:$0xff] %v5320_v48  ;;  %v5341_v48 = vrot.slane %v5335_v29, 2 }
  0x8d   : > { %379 = vst [vmem:[#allocation1] ss:$4 sm:$0xff] %v5303_v7  ;;  %v5356_v7 = vrot.slane %v5351_v19, 2 }
  0x8e   : > { %9446 = vst [vmem:[#allocation70_spill] sm:$0xff] %v5324_v44  ;;  %v5331_v35 = vld.sshfl [vmem:[#allocation1 + $0x20] sm:$0xff pattern:$0x73625140] }
  0x8f   : > { %380 = vst [vmem:[#allocation1 + $0x1] ss:$4 sm:$0xff] %v5309_v1 }
  0x90   : > { %9447 = vst [vmem:[#allocation71_spill] sm:$0xff] %v5328_v39 }
  0x91   : > { %381 = vst [vmem:[#allocation1 + $0x2] ss:$4 sm:$0xff] %v5315_v8  ;;  %v5364_v8 = vld [vmem:[%s5060_s19 + $0xa0] sm:$0xff] }
  0x92   : > { %9448 = vst [vmem:[#allocation72_spill] sm:$0xff] %v5331_v35  ;;  %v5348_v35 = vrot.slane %v5335_v29, 6 }
  0x93   : > { %382 = vst [vmem:[#allocation1 + $0x3] ss:$4 sm:$0xff] %v5318_v54  ;;  %v5360_v54 = vrot.slane %v5351_v19, 4 }
  0x94   : > { %9449 = vst [vmem:[#allocation73_spill] sm:$0xff] %v5335_v29 }
  0x95   : > { %383 = vst [vmem:[#allocation1 + $0x20] ss:$4 sm:$0xff] %v5312_v59 }
  0x96   : > { %384 = vst [vmem:[#allocation1 + $0x21] ss:$4 sm:$0xff] %v5324_v44 }
  0x97   : > { %385 = vst [vmem:[#allocation1 + $0x22] ss:$4 sm:$0xff] %v5328_v39 }
  0x98   : > { %9450 = vst [vmem:[#allocation74_spill] sm:$0xff] %v5341_v48 }
  0x99   : > { %386 = vst [vmem:[#allocation1 + $0x23] ss:$4 sm:$0xff] %v5335_v29  ;;  %v5368_v29 = vrot.slane %v5364_v8, 2 }
  0x9a   : > { %9451 = vst [vmem:[#allocation75_spill] sm:$0xff] %v5345_v24  ;;  %v5353_v14 = vld.sshfl [vmem:[#allocation1] sm:$0xff pattern:$0x73625140] }
  0x9b   : > { %9452 = vst [vmem:[#allocation76_spill] sm:$0xff] %v5348_v35 }
  0x9c   : > { %9453 = vst [vmem:[#allocation77_spill] sm:$0xff] %v5351_v19 }
  0x9d   : > { %9454 = vst [vmem:[#allocation78_spill] sm:$0xff] %v5353_v14  ;;  %v5377_v14 = vld [vmem:[%s5060_s19 + $0xa8] sm:$0xff] }
  0x9e   : > { %9455 = vst [vmem:[#allocation79_spill] sm:$0xff] %v5356_v7 }
  0x9f   : > { %389 = vst [vmem:[#allocation1] ss:$4 sm:$0xff] %v5341_v48 }
  0xa0   : > { %9456 = vst [vmem:[#allocation80_spill] sm:$0xff] %v5360_v54  ;;  %v5370_v1 = vld.sshfl [vmem:[#allocation1 + $0x20] sm:$0xff pattern:$0x73625140] }
  0xa1   : > { %390 = vst [vmem:[#allocation1 + $0x1] ss:$4 sm:$0xff] %v5345_v24  ;;  %v5380_v24 = vrot.slane %v5364_v8, 4 }
  0xa2   : > { %9457 = vst [vmem:[#allocation81_spill] sm:$0xff] %v5364_v8 }
  0xa3   : > { %391 = vst [vmem:[#allocation1 + $0x2] ss:$4 sm:$0xff] %v5348_v35  ;;  %v5384_v35 = vrot.slane %v5364_v8, 6 }
  0xa4   : > { %9458 = vst [vmem:[#allocation82_spill] sm:$0xff] %v5368_v29 }
  0xa5   : > { %9459 = vst [vmem:[#allocation83_spill] sm:$0xff] %v5370_v1  ;;  %v5387_v1 = vrot.slane %v5377_v14, 2 }
  0xa6   : > { %392 = vst [vmem:[#allocation1 + $0x3] ss:$4 sm:$0xff] %v5351_v19 }
  0xa7   : > { %393 = vst [vmem:[#allocation1 + $0x20] ss:$4 sm:$0xff] %v5356_v7  ;;  %v5396_v7 = vld [vmem:[%s5060_s19 + $0xb0] sm:$0xff] }
  0xa8   : > { %394 = vst [vmem:[#allocation1 + $0x21] ss:$4 sm:$0xff] %v5360_v54  ;;  %v5392_v54 = vrot.slane %v5377_v14, 4 }
  0xa9   : > { %395 = vst [vmem:[#allocation1 + $0x22] ss:$4 sm:$0xff] %v5364_v8  ;;  %v5404_v8 = vrot.slane %v5396_v7, 4 }
  0xaa   : > { %9460 = vst [vmem:[#allocation84_spill] sm:$0xff] %v5377_v14 }
  0xab   : > { %9461 = vst [vmem:[#allocation85_spill] sm:$0xff] %v5380_v24 }
  0xac   : > { %396 = vst [vmem:[#allocation1 + $0x23] ss:$4 sm:$0xff] %v5368_v29  ;;  %v5400_v29 = vrot.slane %v5396_v7, 2 }
  0xad   : > { %9462 = vst [vmem:[#allocation86_spill] sm:$0xff] %v5384_v35  ;;  %v5389_v19 = vld.sshfl [vmem:[#allocation1] sm:$0xff pattern:$0x73625140] }
  0xae   : > { %9463 = vst [vmem:[#allocation87_spill] sm:$0xff] %v5387_v1 }
  0xaf   : > { %9464 = vst [vmem:[#allocation88_spill] sm:$0xff] %v5389_v19  ;;  %v5412_v19 = vld [vmem:[%s5060_s19 + $0xb8] sm:$0xff] }
  0xb0   : > { %9465 = vst [vmem:[#allocation89_spill] sm:$0xff] %v5392_v54 }
  0xb1   : > { %399 = vst [vmem:[#allocation1] ss:$4 sm:$0xff] %v5380_v24 }
  0xb2   : > { %9466 = vst [vmem:[#allocation90_spill] sm:$0xff] %v5396_v7 }
  0xb3   : > { %400 = vst [vmem:[#allocation1 + $0x1] ss:$4 sm:$0xff] %v5384_v35  ;;  %v5406_v48 = vld.sshfl [vmem:[#allocation1 + $0x20] sm:$0xff pattern:$0x73625140]  ;;  %v5416_v35 = vrot.slane %v5396_v7, 6 }
  0xb4   : > { %9467 = vst [vmem:[#allocation91_spill] sm:$0xff] %v5400_v29 }
  0xb5   : > { %401 = vst [vmem:[#allocation1 + $0x2] ss:$4 sm:$0xff] %v5377_v14  ;;  %v5420_v14 = vld [vmem:[%s5060_s19 + $0xc0] sm:$0xff] }
  0xb6   : > { %9468 = vst [vmem:[#allocation92_spill] sm:$0xff] %v5404_v8 }
  0xb7   : > { %9469 = vst [vmem:[#allocation93_spill] sm:$0xff] %v5406_v48  ;;  %v5423_v48 = vrot.slane %v5412_v19, 2 }
  0xb8   : > { %402 = vst [vmem:[#allocation1 + $0x3] ss:$4 sm:$0xff] %v5387_v1  ;;  %v5426_v1 = vrot.slane %v5412_v19, 4 }
  0xb9   : > { %403 = vst [vmem:[#allocation1 + $0x20] ss:$4 sm:$0xff] %v5392_v54 }
  0xba   : > { %404 = vst [vmem:[#allocation1 + $0x21] ss:$4 sm:$0xff] %v5396_v7  ;;  %v5436_v7 = vrot.slane %v5420_v14, 4 }
  0xbb   : > { %9470 = vst [vmem:[#allocation94_spill] sm:$0xff] %v5412_v19 }
  0xbc   : > { %405 = vst [vmem:[#allocation1 + $0x22] ss:$4 sm:$0xff] %v5400_v29  ;;  %v5432_v29 = vrot.slane %v5420_v14, 2 }
  0xbd   : > { %9471 = vst [vmem:[#allocation95_spill] sm:$0xff] %v5416_v35 }
  0xbe   : > { %406 = vst [vmem:[#allocation1 + $0x23] ss:$4 sm:$0xff] %v5404_v8  ;;  %v5440_v8 = vrot.slane %v5420_v14, 6 }
  0xbf   : > { %9472 = vst [vmem:[#allocation96_spill] sm:$0xff] %v5420_v14  ;;  %v5428_v54 = vld.sshfl [vmem:[#allocation1] sm:$0xff pattern:$0x73625140] }
  0xc0   : > { %9473 = vst [vmem:[#allocation97_spill] sm:$0xff] %v5423_v48 }
  0xc1   : > { %9474 = vst [vmem:[#allocation98_spill] sm:$0xff] %v5426_v1 }
  0xc2   : > { %9475 = vst [vmem:[#allocation99_spill] sm:$0xff] %v5428_v54  ;;  %v5447_v54 = vld [vmem:[%s5060_s19 + $0xc8] sm:$0xff] }
  0xc3   : > { %409 = vst [vmem:[#allocation1] ss:$4 sm:$0xff] %v5416_v35 }
  0xc4   : > { %9476 = vst [vmem:[#allocation100_spill] sm:$0xff] %v5432_v29 }
  0xc5   : > { %410 = vst [vmem:[#allocation1 + $0x1] ss:$4 sm:$0xff] %v5412_v19  ;;  %v5442_v24 = vld.sshfl [vmem:[#allocation1 + $0x20] sm:$0xff pattern:$0x73625140]  ;;  %v5456_v19 = vrot.slane %v5447_v54, 4 }
  0xc6   : > { %9477 = vst [vmem:[#allocation101_spill] sm:$0xff] %v5436_v7 }
  0xc7   : > { %411 = vst [vmem:[#allocation1 + $0x2] ss:$4 sm:$0xff] %v5423_v48  ;;  %v5453_v48 = vrot.slane %v5447_v54, 2 }
  0xc8   : > { %9478 = vst [vmem:[#allocation102_spill] sm:$0xff] %v5440_v8 }
  0xc9   : > { %9479 = vst [vmem:[#allocation103_spill] sm:$0xff] %v5442_v24  ;;  %v5459_v24 = vld [vmem:[%s5060_s19 + $0xd0] sm:$0xff] }
  0xca   : > { %412 = vst [vmem:[#allocation1 + $0x3] ss:$4 sm:$0xff] %v5426_v1 }
  0xcb   : > { %413 = vst [vmem:[#allocation1 + $0x20] ss:$4 sm:$0xff] %v5420_v14  ;;  %v5464_v14 = vrot.slane %v5459_v24, 2 }
  0xcc   : > { %9480 = vst [vmem:[#allocation104_spill] sm:$0xff] %v5447_v54 }
  0xcd   : > { %414 = vst [vmem:[#allocation1 + $0x21] ss:$4 sm:$0xff] %v5432_v29 }
  0xce   : > { %415 = vst [vmem:[#allocation1 + $0x22] ss:$4 sm:$0xff] %v5436_v7  ;;  %v5468_v7 = vrot.slane %v5459_v24, 4 }
  0xcf   : > { %416 = vst [vmem:[#allocation1 + $0x23] ss:$4 sm:$0xff] %v5440_v8  ;;  %v5472_v8 = vrot.slane %v5459_v24, 6 }
  0xd0   : > { %9481 = vst [vmem:[#allocation105_spill] sm:$0xff] %v5453_v48 }
  0xd1   : > { %9482 = vst [vmem:[#allocation106_spill] sm:$0xff] %v5456_v19  ;;  %v5461_v1 = vld.sshfl [vmem:[#allocation1] sm:$0xff pattern:$0x73625140] }
  0xd2   : > { %9483 = vst [vmem:[#allocation107_spill] sm:$0xff] %v5459_v24 }
  0xd3   : > { %9484 = vst [vmem:[#allocation108_spill] sm:$0xff] %v5461_v1  ;;  %v5479_v1 = vld [vmem:[%s5060_s19 + $0xd8] sm:$0xff] }
  0xd4   : > { %9485 = vst [vmem:[#allocation109_spill] sm:$0xff] %v5464_v14 }
  0xd5   : > { %419 = vst [vmem:[#allocation1] ss:$4 sm:$0xff] %v5447_v54 }
  0xd6   : > { %9486 = vst [vmem:[#allocation110_spill] sm:$0xff] %v5468_v7  ;;  %v5475_v29 = vld.sshfl [vmem:[#allocation1 + $0x20] sm:$0xff pattern:$0x73625140] }
  0xd7   : > { %420 = vst [vmem:[#allocation1 + $0x1] ss:$4 sm:$0xff] %v5453_v48  ;;  %v9490_v48 = vrot.slane %v5067_v4, 2 }
  0xd8   : > { %9487 = vst [vmem:[#allocation111_spill] sm:$0xff] %v5472_v8 }
  0xd9   : > { %421 = vst [vmem:[#allocation1 + $0x2] ss:$4 sm:$0xff] %v5456_v19  ;;  %v506_v54 = vrot.slane %v9490_v48, 7  ;;  %v503_v19 = vrot.slane %v5067_v4, 7 }
  0xda   : > { %9488 = vst [vmem:[#allocation112_spill] sm:$0xff] %v5475_v29  ;;  %v9491_v29 = vrot.slane %v5067_v4, 4 }
  0xdb   : > { %422 = vst [vmem:[#allocation1 + $0x3] ss:$4 sm:$0xff] %v5459_v24  ;;  %v5491_v24 = vrot.slane %v5479_v1, 2  ;;  %v508_v48 = vrot.slane %v506_v54, 2 }
  0xdc   : > { %9489 = vst [vmem:[#allocation113_spill] sm:$0xff] %v5479_v1  ;;  %v509_v35 = vrot.slane %v9491_v29, 7  ;;  %v4841_v29 = vrot.slane %v5067_v4, 13 }
  0xdd   : > { %423 = vst [vmem:[#allocation1 + $0x20] ss:$4 sm:$0xff] %v5464_v14  ;;  %v505_v14 = vrot.slane %v503_v19, 2 }
  0xde   : > { %424 = vst [vmem:[#allocation1 + $0x21] ss:$4 sm:$0xff] %v5468_v7  ;;  %v5495_v7 = vrot.slane %v5479_v1, 4  ;;  %v511_v44 = vrot.slane %v509_v35, 2  ;;  %v510_v3 = vsel %vm5505_vm7, %v508_v48, %v509_v35  ;;  %v528_v48 = vrot.slane %v5104_v15, 7 }
  0xdf   : > { %425 = vst [vmem:[#allocation1 + $0x22] ss:$4 sm:$0xff] %v5472_v8  ;;  %v9495_v8 = vrot.slane %v5063_v2, 2  ;;  %v507_v4 = vsel %vm5505_vm7, %v505_v14, %v506_v54  ;;  %v531_v54 = vrot.slane %v5108_v16, 7 }
  0xe0   : > { %9492 = vst [vmem:[#allocation114_spill] sm:$0xff] %v5491_v24  ;;  %v513_v9 = vsel %vm5505_vm7, %v511_v44, %v4841_v29  ;;  %v538_v44 = vrot.slane %v5116_v18, 7  ;;  %v530_v29 = vrot.slane %v528_v48, 2 }
  0xe1   : > { %426 = vst [vmem:[#allocation1 + $0x23] ss:$4 sm:$0xff] %v5479_v1  ;;  %v494_v59 = vrot.slane %v9495_v8, 7  ;;  %v9499_v1 = vrot.slane %v5063_v2, 4 }
  0xe2   : > { %9493 = vst [vmem:[#allocation115_spill] sm:$0xff] %v5495_v7  ;;  %v5498_v39 = vld.sshfl [vmem:[#allocation1] sm:$0xff pattern:$0x73625140] }
  0xe3   : > { %9494 = vst [vmem:[#allocation116_spill] sm:$0xff] %v5498_v39  ;;  %v497_v0 = vrot.slane %v9499_v1, 7  ;;  %v9500_v39 = vrot.slane %v5063_v2, 6  ;;  %v496_v1 = vrot.slane %v494_v59, 2 }
  0xe4   : > { %429 = vst [vmem:[#allocation1] ss:$4 sm:$0xff] %v5491_v24  ;;  %v4840_v24 = vrot.slane %v5063_v2, 9 }
  0xe5   : > { %9498 = vst [vmem:[#allocation117_spill] sm:$0xff] %v9497_v60  ;;  %v500_v8 = vrot.slane %v9500_v39, 7  ;;  %v5527_v39 = vsel %vm5505_vm7, %v4842_v62, %v516_v5 }
  0xe6   : > { %430 = vst [vmem:[#allocation1 + $0x1] ss:$4 sm:$0xff] %v5495_v7  ;;  %v499_v7 = vrot.slane %v497_v0, 2  ;;  %v495_v35 = vsel %vm5505_vm7, %v4840_v24, %v494_v59  ;;  %v533_v24 = vrot.slane %v531_v54, 2  ;;  %v4843_v59 = vrot.slane %v5099_v13, 13 }
  0xe7   : > { %9502 = vst [vmem:[#allocation119_spill] sm:$0xff] %v5527_v39  ;;  %v502_v14 = vrot.slane %v500_v8, 2 }
  0xe8   : > { %v5521_v6 = vld.sshfl [vmem:[#allocation1 + $0x20] sm:$0xff pattern:$0x73625140] }
  0xe9   : > { %9501 = vst [vmem:[#allocation118_spill] sm:$0xff] %v5521_v6  ;;  %v498_v6 = vsel %vm5505_vm7, %v496_v1, %v497_v0  ;;  %v4844_v0 = vrot.slane %v5112_v17, 9  ;;  %v522_v1 = vrot.slane %v5096_v12, 7 }
  0xea   : > { %808 = vst [vmem:[#allocation1 + $0x20] ss:$4 sm:$0xff] %v507_v4  ;;  %v501_v4 = vsel %vm5505_vm7, %v499_v7, %v500_v8  ;;  %v5550_v7 = vsel %vm5505_vm7, %v530_v29, %v531_v54  ;;  %v5554_v8 = vsel %vm5505_vm7, %v533_v24, %v4843_v59 }
  0xeb   : > { %810 = vst [vmem:[#allocation1 + $0x21] ss:$4 sm:$0xff] %v510_v3  ;;  %v504_v3 = vsel %vm5505_vm7, %v502_v14, %v503_v19  ;;  %v518_v19 = vrot.slane %v516_v5, 2  ;;  %v541_v14 = vrot.slane %v5128_v21, 7  ;;  %v524_v18 = vrot.slane %v522_v1, 2 }
  0xec   : > { %812 = vst [vmem:[#allocation1 + $0x22] ss:$4 sm:$0xff] %v513_v9  ;;  %v519_v9 = vrot.slane %v5093_v11, 7 }
  0xed   : > { %814 = vst [vmem:[#allocation1 + $0x23] ss:$4 sm:$0xff] %v5527_v39  ;;  %v5537_v62 = vld.sshfl [vmem:[#allocation1] sm:$0xff pattern:$0x73625140]  ;;  %v540_v39 = vrot.slane %v538_v44, 2 }
  0xee   : > { %9503 = vst [vmem:[#allocation120_spill] sm:$0xff] %v5537_v62  ;;  %v525_v62 = vrot.slane %v5099_v13, 7  ;;  %v5571_v29 = vsel %vm5505_vm7, %v518_v19, %v519_v9 }
  0xef   : > { %800 = vst [vmem:[#allocation1] ss:$4 sm:$0xff] %v495_v35  ;;  %v521_v35 = vrot.slane %v519_v9, 2  ;;  %v5565_v54 = vsel %vm5505_vm7, %v540_v39, %v541_v14  ;;  %v563_v39 = vrot.slane %v5152_v28, 7 }
  0xf0   : > { %802 = vst [vmem:[#allocation1 + $0x1] ss:$4 sm:$0xff] %v498_v6  ;;  %v5559_v6 = vsel %vm5505_vm7, %v4844_v0, %v538_v44  ;;  %v527_v5 = vrot.slane %v525_v62, 2  ;;  %v560_v44 = vrot.slane %v5148_v27, 7  ;;  %v5584_v59 = vsel %vm5505_vm7, %v524_v18, %v525_v62 }
  0xf1   : > { %804 = vst [vmem:[#allocation1 + $0x2] ss:$4 sm:$0xff] %v501_v4  ;;  %v5578_v24 = vsel %vm5505_vm7, %v521_v35, %v522_v1  ;;  %v4845_v0 = vrot.slane %v5125_v20, 13  ;;  %v4846_v1 = vrot.slane %v5144_v26, 9  ;;  %v544_v35 = vrot.slane %v5132_v22, 7 }
  0xf2   : > { %9504 = vst [vmem:[#allocation121_spill] sm:$0xff] %v5550_v7  ;;  %v547_v18 = vrot.slane %v5125_v20, 7  ;;  %v565_v62 = vrot.slane %v563_v39, 2 }
  0xf3   : > { %806 = vst [vmem:[#allocation1 + $0x3] ss:$4 sm:$0xff] %v504_v3  ;;  %v553_v3 = vrot.slane %v5140_v25, 7 }
  0xf4   : > { %9505 = vst [vmem:[#allocation122_spill] sm:$0xff] %v5554_v8  ;;  %v5561_v4 = vld.sshfl [vmem:[#allocation1 + $0x20] sm:$0xff pattern:$0x73625140] }
  0xf5   : > { %9506 = vst [vmem:[#allocation123_spill] sm:$0xff] %v5559_v6  ;;  %v555_v9 = vrot.slane %v553_v3, 2 }
  0xf6   : > { %9507 = vst [vmem:[#allocation124_spill] sm:$0xff] %v5561_v4  ;;  %v5591_v4 = vsel %vm5505_vm7, %v527_v5, %v528_v48  ;;  %v543_v5 = vrot.slane %v541_v14, 2 }
  0xf7   : > { %9508 = vst [vmem:[#allocation125_spill] sm:$0xff] %v5565_v54  ;;  %v5602_v48 = vsel %vm5505_vm7, %v555_v9, %v4845_v0 }
  0xf8   : > { %821 = vst [vmem:[#allocation1 + $0x20] ss:$4 sm:$0xff] %v5550_v7  ;;  %v549_v7 = vrot.slane %v547_v18, 2  ;;  %v5625_v0 = vsel %vm5505_vm7, %v543_v5, %v544_v35 }
  0xf9   : > { %822 = vst [vmem:[#allocation1 + $0x21] ss:$4 sm:$0xff] %v5554_v8 }
  0xfa   : > { %9509 = vst [vmem:[#allocation126_spill] sm:$0xff] %v5571_v29  ;;  %v5587_v19 = vld.sshfl [vmem:[#allocation1] sm:$0xff pattern:$0x73625140] }
  0xfb   : > { %823 = vst [vmem:[#allocation1 + $0x22] ss:$4 sm:$0xff] %v5559_v6  ;;  %v546_v6 = vrot.slane %v544_v35, 2 }
  0xfc   : > { %9510 = vst [vmem:[#allocation127_spill] sm:$0xff] %v5578_v24 }
  0xfd   : > { %824 = vst [vmem:[#allocation1 + $0x23] ss:$4 sm:$0xff] %v5565_v54  ;;  %v562_v54 = vrot.slane %v560_v44, 2 }
  0xfe   : > { %9511 = vst [vmem:[#allocation128_spill] sm:$0xff] %v5584_v59 }
  0xff   : > { %9512 = vst [vmem:[#allocation129_spill] sm:$0xff] %v5587_v19  ;;  %v550_v19 = vrot.slane %v5135_v23, 7  ;;  %v5612_v8 = vsel %vm5505_vm7, %v562_v54, %v563_v39  ;;  %v585_v54 = vrot.slane %v5184_v37, 7  ;;  %v5631_v39 = vsel %vm5505_vm7, %v546_v6, %v547_v18 }
 0x100   : > { %9513 = vst [vmem:[#allocation130_spill] sm:$0xff] %v5591_v4  ;;  %v569_v6 = vrot.slane %v5160_v30, 7 }
 0x101   : > { %817 = vst [vmem:[#allocation1] ss:$4 sm:$0xff] %v5571_v29  ;;  %v5607_v29 = vsel %vm5505_vm7, %v4846_v1, %v560_v44  ;;  %v552_v14 = vrot.slane %v550_v19, 2  ;;  %v582_v44 = vrot.slane %v5180_v36, 7  ;;  %v588_v1 = vrot.slane %v5188_v38, 7  ;;  %v9614_v38 = vld [vmem:[#allocation98_spill] sm:$0xff] }
 0x102   : > { %818 = vst [vmem:[#allocation1 + $0x1] ss:$4 sm:$0xff] %v5578_v24  ;;  %v566_v24 = vrot.slane %v5164_v31, 7  ;;  %v587_v18 = vrot.slane %v585_v54, 2 }
 0x103   : > { %819 = vst [vmem:[#allocation1 + $0x2] ss:$4 sm:$0xff] %v5584_v59  ;;  %v5644_v5 = vsel %vm5505_vm7, %v552_v14, %v553_v3 }
 0x104   : > { %9514 = vst [vmem:[#allocation131_spill] sm:$0xff] %v5602_v48  ;;  %v5614_v59 = vld.sshfl [vmem:[#allocation1 + $0x20] sm:$0xff pattern:$0x73625140]  ;;  %v5618_v9 = vsel %vm5505_vm7, %v565_v62, %v566_v24  ;;  %v5637_v62 = vsel %vm5505_vm7, %v549_v7, %v550_v19  ;;  %v590_v7 = vrot.slane %v588_v1, 2  ;;  %v575_v19 = vrot.slane %v5174_v34, 7 }
 0x105   : > { %820 = vst [vmem:[#allocation1 + $0x3] ss:$4 sm:$0xff] %v5591_v4  ;;  %v568_v3 = vrot.slane %v566_v24, 2 }
 0x106   : > { %9515 = vst [vmem:[#allocation132_spill] sm:$0xff] %v5607_v29  ;;  %v577_v24 = vrot.slane %v575_v19, 2 }
 0x107   : > { %9516 = vst [vmem:[#allocation133_spill] sm:$0xff] %v5612_v8 }
 0x108   : > { %9517 = vst [vmem:[#allocation134_spill] sm:$0xff] %v5614_v59  ;;  %v4848_v59 = vrot.slane %v5168_v32, 9 }
 0x109   : > { %9518 = vst [vmem:[#allocation135_spill] sm:$0xff] %v5618_v9 }
 0x10a   : > { %831 = vst [vmem:[#allocation1 + $0x20] ss:$4 sm:$0xff] %v5602_v48 }
 0x10b   : > { %832 = vst [vmem:[#allocation1 + $0x21] ss:$4 sm:$0xff] %v5607_v29  ;;  %v5664_v29 = vsel %vm5505_vm7, %v587_v18, %v588_v1  ;;  %v604_v1 = vrot.slane %v5212_v45, 7  ;;  %v610_v18 = vrot.slane %v5220_v47, 7  ;;  %v751_v47 = vrot.slane %v9614_v38, 7 }
 0x10c   : > { %9519 = vst [vmem:[#allocation136_spill] sm:$0xff] %v5625_v0  ;;  %v5640_v35 = vld.sshfl [vmem:[#allocation1] sm:$0xff pattern:$0x73625140] }
 0x10d   : > { %833 = vst [vmem:[#allocation1 + $0x22] ss:$4 sm:$0xff] %v5612_v8  ;;  %v584_v8 = vrot.slane %v582_v44, 2 }
 0x10e   : > { %9520 = vst [vmem:[#allocation137_spill] sm:$0xff] %v5631_v39 }
 0x10f   : > { %834 = vst [vmem:[#allocation1 + $0x23] ss:$4 sm:$0xff] %v5618_v9  ;;  %v572_v9 = vrot.slane %v5171_v33, 7  ;;  %v5659_v14 = vsel %vm5505_vm7, %v584_v8, %v585_v54  ;;  %v4847_v8 = vrot.slane %v5160_v30, 13  ;;  %v5678_v54 = vsel %vm5505_vm7, %v568_v3, %v569_v6 }
 0x110   : > { %9521 = vst [vmem:[#allocation138_spill] sm:$0xff] %v5637_v62 }
 0x111   : > { %9522 = vst [vmem:[#allocation139_spill] sm:$0xff] %v5640_v35  ;;  %v5654_v35 = vsel %vm5505_vm7, %v4848_v59, %v582_v44  ;;  %v574_v48 = vrot.slane %v572_v9, 2  ;;  %v607_v44 = vrot.slane %v5216_v46, 7  ;;  %v9635_v46 = vld [vmem:[#allocation13_spill] sm:$0xff] }
 0x112   : > { %9523 = vst [vmem:[#allocation140_spill] sm:$0xff] %v5644_v5 }
 0x113   : > { %827 = vst [vmem:[#allocation1] ss:$4 sm:$0xff] %v5625_v0  ;;  %v571_v0 = vrot.slane %v569_v6, 2  ;;  %v606_v6 = vrot.slane %v604_v1, 2 }
 0x114   : > { %828 = vst [vmem:[#allocation1 + $0x1] ss:$4 sm:$0xff] %v5631_v39  ;;  %v591_v39 = vrot.slane %v5195_v40, 7 }
 0x115   : > { %829 = vst [vmem:[#allocation1 + $0x2] ss:$4 sm:$0xff] %v5637_v62 }
 0x116   : > { %9524 = vst [vmem:[#allocation141_spill] sm:$0xff] %v5654_v35  ;;  %v5666_v62 = vld.sshfl [vmem:[#allocation1 + $0x20] sm:$0xff pattern:$0x73625140]  ;;  %v5670_v59 = vsel %vm5505_vm7, %v590_v7, %v591_v39  ;;  %v5685_v7 = vsel %vm5505_vm7, %v571_v0, %v572_v9  ;;  %v594_v9 = vrot.slane %v5201_v41, 7  ;;  %v612_v0 = vrot.slane %v610_v18, 2 }
 0x117   : > { %830 = vst [vmem:[#allocation1 + $0x3] ss:$4 sm:$0xff] %v5644_v5 }
 0x118   : > { %9525 = vst [vmem:[#allocation142_spill] sm:$0xff] %v5659_v14 }
 0x119   : > { %9526 = vst [vmem:[#allocation143_spill] sm:$0xff] %v5664_v29 }
 0x11a   : > { %9527 = vst [vmem:[#allocation144_spill] sm:$0xff] %v5666_v62  ;;  %v613_v62 = vrot.slane %v5227_v49, 7 }
 0x11b   : > { %9528 = vst [vmem:[#allocation145_spill] sm:$0xff] %v5670_v59 }
 0x11c   : > { %841 = vst [vmem:[#allocation1 + $0x20] ss:$4 sm:$0xff] %v5654_v35  ;;  %v5697_v35 = vsel %vm5505_vm7, %v577_v24, %v4847_v8  ;;  %v615_v5 = vrot.slane %v613_v62, 2  ;;  %v616_v8 = vrot.slane %v5236_v51, 7 }
 0x11d   : > { %842 = vst [vmem:[#allocation1 + $0x21] ss:$4 sm:$0xff] %v5659_v14  ;;  %v5691_v14 = vsel %vm5505_vm7, %v574_v48, %v575_v19  ;;  %v5706_v48 = vsel %vm5505_vm7, %v606_v6, %v607_v44  ;;  %v593_v19 = vrot.slane %v591_v39, 2  ;;  %v632_v39 = vrot.slane %v5252_v56, 7 }
 0x11e   : > { %9529 = vst [vmem:[#allocation146_spill] sm:$0xff] %v5678_v54  ;;  %v5693_v3 = vld.sshfl [vmem:[#allocation1] sm:$0xff pattern:$0x73625140]  ;;  %v5723_v6 = vsel %vm5505_vm7, %v615_v5, %v616_v8 }
 0x11f   : > { %843 = vst [vmem:[#allocation1 + $0x22] ss:$4 sm:$0xff] %v5664_v29  ;;  %v609_v29 = vrot.slane %v607_v44, 2  ;;  %v4849_v44 = vrot.slane %v5195_v40, 13 }
 0x120   : > { %9530 = vst [vmem:[#allocation147_spill] sm:$0xff] %v5685_v7 }
 0x121   : > { %844 = vst [vmem:[#allocation1 + $0x23] ss:$4 sm:$0xff] %v5670_v59  ;;  %v597_v59 = vrot.slane %v5204_v42, 7  ;;  %v5711_v24 = vsel %vm5505_vm7, %v609_v29, %v610_v18  ;;  %v4850_v29 = vrot.slane %v5207_v43, 9  ;;  %v629_v18 = vrot.slane %v5248_v55, 7  ;;  %v9602_v42 = vld [vmem:[#allocation89_spill] sm:$0xff] }
 0x122   : > { %9531 = vst [vmem:[#allocation148_spill] sm:$0xff] %v5691_v14  ;;  %v729_v41 = vrot.slane %v9602_v42, 7 }
 0x123   : > { %9532 = vst [vmem:[#allocation149_spill] sm:$0xff] %v5693_v3  ;;  %v596_v3 = vrot.slane %v594_v9, 2 }
 0x124   : > { %9533 = vst [vmem:[#allocation150_spill] sm:$0xff] %v5697_v35 }
 0x125   : > { %837 = vst [vmem:[#allocation1] ss:$4 sm:$0xff] %v5678_v54  ;;  %v5738_v5 = vsel %vm5505_vm7, %v596_v3, %v597_v59 }
 0x126   : > { %838 = vst [vmem:[#allocation1 + $0x1] ss:$4 sm:$0xff] %v5685_v7  ;;  %v5716_v7 = vsel %vm5505_vm7, %v612_v0, %v613_v62  ;;  %v5731_v62 = vsel %vm5505_vm7, %v593_v19, %v594_v9  ;;  %v635_v0 = vrot.slane %v5256_v57, 7  ;;  %v631_v19 = vrot.slane %v629_v18, 2 }
 0x127   : > { %839 = vst [vmem:[#allocation1 + $0x2] ss:$4 sm:$0xff] %v5691_v14  ;;  %v599_v14 = vrot.slane %v597_v59, 2  ;;  %v619_v59 = vrot.slane %v5240_v52, 7 }
 0x128   : > { %9534 = vst [vmem:[#allocation151_spill] sm:$0xff] %v5706_v48  ;;  %v5718_v54 = vld.sshfl [vmem:[#allocation1 + $0x20] sm:$0xff pattern:$0x73625140]  ;;  %v637_v3 = vrot.slane %v635_v0, 2 }
 0x129   : > { %840 = vst [vmem:[#allocation1 + $0x3] ss:$4 sm:$0xff] %v5697_v35  ;;  %v4852_v35 = vrot.slane %v5233_v50, 9 }
 0x12a   : > { %9535 = vst [vmem:[#allocation152_spill] sm:$0xff] %v5711_v24 }
 0x12b   : > { %9536 = vst [vmem:[#allocation153_spill] sm:$0xff] %v5716_v7 }
 0x12c   : > { %9537 = vst [vmem:[#allocation154_spill] sm:$0xff] %v5718_v54  ;;  %v638_v54 = vrot.slane %v5260_v58, 7 }
 0x12d   : > { %9538 = vst [vmem:[#allocation155_spill] sm:$0xff] %v5723_v6 }
 0x12e   : > { %851 = vst [vmem:[#allocation1 + $0x20] ss:$4 sm:$0xff] %v5706_v48  ;;  %v634_v48 = vrot.slane %v632_v39, 2 }
 0x12f   : > { %852 = vst [vmem:[#allocation1 + $0x21] ss:$4 sm:$0xff] %v5711_v24  ;;  %v5744_v24 = vsel %vm5505_vm7, %v599_v14, %v4849_v44  ;;  %v626_v14 = vrot.slane %v5243_v53, 7  ;;  %v5760_v44 = vsel %vm5505_vm7, %v631_v19, %v632_v39 }
 0x130   : > { %9539 = vst [vmem:[#allocation156_spill] sm:$0xff] %v5731_v62  ;;  %v5746_v9 = vld.sshfl [vmem:[#allocation1] sm:$0xff pattern:$0x73625140] }
 0x131   : > { %853 = vst [vmem:[#allocation1 + $0x22] ss:$4 sm:$0xff] %v5716_v7  ;;  %v5750_v7 = vsel %vm5505_vm7, %v4850_v29, %v604_v1  ;;  %v618_v1 = vrot.slane %v616_v8, 2  ;;  %v5764_v29 = vsel %vm5505_vm7, %v634_v48, %v635_v0  ;;  %v628_v48 = vrot.slane %v626_v14, 2 }
 0x132   : > { %9540 = vst [vmem:[#allocation157_spill] sm:$0xff] %v5738_v5  ;;  %v657_v8 = vrot.slane %v5279_v63, 7 }
 0x133   : > { %854 = vst [vmem:[#allocation1 + $0x23] ss:$4 sm:$0xff] %v5723_v6  ;;  %v640_v6 = vrot.slane %v638_v54, 2  ;;  %v5782_v0 = vsel %vm5505_vm7, %v618_v1, %v619_v59  ;;  %v5799_v58 = vsel %vm5505_vm7, %v628_v48, %v629_v18 }
 0x134   : > { %9541 = vst [vmem:[#allocation158_spill] sm:$0xff] %v5744_v24 }
 0x135   : > { %9542 = vst [vmem:[#allocation159_spill] sm:$0xff] %v5746_v9  ;;  %v641_v9 = vrot.slane %v5272_v61, 7 }
 0x136   : > { %9543 = vst [vmem:[#allocation160_spill] sm:$0xff] %v5750_v7 }
 0x137   : > { %847 = vst [vmem:[#allocation1] ss:$4 sm:$0xff] %v5731_v62  ;;  %v621_v62 = vrot.slane %v619_v59, 2  ;;  %v5775_v39 = vsel %vm5505_vm7, %v640_v6, %v641_v9  ;;  %v5795_v59 = vsel %vm5505_vm7, %v4852_v35, %v626_v14  ;;  %v4855_v14 = vrot.slane %v5279_v63, 13 }
 0x138   : > { %848 = vst [vmem:[#allocation1 + $0x1] ss:$4 sm:$0xff] %v5738_v5  ;;  %v643_v48 = vrot.slane %v641_v9, 2 }
 0x139   : > { %849 = vst [vmem:[#allocation1 + $0x2] ss:$4 sm:$0xff] %v5744_v24  ;;  %v4851_v24 = vrot.slane %v5227_v49, 13 }
 0x13a   : > { %850 = vst [vmem:[#allocation1 + $0x3] ss:$4 sm:$0xff] %v5750_v7  ;;  %v856_v5 = vld.sshfl [vmem:[#allocation1 + $0x20] sm:$0xff pattern:$0x73625140]  ;;  %v5770_v7 = vsel %vm5505_vm7, %v637_v3, %v638_v54  ;;  %v9549_v54 = vld [vmem:[#allocation60_spill] sm:$0xff] }
 0x13b   : > { %9544 = vst [vmem:[#allocation161_spill] sm:$0xff] %v5760_v44  ;;  %v654_v19 = vrot.slane %v9549_v54, 7  ;;  %v9550_v3 = vld [vmem:[#allocation61_spill] sm:$0xff]  ;;  %v5789_v6 = vsel %vm5505_vm7, %v621_v62, %v4851_v24  ;;  %v659_v24 = vrot.slane %v657_v8, 2 }
 0x13c   : > { %9545 = vst [vmem:[#allocation162_spill] sm:$0xff] %v5764_v29  ;;  %v660_v4 = vrot.slane %v9550_v3, 7 }
 0x13d   : > { %9546 = vst [vmem:[#allocation163_spill] sm:$0xff] %v5770_v7  ;;  %v656_v1 = vrot.slane %v654_v19, 2 }
 0x13e   : > { %9547 = vst [vmem:[#allocation164_spill] sm:$0xff] %v5775_v39  ;;  %v662_v62 = vrot.slane %v660_v4, 2 }
 0x13f   : > { %861 = vst [vmem:[#allocation1 + $0x20] ss:$4 sm:$0xff] %v5760_v44  ;;  %v9552_v44 = vld [vmem:[#allocation62_spill] sm:$0xff] }
 0x140   : > { %862 = vst [vmem:[#allocation1 + $0x21] ss:$4 sm:$0xff] %v5764_v29  ;;  %v663_v29 = vrot.slane %v9552_v44, 7 }
 0x141   : > { %9548 = vst [vmem:[#allocation165_spill] sm:$0xff] %v5782_v0  ;;  %v855_v61 = vld.sshfl [vmem:[#allocation1] sm:$0xff pattern:$0x73625140] }
 0x142   : > { %863 = vst [vmem:[#allocation1 + $0x22] ss:$4 sm:$0xff] %v5770_v7  ;;  %v959_v7 = vpack.c.bf16 %v856_v5, %v855_v61  ;;  %v665_v35 = vrot.slane %v663_v29, 2  ;;  %v9556_v61 = vld [vmem:[#allocation58_spill] sm:$0xff]  ;;  %v5811_v5 = vsel %vm5505_vm7, %v656_v1, %v657_v8  ;;  %v5821_v3 = vsel %vm5505_vm7, %v662_v62, %v663_v29  ;;  %v9565_v62 = vld [vmem:[#allocation71_spill] sm:$0xff] }
 0x143   : > { %9551 = vst [vmem:[#allocation166_spill] sm:$0xff] %v5789_v6  ;;  %v651_v18 = vrot.slane %v9556_v61, 7  ;;  %v9562_v8 = vld [vmem:[#allocation70_spill] sm:$0xff]  ;;  %v685_v61 = vrot.slane %v9565_v62, 7  ;;  %v9570_v62 = vld [vmem:[#allocation67_spill] sm:$0xff] }
 0x144   : > { %864 = vst [vmem:[#allocation1 + $0x23] ss:$4 sm:$0xff] %v5775_v39  ;;  %4873 = vmatmul.msk.bf16.vlgmr.msra.gmra.mxu1 %vm970_vm8, %v959_v7  ;;  %v9555_v39 = vld [vmem:[#allocation56_spill] sm:$0xff]  ;;  %v5816_v7 = vsel %vm5505_vm7, %v659_v24, %v660_v4  ;;  %v5825_v54 = vsel %vm5505_vm7, %v665_v35, %v4855_v14  ;;  %v682_v4 = vrot.slane %v9562_v8, 7  ;;  %v9564_v29 = vld [vmem:[#allocation66_spill] sm:$0xff] }
 0x145   : > { %9553 = vst [vmem:[#allocation167_spill] sm:$0xff] %v5795_v59  ;;  %v648_v44 = vrot.slane %v9555_v39, 7  ;;  %v653_v9 = vrot.slane %v651_v18, 2  ;;  %v679_v24 = vrot.slane %v9564_v29, 7 }
 0x146   : > { %9554 = vst [vmem:[#allocation168_spill] sm:$0xff] %v5799_v58 }
 0x147   : > { %857 = vst [vmem:[#allocation1] ss:$4 sm:$0xff] %v5782_v0  ;;  %v9559_v0 = vld [vmem:[#allocation54_spill] sm:$0xff] }
 0x148   : > { %858 = vst [vmem:[#allocation1 + $0x1] ss:$4 sm:$0xff] %v5789_v6  ;;  %v4853_v6 = vrot.slane %v5256_v57, 13  ;;  %v4854_v39 = vrot.slane %v9559_v0, 9 }
 0x149   : > { %859 = vst [vmem:[#allocation1 + $0x2] ss:$4 sm:$0xff] %v5795_v59 }
 0x14a   : > { %860 = vst [vmem:[#allocation1 + $0x3] ss:$4 sm:$0xff] %v5799_v58  ;;  %v650_v58 = vrot.slane %v648_v44, 2  ;;  %v5832_v1 = vsel %vm5505_vm7, %v643_v48, %v4853_v6  ;;  %v5839_v35 = vsel %vm5505_vm7, %v4854_v39, %v648_v44  ;;  %v5848_v6 = vsel %vm5505_vm7, %v653_v9, %v654_v19  ;;  %v9572_v19 = vld [vmem:[#allocation68_spill] sm:$0xff] }
 0x14b   : > { %9557 = vst [vmem:[#allocation169_spill] sm:$0xff] %v5811_v5  ;;  %v866_v59 = vld.sshfl [vmem:[#allocation1 + $0x20] sm:$0xff pattern:$0x73625140]  ;;  %v684_v48 = vrot.slane %v682_v4, 2  ;;  %v687_v39 = vrot.slane %v685_v61, 2 }
 0x14c   : > { %9558 = vst [vmem:[#allocation170_spill] sm:$0xff] %v5816_v7  ;;  %v676_v9 = vrot.slane %v9572_v19, 7 }
 0x14d   : > { %9560 = vst [vmem:[#allocation171_spill] sm:$0xff] %v5821_v3  ;;  %v5866_v51 = vsel %vm5505_vm7, %v684_v48, %v685_v61  ;;  %v470_v61 = vld [vmem:[%s8956_s1] sm:$0xf] }
 0x14e   : > { %9561 = vst [vmem:[#allocation172_spill] sm:$0xff] %v5825_v54 }
 0x14f   : > { %871 = vst [vmem:[#allocation1 + $0x20] ss:$4 sm:$0xff] %v5811_v5  ;;  %v681_v5 = vrot.slane %v679_v24, 2 }
 0x150   : > { %872 = vst [vmem:[#allocation1 + $0x21] ss:$4 sm:$0xff] %v5816_v7  ;;  %v5844_v7 = vsel %vm5505_vm7, %v650_v58, %v651_v18  ;;  %v673_v58 = vrot.slane %v9570_v62, 7  ;;  %v9571_v18 = vld [vmem:[#allocation73_spill] sm:$0xff] }
 0x151   : > { %9563 = vst [vmem:[#allocation173_spill] sm:$0xff] %v5832_v1  ;;  %v865_v14 = vld.sshfl [vmem:[#allocation1] sm:$0xff pattern:$0x73625140]  ;;  %v4858_v8 = vrot.slane %v9571_v18, 9 }
 0x152   : > { %873 = vst [vmem:[#allocation1 + $0x22] ss:$4 sm:$0xff] %v5821_v3  ;;  %v9569_v3 = vld [vmem:[#allocation65_spill] sm:$0xff]  ;;  %v960_v52 = vpack.c.bf16 %v866_v59, %v865_v14  ;;  %v675_v14 = vrot.slane %v673_v58, 2 }
 0x153   : > { %9566 = vst [vmem:[#allocation174_spill] sm:$0xff] %v5839_v35  ;;  %v670_v44 = vrot.slane %v9569_v3, 7 }
 0x154   : > { %874 = vst [vmem:[#allocation1 + $0x23] ss:$4 sm:$0xff] %v5825_v54  ;;  %v4857_v54 = vrot.slane %v9564_v29, 13  ;;  %4874 = vmatmul.msk.bf16.gmra.mxu1 %vm970_vm8, %v960_v52  ;;  %v5896_v48 = vsel %vm5505_vm7, %v675_v14, %v676_v9 }
 0x155   : > { %9567 = vst [vmem:[#allocation175_spill] sm:$0xff] %v5844_v7  ;;  %v672_v55 = vrot.slane %v670_v44, 2 }
 0x156   : > { %9568 = vst [vmem:[#allocation176_spill] sm:$0xff] %v5848_v6  ;;  %v5871_v59 = vsel %vm5505_vm7, %v687_v39, %v4857_v54 }
 0x157   : > { %867 = vst [vmem:[#allocation1] ss:$4 sm:$0xff] %v5832_v1  ;;  %v5861_v1 = vsel %vm5505_vm7, %v681_v5, %v682_v4  ;;  %v678_v5 = vrot.slane %v676_v9, 2  ;;  %v5891_v4 = vsel %vm5505_vm7, %v672_v55, %v673_v58  ;;  %v9584_v55 = vld [vmem:[#allocation76_spill] sm:$0xff] }
 0x158   : > { %868 = vst [vmem:[#allocation1 + $0x1] ss:$4 sm:$0xff] %v5839_v35  ;;  %v9574_v35 = vld [vmem:[#allocation64_spill] sm:$0xff]  ;;  %v698_v58 = vrot.slane %v9584_v55, 7 }
 0x159   : > { %869 = vst [vmem:[#allocation1 + $0x2] ss:$4 sm:$0xff] %v5844_v7  ;;  %v4856_v3 = vrot.slane %v9574_v35, 9  ;;  %v9576_v7 = vld [vmem:[#allocation74_spill] sm:$0xff] }
 0x15a   : > { %870 = vst [vmem:[#allocation1 + $0x3] ss:$4 sm:$0xff] %v5848_v6  ;;  %v692_v56 = vrot.slane %v9576_v7, 7 }
 0x15b   : > { %9573 = vst [vmem:[#allocation177_spill] sm:$0xff] %v5861_v1  ;;  %v876_v62 = vld.sshfl [vmem:[#allocation1 + $0x20] sm:$0xff pattern:$0x73625140]  ;;  %v5885_v54 = vsel %vm5505_vm7, %v4856_v3, %v670_v44  ;;  %v5900_v3 = vsel %vm5505_vm7, %v678_v5, %v679_v24  ;;  %v9583_v44 = vld [vmem:[#allocation75_spill] sm:$0xff] }
 0x15c   : > { %9575 = vst [vmem:[#allocation178_spill] sm:$0xff] %v5866_v51  ;;  %v5875_v6 = vsel %vm5505_vm7, %v4858_v8, %v692_v56  ;;  %v1127_v8 = vsel %vm1010_vm0, %v470_v61, 0  ;;  %v695_v39 = vrot.slane %v9583_v44, 7  ;;  %v9585_v61 = vld [vmem:[#allocation77_spill] sm:$0xff]  ;;  %v694_v9 = vrot.slane %v692_v56, 2  ;;  %v9586_v24 = vld [vmem:[#allocation79_spill] sm:$0xff] }
 0x15d   : > { %9577 = vst [vmem:[#allocation179_spill] sm:$0xff] %v5871_v59  ;;  %1136 = vmatpush.bf16.msrb.mxu1 %v1127_v8  ;;  %v701_v8 = vrot.slane %v9585_v61, 7  ;;  %v704_v5 = vrot.slane %v9586_v24, 7  ;;  %v9595_v44 = vld [vmem:[#allocation84_spill] sm:$0xff] }
 0x15e   : > { %9578 = vst [vmem:[#allocation180_spill] sm:$0xff] %v5875_v6  ;;  %v697_v14 = vrot.slane %v695_v39, 2  ;;  %v723_v7 = vrot.slane %v9595_v44, 7 }
 0x15f   : > { %881 = vst [vmem:[#allocation1 + $0x20] ss:$4 sm:$0xff] %v5861_v1 }
 0x160   : > { %882 = vst [vmem:[#allocation1 + $0x21] ss:$4 sm:$0xff] %v5866_v51 }
 0x161   : > { %9579 = vst [vmem:[#allocation181_spill] sm:$0xff] %v5885_v54  ;;  %v875_v52 = vld.sshfl [vmem:[#allocation1] sm:$0xff pattern:$0x73625140] }
 0x162   : > { %883 = vst [vmem:[#allocation1 + $0x22] ss:$4 sm:$0xff] %v5871_v59  ;;  %v703_v59 = vrot.slane %v701_v8, 2  ;;  %v961_v51 = vpack.c.bf16 %v876_v62, %v875_v52  ;;  %v9592_v62 = vld [vmem:[#allocation80_spill] sm:$0xff] }
 0x163   : > { %9580 = vst [vmem:[#allocation182_spill] sm:$0xff] %v5891_v4  ;;  %v707_v52 = vrot.slane %v9592_v62, 7 }
 0x164   : > { %884 = vst [vmem:[#allocation1 + $0x23] ss:$4 sm:$0xff] %v5875_v6  ;;  %v700_v6 = vrot.slane %v698_v58, 2  ;;  %v5924_v56 = vsel %vm5505_vm7, %v703_v59, %v704_v5  ;;  %4875 = vmatmul.msk.bf16.gmra.mxu1 %vm970_vm8, %v961_v51  ;;  %v9597_v51 = vld [vmem:[#allocation81_spill] sm:$0xff] }
 0x165   : > { %9581 = vst [vmem:[#allocation183_spill] sm:$0xff] %v5896_v48  ;;  %v709_v24 = vrot.slane %v707_v52, 2  ;;  %v4860_v19 = vrot.slane %v9597_v51, 9 }
 0x166   : > { %9582 = vst [vmem:[#allocation184_spill] sm:$0xff] %v5900_v3  ;;  %v5920_v1 = vsel %vm5505_vm7, %v700_v6, %v701_v8  ;;  %v9596_v8 = vld [vmem:[#allocation87_spill] sm:$0xff] }
 0x167   : > { %877 = vst [vmem:[#allocation1] ss:$4 sm:$0xff] %v5885_v54  ;;  %v726_v59 = vrot.slane %v9596_v8, 7 }
 0x168   : > { %878 = vst [vmem:[#allocation1 + $0x1] ss:$4 sm:$0xff] %v5891_v4  ;;  %v5912_v4 = vsel %vm5505_vm7, %v694_v9, %v695_v39  ;;  %v9593_v39 = vld [vmem:[#allocation82_spill] sm:$0xff] }
 0x169   : > { %879 = vst [vmem:[#allocation1 + $0x2] ss:$4 sm:$0xff] %v5896_v48  ;;  %v5916_v48 = vsel %vm5505_vm7, %v697_v14, %v698_v58  ;;  %v714_v58 = vrot.slane %v9593_v39, 7  ;;  %v9594_v9 = vld [vmem:[#allocation86_spill] sm:$0xff]  ;;  %v728_v53 = vrot.slane %v726_v59, 2 }
 0x16a   : > { %880 = vst [vmem:[#allocation1 + $0x3] ss:$4 sm:$0xff] %v5900_v3  ;;  %v9591_v3 = vld [vmem:[#allocation85_spill] sm:$0xff]  ;;  %v720_v14 = vrot.slane %v9594_v9, 7 }
 0x16b   : > { %9587 = vst [vmem:[#allocation185_spill] sm:$0xff] %v5912_v4  ;;  %v717_v55 = vrot.slane %v9591_v3, 7  ;;  %v886_v6 = vld.sshfl [vmem:[#allocation1 + $0x20] sm:$0xff pattern:$0x73625140]  ;;  %v706_v3 = vrot.slane %v704_v5, 2  ;;  %v5949_v5 = vsel %vm5505_vm7, %v4860_v19, %v714_v58 }
 0x16c   : > { %9588 = vst [vmem:[#allocation186_spill] sm:$0xff] %v5916_v48  ;;  %v716_v39 = vrot.slane %v714_v58, 2 }
 0x16d   : > { %9589 = vst [vmem:[#allocation187_spill] sm:$0xff] %v5920_v1  ;;  %v719_v62 = vrot.slane %v717_v55, 2  ;;  %v5941_v9 = vsel %vm5505_vm7, %v706_v3, %v707_v52  ;;  %v9605_v3 = vld [vmem:[#allocation91_spill] sm:$0xff] }
 0x16e   : > { %9590 = vst [vmem:[#allocation188_spill] sm:$0xff] %v5924_v56  ;;  %v5953_v8 = vsel %vm5505_vm7, %v716_v39, %v717_v55  ;;  %v736_v55 = vrot.slane %v9605_v3, 7 }
 0x16f   : > { %9598 = vst [vmem:[#allocation189_spill] sm:$0xff] %v5941_v9 }
 0x170   : > { %9600 = vst [vmem:[#allocation191_spill] sm:$0xff] %v5949_v5 }
 0x171   : > { %v885_v54 = vld.sshfl [vmem:[#allocation1] sm:$0xff pattern:$0x73625140]  ;;  %9601 = vst [vmem:[#allocation192_spill] sm:$0xff] %v5953_v8 }
 0x172   : > { %887 = vst [vmem:[#allocation1] ss:$4 sm:$0xff] %v5912_v4  ;;  %v4859_v4 = vrot.slane %v9585_v61, 13 }
 0x173   : > { %888 = vst [vmem:[#allocation1 + $0x1] ss:$4 sm:$0xff] %v5916_v48 }
 0x174   : > { %889 = vst [vmem:[#allocation1 + $0x2] ss:$4 sm:$0xff] %v5920_v1  ;;  %v5945_v48 = vsel %vm5505_vm7, %v709_v24, %v4859_v4  ;;  %v722_v1 = vrot.slane %v720_v14, 2  ;;  %v5960_v4 = vsel %vm5505_vm7, %v719_v62, %v720_v14  ;;  %v9606_v24 = vld [vmem:[#allocation92_spill] sm:$0xff]  ;;  %v5976_v62 = vsel %vm5505_vm7, %v728_v53, %v729_v41  ;;  %v9612_v53 = vld [vmem:[#allocation97_spill] sm:$0xff] }
 0x175   : > { %890 = vst [vmem:[#allocation1 + $0x3] ss:$4 sm:$0xff] %v5924_v56  ;;  %v725_v56 = vrot.slane %v723_v7, 2  ;;  %v739_v52 = vrot.slane %v9606_v24, 7  ;;  %v731_v14 = vrot.slane %v729_v41, 2  ;;  %v9611_v24 = vld [vmem:[#allocation94_spill] sm:$0xff] }
 0x176   : > { %9599 = vst [vmem:[#allocation190_spill] sm:$0xff] %v5945_v48  ;;  %v5965_v19 = vsel %vm5505_vm7, %v722_v1, %v723_v7  ;;  %v4861_v7 = vrot.slane %v9595_v44, 13  ;;  %v9609_v1 = vld [vmem:[#allocation90_spill] sm:$0xff]  ;;  %v745_v3 = vrot.slane %v9611_v24, 7  ;;  %v748_v42 = vrot.slane %v9612_v53, 7 }
 0x177   : > { %891 = vst [vmem:[#allocation1 + $0x20] ss:$4 sm:$0xff] %v5941_v9  ;;  %v5972_v39 = vsel %vm5505_vm7, %v725_v56, %v726_v59  ;;  %v962_v56 = vpack.c.bf16 %v886_v6, %v885_v54  ;;  %v741_v59 = vrot.slane %v739_v52, 2 }
 0x178   : > { %892 = vst [vmem:[#allocation1 + $0x21] ss:$4 sm:$0xff] %v5945_v48  ;;  %v9610_v48 = vld [vmem:[#allocation95_spill] sm:$0xff]  ;;  %v5990_v41 = vsel %vm5505_vm7, %v731_v14, %v4861_v7  ;;  %v747_v6 = vrot.slane %v745_v3, 2  ;;  %v750_v7 = vrot.slane %v748_v42, 2 }
 0x179   : > { %9603 = vst [vmem:[#allocation193_spill] sm:$0xff] %v5960_v4  ;;  %v742_v9 = vrot.slane %v9610_v48, 7  ;;  %4876 = vmatmul.msk.bf16.gmra.mxu1 %vm970_vm8, %v962_v56  ;;  %v9621_v56 = vld [vmem:[#allocation101_spill] sm:$0xff] }
 0x17a   : > { %893 = vst [vmem:[#allocation1 + $0x22] ss:$4 sm:$0xff] %v5949_v5  ;;  %v4862_v5 = vrot.slane %v9609_v1, 9 }
 0x17b   : > { %9604 = vst [vmem:[#allocation194_spill] sm:$0xff] %v5965_v19  ;;  %v744_v48 = vrot.slane %v742_v9, 2  ;;  %v6007_v14 = vsel %vm5505_vm7, %v741_v59, %v742_v9  ;;  %v6020_v9 = vsel %vm5505_vm7, %v747_v6, %v748_v42  ;;  %v761_v59 = vrot.slane %v9621_v56, 7  ;;  %v9627_v42 = vld [vmem:[#allocation104_spill] sm:$0xff] }
 0x17c   : > { %894 = vst [vmem:[#allocation1 + $0x23] ss:$4 sm:$0xff] %v5953_v8  ;;  %v5978_v58 = vld.sshfl [vmem:[#allocation1] sm:$0xff pattern:$0x73625140]  ;;  %v738_v8 = vrot.slane %v736_v55, 2 }
 0x17d   : > { %9607 = vst [vmem:[#allocation195_spill] sm:$0xff] %v5972_v39  ;;  %v767_v6 = vrot.slane %v9627_v42, 7 }
 0x17e   : > { %9608 = vst [vmem:[#allocation196_spill] sm:$0xff] %v5976_v62  ;;  %v6000_v54 = vsel %vm5505_vm7, %v738_v8, %v739_v52  ;;  %v6014_v8 = vsel %vm5505_vm7, %v744_v48, %v745_v3 }
 0x17f   : > { %897 = vst [vmem:[#allocation1] ss:$4 sm:$0xff] %v5960_v4  ;;  %v5996_v4 = vsel %vm5505_vm7, %v4862_v5, %v736_v55  ;;  %v4863_v5 = vrot.slane %v9611_v24, 13  ;;  %v9619_v55 = vld [vmem:[#allocation100_spill] sm:$0xff] }
 0x180   : > { %898 = vst [vmem:[#allocation1 + $0x1] ss:$4 sm:$0xff] %v5965_v19  ;;  %v758_v52 = vrot.slane %v9619_v55, 7 }
 0x181   : > { %899 = vst [vmem:[#allocation1 + $0x2] ss:$4 sm:$0xff] %v5972_v39  ;;  %v753_v39 = vrot.slane %v751_v47, 2 }
 0x182   : > { %9613 = vst [vmem:[#allocation197_spill] sm:$0xff] %v5990_v41  ;;  %v760_v56 = vrot.slane %v758_v52, 2 }
 0x183   : > { %900 = vst [vmem:[#allocation1 + $0x3] ss:$4 sm:$0xff] %v5976_v62  ;;  %v6002_v19 = vld.sshfl [vmem:[#allocation1 + $0x20] sm:$0xff pattern:$0x73625140]  ;;  %v6033_v3 = vsel %vm5505_vm7, %v753_v39, %v4863_v5  ;;  %v769_v5 = vrot.slane %v767_v6, 2 }
 0x184   : > { %9615 = vst [vmem:[#allocation198_spill] sm:$0xff] %v5996_v4 }
 0x185   : > { %9616 = vst [vmem:[#allocation199_spill] sm:$0xff] %v6000_v54 }
 0x186   : > { %9617 = vst [vmem:[#allocation200_spill] sm:$0xff] %v6007_v14 }
 0x187   : > { %901 = vst [vmem:[#allocation1 + $0x20] ss:$4 sm:$0xff] %v5990_v41  ;;  %v6026_v41 = vsel %vm5505_vm7, %v750_v7, %v751_v47  ;;  %v763_v47 = vrot.slane %v761_v59, 2  ;;  %v9629_v7 = vld [vmem:[#allocation106_spill] sm:$0xff] }
 0x188   : > { %902 = vst [vmem:[#allocation1 + $0x21] ss:$4 sm:$0xff] %v5996_v4  ;;  %v9623_v4 = vld [vmem:[#allocation102_spill] sm:$0xff] }
 0x189   : > { %9618 = vst [vmem:[#allocation201_spill] sm:$0xff] %v6014_v8  ;;  %v764_v62 = vrot.slane %v9623_v4, 7  ;;  %v773_v4 = vrot.slane %v9629_v7, 7 }
 0x18a   : > { %903 = vst [vmem:[#allocation1 + $0x22] ss:$4 sm:$0xff] %v6000_v54  ;;  %v6029_v48 = vld.sshfl [vmem:[#allocation1] sm:$0xff pattern:$0x73625140]  ;;  %v9626_v54 = vld [vmem:[#allocation96_spill] sm:$0xff] }
 0x18b   : > { %9620 = vst [vmem:[#allocation202_spill] sm:$0xff] %v6020_v9  ;;  %v4864_v53 = vrot.slane %v9626_v54, 9  ;;  %v775_v7 = vrot.slane %v773_v4, 2 }
 0x18c   : > { %904 = vst [vmem:[#allocation1 + $0x23] ss:$4 sm:$0xff] %v6007_v14  ;;  %v9628_v14 = vld [vmem:[#allocation105_spill] sm:$0xff] }
 0x18d   : > { %9622 = vst [vmem:[#allocation203_spill] sm:$0xff] %v6026_v41  ;;  %v770_v55 = vrot.slane %v9628_v14, 7  ;;  %v6045_v39 = vsel %vm5505_vm7, %v4864_v53, %v758_v52  ;;  %v9637_v52 = vld [vmem:[#allocation107_spill] sm:$0xff] }
 0x18e   : > { %9624 = vst [vmem:[#allocation204_spill] sm:$0xff] %v6029_v48  ;;  %v766_v48 = vrot.slane %v764_v62, 2 }
 0x18f   : > { %9625 = vst [vmem:[#allocation205_spill] sm:$0xff] %v6033_v3  ;;  %v772_v14 = vrot.slane %v770_v55, 2 }
 0x190   : > { %907 = vst [vmem:[#allocation1] ss:$4 sm:$0xff] %v6014_v8  ;;  %v6049_v8 = vsel %vm5505_vm7, %v760_v56, %v761_v59  ;;  %v6062_v53 = vsel %vm5505_vm7, %v766_v48, %v767_v6  ;;  %v4866_v56 = vrot.slane %v9637_v52, 9  ;;  %v9638_v59 = vld [vmem:[#allocation109_spill] sm:$0xff]  ;;  %v9642_v48 = vld [vmem:[#allocation111_spill] sm:$0xff] }
 0x191   : > { %908 = vst [vmem:[#allocation1 + $0x1] ss:$4 sm:$0xff] %v6020_v9  ;;  %v6053_v9 = vsel %vm5505_vm7, %v763_v47, %v764_v62  ;;  %v780_v33 = vrot.slane %v9638_v59, 7  ;;  %v6069_v62 = vsel %vm5505_vm7, %v769_v5, %v770_v55  ;;  %v9640_v47 = vld [vmem:[#allocation110_spill] sm:$0xff] }
 0x192   : > { %909 = vst [vmem:[#allocation1 + $0x2] ss:$4 sm:$0xff] %v6026_v41  ;;  %v4865_v41 = vrot.slane %v9627_v42, 13  ;;  %v783_v31 = vrot.slane %v9640_v47, 7  ;;  %v9647_v5 = vld [vmem:[#allocation114_spill] sm:$0xff] }
 0x193   : > { %910 = vst [vmem:[#allocation1 + $0x3] ss:$4 sm:$0xff] %v6033_v3  ;;  %v6056_v38 = vld.sshfl [vmem:[#allocation1 + $0x20] sm:$0xff pattern:$0x73625140]  ;;  %v9634_v3 = vld [vmem:[#allocation8_spill] sm:$0xff] }
 0x194   : > { %9630 = vst [vmem:[#allocation206_spill] sm:$0xff] %v6045_v39  ;;  %v457_v45 = vpack.c.bf16 %v9635_v46, %v9634_v3  ;;  %v6075_v46 = vsel %vm5505_vm7, %v772_v14, %v773_v4  ;;  %v786_v3 = vrot.slane %v9642_v48, 7  ;;  %v6081_v6 = vsel %vm5505_vm7, %v775_v7, %v4865_v41  ;;  %v9648_v41 = vld [vmem:[#allocation115_spill] sm:$0xff] }
 0x195   : > { %9631 = vst [vmem:[#allocation207_spill] sm:$0xff] %v6049_v8  ;;  %v6090_v4 = vsel %vm5505_vm7, %v4866_v56, %v780_v33  ;;  %v782_v14 = vrot.slane %v780_v33, 2  ;;  %v795_v7 = vrot.slane %v9648_v41, 7 }
 0x196   : > { %9632 = vst [vmem:[#allocation208_spill] sm:$0xff] %v6053_v9  ;;  %4882 = vmatmul.msk.bf16.vlgmr.msrb.gmra.mxu1 %vm970_vm8, %v457_v45  ;;  %v788_v48 = vrot.slane %v786_v3, 2 }
 0x197   : > { %9633 = vst [vmem:[#allocation209_spill] sm:$0xff] %v6056_v38  ;;  %v9644_v38 = vld [vmem:[#allocation113_spill] sm:$0xff]  ;;  %v6100_v45 = vsel %vm5505_vm7, %v782_v14, %v783_v31  ;;  %v9660_v14 = vld [vmem:[#allocation2_spill] sm:$0xff] }
 0x198   : > { %9636 = vst [vmem:[#allocation8_spill] sm:$0xff] %v6062_v53 }
 0x199   : > { %911 = vst [vmem:[#allocation1 + $0x20] ss:$4 sm:$0xff] %v6045_v39  ;;  %v789_v39 = vrot.slane %v9644_v38, 7 }
 0x19a   : > { %9639 = vst [vmem:[#allocation13_spill] sm:$0xff] %v6069_v62  ;;  %v6085_v55 = vld.sshfl [vmem:[#allocation1] sm:$0xff pattern:$0x73625140] }
 0x19b   : > { %912 = vst [vmem:[#allocation1 + $0x21] ss:$4 sm:$0xff] %v6049_v8  ;;  %v792_v8 = vrot.slane %v9647_v5, 7 }
 0x19c   : > { %9641 = vst [vmem:[#allocation210_spill] sm:$0xff] %v6075_v46 }
 0x19d   : > { %913 = vst [vmem:[#allocation1 + $0x22] ss:$4 sm:$0xff] %v6053_v9  ;;  %v785_v9 = vrot.slane %v783_v31, 2  ;;  %v794_v33 = vrot.slane %v792_v8, 2 }
 0x19e   : > { %9643 = vst [vmem:[#allocation211_spill] sm:$0xff] %v6081_v6 }
 0x19f   : > { %914 = vst [vmem:[#allocation1 + $0x23] ss:$4 sm:$0xff] %v6062_v53  ;;  %v6104_v56 = vsel %vm5505_vm7, %v785_v9, %v786_v3  ;;  %v4867_v53 = vrot.slane %v9644_v38, 13  ;;  %v6120_v31 = vsel %vm5505_vm7, %v794_v33, %v795_v7 }
 0x1a0   : > { %9645 = vst [vmem:[#allocation212_spill] sm:$0xff] %v6085_v55  ;;  %v791_v55 = vrot.slane %v789_v39, 2 }
 0x1a1   : > { %9646 = vst [vmem:[#allocation213_spill] sm:$0xff] %v6090_v4 }
 0x1a2   : > { %917 = vst [vmem:[#allocation1] ss:$4 sm:$0xff] %v6069_v62  ;;  %v797_v62 = vrot.slane %v795_v7, 2 }
 0x1a3   : > { %918 = vst [vmem:[#allocation1 + $0x1] ss:$4 sm:$0xff] %v6075_v46  ;;  %v6109_v46 = vsel %vm5505_vm7, %v788_v48, %v789_v39  ;;  %v9658_v48 = vld [vmem:[#allocation23_spill] sm:$0xff] }
 0x1a4   : > { %919 = vst [vmem:[#allocation1 + $0x2] ss:$4 sm:$0xff] %v6081_v6  ;;  %v6125_v9 = vsel %vm5505_vm7, %v797_v62, %v4867_v53 }
 0x1a5   : > { %920 = vst [vmem:[#allocation1 + $0x3] ss:$4 sm:$0xff] %v6090_v4  ;;  %v6115_v4 = vsel %vm5505_vm7, %v791_v55, %v792_v8  ;;  %v9657_v8 = vld [vmem:[#allocation18_spill] sm:$0xff] }
 0x1a6   : > { %9649 = vst [vmem:[#allocation214_spill] sm:$0xff] %v6100_v45  ;;  %v6111_v6 = vld.sshfl [vmem:[#allocation1 + $0x20] sm:$0xff pattern:$0x73625140]  ;;  %v458_v3 = vpack.c.bf16 %v9658_v48, %v9657_v8 }
 0x1a7   : > { %9650 = vst [vmem:[#allocation215_spill] sm:$0xff] %v6104_v56 }
 0x1a8   : > { %9651 = vst [vmem:[#allocation216_spill] sm:$0xff] %v6109_v46  ;;  %4883 = vmatmul.msk.bf16.gmra.mxu1 %vm970_vm8, %v458_v3 }
 0x1a9   : > { %9652 = vst [vmem:[#allocation217_spill] sm:$0xff] %v6111_v6 }
 0x1aa   : > { %9653 = vst [vmem:[#allocation218_spill] sm:$0xff] %v6115_v4 }
 0x1ab   : > { %921 = vst [vmem:[#allocation1 + $0x20] ss:$4 sm:$0xff] %v6100_v45 }
 0x1ac   : > { %9654 = vst [vmem:[#allocation219_spill] sm:$0xff] %v6120_v31  ;;  %v6129_v39 = vld.sshfl [vmem:[#allocation1] sm:$0xff pattern:$0x73625140] }
 0x1ad   : > { %922 = vst [vmem:[#allocation1 + $0x21] ss:$4 sm:$0xff] %v6104_v56 }
 0x1ae   : > { %9655 = vst [vmem:[#allocation220_spill] sm:$0xff] %v6125_v9 }
 0x1af   : > { %923 = vst [vmem:[#allocation1 + $0x22] ss:$4 sm:$0xff] %v6109_v46 }
 0x1b0   : > { %924 = vst [vmem:[#allocation1 + $0x23] ss:$4 sm:$0xff] %v6115_v4 }
 0x1b1   : > { %9656 = vst [vmem:[#allocation221_spill] sm:$0xff] %v6129_v39 }
 0x1b2   : > { %927 = vst [vmem:[#allocation1] ss:$4 sm:$0xff] %v6120_v31 }
 0x1b3   : > { %928 = vst [vmem:[#allocation1 + $0x1] ss:$4 sm:$0xff] %v6125_v9 }
 0x1b7   : > { %v6136_v55 = vld.sshfl [vmem:[#allocation1 + $0x20] sm:$0xff pattern:$0x73625140] }
 0x1b8   : > { %9659 = vst [vmem:[#allocation18_spill] sm:$0xff] %v6136_v55  ;;  %v9662_v55 = vld [vmem:[#allocation29_spill] sm:$0xff] }
 0x1b9   : > { %1203 = vst.sshfl [vmem:[#allocation1 + $0x20] sm:$0xff pattern:$0x73625140] %v9660_v14  ;;  %v9663_v14 = vld [vmem:[#allocation33_spill] sm:$0xff] }
 0x1ba   : > { %v6139_v53 = vld.sshfl [vmem:[#allocation1] sm:$0xff pattern:$0x73625140]  ;;  %v459_v6 = vpack.c.bf16 %v9663_v14, %v9662_v55  ;;  %v9665_v55 = vld [vmem:[#allocation38_spill] sm:$0xff] }
 0x1bb   : > { %9661 = vst [vmem:[#allocation23_spill] sm:$0xff] %v6139_v53  ;;  %v9664_v53 = vld [vmem:[#allocation3_spill] sm:$0xff] }
 0x1bc   : > { %1202 = vst.sshfl [vmem:[#allocation1] sm:$0xff pattern:$0x73625140] %v5063_v2  ;;  %4884 = vmatmul.msk.bf16.gmra.mxu1 %vm970_vm8, %v459_v6  ;;  %v9666_v6 = vld [vmem:[#allocation42_spill] sm:$0xff] }
 0x1bd   : > { %v460_v14 = vpack.c.bf16 %v9666_v6, %v9665_v55  ;;  %v963_v55 = vpack.c.bf16 %v6002_v19, %v5978_v58  ;;  %v9667_v19 = vld [vmem:[#allocation48_spill] sm:$0xff]  ;;  %v9668_v58 = vld [vmem:[#allocation53_spill] sm:$0xff] }
 0x1bf   : > { %4877 = vmatmul.msk.bf16.vlgmr.msra.gmra.mxu2 %vm970_vm8, %v963_v55 }
 0x1c0   : > { %v6142_v62 = vld [vmem:[#allocation1 + $0x20] ss:$4 sm:$0xff]  ;;  %v6144_v7 = vld [vmem:[#allocation1 + $0x21] ss:$4 sm:$0xff]  ;;  %v6146_v33 = vld [vmem:[#allocation1 + $0x22] ss:$4 sm:$0xff] }
 0x1c1   : > { %v6148_v39 = vld [vmem:[#allocation1 + $0x23] ss:$4 sm:$0xff] }
 0x1c2   : > { %1219 = vst.sshfl [vmem:[#allocation1 + $0x20] sm:$0xff pattern:$0x73625140] %v5099_v13 }
 0x1c3   : > { %v6150_v8 = vld [vmem:[#allocation1 + $0x1] ss:$4 sm:$0xff]  ;;  %v6152_v48 = vld [vmem:[#allocation1 + $0x2] ss:$4 sm:$0xff]  ;;  %v6154_v3 = vld [vmem:[#allocation1 + $0x3] ss:$4 sm:$0xff] }
 0x1c4   : > { %1218 = vst.sshfl [vmem:[#allocation1] sm:$0xff pattern:$0x73625140] %v9664_v53 }
 0x1c9   : > { %v6167_v4 = vld [vmem:[#allocation1 + $0x20] ss:$4 sm:$0xff]  ;;  %v6169_v60 = vld [vmem:[#allocation1 + $0x21] ss:$4 sm:$0xff]  ;;  %v6171_v46 = vld [vmem:[#allocation1 + $0x22] ss:$4 sm:$0xff] }
 0x1ca   : > { %v6173_v56 = vld [vmem:[#allocation1 + $0x23] ss:$4 sm:$0xff] }
 0x1cb   : > { %v6161_v2 = vld [vmem:[#allocation1 + $0x1] ss:$4 sm:$0xff]  ;;  %v6163_v9 = vld [vmem:[#allocation1 + $0x2] ss:$4 sm:$0xff]  ;;  %v6165_v31 = vld [vmem:[#allocation1 + $0x3] ss:$4 sm:$0xff] }
 0x1cc   : > { %1227 = vst.sshfl [vmem:[#allocation1] sm:$0xff pattern:$0x73625140] %v5112_v17  ;;  %4885 = vmatmul.msk.bf16.gmra.mxu1 %vm970_vm8, %v460_v14  ;;  %v461_v14 = vpack.c.bf16 %v9668_v58, %v9667_v19 }
 0x1cd   : > { %1228 = vst.sshfl [vmem:[#allocation1 + $0x20] sm:$0xff pattern:$0x73625140] %v5125_v20 }
 0x1d3   : > { %v6179_v45 = vld [vmem:[#allocation1 + $0x1] ss:$4 sm:$0xff]  ;;  %v6181_v41 = vld [vmem:[#allocation1 + $0x2] ss:$4 sm:$0xff]  ;;  %v6183_v5 = vld [vmem:[#allocation1 + $0x3] ss:$4 sm:$0xff] }
 0x1d4   : > { %v6185_v47 = vld [vmem:[#allocation1 + $0x20] ss:$4 sm:$0xff]  ;;  %v6187_v59 = vld [vmem:[#allocation1 + $0x21] ss:$4 sm:$0xff]  ;;  %v6189_v28 = vld [vmem:[#allocation1 + $0x22] ss:$4 sm:$0xff] }
 0x1d5   : > { %v6191_v37 = vld [vmem:[#allocation1 + $0x23] ss:$4 sm:$0xff]  ;;  %1236 = vst.sshfl [vmem:[#allocation1] sm:$0xff pattern:$0x73625140] %v5144_v26 }
 0x1d6   : > { %1237 = vst.sshfl [vmem:[#allocation1 + $0x20] sm:$0xff pattern:$0x73625140] %v5160_v30 }
 0x1dc   : > { %v6199_v6 = vld [vmem:[#allocation1 + $0x1] ss:$4 sm:$0xff]  ;;  %v6201_v36 = vld [vmem:[#allocation1 + $0x2] ss:$4 sm:$0xff]  ;;  %v6203_v34 = vld [vmem:[#allocation1 + $0x3] ss:$4 sm:$0xff]  ;;  %4886 = vmatmul.msk.bf16.gmra.mxu1 %vm970_vm8, %v461_v14 }
 0x1dd   : > { %v6205_v20 = vld [vmem:[#allocation1 + $0x20] ss:$4 sm:$0xff]  ;;  %v6207_v22 = vld [vmem:[#allocation1 + $0x21] ss:$4 sm:$0xff]  ;;  %v6209_v21 = vld [vmem:[#allocation1 + $0x22] ss:$4 sm:$0xff] }
 0x1de   : > { %v6211_v30 = vld [vmem:[#allocation1 + $0x23] ss:$4 sm:$0xff]  ;;  %1245 = vst.sshfl [vmem:[#allocation1] sm:$0xff pattern:$0x73625140] %v5168_v32 }
 0x1df   : > { %1246 = vst.sshfl [vmem:[#allocation1 + $0x20] sm:$0xff pattern:$0x73625140] %v5195_v40  ;;  %v9672_v14 = vld [vmem:[#allocation59_spill] sm:$0xff] }
 0x1e5   : > { %v6217_v55 = vld [vmem:[#allocation1 + $0x1] ss:$4 sm:$0xff]  ;;  %v6219_v27 = vld [vmem:[#allocation1 + $0x2] ss:$4 sm:$0xff]  ;;  %v6221_v26 = vld [vmem:[#allocation1 + $0x3] ss:$4 sm:$0xff] }
 0x1e6   : > { %v6223_v25 = vld [vmem:[#allocation1 + $0x20] ss:$4 sm:$0xff]  ;;  %v6225_v23 = vld [vmem:[#allocation1 + $0x21] ss:$4 sm:$0xff]  ;;  %v6227_v12 = vld [vmem:[#allocation1 + $0x22] ss:$4 sm:$0xff] }
 0x1e7   : > { %v6230_v32 = vld [vmem:[#allocation1 + $0x23] ss:$4 sm:$0xff]  ;;  %1254 = vst.sshfl [vmem:[#allocation1] sm:$0xff pattern:$0x73625140] %v5207_v43 }
 0x1e8   : > { %1255 = vst.sshfl [vmem:[#allocation1 + $0x20] sm:$0xff pattern:$0x73625140] %v5227_v49  ;;  %v9673_v49 = vld [vmem:[#allocation63_spill] sm:$0xff] }
 0x1e9   : > { %v462_v43 = vpack.c.bf16 %v9673_v49, %v9672_v14 }
 0x1ec   : > { %4887 = vmatmul.msk.bf16.gmra.mxu1 %vm970_vm8, %v462_v43 }
 0x1ee   : > { %v6234_v19 = vld [vmem:[#allocation1 + $0x1] ss:$4 sm:$0xff]  ;;  %v6236_v58 = vld [vmem:[#allocation1 + $0x2] ss:$4 sm:$0xff]  ;;  %v6238_v40 = vld [vmem:[#allocation1 + $0x3] ss:$4 sm:$0xff] }
 0x1ef   : > { %v6240_v11 = vld [vmem:[#allocation1 + $0x20] ss:$4 sm:$0xff]  ;;  %v6242_v10 = vld [vmem:[#allocation1 + $0x21] ss:$4 sm:$0xff]  ;;  %v6244_v53 = vld [vmem:[#allocation1 + $0x22] ss:$4 sm:$0xff] }
 0x1f0   : > { %9669 = vst [vmem:[#allocation2_spill] sm:$0xff] %v6242_v10  ;;  %v6246_v17 = vld [vmem:[#allocation1 + $0x23] ss:$4 sm:$0xff] }
 0x1f1   : > { %9670 = vst [vmem:[#allocation29_spill] sm:$0xff] %v6244_v53 }
 0x1f2   : > { %9671 = vst [vmem:[#allocation33_spill] sm:$0xff] %v6246_v17 }
 0x1f3   : > { %1263 = vst.sshfl [vmem:[#allocation1] sm:$0xff pattern:$0x73625140] %v5233_v50 }
 0x1f4   : > { %1264 = vst.sshfl [vmem:[#allocation1 + $0x20] sm:$0xff pattern:$0x73625140] %v5256_v57 }
 0x1fa   : > { %v6253_v16 = vld [vmem:[#allocation1 + $0x1] ss:$4 sm:$0xff]  ;;  %v6255_v15 = vld [vmem:[#allocation1 + $0x2] ss:$4 sm:$0xff]  ;;  %v6257_v13 = vld [vmem:[#allocation1 + $0x3] ss:$4 sm:$0xff] }
 0x1fb   : > { %9674 = vst [vmem:[#allocation38_spill] sm:$0xff] %v6257_v13  ;;  %v6259_v10 = vld [vmem:[#allocation1 + $0x20] ss:$4 sm:$0xff]  ;;  %v6261_v53 = vld [vmem:[#allocation1 + $0x21] ss:$4 sm:$0xff] }
 0x1fc   : > { %9675 = vst [vmem:[#allocation42_spill] sm:$0xff] %v6259_v10  ;;  %v6263_v17 = vld [vmem:[#allocation1 + $0x22] ss:$4 sm:$0xff]  ;;  %v6265_v50 = vld [vmem:[#allocation1 + $0x23] ss:$4 sm:$0xff] }
 0x1fd   : > { %9676 = vst [vmem:[#allocation48_spill] sm:$0xff] %v6261_v53 }
 0x1fe   : > { %1272 = vst.sshfl [vmem:[#allocation1] sm:$0xff pattern:$0x73625140] %v9559_v0 }
 0x1ff   : > { %1273 = vst.sshfl [vmem:[#allocation1 + $0x20] sm:$0xff pattern:$0x73625140] %v5279_v63 }
 0x205   : > { %v6269_v49 = vld [vmem:[#allocation1 + $0x1] ss:$4 sm:$0xff]  ;;  %v6271_v43 = vld [vmem:[#allocation1 + $0x2] ss:$4 sm:$0xff]  ;;  %v6273_v14 = vld [vmem:[#allocation1 + $0x3] ss:$4 sm:$0xff] }
 0x206   : > { %9677 = vst [vmem:[#allocation53_spill] sm:$0xff] %v6269_v49  ;;  %v6275_v57 = vld [vmem:[#allocation1 + $0x20] ss:$4 sm:$0xff]  ;;  %v6277_v13 = vld [vmem:[#allocation1 + $0x21] ss:$4 sm:$0xff] }
 0x207   : > { %9678 = vst [vmem:[#allocation59_spill] sm:$0xff] %v6271_v43  ;;  %v6279_v10 = vld [vmem:[#allocation1 + $0x22] ss:$4 sm:$0xff]  ;;  %v6281_v53 = vld [vmem:[#allocation1 + $0x23] ss:$4 sm:$0xff] }
 0x208   : > { %9679 = vst [vmem:[#allocation63_spill] sm:$0xff] %v6273_v14 }
 0x209   : > { %9680 = vst [vmem:[#allocation222_spill] sm:$0xff] %v6275_v57 }
 0x20a   : > { %9681 = vst [vmem:[#allocation223_spill] sm:$0xff] %v6277_v13 }
 0x20b   : > { %1281 = vst.sshfl [vmem:[#allocation1] sm:$0xff pattern:$0x73625140] %v9574_v35 }
 0x20c   : > { %1282 = vst.sshfl [vmem:[#allocation1 + $0x20] sm:$0xff pattern:$0x73625140] %v9564_v29 }
 0x212   : > { %v6285_v0 = vld [vmem:[#allocation1 + $0x1] ss:$4 sm:$0xff]  ;;  %v6287_v63 = vld [vmem:[#allocation1 + $0x2] ss:$4 sm:$0xff]  ;;  %v6289_v49 = vld [vmem:[#allocation1 + $0x3] ss:$4 sm:$0xff] }
 0x213   : > { %9682 = vst [vmem:[#allocation224_spill] sm:$0xff] %v6285_v0  ;;  %v6291_v43 = vld [vmem:[#allocation1 + $0x20] ss:$4 sm:$0xff]  ;;  %v6293_v14 = vld [vmem:[#allocation1 + $0x21] ss:$4 sm:$0xff] }
 0x214   : > { %9683 = vst [vmem:[#allocation225_spill] sm:$0xff] %v6287_v63  ;;  %v6295_v57 = vld [vmem:[#allocation1 + $0x22] ss:$4 sm:$0xff]  ;;  %v6297_v13 = vld [vmem:[#allocation1 + $0x23] ss:$4 sm:$0xff] }
 0x215   : > { %9684 = vst [vmem:[#allocation226_spill] sm:$0xff] %v6289_v49 }
 0x216   : > { %9685 = vst [vmem:[#allocation227_spill] sm:$0xff] %v6291_v43 }
 0x217   : > { %9686 = vst [vmem:[#allocation228_spill] sm:$0xff] %v6293_v14 }
 0x218   : > { %1290 = vst.sshfl [vmem:[#allocation1] sm:$0xff pattern:$0x73625140] %v9571_v18 }
 0x219   : > { %1291 = vst.sshfl [vmem:[#allocation1 + $0x20] sm:$0xff pattern:$0x73625140] %v9585_v61 }
 0x21f   : > { %v6301_v35 = vld [vmem:[#allocation1 + $0x1] ss:$4 sm:$0xff]  ;;  %v6303_v29 = vld [vmem:[#allocation1 + $0x2] ss:$4 sm:$0xff]  ;;  %v6305_v0 = vld [vmem:[#allocation1 + $0x3] ss:$4 sm:$0xff] }
 0x220   : > { %9687 = vst [vmem:[#allocation229_spill] sm:$0xff] %v6301_v35  ;;  %v6307_v63 = vld [vmem:[#allocation1 + $0x20] ss:$4 sm:$0xff]  ;;  %v6309_v49 = vld [vmem:[#allocation1 + $0x21] ss:$4 sm:$0xff] }
 0x221   : > { %9688 = vst [vmem:[#allocation230_spill] sm:$0xff] %v6303_v29  ;;  %v6311_v43 = vld [vmem:[#allocation1 + $0x22] ss:$4 sm:$0xff]  ;;  %v6313_v14 = vld [vmem:[#allocation1 + $0x23] ss:$4 sm:$0xff] }
 0x222   : > { %9689 = vst [vmem:[#allocation231_spill] sm:$0xff] %v6305_v0 }
 0x223   : > { %9690 = vst [vmem:[#allocation232_spill] sm:$0xff] %v6307_v63 }
 0x224   : > { %9691 = vst [vmem:[#allocation233_spill] sm:$0xff] %v6309_v49 }
 0x225   : > { %1299 = vst.sshfl [vmem:[#allocation1] sm:$0xff pattern:$0x73625140] %v9597_v51 }
 0x226   : > { %1300 = vst.sshfl [vmem:[#allocation1 + $0x20] sm:$0xff pattern:$0x73625140] %v9595_v44 }
 0x22c   : > { %v6317_v18 = vld [vmem:[#allocation1 + $0x1] ss:$4 sm:$0xff]  ;;  %v6319_v61 = vld [vmem:[#allocation1 + $0x2] ss:$4 sm:$0xff]  ;;  %v6321_v35 = vld [vmem:[#allocation1 + $0x3] ss:$4 sm:$0xff] }
 0x22d   : > { %9692 = vst [vmem:[#allocation234_spill] sm:$0xff] %v6317_v18  ;;  %v6323_v29 = vld [vmem:[#allocation1 + $0x20] ss:$4 sm:$0xff]  ;;  %v6325_v0 = vld [vmem:[#allocation1 + $0x21] ss:$4 sm:$0xff] }
 0x22e   : > { %9693 = vst [vmem:[#allocation235_spill] sm:$0xff] %v6319_v61  ;;  %v6327_v63 = vld [vmem:[#allocation1 + $0x22] ss:$4 sm:$0xff]  ;;  %v6329_v49 = vld [vmem:[#allocation1 + $0x23] ss:$4 sm:$0xff] }
 0x22f   : > { %9694 = vst [vmem:[#allocation236_spill] sm:$0xff] %v6321_v35 }
 0x230   : > { %9695 = vst [vmem:[#allocation237_spill] sm:$0xff] %v6323_v29 }
 0x231   : > { %9696 = vst [vmem:[#allocation238_spill] sm:$0xff] %v6325_v0 }
 0x232   : > { %1308 = vst.sshfl [vmem:[#allocation1] sm:$0xff pattern:$0x73625140] %v9609_v1 }
 0x233   : > { %1309 = vst.sshfl [vmem:[#allocation1 + $0x20] sm:$0xff pattern:$0x73625140] %v9611_v24 }
 0x239   : > { %v6333_v51 = vld [vmem:[#allocation1 + $0x1] ss:$4 sm:$0xff]  ;;  %v6335_v44 = vld [vmem:[#allocation1 + $0x2] ss:$4 sm:$0xff]  ;;  %v6337_v18 = vld [vmem:[#allocation1 + $0x3] ss:$4 sm:$0xff] }
 0x23a   : > { %9697 = vst [vmem:[#allocation239_spill] sm:$0xff] %v6333_v51  ;;  %v6339_v61 = vld [vmem:[#allocation1 + $0x20] ss:$4 sm:$0xff]  ;;  %v6341_v35 = vld [vmem:[#allocation1 + $0x21] ss:$4 sm:$0xff] }
 0x23b   : > { %9698 = vst [vmem:[#allocation240_spill] sm:$0xff] %v6335_v44  ;;  %v6343_v29 = vld [vmem:[#allocation1 + $0x22] ss:$4 sm:$0xff]  ;;  %v6345_v0 = vld [vmem:[#allocation1 + $0x23] ss:$4 sm:$0xff] }
 0x23c   : > { %9699 = vst [vmem:[#allocation241_spill] sm:$0xff] %v6337_v18 }
 0x23d   : > { %9700 = vst [vmem:[#allocation242_spill] sm:$0xff] %v6339_v61 }
 0x23e   : > { %9701 = vst [vmem:[#allocation243_spill] sm:$0xff] %v6341_v35 }
 0x23f   : > { %1317 = vst.sshfl [vmem:[#allocation1] sm:$0xff pattern:$0x73625140] %v9626_v54 }
 0x240   : > { %1318 = vst.sshfl [vmem:[#allocation1 + $0x20] sm:$0xff pattern:$0x73625140] %v9627_v42 }
 0x246   : > { %v6349_v1 = vld [vmem:[#allocation1 + $0x1] ss:$4 sm:$0xff]  ;;  %v6351_v24 = vld [vmem:[#allocation1 + $0x2] ss:$4 sm:$0xff]  ;;  %v6353_v51 = vld [vmem:[#allocation1 + $0x3] ss:$4 sm:$0xff] }
 0x247   : > { %9702 = vst [vmem:[#allocation244_spill] sm:$0xff] %v6351_v24  ;;  %v6355_v44 = vld [vmem:[#allocation1 + $0x20] ss:$4 sm:$0xff]  ;;  %v6357_v18 = vld [vmem:[#allocation1 + $0x21] ss:$4 sm:$0xff] }
 0x248   : > { %9703 = vst [vmem:[#allocation245_spill] sm:$0xff] %v6353_v51  ;;  %v6359_v61 = vld [vmem:[#allocation1 + $0x22] ss:$4 sm:$0xff]  ;;  %v6361_v35 = vld [vmem:[#allocation1 + $0x23] ss:$4 sm:$0xff] }
 0x249   : > { %9704 = vst [vmem:[#allocation246_spill] sm:$0xff] %v6357_v18 }
 0x24a   : > { %9705 = vst [vmem:[#allocation247_spill] sm:$0xff] %v6361_v35 }
 0x24b   : > { %1326 = vst.sshfl [vmem:[#allocation1] sm:$0xff pattern:$0x73625140] %v9637_v52 }
 0x24c   : > { %1327 = vst.sshfl [vmem:[#allocation1 + $0x20] sm:$0xff pattern:$0x73625140] %v9644_v38 }
 0x24d   : > { %1335 = vst [vmem:[#allocation1] ss:$4 sm:$0xff] %v6150_v8 }
 0x252   : > { %v6366_v42 = vld [vmem:[#allocation1 + $0x1] ss:$4 sm:$0xff]  ;;  %v6368_v54 = vld [vmem:[#allocation1 + $0x2] ss:$4 sm:$0xff]  ;;  %v6370_v24 = vld [vmem:[#allocation1 + $0x3] ss:$4 sm:$0xff] }
 0x253   : > { %v6372_v51 = vld [vmem:[#allocation1 + $0x20] ss:$4 sm:$0xff]  ;;  %1337 = vst [vmem:[#allocation1 + $0x1] ss:$4 sm:$0xff] %v6152_v48  ;;  %v6375_v18 = vld [vmem:[#allocation1 + $0x21] ss:$4 sm:$0xff] }
 0x254   : > { %1339 = vst [vmem:[#allocation1 + $0x2] ss:$4 sm:$0xff] %v6154_v3  ;;  %v6378_v35 = vld [vmem:[#allocation1 + $0x22] ss:$4 sm:$0xff]  ;;  %v6381_v38 = vld [vmem:[#allocation1 + $0x23] ss:$4 sm:$0xff] }
 0x255   : > { %1341 = vst [vmem:[#allocation1 + $0x3] ss:$4 sm:$0xff] %v6142_v62  ;;  %v9728_v62 = vld [vmem:[#allocation233_spill] sm:$0xff] }
 0x256   : > { %1343 = vst [vmem:[#allocation1 + $0x20] ss:$4 sm:$0xff] %v6144_v7  ;;  %v9733_v3 = vld [vmem:[#allocation237_spill] sm:$0xff] }
 0x257   : > { %1345 = vst [vmem:[#allocation1 + $0x21] ss:$4 sm:$0xff] %v6146_v33  ;;  %v9732_v33 = vld [vmem:[#allocation236_spill] sm:$0xff] }
 0x258   : > { %1347 = vst [vmem:[#allocation1 + $0x22] ss:$4 sm:$0xff] %v6148_v39 }
 0x259   : > { %1349 = vst [vmem:[#allocation1 + $0x23] ss:$4 sm:$0xff] %v6161_v2  ;;  %v9734_v2 = vld [vmem:[#allocation238_spill] sm:$0xff] }
 0x25c   : > { %v6387_v8 = vld.sshfl [vmem:[#allocation1] sm:$0xff pattern:$0x73625140] }
 0x25d   : > { %1352 = vst [vmem:[#allocation1] ss:$4 sm:$0xff] %v6163_v9  ;;  %v9726_v9 = vld [vmem:[#allocation232_spill] sm:$0xff] }
 0x25e   : > { %1353 = vst [vmem:[#allocation1 + $0x1] ss:$4 sm:$0xff] %v6165_v31  ;;  %v9725_v31 = vld [vmem:[#allocation231_spill] sm:$0xff] }
 0x25f   : > { %1354 = vst [vmem:[#allocation1 + $0x2] ss:$4 sm:$0xff] %v6167_v4 }
 0x260   : > { %v6392_v48 = vld.sshfl [vmem:[#allocation1 + $0x20] sm:$0xff pattern:$0x73625140]  ;;  %1355 = vst [vmem:[#allocation1 + $0x3] ss:$4 sm:$0xff] %v6169_v60 }
 0x261   : > { %1356 = vst [vmem:[#allocation1 + $0x20] ss:$4 sm:$0xff] %v6171_v46 }
 0x262   : > { %1357 = vst [vmem:[#allocation1 + $0x21] ss:$4 sm:$0xff] %v6173_v56  ;;  %v9724_v56 = vld [vmem:[#allocation230_spill] sm:$0xff] }
 0x263   : > { %1358 = vst [vmem:[#allocation1 + $0x22] ss:$4 sm:$0xff] %v6179_v45 }
 0x264   : > { %1359 = vst [vmem:[#allocation1 + $0x23] ss:$4 sm:$0xff] %v6181_v41  ;;  %v9721_v41 = vld [vmem:[#allocation228_spill] sm:$0xff] }
 0x267   : > { %v6399_v39 = vld.sshfl [vmem:[#allocation1] sm:$0xff pattern:$0x73625140] }
 0x268   : > { %1362 = vst [vmem:[#allocation1] ss:$4 sm:$0xff] %v6183_v5  ;;  %v9720_v5 = vld [vmem:[#allocation227_spill] sm:$0xff] }
 0x269   : > { %1363 = vst [vmem:[#allocation1 + $0x1] ss:$4 sm:$0xff] %v6185_v47  ;;  %v9719_v47 = vld [vmem:[#allocation226_spill] sm:$0xff] }
 0x26a   : > { %1364 = vst [vmem:[#allocation1 + $0x2] ss:$4 sm:$0xff] %v6187_v59 }
 0x26b   : > { %v6404_v4 = vld.sshfl [vmem:[#allocation1 + $0x20] sm:$0xff pattern:$0x73625140]  ;;  %1365 = vst [vmem:[#allocation1 + $0x3] ss:$4 sm:$0xff] %v6189_v28 }
 0x26c   : > { %1366 = vst [vmem:[#allocation1 + $0x20] ss:$4 sm:$0xff] %v6191_v37  ;;  %v9716_v37 = vld [vmem:[#allocation223_spill] sm:$0xff] }
 0x26d   : > { %1367 = vst [vmem:[#allocation1 + $0x21] ss:$4 sm:$0xff] %v6199_v6 }
 0x26e   : > { %1368 = vst [vmem:[#allocation1 + $0x22] ss:$4 sm:$0xff] %v6201_v36  ;;  %v9714_v36 = vld [vmem:[#allocation63_spill] sm:$0xff] }
 0x26f   : > { %1369 = vst [vmem:[#allocation1 + $0x23] ss:$4 sm:$0xff] %v6203_v34  ;;  %v9713_v34 = vld [vmem:[#allocation59_spill] sm:$0xff] }
 0x272   : > { %v6411_v60 = vld.sshfl [vmem:[#allocation1] sm:$0xff pattern:$0x73625140] }
 0x273   : > { %1372 = vst [vmem:[#allocation1] ss:$4 sm:$0xff] %v6205_v20 }
 0x274   : > { %1373 = vst [vmem:[#allocation1 + $0x1] ss:$4 sm:$0xff] %v6207_v22 }
 0x275   : > { %1374 = vst [vmem:[#allocation1 + $0x2] ss:$4 sm:$0xff] %v6209_v21  ;;  %v9706_v21 = vld [vmem:[#allocation2_spill] sm:$0xff] }
 0x276   : > { %v6416_v59 = vld.sshfl [vmem:[#allocation1 + $0x20] sm:$0xff pattern:$0x73625140]  ;;  %1375 = vst [vmem:[#allocation1 + $0x3] ss:$4 sm:$0xff] %v6211_v30  ;;  %v9711_v30 = vld [vmem:[#allocation48_spill] sm:$0xff] }
 0x277   : > { %1376 = vst [vmem:[#allocation1 + $0x20] ss:$4 sm:$0xff] %v6217_v55  ;;  %v9736_v55 = vld [vmem:[#allocation239_spill] sm:$0xff] }
 0x278   : > { %1377 = vst [vmem:[#allocation1 + $0x21] ss:$4 sm:$0xff] %v6219_v27  ;;  %v9710_v27 = vld [vmem:[#allocation42_spill] sm:$0xff] }
 0x279   : > { %1378 = vst [vmem:[#allocation1 + $0x22] ss:$4 sm:$0xff] %v6221_v26  ;;  %v9709_v26 = vld [vmem:[#allocation38_spill] sm:$0xff] }
 0x27a   : > { %1379 = vst [vmem:[#allocation1 + $0x23] ss:$4 sm:$0xff] %v6223_v25  ;;  %v9707_v25 = vld [vmem:[#allocation29_spill] sm:$0xff] }
 0x27d   : > { %v6423_v28 = vld.sshfl [vmem:[#allocation1] sm:$0xff pattern:$0x73625140] }
 0x27e   : > { %1382 = vst [vmem:[#allocation1] ss:$4 sm:$0xff] %v6225_v23  ;;  %v9708_v23 = vld [vmem:[#allocation33_spill] sm:$0xff] }
 0x27f   : > { %1383 = vst [vmem:[#allocation1 + $0x1] ss:$4 sm:$0xff] %v6227_v12 }
 0x280   : > { %1384 = vst [vmem:[#allocation1 + $0x2] ss:$4 sm:$0xff] %v6230_v32  ;;  %v9712_v32 = vld [vmem:[#allocation53_spill] sm:$0xff] }
 0x281   : > { %v6428_v20 = vld.sshfl [vmem:[#allocation1 + $0x20] sm:$0xff pattern:$0x73625140]  ;;  %1385 = vst [vmem:[#allocation1 + $0x3] ss:$4 sm:$0xff] %v6234_v19  ;;  %v9737_v19 = vld [vmem:[#allocation240_spill] sm:$0xff] }
 0x282   : > { %1386 = vst [vmem:[#allocation1 + $0x20] ss:$4 sm:$0xff] %v6236_v58  ;;  %v9738_v58 = vld [vmem:[#allocation241_spill] sm:$0xff] }
 0x283   : > { %1387 = vst [vmem:[#allocation1 + $0x21] ss:$4 sm:$0xff] %v6238_v40  ;;  %v9717_v40 = vld [vmem:[#allocation224_spill] sm:$0xff] }
 0x284   : > { %1388 = vst [vmem:[#allocation1 + $0x22] ss:$4 sm:$0xff] %v6240_v11 }
 0x285   : > { %1389 = vst [vmem:[#allocation1 + $0x23] ss:$4 sm:$0xff] %v9706_v21  ;;  %v9741_v21 = vld [vmem:[#allocation243_spill] sm:$0xff] }
 0x288   : > { %v6435_v22 = vld.sshfl [vmem:[#allocation1] sm:$0xff pattern:$0x73625140] }
 0x289   : > { %1392 = vst [vmem:[#allocation1] ss:$4 sm:$0xff] %v9707_v25 }
 0x28a   : > { %1393 = vst [vmem:[#allocation1 + $0x1] ss:$4 sm:$0xff] %v9708_v23 }
 0x28b   : > { %1394 = vst [vmem:[#allocation1 + $0x2] ss:$4 sm:$0xff] %v6253_v16 }
 0x28c   : > { %v6440_v12 = vld.sshfl [vmem:[#allocation1 + $0x20] sm:$0xff pattern:$0x73625140]  ;;  %1395 = vst [vmem:[#allocation1 + $0x3] ss:$4 sm:$0xff] %v6255_v15  ;;  %v9715_v15 = vld [vmem:[#allocation222_spill] sm:$0xff] }
 0x28d   : > { %1396 = vst [vmem:[#allocation1 + $0x20] ss:$4 sm:$0xff] %v9709_v26  ;;  %v9746_v26 = vld [vmem:[#allocation246_spill] sm:$0xff] }
 0x28e   : > { %1397 = vst [vmem:[#allocation1 + $0x21] ss:$4 sm:$0xff] %v9710_v27  ;;  %v9747_v27 = vld [vmem:[#allocation247_spill] sm:$0xff] }
 0x28f   : > { %1398 = vst [vmem:[#allocation1 + $0x22] ss:$4 sm:$0xff] %v9711_v30  ;;  %v9758_v30 = vld [vmem:[#allocation5_spill] sm:$0xff] }
 0x290   : > { %1399 = vst [vmem:[#allocation1 + $0x23] ss:$4 sm:$0xff] %v6263_v17 }
 0x293   : > { %v6447_v11 = vld.sshfl [vmem:[#allocation1] sm:$0xff pattern:$0x73625140] }
 0x294   : > { %1402 = vst [vmem:[#allocation1] ss:$4 sm:$0xff] %v6265_v50  ;;  %v9718_v50 = vld [vmem:[#allocation225_spill] sm:$0xff] }
 0x295   : > { %1403 = vst [vmem:[#allocation1 + $0x1] ss:$4 sm:$0xff] %v9712_v32  ;;  %v9760_v32 = vld [vmem:[#allocation17_spill] sm:$0xff] }
 0x296   : > { %1404 = vst [vmem:[#allocation1 + $0x2] ss:$4 sm:$0xff] %v9713_v34  ;;  %v9761_v34 = vld [vmem:[#allocation19_spill] sm:$0xff] }
 0x297   : > { %v6452_v16 = vld.sshfl [vmem:[#allocation1 + $0x20] sm:$0xff pattern:$0x73625140]  ;;  %1405 = vst [vmem:[#allocation1 + $0x3] ss:$4 sm:$0xff] %v9714_v36  ;;  %v9762_v36 = vld [vmem:[#allocation20_spill] sm:$0xff] }
 0x298   : > { %1406 = vst [vmem:[#allocation1 + $0x20] ss:$4 sm:$0xff] %v9715_v15  ;;  %v9763_v15 = vld [vmem:[#allocation21_spill] sm:$0xff] }
 0x299   : > { %1407 = vst [vmem:[#allocation1 + $0x21] ss:$4 sm:$0xff] %v9716_v37 }
 0x29a   : > { %1408 = vst [vmem:[#allocation1 + $0x22] ss:$4 sm:$0xff] %v6279_v10  ;;  %v9722_v10 = vld [vmem:[#allocation229_spill] sm:$0xff] }
 0x29b   : > { %1409 = vst [vmem:[#allocation1 + $0x23] ss:$4 sm:$0xff] %v6281_v53 }
 0x29e   : > { %v6459_v17 = vld.sshfl [vmem:[#allocation1] sm:$0xff pattern:$0x73625140] }
 0x29f   : > { %1412 = vst [vmem:[#allocation1] ss:$4 sm:$0xff] %v9717_v40  ;;  %v9764_v40 = vld [vmem:[#allocation12_spill] sm:$0xff] }
 0x2a0   : > { %1413 = vst [vmem:[#allocation1 + $0x1] ss:$4 sm:$0xff] %v9718_v50  ;;  %v9765_v50 = vld [vmem:[#allocation15_spill] sm:$0xff] }
 0x2a1   : > { %1414 = vst [vmem:[#allocation1 + $0x2] ss:$4 sm:$0xff] %v9719_v47  ;;  %v9766_v47 = vld [vmem:[#allocation16_spill] sm:$0xff] }
 0x2a2   : > { %v6464_v46 = vld.sshfl [vmem:[#allocation1 + $0x20] sm:$0xff pattern:$0x73625140]  ;;  %1415 = vst [vmem:[#allocation1 + $0x3] ss:$4 sm:$0xff] %v9720_v5  ;;  %v9767_v5 = vld [vmem:[#allocation14_spill] sm:$0xff] }
 0x2a3   : > { %1416 = vst [vmem:[#allocation1 + $0x20] ss:$4 sm:$0xff] %v9721_v41 }
 0x2a4   : > { %1417 = vst [vmem:[#allocation1 + $0x21] ss:$4 sm:$0xff] %v6295_v57  ;;  %v9729_v57 = vld [vmem:[#allocation234_spill] sm:$0xff] }
 0x2a5   : > { %1418 = vst [vmem:[#allocation1 + $0x22] ss:$4 sm:$0xff] %v6297_v13  ;;  %v9730_v13 = vld [vmem:[#allocation235_spill] sm:$0xff] }
 0x2a6   : > { %1419 = vst [vmem:[#allocation1 + $0x23] ss:$4 sm:$0xff] %v9722_v10  ;;  %v9769_v10 = vld [vmem:[#allocation28_spill] sm:$0xff] }
 0x2a9   : > { %v6471_v45 = vld.sshfl [vmem:[#allocation1] sm:$0xff pattern:$0x73625140] }
 0x2aa   : > { %9723 = vst [vmem:[#allocation2_spill] sm:$0xff] %v6471_v45  ;;  %v9976_v45 = vld [vmem:[#allocation8_spill] sm:$0xff] }
 0x2ab   : > { %1422 = vst [vmem:[#allocation1] ss:$4 sm:$0xff] %v9724_v56  ;;  %v9770_v56 = vld [vmem:[#allocation26_spill] sm:$0xff] }
 0x2ac   : > { %1423 = vst [vmem:[#allocation1 + $0x1] ss:$4 sm:$0xff] %v9725_v31  ;;  %v9771_v31 = vld [vmem:[#allocation30_spill] sm:$0xff] }
 0x2ad   : > { %1424 = vst [vmem:[#allocation1 + $0x2] ss:$4 sm:$0xff] %v9726_v9  ;;  %v6476_v53 = vld.sshfl [vmem:[#allocation1 + $0x20] sm:$0xff pattern:$0x73625140]  ;;  %v9772_v9 = vld [vmem:[#allocation31_spill] sm:$0xff] }
 0x2ae   : > { %9727 = vst [vmem:[#allocation29_spill] sm:$0xff] %v6476_v53 }
 0x2af   : > { %1425 = vst [vmem:[#allocation1 + $0x3] ss:$4 sm:$0xff] %v9728_v62 }
 0x2b0   : > { %1426 = vst [vmem:[#allocation1 + $0x20] ss:$4 sm:$0xff] %v6311_v43 }
 0x2b1   : > { %1427 = vst [vmem:[#allocation1 + $0x21] ss:$4 sm:$0xff] %v6313_v14  ;;  %v9740_v14 = vld [vmem:[#allocation242_spill] sm:$0xff] }
 0x2b2   : > { %1428 = vst [vmem:[#allocation1 + $0x22] ss:$4 sm:$0xff] %v9729_v57  ;;  %v9774_v57 = vld [vmem:[#allocation22_spill] sm:$0xff] }
 0x2b3   : > { %1429 = vst [vmem:[#allocation1 + $0x23] ss:$4 sm:$0xff] %v9730_v13  ;;  %v9775_v13 = vld [vmem:[#allocation25_spill] sm:$0xff] }
 0x2b6   : > { %v6483_v7 = vld.sshfl [vmem:[#allocation1] sm:$0xff pattern:$0x73625140] }
 0x2b7   : > { %9731 = vst [vmem:[#allocation33_spill] sm:$0xff] %v6483_v7 }
 0x2b8   : > { %1432 = vst [vmem:[#allocation1] ss:$4 sm:$0xff] %v9732_v33  ;;  %v9776_v33 = vld [vmem:[#allocation24_spill] sm:$0xff] }
 0x2b9   : > { %1433 = vst [vmem:[#allocation1 + $0x1] ss:$4 sm:$0xff] %v9733_v3  ;;  %v9777_v3 = vld [vmem:[#allocation27_spill] sm:$0xff] }
 0x2ba   : > { %1434 = vst [vmem:[#allocation1 + $0x2] ss:$4 sm:$0xff] %v9734_v2  ;;  %v6488_v6 = vld.sshfl [vmem:[#allocation1 + $0x20] sm:$0xff pattern:$0x73625140] }
 0x2bb   : > { %9735 = vst [vmem:[#allocation38_spill] sm:$0xff] %v6488_v6  ;;  %v9884_v6 = vld [vmem:[#allocation133_spill] sm:$0xff] }
 0x2bc   : > { %1435 = vst [vmem:[#allocation1 + $0x3] ss:$4 sm:$0xff] %v6327_v63  ;;  %v9743_v63 = vld [vmem:[#allocation244_spill] sm:$0xff] }
 0x2bd   : > { %1436 = vst [vmem:[#allocation1 + $0x20] ss:$4 sm:$0xff] %v6329_v49  ;;  %v9744_v49 = vld [vmem:[#allocation245_spill] sm:$0xff] }
 0x2be   : > { %1437 = vst [vmem:[#allocation1 + $0x21] ss:$4 sm:$0xff] %v9736_v55  ;;  %v9779_v55 = vld [vmem:[#allocation37_spill] sm:$0xff] }
 0x2bf   : > { %1438 = vst [vmem:[#allocation1 + $0x22] ss:$4 sm:$0xff] %v9737_v19  ;;  %v9780_v19 = vld [vmem:[#allocation39_spill] sm:$0xff] }
 0x2c0   : > { %1439 = vst [vmem:[#allocation1 + $0x23] ss:$4 sm:$0xff] %v9738_v58  ;;  %v9781_v58 = vld [vmem:[#allocation40_spill] sm:$0xff] }
 0x2c3   : > { %v6495_v43 = vld.sshfl [vmem:[#allocation1] sm:$0xff pattern:$0x73625140] }
 0x2c4   : > { %9739 = vst [vmem:[#allocation42_spill] sm:$0xff] %v6495_v43  ;;  %v9873_v43 = vld [vmem:[#allocation123_spill] sm:$0xff] }
 0x2c5   : > { %1442 = vst [vmem:[#allocation1] ss:$4 sm:$0xff] %v9740_v14  ;;  %v9782_v14 = vld [vmem:[#allocation41_spill] sm:$0xff] }
 0x2c6   : > { %1443 = vst [vmem:[#allocation1 + $0x1] ss:$4 sm:$0xff] %v9741_v21 }
 0x2c7   : > { %1444 = vst [vmem:[#allocation1 + $0x2] ss:$4 sm:$0xff] %v6343_v29  ;;  %v6500_v25 = vld.sshfl [vmem:[#allocation1 + $0x20] sm:$0xff pattern:$0x73625140] }
 0x2c8   : > { %9742 = vst [vmem:[#allocation48_spill] sm:$0xff] %v6500_v25 }
 0x2c9   : > { %1445 = vst [vmem:[#allocation1 + $0x3] ss:$4 sm:$0xff] %v6345_v0 }
 0x2ca   : > { %1446 = vst [vmem:[#allocation1 + $0x20] ss:$4 sm:$0xff] %v6349_v1  ;;  %v9752_v1 = vld [vmem:[#allocation9_spill] sm:$0xff] }
 0x2cb   : > { %1447 = vst [vmem:[#allocation1 + $0x21] ss:$4 sm:$0xff] %v9743_v63  ;;  %v9784_v63 = vld [vmem:[#allocation32_spill] sm:$0xff] }
 0x2cc   : > { %1448 = vst [vmem:[#allocation1 + $0x22] ss:$4 sm:$0xff] %v9744_v49  ;;  %v9785_v49 = vld [vmem:[#allocation34_spill] sm:$0xff] }
 0x2cd   : > { %1449 = vst [vmem:[#allocation1 + $0x23] ss:$4 sm:$0xff] %v6355_v44 }
 0x2d0   : > { %v6507_v23 = vld.sshfl [vmem:[#allocation1] sm:$0xff pattern:$0x73625140] }
 0x2d1   : > { %9745 = vst [vmem:[#allocation53_spill] sm:$0xff] %v6507_v23  ;;  %v9868_v23 = vld [vmem:[#allocation130_spill] sm:$0xff] }
 0x2d2   : > { %1452 = vst [vmem:[#allocation1] ss:$4 sm:$0xff] %v9746_v26  ;;  %v9786_v26 = vld [vmem:[#allocation35_spill] sm:$0xff] }
 0x2d3   : > { %1453 = vst [vmem:[#allocation1 + $0x1] ss:$4 sm:$0xff] %v6359_v61  ;;  %v9751_v61 = vld [vmem:[#allocation7_spill] sm:$0xff] }
 0x2d4   : > { %1454 = vst [vmem:[#allocation1 + $0x2] ss:$4 sm:$0xff] %v9747_v27  ;;  %v6512_v29 = vld.sshfl [vmem:[#allocation1 + $0x20] sm:$0xff pattern:$0x73625140]  ;;  %v9787_v27 = vld [vmem:[#allocation36_spill] sm:$0xff] }
 0x2d5   : > { %9748 = vst [vmem:[#allocation59_spill] sm:$0xff] %v6512_v29  ;;  %v9866_v29 = vld [vmem:[#allocation115_spill] sm:$0xff] }
 0x2d6   : > { %1455 = vst [vmem:[#allocation1 + $0x3] ss:$4 sm:$0xff] %v6366_v42  ;;  %v9753_v42 = vld [vmem:[#allocation10_spill] sm:$0xff] }
 0x2d7   : > { %1456 = vst [vmem:[#allocation1 + $0x20] ss:$4 sm:$0xff] %v6368_v54  ;;  %v9754_v54 = vld [vmem:[#allocation11_spill] sm:$0xff] }
 0x2d8   : > { %1457 = vst [vmem:[#allocation1 + $0x21] ss:$4 sm:$0xff] %v6370_v24 }
 0x2d9   : > { %1458 = vst [vmem:[#allocation1 + $0x22] ss:$4 sm:$0xff] %v6372_v51  ;;  %v9756_v51 = vld [vmem:[#allocation3_spill] sm:$0xff] }
 0x2da   : > { %1459 = vst [vmem:[#allocation1 + $0x23] ss:$4 sm:$0xff] %v6375_v18  ;;  %v9757_v18 = vld [vmem:[#allocation4_spill] sm:$0xff] }
 0x2dd   : > { %v6519_v0 = vld.sshfl [vmem:[#allocation1] sm:$0xff pattern:$0x73625140] }
 0x2de   : > { %9749 = vst [vmem:[#allocation63_spill] sm:$0xff] %v6519_v0  ;;  %v9847_v0 = vld [vmem:[#allocation97_spill] sm:$0xff] }
 0x2df   : > { %1462 = vst [vmem:[#allocation1] ss:$4 sm:$0xff] %v6378_v35  ;;  %v9759_v35 = vld [vmem:[#allocation6_spill] sm:$0xff] }
 0x2e0   : > { %1463 = vst [vmem:[#allocation1 + $0x1] ss:$4 sm:$0xff] %v6381_v38 }
 0x2e1   : > { %v6523_v44 = vld.sshfl [vmem:[#allocation1 + $0x20] sm:$0xff pattern:$0x73625140] }
 0x2e2   : > { %9750 = vst [vmem:[#allocation222_spill] sm:$0xff] %v6523_v44  ;;  %v9835_v44 = vld [vmem:[#allocation85_spill] sm:$0xff] }
 0x2e3   : > { %1660 = vst [vmem:[#allocation1 + $0x20] ss:$4 sm:$0xff] %v9751_v61 }
 0x2e4   : > { %1662 = vst [vmem:[#allocation1 + $0x21] ss:$4 sm:$0xff] %v9752_v1 }
 0x2e5   : > { %1664 = vst [vmem:[#allocation1 + $0x22] ss:$4 sm:$0xff] %v9753_v42  ;;  %v9789_v42 = vld [vmem:[#allocation47_spill] sm:$0xff] }
 0x2e6   : > { %1666 = vst [vmem:[#allocation1 + $0x23] ss:$4 sm:$0xff] %v9754_v54 }
 0x2e7   : > { %v6529_v24 = vld.sshfl [vmem:[#allocation1] sm:$0xff pattern:$0x73625140] }
 0x2e8   : > { %9755 = vst [vmem:[#allocation223_spill] sm:$0xff] %v6529_v24  ;;  %v9826_v24 = vld [vmem:[#allocation75_spill] sm:$0xff] }
 0x2e9   : > { %1652 = vst [vmem:[#allocation1] ss:$4 sm:$0xff] %v9756_v51 }
 0x2ea   : > { %1654 = vst [vmem:[#allocation1 + $0x1] ss:$4 sm:$0xff] %v9757_v18  ;;  %v9790_v18 = vld [vmem:[#allocation49_spill] sm:$0xff] }
 0x2eb   : > { %1656 = vst [vmem:[#allocation1 + $0x2] ss:$4 sm:$0xff] %v9758_v30  ;;  %v9791_v30 = vld [vmem:[#allocation50_spill] sm:$0xff] }
 0x2ec   : > { %1658 = vst [vmem:[#allocation1 + $0x3] ss:$4 sm:$0xff] %v9759_v35  ;;  %v9792_v35 = vld [vmem:[#allocation51_spill] sm:$0xff] }
 0x2ed   : > { %v6535_v38 = vld.sshfl [vmem:[#allocation1 + $0x20] sm:$0xff pattern:$0x73625140] }
 0x2ee   : > { %1673 = vst [vmem:[#allocation1 + $0x20] ss:$4 sm:$0xff] %v9760_v32  ;;  %v9809_v32 = vld [vmem:[#allocation68_spill] sm:$0xff] }
 0x2ef   : > { %1674 = vst [vmem:[#allocation1 + $0x21] ss:$4 sm:$0xff] %v9761_v34 }
 0x2f0   : > { %1675 = vst [vmem:[#allocation1 + $0x22] ss:$4 sm:$0xff] %v9762_v36 }
 0x2f1   : > { %1676 = vst [vmem:[#allocation1 + $0x23] ss:$4 sm:$0xff] %v9763_v15  ;;  %v9817_v15 = vld [vmem:[#allocation67_spill] sm:$0xff] }
 0x2f3   : > { %v6541_v37 = vld.sshfl [vmem:[#allocation1] sm:$0xff pattern:$0x73625140] }
 0x2f4   : > { %1669 = vst [vmem:[#allocation1] ss:$4 sm:$0xff] %v9764_v40  ;;  %v9824_v40 = vld [vmem:[#allocation73_spill] sm:$0xff] }
 0x2f5   : > { %1670 = vst [vmem:[#allocation1 + $0x1] ss:$4 sm:$0xff] %v9765_v50  ;;  %v9821_v50 = vld [vmem:[#allocation80_spill] sm:$0xff] }
 0x2f6   : > { %1671 = vst [vmem:[#allocation1 + $0x2] ss:$4 sm:$0xff] %v9766_v47  ;;  %v9819_v47 = vld [vmem:[#allocation77_spill] sm:$0xff] }
 0x2f7   : > { %1672 = vst [vmem:[#allocation1 + $0x3] ss:$4 sm:$0xff] %v9767_v5 }
 0x2f8   : > { %v6547_v41 = vld.sshfl [vmem:[#allocation1 + $0x20] sm:$0xff pattern:$0x73625140] }
 0x2f9   : > { %9768 = vst [vmem:[#allocation224_spill] sm:$0xff] %v6547_v41  ;;  %v9886_v41 = vld [vmem:[#allocation125_spill] sm:$0xff] }
 0x2fa   : > { %1683 = vst [vmem:[#allocation1 + $0x20] ss:$4 sm:$0xff] %v9769_v10  ;;  %v9797_v10 = vld [vmem:[#allocation44_spill] sm:$0xff] }
 0x2fb   : > { %1684 = vst [vmem:[#allocation1 + $0x21] ss:$4 sm:$0xff] %v9770_v56 }
 0x2fc   : > { %1685 = vst [vmem:[#allocation1 + $0x22] ss:$4 sm:$0xff] %v9771_v31  ;;  %v9796_v31 = vld [vmem:[#allocation46_spill] sm:$0xff] }
 0x2fd   : > { %1686 = vst [vmem:[#allocation1 + $0x23] ss:$4 sm:$0xff] %v9772_v9  ;;  %v9805_v9 = vld [vmem:[#allocation55_spill] sm:$0xff] }
 0x2fe   : > { %v6553_v62 = vld.sshfl [vmem:[#allocation1] sm:$0xff pattern:$0x73625140] }
 0x2ff   : > { %9773 = vst [vmem:[#allocation225_spill] sm:$0xff] %v6553_v62  ;;  %v9896_v62 = vld [vmem:[#allocation135_spill] sm:$0xff] }
 0x300   : > { %1679 = vst [vmem:[#allocation1] ss:$4 sm:$0xff] %v9774_v57  ;;  %v9814_v57 = vld [vmem:[#allocation62_spill] sm:$0xff] }
 0x301   : > { %1680 = vst [vmem:[#allocation1 + $0x1] ss:$4 sm:$0xff] %v9775_v13  ;;  %v9812_v13 = vld [vmem:[#allocation71_spill] sm:$0xff] }
 0x302   : > { %1681 = vst [vmem:[#allocation1 + $0x2] ss:$4 sm:$0xff] %v9776_v33 }
 0x303   : > { %1682 = vst [vmem:[#allocation1 + $0x3] ss:$4 sm:$0xff] %v9777_v3  ;;  %v9799_v3 = vld [vmem:[#allocation58_spill] sm:$0xff] }
 0x304   : > { %v6559_v2 = vld.sshfl [vmem:[#allocation1 + $0x20] sm:$0xff pattern:$0x73625140] }
 0x305   : > { %9778 = vst [vmem:[#allocation226_spill] sm:$0xff] %v6559_v2  ;;  %v9879_v2 = vld [vmem:[#allocation132_spill] sm:$0xff] }
 0x306   : > { %1693 = vst [vmem:[#allocation1 + $0x20] ss:$4 sm:$0xff] %v9779_v55 }
 0x307   : > { %1694 = vst [vmem:[#allocation1 + $0x21] ss:$4 sm:$0xff] %v9780_v19  ;;  %v9794_v19 = vld [vmem:[#allocation43_spill] sm:$0xff] }
 0x308   : > { %1695 = vst [vmem:[#allocation1 + $0x22] ss:$4 sm:$0xff] %v9781_v58 }
 0x309   : > { %1696 = vst [vmem:[#allocation1 + $0x23] ss:$4 sm:$0xff] %v9782_v14  ;;  %v9795_v14 = vld [vmem:[#allocation45_spill] sm:$0xff] }
 0x30a   : > { %v6565_v21 = vld.sshfl [vmem:[#allocation1] sm:$0xff pattern:$0x73625140] }
 0x30b   : > { %9783 = vst [vmem:[#allocation227_spill] sm:$0xff] %v6565_v21  ;;  %v9880_v21 = vld [vmem:[#allocation119_spill] sm:$0xff] }
 0x30c   : > { %1689 = vst [vmem:[#allocation1] ss:$4 sm:$0xff] %v9784_v63  ;;  %v9804_v63 = vld [vmem:[#allocation52_spill] sm:$0xff] }
 0x30d   : > { %1690 = vst [vmem:[#allocation1 + $0x1] ss:$4 sm:$0xff] %v9785_v49 }
 0x30e   : > { %1691 = vst [vmem:[#allocation1 + $0x2] ss:$4 sm:$0xff] %v9786_v26 }
 0x30f   : > { %1692 = vst [vmem:[#allocation1 + $0x3] ss:$4 sm:$0xff] %v9787_v27 }
 0x310   : > { %v6571_v1 = vld.sshfl [vmem:[#allocation1 + $0x20] sm:$0xff pattern:$0x73625140] }
 0x311   : > { %9788 = vst [vmem:[#allocation228_spill] sm:$0xff] %v6571_v1 }
 0x312   : > { %1703 = vst [vmem:[#allocation1 + $0x20] ss:$4 sm:$0xff] %v9789_v42  ;;  %v9800_v42 = vld [vmem:[#allocation60_spill] sm:$0xff] }
 0x313   : > { %1704 = vst [vmem:[#allocation1 + $0x21] ss:$4 sm:$0xff] %v9790_v18  ;;  %v9801_v18 = vld [vmem:[#allocation57_spill] sm:$0xff] }
 0x314   : > { %1705 = vst [vmem:[#allocation1 + $0x22] ss:$4 sm:$0xff] %v9791_v30  ;;  %v9802_v30 = vld [vmem:[#allocation61_spill] sm:$0xff] }
 0x315   : > { %1706 = vst [vmem:[#allocation1 + $0x23] ss:$4 sm:$0xff] %v9792_v35 }
 0x316   : > { %v6577_v58 = vld.sshfl [vmem:[#allocation1] sm:$0xff pattern:$0x73625140] }
 0x317   : > { %9793 = vst [vmem:[#allocation229_spill] sm:$0xff] %v6577_v58  ;;  %v9870_v58 = vld [vmem:[#allocation121_spill] sm:$0xff] }
 0x318   : > { %1699 = vst [vmem:[#allocation1] ss:$4 sm:$0xff] %v9794_v19 }
 0x319   : > { %1700 = vst [vmem:[#allocation1 + $0x1] ss:$4 sm:$0xff] %v9795_v14  ;;  %v9806_v14 = vld [vmem:[#allocation54_spill] sm:$0xff] }
 0x31a   : > { %1701 = vst [vmem:[#allocation1 + $0x2] ss:$4 sm:$0xff] %v9796_v31  ;;  %v9807_v31 = vld [vmem:[#allocation56_spill] sm:$0xff] }
 0x31b   : > { %1702 = vst [vmem:[#allocation1 + $0x3] ss:$4 sm:$0xff] %v9797_v10 }
 0x31c   : > { %v6583_v27 = vld.sshfl [vmem:[#allocation1 + $0x20] sm:$0xff pattern:$0x73625140] }
 0x31d   : > { %9798 = vst [vmem:[#allocation230_spill] sm:$0xff] %v6583_v27  ;;  %v9855_v27 = vld [vmem:[#allocation104_spill] sm:$0xff] }
 0x31e   : > { %1713 = vst [vmem:[#allocation1 + $0x20] ss:$4 sm:$0xff] %v9799_v3  ;;  %v9810_v3 = vld [vmem:[#allocation66_spill] sm:$0xff] }
 0x31f   : > { %1714 = vst [vmem:[#allocation1 + $0x21] ss:$4 sm:$0xff] %v9800_v42  ;;  %v9811_v42 = vld [vmem:[#allocation70_spill] sm:$0xff] }
 0x320   : > { %1715 = vst [vmem:[#allocation1 + $0x22] ss:$4 sm:$0xff] %v9801_v18 }
 0x321   : > { %1716 = vst [vmem:[#allocation1 + $0x23] ss:$4 sm:$0xff] %v9802_v30 }
 0x322   : > { %v6589_v26 = vld.sshfl [vmem:[#allocation1] sm:$0xff pattern:$0x73625140] }
 0x323   : > { %9803 = vst [vmem:[#allocation231_spill] sm:$0xff] %v6589_v26 }
 0x324   : > { %1709 = vst [vmem:[#allocation1] ss:$4 sm:$0xff] %v9804_v63  ;;  %v9815_v63 = vld [vmem:[#allocation64_spill] sm:$0xff] }
 0x325   : > { %1710 = vst [vmem:[#allocation1 + $0x1] ss:$4 sm:$0xff] %v9805_v9  ;;  %v9816_v9 = vld [vmem:[#allocation65_spill] sm:$0xff] }
 0x326   : > { %1711 = vst [vmem:[#allocation1 + $0x2] ss:$4 sm:$0xff] %v9806_v14 }
 0x327   : > { %1712 = vst [vmem:[#allocation1 + $0x3] ss:$4 sm:$0xff] %v9807_v31 }
 0x328   : > { %v6595_v34 = vld.sshfl [vmem:[#allocation1 + $0x20] sm:$0xff pattern:$0x73625140] }
 0x329   : > { %9808 = vst [vmem:[#allocation232_spill] sm:$0xff] %v6595_v34  ;;  %v9830_v34 = vld [vmem:[#allocation89_spill] sm:$0xff] }
 0x32a   : > { %1723 = vst [vmem:[#allocation1 + $0x20] ss:$4 sm:$0xff] %v9809_v32  ;;  %v9820_v32 = vld [vmem:[#allocation79_spill] sm:$0xff] }
 0x32b   : > { %1724 = vst [vmem:[#allocation1 + $0x21] ss:$4 sm:$0xff] %v9810_v3 }
 0x32c   : > { %1725 = vst [vmem:[#allocation1 + $0x22] ss:$4 sm:$0xff] %v9811_v42  ;;  %v9822_v42 = vld [vmem:[#allocation81_spill] sm:$0xff] }
 0x32d   : > { %1726 = vst [vmem:[#allocation1 + $0x23] ss:$4 sm:$0xff] %v9812_v13 }
 0x32e   : > { %v6601_v30 = vld.sshfl [vmem:[#allocation1] sm:$0xff pattern:$0x73625140] }
 0x32f   : > { %9813 = vst [vmem:[#allocation233_spill] sm:$0xff] %v6601_v30 }
 0x330   : > { %1719 = vst [vmem:[#allocation1] ss:$4 sm:$0xff] %v9814_v57  ;;  %v9825_v57 = vld [vmem:[#allocation74_spill] sm:$0xff] }
 0x331   : > { %1720 = vst [vmem:[#allocation1 + $0x1] ss:$4 sm:$0xff] %v9815_v63 }
 0x332   : > { %1721 = vst [vmem:[#allocation1 + $0x2] ss:$4 sm:$0xff] %v9816_v9  ;;  %v9827_v9 = vld [vmem:[#allocation76_spill] sm:$0xff] }
 0x333   : > { %1722 = vst [vmem:[#allocation1 + $0x3] ss:$4 sm:$0xff] %v9817_v15 }
 0x334   : > { %v6607_v31 = vld.sshfl [vmem:[#allocation1 + $0x20] sm:$0xff pattern:$0x73625140] }
 0x335   : > { %9818 = vst [vmem:[#allocation234_spill] sm:$0xff] %v6607_v31  ;;  %v9829_v31 = vld [vmem:[#allocation87_spill] sm:$0xff] }
 0x336   : > { %1733 = vst [vmem:[#allocation1 + $0x20] ss:$4 sm:$0xff] %v9819_v47 }
 0x337   : > { %1734 = vst [vmem:[#allocation1 + $0x21] ss:$4 sm:$0xff] %v9820_v32  ;;  %v9831_v32 = vld [vmem:[#allocation90_spill] sm:$0xff] }
 0x338   : > { %1735 = vst [vmem:[#allocation1 + $0x22] ss:$4 sm:$0xff] %v9821_v50  ;;  %v9832_v50 = vld [vmem:[#allocation91_spill] sm:$0xff] }
 0x339   : > { %1736 = vst [vmem:[#allocation1 + $0x23] ss:$4 sm:$0xff] %v9822_v42 }
 0x33a   : > { %v6613_v13 = vld.sshfl [vmem:[#allocation1] sm:$0xff pattern:$0x73625140] }
 0x33b   : > { %9823 = vst [vmem:[#allocation235_spill] sm:$0xff] %v6613_v13  ;;  %v9834_v13 = vld [vmem:[#allocation82_spill] sm:$0xff] }
 0x33c   : > { %1729 = vst [vmem:[#allocation1] ss:$4 sm:$0xff] %v9824_v40 }
 0x33d   : > { %1730 = vst [vmem:[#allocation1 + $0x1] ss:$4 sm:$0xff] %v9825_v57  ;;  %v9836_v57 = vld [vmem:[#allocation86_spill] sm:$0xff] }
 0x33e   : > { %1731 = vst [vmem:[#allocation1 + $0x2] ss:$4 sm:$0xff] %v9826_v24  ;;  %v9837_v24 = vld [vmem:[#allocation84_spill] sm:$0xff] }
 0x33f   : > { %1732 = vst [vmem:[#allocation1 + $0x3] ss:$4 sm:$0xff] %v9827_v9 }
 0x340   : > { %v6619_v15 = vld.sshfl [vmem:[#allocation1 + $0x20] sm:$0xff pattern:$0x73625140] }
 0x341   : > { %9828 = vst [vmem:[#allocation236_spill] sm:$0xff] %v6619_v15  ;;  %v9839_v15 = vld [vmem:[#allocation98_spill] sm:$0xff] }
 0x342   : > { %1743 = vst [vmem:[#allocation1 + $0x20] ss:$4 sm:$0xff] %v9829_v31  ;;  %v9840_v31 = vld [vmem:[#allocation96_spill] sm:$0xff] }
 0x343   : > { %1744 = vst [vmem:[#allocation1 + $0x21] ss:$4 sm:$0xff] %v9830_v34  ;;  %v9841_v34 = vld [vmem:[#allocation100_spill] sm:$0xff] }
 0x344   : > { %1745 = vst [vmem:[#allocation1 + $0x22] ss:$4 sm:$0xff] %v9831_v32 }
 0x345   : > { %1746 = vst [vmem:[#allocation1 + $0x23] ss:$4 sm:$0xff] %v9832_v50  ;;  %v9842_v50 = vld [vmem:[#allocation101_spill] sm:$0xff] }
 0x346   : > { %v6625_v30 = vld.sshfl [vmem:[#allocation1] sm:$0xff pattern:$0x73625140] }
 0x347   : > { %9833 = vst [vmem:[#allocation237_spill] sm:$0xff] %v6625_v30 }
 0x348   : > { %1739 = vst [vmem:[#allocation1] ss:$4 sm:$0xff] %v9834_v13  ;;  %v9844_v13 = vld [vmem:[#allocation92_spill] sm:$0xff] }
 0x349   : > { %1740 = vst [vmem:[#allocation1 + $0x1] ss:$4 sm:$0xff] %v9835_v44  ;;  %v9845_v44 = vld [vmem:[#allocation95_spill] sm:$0xff] }
 0x34a   : > { %1741 = vst [vmem:[#allocation1 + $0x2] ss:$4 sm:$0xff] %v9836_v57  ;;  %v9846_v57 = vld [vmem:[#allocation94_spill] sm:$0xff] }
 0x34b   : > { %1742 = vst [vmem:[#allocation1 + $0x3] ss:$4 sm:$0xff] %v9837_v24 }
 0x34c   : > { %v6631_v9 = vld.sshfl [vmem:[#allocation1 + $0x20] sm:$0xff pattern:$0x73625140] }
 0x34d   : > { %9838 = vst [vmem:[#allocation238_spill] sm:$0xff] %v6631_v9 }
 0x34e   : > { %1753 = vst [vmem:[#allocation1 + $0x20] ss:$4 sm:$0xff] %v9839_v15  ;;  %v9849_v15 = vld [vmem:[#allocation109_spill] sm:$0xff] }
 0x34f   : > { %1754 = vst [vmem:[#allocation1 + $0x21] ss:$4 sm:$0xff] %v9840_v31 }
 0x350   : > { %1755 = vst [vmem:[#allocation1 + $0x22] ss:$4 sm:$0xff] %v9841_v34  ;;  %v9850_v34 = vld [vmem:[#allocation110_spill] sm:$0xff] }
 0x351   : > { %1756 = vst [vmem:[#allocation1 + $0x23] ss:$4 sm:$0xff] %v9842_v50  ;;  %v9851_v50 = vld [vmem:[#allocation111_spill] sm:$0xff] }
 0x352   : > { %v6637_v30 = vld.sshfl [vmem:[#allocation1] sm:$0xff pattern:$0x73625140] }
 0x353   : > { %9843 = vst [vmem:[#allocation239_spill] sm:$0xff] %v6637_v30 }
 0x354   : > { %1749 = vst [vmem:[#allocation1] ss:$4 sm:$0xff] %v9844_v13  ;;  %v9853_v13 = vld [vmem:[#allocation102_spill] sm:$0xff] }
 0x355   : > { %1750 = vst [vmem:[#allocation1 + $0x1] ss:$4 sm:$0xff] %v9845_v44  ;;  %v6653_v44 = vld [vmem:[%s5060_s19 + $0xe0] sm:$0xff] }
 0x356   : > { %1751 = vst [vmem:[#allocation1 + $0x2] ss:$4 sm:$0xff] %v9846_v57  ;;  %v6661_v26 = vrot.slane %v6653_v44, 4 }
 0x357   : > { %1752 = vst [vmem:[#allocation1 + $0x3] ss:$4 sm:$0xff] %v9847_v0  ;;  %v6657_v0 = vrot.slane %v6653_v44, 2 }
 0x358   : > { %v6643_v9 = vld.sshfl [vmem:[#allocation1 + $0x20] sm:$0xff pattern:$0x73625140]  ;;  %9854 = vst [vmem:[#allocation242_spill] sm:$0xff] %v6653_v44 }
 0x359   : > { %9848 = vst [vmem:[#allocation240_spill] sm:$0xff] %v6643_v9  ;;  %v9857_v9 = vld [vmem:[#allocation105_spill] sm:$0xff] }
 0x35a   : > { %1763 = vst [vmem:[#allocation1 + $0x20] ss:$4 sm:$0xff] %v9637_v52 }
 0x35b   : > { %1764 = vst [vmem:[#allocation1 + $0x21] ss:$4 sm:$0xff] %v9849_v15  ;;  %v9859_v15 = vld [vmem:[#allocation106_spill] sm:$0xff] }
 0x35c   : > { %1765 = vst [vmem:[#allocation1 + $0x22] ss:$4 sm:$0xff] %v9850_v34  ;;  %v6665_v34 = vrot.slane %v6653_v44, 6 }
 0x35d   : > { %1766 = vst [vmem:[#allocation1 + $0x23] ss:$4 sm:$0xff] %v9851_v50 }
 0x35e   : > { %v6649_v30 = vld.sshfl [vmem:[#allocation1] sm:$0xff pattern:$0x73625140]  ;;  %9856 = vst [vmem:[#allocation243_spill] sm:$0xff] %v6657_v0 }
 0x35f   : > { %9852 = vst [vmem:[#allocation241_spill] sm:$0xff] %v6649_v30  ;;  %v9864_v30 = vld [vmem:[#allocation113_spill] sm:$0xff] }
 0x360   : > { %1759 = vst [vmem:[#allocation1] ss:$4 sm:$0xff] %v9853_v13  ;;  %v6672_v13 = vld [vmem:[%s5060_s19 + $0xe8] sm:$0xff] }
 0x361   : > { %1760 = vst [vmem:[#allocation1 + $0x1] ss:$4 sm:$0xff] %v9855_v27  ;;  %v6686_v1 = vrot.slane %v6672_v13, 2  ;;  %v6690_v25 = vrot.slane %v6672_v13, 4 }
 0x362   : > { %1761 = vst [vmem:[#allocation1 + $0x2] ss:$4 sm:$0xff] %v9857_v9 }
 0x363   : > { %9858 = vst [vmem:[#allocation244_spill] sm:$0xff] %v6661_v26 }
 0x364   : > { %1762 = vst [vmem:[#allocation1 + $0x3] ss:$4 sm:$0xff] %v9859_v15  ;;  %v6667_v50 = vld.sshfl [vmem:[#allocation1 + $0x20] sm:$0xff pattern:$0x73625140]  ;;  %v9865_v15 = vld [vmem:[#allocation114_spill] sm:$0xff] }
 0x365   : > { %9860 = vst [vmem:[#allocation245_spill] sm:$0xff] %v6665_v34 }
 0x366   : > { %9861 = vst [vmem:[#allocation246_spill] sm:$0xff] %v6667_v50 }
 0x367   : > { %1773 = vst [vmem:[#allocation1 + $0x20] ss:$4 sm:$0xff] %v6657_v0 }
 0x368   : > { %1774 = vst [vmem:[#allocation1 + $0x21] ss:$4 sm:$0xff] %v6661_v26 }
 0x369   : > { %9862 = vst [vmem:[#allocation247_spill] sm:$0xff] %v6672_v13 }
 0x36a   : > { %1775 = vst [vmem:[#allocation1 + $0x22] ss:$4 sm:$0xff] %v6665_v34 }
 0x36b   : > { %1776 = vst [vmem:[#allocation1 + $0x23] ss:$4 sm:$0xff] %v6672_v13  ;;  %v6676_v9 = vld.sshfl [vmem:[#allocation1] sm:$0xff pattern:$0x73625140] }
 0x36c   : > { %9863 = vst [vmem:[#allocation7_spill] sm:$0xff] %v6676_v9  ;;  %v9872_v9 = vld [vmem:[#allocation122_spill] sm:$0xff] }
 0x36d   : > { %1769 = vst [vmem:[#allocation1] ss:$4 sm:$0xff] %v9864_v30 }
 0x36e   : > { %1770 = vst [vmem:[#allocation1 + $0x1] ss:$4 sm:$0xff] %v9865_v15 }
 0x36f   : > { %1771 = vst [vmem:[#allocation1 + $0x2] ss:$4 sm:$0xff] %v9866_v29 }
 0x370   : > { %1772 = vst [vmem:[#allocation1 + $0x3] ss:$4 sm:$0xff] %v6653_v44 }
 0x371   : > { %9869 = vst [vmem:[#allocation10_spill] sm:$0xff] %v6686_v1 }
 0x372   : > { %v6682_v50 = vld.sshfl [vmem:[#allocation1 + $0x20] sm:$0xff pattern:$0x73625140]  ;;  %9871 = vst [vmem:[#allocation3_spill] sm:$0xff] %v6690_v25 }
 0x373   : > { %9867 = vst [vmem:[#allocation9_spill] sm:$0xff] %v6682_v50  ;;  %v9877_v50 = vld [vmem:[#allocation131_spill] sm:$0xff] }
 0x374   : > { %1993 = vst [vmem:[#allocation1 + $0x20] ss:$4 sm:$0xff] %v9868_v23  ;;  %v9876_v23 = vld [vmem:[#allocation140_spill] sm:$0xff] }
 0x375   : > { %1995 = vst [vmem:[#allocation1 + $0x21] ss:$4 sm:$0xff] %v9870_v58 }
 0x376   : > { %1997 = vst [vmem:[#allocation1 + $0x22] ss:$4 sm:$0xff] %v9872_v9  ;;  %v9881_v9 = vld [vmem:[#allocation126_spill] sm:$0xff] }
 0x377   : > { %1999 = vst [vmem:[#allocation1 + $0x23] ss:$4 sm:$0xff] %v9873_v43  ;;  %v6694_v15 = vld.sshfl [vmem:[#allocation1] sm:$0xff pattern:$0x73625140]  ;;  %v9882_v43 = vld [vmem:[#allocation127_spill] sm:$0xff] }
 0x378   : > { %9874 = vst [vmem:[#allocation4_spill] sm:$0xff] %v6694_v15  ;;  %v9883_v15 = vld [vmem:[#allocation128_spill] sm:$0xff] }
 0x379   : > { %1779 = vst [vmem:[#allocation1] ss:$4 sm:$0xff] %v6686_v1 }
 0x37a   : > { %1780 = vst [vmem:[#allocation1 + $0x1] ss:$4 sm:$0xff] %v6690_v25 }
 0x37e   : > { %v6698_v29 = vld.sshfl [vmem:[#allocation1 + $0x20] sm:$0xff pattern:$0x73625140] }
 0x37f   : > { %9875 = vst [vmem:[#allocation5_spill] sm:$0xff] %v6698_v29  ;;  %v9983_v29 = vld [vmem:[#allocation211_spill] sm:$0xff] }
 0x380   : > { %2006 = vst [vmem:[#allocation1 + $0x20] ss:$4 sm:$0xff] %v9876_v23  ;;  %v9887_v23 = vld [vmem:[#allocation136_spill] sm:$0xff] }
 0x381   : > { %2007 = vst [vmem:[#allocation1 + $0x21] ss:$4 sm:$0xff] %v9877_v50  ;;  %v6702_v58 = vld.sshfl [vmem:[#allocation1] sm:$0xff pattern:$0x73625140] }
 0x382   : > { %9878 = vst [vmem:[#allocation6_spill] sm:$0xff] %v6702_v58  ;;  %v9889_v58 = vld [vmem:[#allocation137_spill] sm:$0xff] }
 0x383   : > { %2008 = vst [vmem:[#allocation1 + $0x22] ss:$4 sm:$0xff] %v9879_v2  ;;  %v9890_v2 = vld [vmem:[#allocation138_spill] sm:$0xff] }
 0x384   : > { %1985 = vst [vmem:[#allocation1] ss:$4 sm:$0xff] %v9880_v21  ;;  %v9891_v21 = vld [vmem:[#allocation150_spill] sm:$0xff] }
 0x385   : > { %1987 = vst [vmem:[#allocation1 + $0x1] ss:$4 sm:$0xff] %v9881_v9  ;;  %v9892_v9 = vld [vmem:[#allocation141_spill] sm:$0xff] }
 0x386   : > { %1989 = vst [vmem:[#allocation1 + $0x2] ss:$4 sm:$0xff] %v9882_v43  ;;  %v9893_v43 = vld [vmem:[#allocation142_spill] sm:$0xff] }
 0x387   : > { %1991 = vst [vmem:[#allocation1 + $0x3] ss:$4 sm:$0xff] %v9883_v15  ;;  %v9894_v15 = vld [vmem:[#allocation143_spill] sm:$0xff] }
 0x388   : > { %2009 = vst [vmem:[#allocation1 + $0x23] ss:$4 sm:$0xff] %v9884_v6 }
 0x38e   : > { %v6710_v7 = vld.sshfl [vmem:[#allocation1] sm:$0xff pattern:$0x73625140] }
 0x38f   : > { %9885 = vst [vmem:[#allocation130_spill] sm:$0xff] %v6710_v7  ;;  %v6714_v50 = vld.sshfl [vmem:[#allocation1 + $0x20] sm:$0xff pattern:$0x73625140] }
 0x390   : > { %2002 = vst [vmem:[#allocation1] ss:$4 sm:$0xff] %v9886_v41  ;;  %v9897_v41 = vld [vmem:[#allocation146_spill] sm:$0xff] }
 0x391   : > { %2003 = vst [vmem:[#allocation1 + $0x1] ss:$4 sm:$0xff] %v9887_v23  ;;  %v9898_v23 = vld [vmem:[#allocation147_spill] sm:$0xff] }
 0x392   : > { %9888 = vst [vmem:[#allocation121_spill] sm:$0xff] %v6714_v50  ;;  %v9899_v50 = vld [vmem:[#allocation148_spill] sm:$0xff] }
 0x393   : > { %2004 = vst [vmem:[#allocation1 + $0x2] ss:$4 sm:$0xff] %v9889_v58 }
 0x394   : > { %2005 = vst [vmem:[#allocation1 + $0x3] ss:$4 sm:$0xff] %v9890_v2  ;;  %v9901_v2 = vld [vmem:[#allocation160_spill] sm:$0xff] }
 0x395   : > { %2016 = vst [vmem:[#allocation1 + $0x20] ss:$4 sm:$0xff] %v9891_v21  ;;  %v9902_v21 = vld [vmem:[#allocation151_spill] sm:$0xff] }
 0x396   : > { %2017 = vst [vmem:[#allocation1 + $0x21] ss:$4 sm:$0xff] %v9892_v9  ;;  %v9903_v9 = vld [vmem:[#allocation152_spill] sm:$0xff] }
 0x397   : > { %2018 = vst [vmem:[#allocation1 + $0x22] ss:$4 sm:$0xff] %v9893_v43  ;;  %v9904_v43 = vld [vmem:[#allocation153_spill] sm:$0xff] }
 0x398   : > { %2019 = vst [vmem:[#allocation1 + $0x23] ss:$4 sm:$0xff] %v9894_v15 }
 0x39b   : > { %v6722_v6 = vld.sshfl [vmem:[#allocation1] sm:$0xff pattern:$0x73625140] }
 0x39c   : > { %9895 = vst [vmem:[#allocation122_spill] sm:$0xff] %v6722_v6  ;;  %v9906_v6 = vld [vmem:[#allocation145_spill] sm:$0xff] }
 0x39d   : > { %2012 = vst [vmem:[#allocation1] ss:$4 sm:$0xff] %v9896_v62  ;;  %v9907_v62 = vld [vmem:[#allocation156_spill] sm:$0xff] }
 0x39e   : > { %2013 = vst [vmem:[#allocation1 + $0x1] ss:$4 sm:$0xff] %v9897_v41  ;;  %v9908_v41 = vld [vmem:[#allocation157_spill] sm:$0xff] }
 0x39f   : > { %2014 = vst [vmem:[#allocation1 + $0x2] ss:$4 sm:$0xff] %v9898_v23  ;;  %v6728_v58 = vld.sshfl [vmem:[#allocation1 + $0x20] sm:$0xff pattern:$0x73625140]  ;;  %v9909_v23 = vld [vmem:[#allocation158_spill] sm:$0xff] }
 0x3a0   : > { %2015 = vst [vmem:[#allocation1 + $0x3] ss:$4 sm:$0xff] %v9899_v50 }
 0x3a1   : > { %9900 = vst [vmem:[#allocation119_spill] sm:$0xff] %v6728_v58  ;;  %v9911_v58 = vld [vmem:[#allocation168_spill] sm:$0xff] }
 0x3a2   : > { %2026 = vst [vmem:[#allocation1 + $0x20] ss:$4 sm:$0xff] %v9901_v2  ;;  %v9912_v2 = vld [vmem:[#allocation161_spill] sm:$0xff] }
 0x3a3   : > { %2027 = vst [vmem:[#allocation1 + $0x21] ss:$4 sm:$0xff] %v9902_v21  ;;  %v9913_v21 = vld [vmem:[#allocation162_spill] sm:$0xff] }
 0x3a4   : > { %2028 = vst [vmem:[#allocation1 + $0x22] ss:$4 sm:$0xff] %v9903_v9  ;;  %v9914_v9 = vld [vmem:[#allocation163_spill] sm:$0xff] }
 0x3a5   : > { %2029 = vst [vmem:[#allocation1 + $0x23] ss:$4 sm:$0xff] %v9904_v43 }
 0x3a7   : > { %v6734_v15 = vld.sshfl [vmem:[#allocation1] sm:$0xff pattern:$0x73625140] }
 0x3a8   : > { %9905 = vst [vmem:[#allocation126_spill] sm:$0xff] %v6734_v15  ;;  %v9916_v15 = vld [vmem:[#allocation155_spill] sm:$0xff] }
 0x3a9   : > { %2022 = vst [vmem:[#allocation1] ss:$4 sm:$0xff] %v9906_v6  ;;  %v9917_v6 = vld [vmem:[#allocation165_spill] sm:$0xff] }
 0x3aa   : > { %2023 = vst [vmem:[#allocation1 + $0x1] ss:$4 sm:$0xff] %v9907_v62  ;;  %v9918_v62 = vld [vmem:[#allocation166_spill] sm:$0xff] }
 0x3ab   : > { %2024 = vst [vmem:[#allocation1 + $0x2] ss:$4 sm:$0xff] %v9908_v41  ;;  %v9919_v41 = vld [vmem:[#allocation167_spill] sm:$0xff] }
 0x3ac   : > { %2025 = vst [vmem:[#allocation1 + $0x3] ss:$4 sm:$0xff] %v9909_v23  ;;  %v6740_v50 = vld.sshfl [vmem:[#allocation1 + $0x20] sm:$0xff pattern:$0x73625140] }
 0x3ad   : > { %9910 = vst [vmem:[#allocation127_spill] sm:$0xff] %v6740_v50  ;;  %v9921_v50 = vld [vmem:[#allocation176_spill] sm:$0xff] }
 0x3ae   : > { %2036 = vst [vmem:[#allocation1 + $0x20] ss:$4 sm:$0xff] %v9911_v58  ;;  %v9922_v58 = vld [vmem:[#allocation169_spill] sm:$0xff] }
 0x3af   : > { %2037 = vst [vmem:[#allocation1 + $0x21] ss:$4 sm:$0xff] %v9912_v2  ;;  %v9923_v2 = vld [vmem:[#allocation170_spill] sm:$0xff] }
 0x3b0   : > { %2038 = vst [vmem:[#allocation1 + $0x22] ss:$4 sm:$0xff] %v9913_v21  ;;  %v9924_v21 = vld [vmem:[#allocation171_spill] sm:$0xff] }
 0x3b1   : > { %2039 = vst [vmem:[#allocation1 + $0x23] ss:$4 sm:$0xff] %v9914_v9 }
 0x3b3   : > { %v6746_v43 = vld.sshfl [vmem:[#allocation1] sm:$0xff pattern:$0x73625140] }
 0x3b4   : > { %9915 = vst [vmem:[#allocation128_spill] sm:$0xff] %v6746_v43  ;;  %v9926_v43 = vld [vmem:[#allocation164_spill] sm:$0xff] }
 0x3b5   : > { %2032 = vst [vmem:[#allocation1] ss:$4 sm:$0xff] %v9916_v15  ;;  %v9927_v15 = vld [vmem:[#allocation173_spill] sm:$0xff] }
 0x3b6   : > { %2033 = vst [vmem:[#allocation1 + $0x1] ss:$4 sm:$0xff] %v9917_v6  ;;  %v9928_v6 = vld [vmem:[#allocation174_spill] sm:$0xff] }
 0x3b7   : > { %2034 = vst [vmem:[#allocation1 + $0x2] ss:$4 sm:$0xff] %v9918_v62  ;;  %v9929_v62 = vld [vmem:[#allocation175_spill] sm:$0xff] }
 0x3b8   : > { %2035 = vst [vmem:[#allocation1 + $0x3] ss:$4 sm:$0xff] %v9919_v41  ;;  %v6752_v23 = vld.sshfl [vmem:[#allocation1 + $0x20] sm:$0xff pattern:$0x73625140] }
 0x3b9   : > { %9920 = vst [vmem:[#allocation248_spill] sm:$0xff] %v6752_v23  ;;  %v9931_v23 = vld [vmem:[#allocation184_spill] sm:$0xff] }
 0x3ba   : > { %2046 = vst [vmem:[#allocation1 + $0x20] ss:$4 sm:$0xff] %v9921_v50  ;;  %v9932_v50 = vld [vmem:[#allocation177_spill] sm:$0xff] }
 0x3bb   : > { %2047 = vst [vmem:[#allocation1 + $0x21] ss:$4 sm:$0xff] %v9922_v58  ;;  %v9933_v58 = vld [vmem:[#allocation178_spill] sm:$0xff] }
 0x3bc   : > { %2048 = vst [vmem:[#allocation1 + $0x22] ss:$4 sm:$0xff] %v9923_v2  ;;  %v9934_v2 = vld [vmem:[#allocation179_spill] sm:$0xff] }
 0x3bd   : > { %2049 = vst [vmem:[#allocation1 + $0x23] ss:$4 sm:$0xff] %v9924_v21 }
 0x3bf   : > { %v6758_v9 = vld.sshfl [vmem:[#allocation1] sm:$0xff pattern:$0x73625140] }
 0x3c0   : > { %9925 = vst [vmem:[#allocation249_spill] sm:$0xff] %v6758_v9  ;;  %v9936_v9 = vld [vmem:[#allocation172_spill] sm:$0xff] }
 0x3c1   : > { %2042 = vst [vmem:[#allocation1] ss:$4 sm:$0xff] %v9926_v43  ;;  %v9937_v43 = vld [vmem:[#allocation181_spill] sm:$0xff] }
 0x3c2   : > { %2043 = vst [vmem:[#allocation1 + $0x1] ss:$4 sm:$0xff] %v9927_v15  ;;  %v9938_v15 = vld [vmem:[#allocation182_spill] sm:$0xff] }
 0x3c3   : > { %2044 = vst [vmem:[#allocation1 + $0x2] ss:$4 sm:$0xff] %v9928_v6  ;;  %v9939_v6 = vld [vmem:[#allocation183_spill] sm:$0xff] }
 0x3c4   : > { %2045 = vst [vmem:[#allocation1 + $0x3] ss:$4 sm:$0xff] %v9929_v62  ;;  %v6764_v41 = vld.sshfl [vmem:[#allocation1 + $0x20] sm:$0xff pattern:$0x73625140] }
 0x3c5   : > { %9930 = vst [vmem:[#allocation250_spill] sm:$0xff] %v6764_v41  ;;  %v9941_v41 = vld [vmem:[#allocation188_spill] sm:$0xff] }
 0x3c6   : > { %2056 = vst [vmem:[#allocation1 + $0x20] ss:$4 sm:$0xff] %v9931_v23  ;;  %v9942_v23 = vld [vmem:[#allocation189_spill] sm:$0xff] }
 0x3c7   : > { %2057 = vst [vmem:[#allocation1 + $0x21] ss:$4 sm:$0xff] %v9932_v50  ;;  %v9943_v50 = vld [vmem:[#allocation190_spill] sm:$0xff] }
 0x3c8   : > { %2058 = vst [vmem:[#allocation1 + $0x22] ss:$4 sm:$0xff] %v9933_v58  ;;  %v9944_v58 = vld [vmem:[#allocation191_spill] sm:$0xff] }
 0x3c9   : > { %2059 = vst [vmem:[#allocation1 + $0x23] ss:$4 sm:$0xff] %v9934_v2 }
 0x3cb   : > { %v6770_v21 = vld.sshfl [vmem:[#allocation1] sm:$0xff pattern:$0x73625140] }
 0x3cc   : > { %9935 = vst [vmem:[#allocation251_spill] sm:$0xff] %v6770_v21  ;;  %v9946_v21 = vld [vmem:[#allocation180_spill] sm:$0xff] }
 0x3cd   : > { %2052 = vst [vmem:[#allocation1] ss:$4 sm:$0xff] %v9936_v9  ;;  %v9947_v9 = vld [vmem:[#allocation185_spill] sm:$0xff] }
 0x3ce   : > { %2053 = vst [vmem:[#allocation1 + $0x1] ss:$4 sm:$0xff] %v9937_v43  ;;  %v9948_v43 = vld [vmem:[#allocation186_spill] sm:$0xff] }
 0x3cf   : > { %2054 = vst [vmem:[#allocation1 + $0x2] ss:$4 sm:$0xff] %v9938_v15  ;;  %v9949_v15 = vld [vmem:[#allocation187_spill] sm:$0xff] }
 0x3d0   : > { %2055 = vst [vmem:[#allocation1 + $0x3] ss:$4 sm:$0xff] %v9939_v6  ;;  %v6776_v62 = vld.sshfl [vmem:[#allocation1 + $0x20] sm:$0xff pattern:$0x73625140] }
 0x3d1   : > { %9940 = vst [vmem:[#allocation252_spill] sm:$0xff] %v6776_v62  ;;  %v9951_v62 = vld [vmem:[#allocation196_spill] sm:$0xff] }
 0x3d2   : > { %2066 = vst [vmem:[#allocation1 + $0x20] ss:$4 sm:$0xff] %v9941_v41  ;;  %v9952_v41 = vld [vmem:[#allocation197_spill] sm:$0xff] }
 0x3d3   : > { %2067 = vst [vmem:[#allocation1 + $0x21] ss:$4 sm:$0xff] %v9942_v23  ;;  %v9953_v23 = vld [vmem:[#allocation198_spill] sm:$0xff] }
 0x3d4   : > { %2068 = vst [vmem:[#allocation1 + $0x22] ss:$4 sm:$0xff] %v9943_v50  ;;  %v9954_v50 = vld [vmem:[#allocation199_spill] sm:$0xff] }
 0x3d5   : > { %2069 = vst [vmem:[#allocation1 + $0x23] ss:$4 sm:$0xff] %v9944_v58 }
 0x3d7   : > { %v6782_v2 = vld.sshfl [vmem:[#allocation1] sm:$0xff pattern:$0x73625140] }
 0x3d8   : > { %9945 = vst [vmem:[#allocation253_spill] sm:$0xff] %v6782_v2  ;;  %v9956_v2 = vld [vmem:[#allocation192_spill] sm:$0xff] }
 0x3d9   : > { %2062 = vst [vmem:[#allocation1] ss:$4 sm:$0xff] %v9946_v21  ;;  %v9957_v21 = vld [vmem:[#allocation193_spill] sm:$0xff] }
 0x3da   : > { %2063 = vst [vmem:[#allocation1 + $0x1] ss:$4 sm:$0xff] %v9947_v9  ;;  %v9958_v9 = vld [vmem:[#allocation194_spill] sm:$0xff] }
 0x3db   : > { %2064 = vst [vmem:[#allocation1 + $0x2] ss:$4 sm:$0xff] %v9948_v43  ;;  %v9959_v43 = vld [vmem:[#allocation195_spill] sm:$0xff] }
 0x3dc   : > { %2065 = vst [vmem:[#allocation1 + $0x3] ss:$4 sm:$0xff] %v9949_v15  ;;  %v6788_v6 = vld.sshfl [vmem:[#allocation1 + $0x20] sm:$0xff pattern:$0x73625140] }
 0x3dd   : > { %9950 = vst [vmem:[#allocation254_spill] sm:$0xff] %v6788_v6  ;;  %v9961_v6 = vld [vmem:[#allocation205_spill] sm:$0xff] }
 0x3de   : > { %2076 = vst [vmem:[#allocation1 + $0x20] ss:$4 sm:$0xff] %v9951_v62  ;;  %v9962_v62 = vld [vmem:[#allocation206_spill] sm:$0xff] }
 0x3df   : > { %2077 = vst [vmem:[#allocation1 + $0x21] ss:$4 sm:$0xff] %v9952_v41  ;;  %v9963_v41 = vld [vmem:[#allocation207_spill] sm:$0xff] }
 0x3e0   : > { %2078 = vst [vmem:[#allocation1 + $0x22] ss:$4 sm:$0xff] %v9953_v23  ;;  %v9964_v23 = vld [vmem:[#allocation208_spill] sm:$0xff] }
 0x3e1   : > { %2079 = vst [vmem:[#allocation1 + $0x23] ss:$4 sm:$0xff] %v9954_v50 }
 0x3e3   : > { %v6794_v58 = vld.sshfl [vmem:[#allocation1] sm:$0xff pattern:$0x73625140] }
 0x3e4   : > { %9955 = vst [vmem:[#allocation255_spill] sm:$0xff] %v6794_v58  ;;  %v9966_v58 = vld [vmem:[#allocation200_spill] sm:$0xff] }
 0x3e5   : > { %2072 = vst [vmem:[#allocation1] ss:$4 sm:$0xff] %v9956_v2  ;;  %v9967_v2 = vld [vmem:[#allocation201_spill] sm:$0xff] }
 0x3e6   : > { %2073 = vst [vmem:[#allocation1 + $0x1] ss:$4 sm:$0xff] %v9957_v21  ;;  %v9968_v21 = vld [vmem:[#allocation202_spill] sm:$0xff] }
 0x3e7   : > { %2074 = vst [vmem:[#allocation1 + $0x2] ss:$4 sm:$0xff] %v9958_v9  ;;  %v9969_v9 = vld [vmem:[#allocation203_spill] sm:$0xff] }
 0x3e8   : > { %2075 = vst [vmem:[#allocation1 + $0x3] ss:$4 sm:$0xff] %v9959_v43  ;;  %v6800_v15 = vld.sshfl [vmem:[#allocation1 + $0x20] sm:$0xff pattern:$0x73625140] }
 0x3e9   : > { %9960 = vst [vmem:[#allocation256_spill] sm:$0xff] %v6800_v15  ;;  %v9971_v15 = vld [vmem:[#allocation213_spill] sm:$0xff] }
 0x3ea   : > { %2086 = vst [vmem:[#allocation1 + $0x20] ss:$4 sm:$0xff] %v9961_v6  ;;  %v9972_v6 = vld [vmem:[#allocation214_spill] sm:$0xff] }
 0x3eb   : > { %2087 = vst [vmem:[#allocation1 + $0x21] ss:$4 sm:$0xff] %v9962_v62  ;;  %v1968_v62 = vrot.slane %v6661_v26, 7 }
 0x3ec   : > { %2088 = vst [vmem:[#allocation1 + $0x22] ss:$4 sm:$0xff] %v9963_v41  ;;  %v1971_v41 = vrot.slane %v6665_v34, 7  ;;  %v9981_v34 = vld [vmem:[#allocation210_spill] sm:$0xff] }
 0x3ed   : > { %2089 = vst [vmem:[#allocation1 + $0x23] ss:$4 sm:$0xff] %v9964_v23  ;;  %v1965_v23 = vrot.slane %v6657_v0, 7  ;;  %v9979_v0 = vld [vmem:[#allocation13_spill] sm:$0xff] }
 0x3ee   : > { %v1973_v53 = vrot.slane %v1971_v41, 2 }
 0x3ef   : > { %v6806_v50 = vld.sshfl [vmem:[#allocation1] sm:$0xff pattern:$0x73625140] }
 0x3f0   : > { %9965 = vst [vmem:[#allocation257_spill] sm:$0xff] %v6806_v50  ;;  %v9973_v50 = vld [vmem:[#allocation215_spill] sm:$0xff] }
 0x3f1   : > { %2082 = vst [vmem:[#allocation1] ss:$4 sm:$0xff] %v9966_v58  ;;  %v9974_v58 = vld [vmem:[#allocation216_spill] sm:$0xff] }
 0x3f2   : > { %2083 = vst [vmem:[#allocation1 + $0x1] ss:$4 sm:$0xff] %v9967_v2  ;;  %v1974_v2 = vrot.slane %v6672_v13, 7 }
 0x3f3   : > { %2084 = vst [vmem:[#allocation1 + $0x2] ss:$4 sm:$0xff] %v9968_v21  ;;  %v1967_v21 = vrot.slane %v1965_v23, 2 }
 0x3f4   : > { %2085 = vst [vmem:[#allocation1 + $0x3] ss:$4 sm:$0xff] %v9969_v9  ;;  %v6812_v43 = vld.sshfl [vmem:[#allocation1 + $0x20] sm:$0xff pattern:$0x73625140]  ;;  %v1970_v9 = vrot.slane %v1968_v62, 2 }
 0x3f5   : > { %9970 = vst [vmem:[#allocation258_spill] sm:$0xff] %v6812_v43 }
 0x3f6   : > { %2096 = vst [vmem:[#allocation1 + $0x20] ss:$4 sm:$0xff] %v9971_v15  ;;  %v1976_v15 = vrot.slane %v1974_v2, 2 }
 0x3f7   : > { %2097 = vst [vmem:[#allocation1 + $0x21] ss:$4 sm:$0xff] %v9972_v6  ;;  %v6827_v6 = vsel %vm5505_vm7, %v1967_v21, %v1968_v62  ;;  %v9988_v21 = vld [vmem:[#allocation218_spill] sm:$0xff] }
 0x3f8   : > { %2098 = vst [vmem:[#allocation1 + $0x22] ss:$4 sm:$0xff] %v9973_v50  ;;  %v6832_v50 = vsel %vm5505_vm7, %v1970_v9, %v1971_v41  ;;  %v4923_v41 = vrot.slane %v6653_v44, 9  ;;  %v1980_v9 = vrot.slane %v6690_v25, 7 }
 0x3f9   : > { %2099 = vst [vmem:[#allocation1 + $0x23] ss:$4 sm:$0xff] %v9974_v58  ;;  %v1977_v58 = vrot.slane %v6686_v1, 7 }
 0x3fa   : > { %9978 = vst [vmem:[#allocation260_spill] sm:$0xff] %v6827_v6 }
 0x3fb   : > { %v6822_v43 = vld.sshfl [vmem:[#allocation1] sm:$0xff pattern:$0x73625140]  ;;  %9980 = vst [vmem:[#allocation261_spill] sm:$0xff] %v6832_v50  ;;  %v6845_v62 = vsel %vm5505_vm7, %v1976_v15, %v1977_v58  ;;  %v9989_v15 = vld [vmem:[#allocation219_spill] sm:$0xff] }
 0x3fc   : > { %9975 = vst [vmem:[#allocation259_spill] sm:$0xff] %v6822_v43  ;;  %v6838_v43 = vsel %vm5505_vm7, %v1973_v53, %v1974_v2  ;;  %v6856_v2 = vsel %vm5505_vm7, %v4923_v41, %v1965_v23 }
 0x3fd   : > { %2092 = vst [vmem:[#allocation1] ss:$4 sm:$0xff] %v9976_v45 }
 0x3fe   : > { %2093 = vst [vmem:[#allocation1 + $0x1] ss:$4 sm:$0xff] %v9979_v0 }
 0x3ff   : > { %2094 = vst [vmem:[#allocation1 + $0x2] ss:$4 sm:$0xff] %v9981_v34 }
 0x400   : > { %9982 = vst [vmem:[#allocation262_spill] sm:$0xff] %v6838_v43  ;;  %v6841_v45 = vld.sshfl [vmem:[#allocation1 + $0x20] sm:$0xff pattern:$0x73625140] }
 0x401   : > { %2095 = vst [vmem:[#allocation1 + $0x3] ss:$4 sm:$0xff] %v9983_v29  ;;  %v4924_v29 = vrot.slane %v6672_v13, 13 }
 0x402   : > { %9984 = vst [vmem:[#allocation263_spill] sm:$0xff] %v6841_v45 }
 0x403   : > { %9985 = vst [vmem:[#allocation264_spill] sm:$0xff] %v6845_v62 }
 0x404   : > { %2106 = vst [vmem:[#allocation1 + $0x20] ss:$4 sm:$0xff] %v6827_v6  ;;  %v9990_v6 = vld [vmem:[#allocation220_spill] sm:$0xff] }
 0x405   : > { %2107 = vst [vmem:[#allocation1 + $0x21] ss:$4 sm:$0xff] %v6832_v50  ;;  %v1979_v50 = vrot.slane %v1977_v58, 2 }
 0x406   : > { %2108 = vst [vmem:[#allocation1 + $0x22] ss:$4 sm:$0xff] %v6838_v43 }
 0x407   : > { %2109 = vst [vmem:[#allocation1 + $0x23] ss:$4 sm:$0xff] %v6845_v62  ;;  %v1982_v62 = vrot.slane %v1980_v9, 2  ;;  %v6869_v23 = vsel %vm5505_vm7, %v1979_v50, %v1980_v9  ;;  %v6888_v50 = vpop.f32.mrf.mxu1 }
 0x408   : > { %v6852_v53 = vld.sshfl [vmem:[#allocation1] sm:$0xff pattern:$0x73625140]  ;;  %9987 = vst [vmem:[#allocation266_spill] sm:$0xff] %v6856_v2 }
 0x409   : > { %9986 = vst [vmem:[#allocation265_spill] sm:$0xff] %v6852_v53  ;;  %v6873_v41 = vsel %vm5505_vm7, %v1982_v62, %v4924_v29 }
 0x40a   : > { %2102 = vst [vmem:[#allocation1] ss:$4 sm:$0xff] %v9988_v21 }
 0x40b   : > { %2103 = vst [vmem:[#allocation1 + $0x1] ss:$4 sm:$0xff] %v9989_v15 }
 0x40c   : > { %2104 = vst [vmem:[#allocation1 + $0x2] ss:$4 sm:$0xff] %v9990_v6 }
 0x40d   : > { %2105 = vst [vmem:[#allocation1 + $0x3] ss:$4 sm:$0xff] %v6856_v2 }
 0x40e   : > { %v6863_v43 = vld.sshfl [vmem:[#allocation1 + $0x20] sm:$0xff pattern:$0x73625140]  ;;  %9992 = vst [vmem:[#allocation268_spill] sm:$0xff] %v6869_v23 }
 0x40f   : > { %9991 = vst [vmem:[#allocation267_spill] sm:$0xff] %v6863_v43 }
 0x410   : > { %2296 = vst.sshfl [vmem:[#allocation1 + $0x20] sm:$0xff pattern:$0x73625140] %v9751_v61 }
 0x411   : > { %9993 = vst [vmem:[#allocation269_spill] sm:$0xff] %v6873_v41 }
 0x412   : > { %9995 = vst [vmem:[#allocation271_spill] sm:$0xff] %v6888_v50 }
 0x414   : > { %v6875_v15 = vld.sshfl [vmem:[#allocation1] sm:$0xff pattern:$0x73625140] }
 0x415   : > { %9994 = vst [vmem:[#allocation270_spill] sm:$0xff] %v6875_v15 }
 0x416   : > { %2112 = vst [vmem:[#allocation1] ss:$4 sm:$0xff] %v6869_v23 }
 0x417   : > { %v6878_v2 = vld [vmem:[#allocation1 + $0x20] ss:$4 sm:$0xff]  ;;  %v6880_v58 = vld [vmem:[#allocation1 + $0x21] ss:$4 sm:$0xff]  ;;  %2113 = vst [vmem:[#allocation1 + $0x1] ss:$4 sm:$0xff] %v6873_v41  ;;  %v6902_v41 = vpop.f32.mrf.mxu1 }
 0x418   : > { %v6883_v61 = vld [vmem:[#allocation1 + $0x22] ss:$4 sm:$0xff]  ;;  %v6885_v6 = vld [vmem:[#allocation1 + $0x23] ss:$4 sm:$0xff]  ;;  %9999 = vst [vmem:[#allocation275_spill] sm:$0xff] %v6902_v41 }
 0x419   : > { %2312 = vst.sshfl [vmem:[#allocation1 + $0x20] sm:$0xff pattern:$0x73625140] %v9767_v5 }
 0x41e   : > { %v6890_v29 = vld.sshfl [vmem:[#allocation1] sm:$0xff pattern:$0x73625140] }
 0x41f   : > { %9996 = vst [vmem:[#allocation272_spill] sm:$0xff] %v6890_v29  ;;  %v6927_v15 = vpop.f32.mrf.mxu1 }
 0x420   : > { %2295 = vst.sshfl [vmem:[#allocation1] sm:$0xff pattern:$0x73625140] %v9756_v51  ;;  %v6893_v62 = vld [vmem:[#allocation1 + $0x20] ss:$4 sm:$0xff] }
 0x421   : > { %v6895_v9 = vld [vmem:[#allocation1 + $0x21] ss:$4 sm:$0xff]  ;;  %v6897_v23 = vld [vmem:[#allocation1 + $0x22] ss:$4 sm:$0xff]  ;;  %v6899_v26 = vld [vmem:[#allocation1 + $0x23] ss:$4 sm:$0xff] }
 0x422   : > { %9997 = vst [vmem:[#allocation273_spill] sm:$0xff] %v6897_v23 }
 0x423   : > { %9998 = vst [vmem:[#allocation274_spill] sm:$0xff] %v6899_v26 }
 0x424   : > { %2321 = vst.sshfl [vmem:[#allocation1 + $0x20] sm:$0xff pattern:$0x73625140] %v9776_v33 }
 0x425   : > { %10001 = vst [vmem:[#allocation277_spill] sm:$0xff] %v6927_v15 }
 0x427   : > { %v6904_v21 = vld [vmem:[#allocation1 + $0x1] ss:$4 sm:$0xff]  ;;  %v6906_v34 = vld [vmem:[#allocation1 + $0x2] ss:$4 sm:$0xff]  ;;  %v6908_v0 = vld [vmem:[#allocation1 + $0x3] ss:$4 sm:$0xff]  ;;  %v6951_v23 = vpop.f32.mrf.mxu1 }
 0x428   : > { %2311 = vst.sshfl [vmem:[#allocation1] sm:$0xff pattern:$0x73625140] %v9754_v54 }
 0x429   : > { %10007 = vst [vmem:[#allocation283_spill] sm:$0xff] %v6951_v23 }
 0x42b   : > { %v6911_v51 = vld [vmem:[#allocation1 + $0x20] ss:$4 sm:$0xff]  ;;  %v6913_v25 = vld [vmem:[#allocation1 + $0x21] ss:$4 sm:$0xff]  ;;  %v6915_v1 = vld [vmem:[#allocation1 + $0x22] ss:$4 sm:$0xff] }
 0x42c   : > { %v6917_v29 = vld [vmem:[#allocation1 + $0x23] ss:$4 sm:$0xff] }
 0x42d   : > { %10000 = vst [vmem:[#allocation276_spill] sm:$0xff] %v6917_v29 }
 0x42e   : > { %2330 = vst.sshfl [vmem:[#allocation1 + $0x20] sm:$0xff pattern:$0x73625140] %v9785_v49 }
 0x42f   : > { %v6920_v50 = vld [vmem:[#allocation1 + $0x1] ss:$4 sm:$0xff]  ;;  %v6922_v41 = vld [vmem:[#allocation1 + $0x2] ss:$4 sm:$0xff]  ;;  %v6924_v43 = vld [vmem:[#allocation1 + $0x3] ss:$4 sm:$0xff] }
 0x430   : > { %2320 = vst.sshfl [vmem:[#allocation1] sm:$0xff pattern:$0x73625140] %v9762_v36 }
 0x435   : > { %v6929_v45 = vld [vmem:[#allocation1 + $0x20] ss:$4 sm:$0xff]  ;;  %v6931_v53 = vld [vmem:[#allocation1 + $0x21] ss:$4 sm:$0xff]  ;;  %v6933_v5 = vld [vmem:[#allocation1 + $0x22] ss:$4 sm:$0xff] }
 0x436   : > { %v6935_v33 = vld [vmem:[#allocation1 + $0x23] ss:$4 sm:$0xff] }
 0x437   : > { %2339 = vst.sshfl [vmem:[#allocation1 + $0x20] sm:$0xff pattern:$0x73625140] %v9794_v19  ;;  %v6938_v49 = vld [vmem:[#allocation1 + $0x1] ss:$4 sm:$0xff] }
 0x438   : > { %10002 = vst [vmem:[#allocation278_spill] sm:$0xff] %v6938_v49  ;;  %v6940_v54 = vld [vmem:[#allocation1 + $0x2] ss:$4 sm:$0xff]  ;;  %v6942_v29 = vld [vmem:[#allocation1 + $0x3] ss:$4 sm:$0xff] }
 0x439   : > { %10003 = vst [vmem:[#allocation279_spill] sm:$0xff] %v6940_v54 }
 0x43a   : > { %2329 = vst.sshfl [vmem:[#allocation1] sm:$0xff pattern:$0x73625140] %v9770_v56  ;;  %v6963_v56 = vpop.f32.mrf.mxu1 }
 0x43b   : > { %10012 = vst [vmem:[#allocation288_spill] sm:$0xff] %v6963_v56  ;;  %v1490_v56 = vpack.c.bf16 %v6392_v48, %v6387_v8 }
 0x43e   : > { %v6945_v36 = vld [vmem:[#allocation1 + $0x20] ss:$4 sm:$0xff]  ;;  %v6947_v15 = vld [vmem:[#allocation1 + $0x21] ss:$4 sm:$0xff]  ;;  %v6949_v26 = vld [vmem:[#allocation1 + $0x22] ss:$4 sm:$0xff] }
 0x43f   : > { %10004 = vst [vmem:[#allocation280_spill] sm:$0xff] %v6945_v36  ;;  %v6953_v7 = vld [vmem:[#allocation1 + $0x23] ss:$4 sm:$0xff] }
 0x440   : > { %10005 = vst [vmem:[#allocation281_spill] sm:$0xff] %v6947_v15  ;;  %v4895_v36 = vld [vmem:[%s8956_s1 + $0x8] sm:$0xf] }
 0x441   : > { %10006 = vst [vmem:[#allocation282_spill] sm:$0xff] %v6949_v26  ;;  %v6956_v19 = vld [vmem:[#allocation1 + $0x1] ss:$4 sm:$0xff]  ;;  %v6958_v49 = vld [vmem:[#allocation1 + $0x2] ss:$4 sm:$0xff] }
 0x442   : > { %10008 = vst [vmem:[#allocation284_spill] sm:$0xff] %v6953_v7  ;;  %v6960_v54 = vld [vmem:[#allocation1 + $0x3] ss:$4 sm:$0xff] }
 0x443   : > { %2348 = vst.sshfl [vmem:[#allocation1 + $0x20] sm:$0xff pattern:$0x73625140] %v9792_v35  ;;  %v10015_v35 = vld [vmem:[#allocation69_spill] sm:$0xff] }
 0x444   : > { %10009 = vst [vmem:[#allocation285_spill] sm:$0xff] %v6956_v19  ;;  %v10016_v19 = vld [vmem:[#allocation72_spill] sm:$0xff] }
 0x445   : > { %10010 = vst [vmem:[#allocation286_spill] sm:$0xff] %v6958_v49  ;;  %v463_v15 = vpack.c.bf16 %v10016_v19, %v10015_v35  ;;  %v6991_v19 = vpop.f32.mrf.mxu1 }
 0x446   : > { %10011 = vst [vmem:[#allocation287_spill] sm:$0xff] %v6960_v54  ;;  %v1545_v54 = vsel %vm1010_vm0, %v4895_v36, 0 }
 0x447   : > { %2338 = vst.sshfl [vmem:[#allocation1] sm:$0xff pattern:$0x73625140] %v9779_v55  ;;  %1554 = vmatpush.bf16.msrb.mxu2 %v1545_v54  ;;  %4888 = vmatmul.msk.bf16.gmra.mxu1 %vm970_vm8, %v463_v15 }
 0x448   : > { %10017 = vst [vmem:[#allocation69_spill] sm:$0xff] %v6991_v19  ;;  %v10024_v19 = vld [vmem:[#allocation78_spill] sm:$0xff] }
 0x44a   : > { %v6968_v26 = vld [vmem:[#allocation1 + $0x20] ss:$4 sm:$0xff]  ;;  %v6970_v23 = vld [vmem:[#allocation1 + $0x21] ss:$4 sm:$0xff]  ;;  %v6972_v7 = vld [vmem:[#allocation1 + $0x22] ss:$4 sm:$0xff]  ;;  %4896 = vmatmul.msk.bf16.vlgmr.msrb.gmra.mxu2 %vm970_vm8, %v1490_v56 }
 0x44b   : > { %10013 = vst [vmem:[#allocation289_spill] sm:$0xff] %v6968_v26  ;;  %v6976_v49 = vld [vmem:[#allocation1 + $0x23] ss:$4 sm:$0xff] }
 0x44c   : > { %10014 = vst [vmem:[#allocation290_spill] sm:$0xff] %v6970_v23 }
 0x44d   : > { %2357 = vst.sshfl [vmem:[#allocation1 + $0x20] sm:$0xff pattern:$0x73625140] %v9801_v18  ;;  %v7009_v56 = vpop.f32.mrf.mxu1 }
 0x44e   : > { %v6983_v55 = vld [vmem:[#allocation1 + $0x1] ss:$4 sm:$0xff]  ;;  %v6985_v23 = vld [vmem:[#allocation1 + $0x2] ss:$4 sm:$0xff]  ;;  %v6987_v26 = vld [vmem:[#allocation1 + $0x3] ss:$4 sm:$0xff] }
 0x44f   : > { %2347 = vst.sshfl [vmem:[#allocation1] sm:$0xff pattern:$0x73625140] %v9797_v10  ;;  %v10025_v10 = vld [vmem:[#allocation83_spill] sm:$0xff] }
 0x450   : > { %10023 = vst [vmem:[#allocation295_spill] sm:$0xff] %v7009_v56 }
 0x454   : > { %v6993_v36 = vld [vmem:[#allocation1 + $0x20] ss:$4 sm:$0xff]  ;;  %v6995_v54 = vld [vmem:[#allocation1 + $0x21] ss:$4 sm:$0xff]  ;;  %v6997_v35 = vld [vmem:[#allocation1 + $0x22] ss:$4 sm:$0xff] }
 0x455   : > { %10018 = vst [vmem:[#allocation72_spill] sm:$0xff] %v6993_v36  ;;  %v6999_v15 = vld [vmem:[#allocation1 + $0x23] ss:$4 sm:$0xff]  ;;  %v464_v36 = vpack.c.bf16 %v10025_v10, %v10024_v19 }
 0x456   : > { %10019 = vst [vmem:[#allocation291_spill] sm:$0xff] %v6995_v54  ;;  %v7001_v8 = vld [vmem:[#allocation1 + $0x1] ss:$4 sm:$0xff]  ;;  %v7003_v48 = vld [vmem:[#allocation1 + $0x2] ss:$4 sm:$0xff] }
 0x457   : > { %10020 = vst [vmem:[#allocation292_spill] sm:$0xff] %v6997_v35  ;;  %v7005_v18 = vld [vmem:[#allocation1 + $0x3] ss:$4 sm:$0xff]  ;;  %4889 = vmatmul.msk.bf16.gmra.mxu1 %vm970_vm8, %v464_v36  ;;  %v1491_v35 = vpack.c.bf16 %v6404_v4, %v6399_v39  ;;  %v7033_v39 = vpop.f32.mrf.mxu1 }
 0x458   : > { %10021 = vst [vmem:[#allocation293_spill] sm:$0xff] %v6999_v15 }
 0x459   : > { %10022 = vst [vmem:[#allocation294_spill] sm:$0xff] %v7003_v48 }
 0x45a   : > { %2356 = vst.sshfl [vmem:[#allocation1] sm:$0xff pattern:$0x73625140] %v9806_v14  ;;  %4897 = vmatmul.msk.bf16.gmra.mxu2 %vm970_vm8, %v1491_v35 }
 0x45b   : > { %2366 = vst.sshfl [vmem:[#allocation1 + $0x20] sm:$0xff pattern:$0x73625140] %v9810_v3 }
 0x45c   : > { %10031 = vst [vmem:[#allocation299_spill] sm:$0xff] %v7033_v39  ;;  %v10037_v39 = vld [vmem:[#allocation88_spill] sm:$0xff] }
 0x45f   : > { %v7051_v35 = vpop.f32.mrf.mxu1 }
 0x460   : > { %10036 = vst [vmem:[#allocation304_spill] sm:$0xff] %v7051_v35 }
 0x461   : > { %v7016_v54 = vld [vmem:[#allocation1 + $0x1] ss:$4 sm:$0xff]  ;;  %v7018_v15 = vld [vmem:[#allocation1 + $0x2] ss:$4 sm:$0xff]  ;;  %v7020_v48 = vld [vmem:[#allocation1 + $0x3] ss:$4 sm:$0xff] }
 0x462   : > { %10026 = vst [vmem:[#allocation78_spill] sm:$0xff] %v7020_v48  ;;  %v7023_v14 = vld [vmem:[#allocation1 + $0x20] ss:$4 sm:$0xff]  ;;  %v7025_v3 = vld [vmem:[#allocation1 + $0x21] ss:$4 sm:$0xff] }
 0x463   : > { %2365 = vst.sshfl [vmem:[#allocation1] sm:$0xff pattern:$0x73625140] %v9815_v63  ;;  %v7027_v56 = vld [vmem:[#allocation1 + $0x22] ss:$4 sm:$0xff] }
 0x464   : > { %10027 = vst [vmem:[#allocation83_spill] sm:$0xff] %v7023_v14  ;;  %v7029_v10 = vld [vmem:[#allocation1 + $0x23] ss:$4 sm:$0xff] }
 0x465   : > { %10028 = vst [vmem:[#allocation296_spill] sm:$0xff] %v7025_v3 }
 0x466   : > { %10029 = vst [vmem:[#allocation297_spill] sm:$0xff] %v7027_v56 }
 0x467   : > { %10030 = vst [vmem:[#allocation298_spill] sm:$0xff] %v7029_v10 }
 0x468   : > { %2375 = vst.sshfl [vmem:[#allocation1 + $0x20] sm:$0xff pattern:$0x73625140] %v9819_v47  ;;  %v10038_v47 = vld [vmem:[#allocation93_spill] sm:$0xff] }
 0x469   : > { %v465_v14 = vpack.c.bf16 %v10038_v47, %v10037_v39  ;;  %v10043_v39 = vld [vmem:[#allocation209_spill] sm:$0xff] }
 0x46a   : > { %v7035_v4 = vld [vmem:[#allocation1 + $0x1] ss:$4 sm:$0xff]  ;;  %v7037_v19 = vld [vmem:[#allocation1 + $0x2] ss:$4 sm:$0xff]  ;;  %v7039_v36 = vld [vmem:[#allocation1 + $0x3] ss:$4 sm:$0xff] }
 0x46b   : > { %2374 = vst.sshfl [vmem:[#allocation1] sm:$0xff pattern:$0x73625140] %v9824_v40  ;;  %4890 = vmatmul.msk.bf16.gmra.mxu1 %vm970_vm8, %v465_v14  ;;  %v1492_v40 = vpack.c.bf16 %v6416_v59, %v6411_v60  ;;  %v10042_v14 = vld [vmem:[#allocation204_spill] sm:$0xff]  ;;  %v7076_v59 = vpop.f32.mrf.mxu1 }
 0x46c   : > { %10045 = vst [vmem:[#allocation209_spill] sm:$0xff] %v7076_v59 }
 0x46d   : > { %4898 = vmatmul.msk.bf16.gmra.mxu2 %vm970_vm8, %v1492_v40 }
 0x46f   : > { %v7042_v63 = vld [vmem:[#allocation1 + $0x20] ss:$4 sm:$0xff]  ;;  %v7044_v3 = vld [vmem:[#allocation1 + $0x21] ss:$4 sm:$0xff]  ;;  %v7046_v56 = vld [vmem:[#allocation1 + $0x22] ss:$4 sm:$0xff] }
 0x470   : > { %10032 = vst [vmem:[#allocation300_spill] sm:$0xff] %v7042_v63  ;;  %v7048_v10 = vld [vmem:[#allocation1 + $0x23] ss:$4 sm:$0xff] }
 0x471   : > { %10033 = vst [vmem:[#allocation301_spill] sm:$0xff] %v7044_v3 }
 0x472   : > { %10034 = vst [vmem:[#allocation302_spill] sm:$0xff] %v7046_v56  ;;  %v7058_v48 = vld [vmem:[#allocation1 + $0x1] ss:$4 sm:$0xff]  ;;  %v7060_v63 = vld [vmem:[#allocation1 + $0x2] ss:$4 sm:$0xff] }
 0x473   : > { %10035 = vst [vmem:[#allocation303_spill] sm:$0xff] %v7048_v10  ;;  %v7062_v3 = vld [vmem:[#allocation1 + $0x3] ss:$4 sm:$0xff]  ;;  %v964_v10 = vpack.c.bf16 %v10043_v39, %v10042_v14 }
 0x474   : > { %2384 = vst.sshfl [vmem:[#allocation1 + $0x20] sm:$0xff pattern:$0x73625140] %v9837_v24 }
 0x475   : > { %2383 = vst.sshfl [vmem:[#allocation1] sm:$0xff pattern:$0x73625140] %v9822_v42  ;;  %4878 = vmatmul.msk.bf16.vlgmr.msra.gmra.mxu3 %vm970_vm8, %v964_v10 }
 0x47b   : > { %v7066_v24 = vld [vmem:[#allocation1 + $0x20] ss:$4 sm:$0xff]  ;;  %v7068_v35 = vld [vmem:[#allocation1 + $0x21] ss:$4 sm:$0xff]  ;;  %v7070_v47 = vld [vmem:[#allocation1 + $0x22] ss:$4 sm:$0xff] }
 0x47c   : > { %10039 = vst [vmem:[#allocation88_spill] sm:$0xff] %v7066_v24  ;;  %v7074_v60 = vld [vmem:[#allocation1 + $0x23] ss:$4 sm:$0xff]  ;;  %v7080_v42 = vld [vmem:[#allocation1 + $0x1] ss:$4 sm:$0xff] }
 0x47d   : > { %10040 = vst [vmem:[#allocation93_spill] sm:$0xff] %v7068_v35  ;;  %v7082_v40 = vld [vmem:[#allocation1 + $0x2] ss:$4 sm:$0xff]  ;;  %v7084_v56 = vld [vmem:[#allocation1 + $0x3] ss:$4 sm:$0xff] }
 0x47e   : > { %10041 = vst [vmem:[#allocation305_spill] sm:$0xff] %v7070_v47  ;;  %v10048_v47 = vld [vmem:[#allocation129_spill] sm:$0xff]  ;;  %v10049_v35 = vld [vmem:[#allocation124_spill] sm:$0xff] }
 0x47f   : > { %10044 = vst [vmem:[#allocation204_spill] sm:$0xff] %v7074_v60  ;;  %v955_v24 = vpack.c.bf16 %v10049_v35, %v10048_v47  ;;  %v10053_v60 = vld [vmem:[#allocation99_spill] sm:$0xff]  ;;  %v1493_v35 = vpack.c.bf16 %v6428_v20, %v6423_v28 }
 0x480   : > { %2393 = vst.sshfl [vmem:[#allocation1 + $0x20] sm:$0xff pattern:$0x73625140] %v9846_v57  ;;  %v7095_v57 = vpop.f32.mrf.mxu1 }
 0x481   : > { %10046 = vst [vmem:[#allocation306_spill] sm:$0xff] %v7080_v42  ;;  %4869 = vmatmul.msk.bf16.vlgmr.msra.gmra.mxu0 %vm970_vm8, %v955_v24  ;;  %v10054_v42 = vld [vmem:[#allocation103_spill] sm:$0xff]  ;;  %4899 = vmatmul.msk.bf16.gmra.mxu2 %vm970_vm8, %v1493_v35  ;;  %v10057_v24 = vld [vmem:[#allocation212_spill] sm:$0xff] }
 0x482   : > { %10047 = vst [vmem:[#allocation307_spill] sm:$0xff] %v7084_v56  ;;  %v466_v56 = vpack.c.bf16 %v10054_v42, %v10053_v60 }
 0x483   : > { %2392 = vst.sshfl [vmem:[#allocation1] sm:$0xff pattern:$0x73625140] %v9831_v32 }
 0x484   : > { %10051 = vst [vmem:[#allocation124_spill] sm:$0xff] %v7095_v57  ;;  %4891 = vmatmul.msk.bf16.gmra.mxu1 %vm970_vm8, %v466_v56  ;;  %v10058_v57 = vld [vmem:[#allocation217_spill] sm:$0xff] }
 0x485   : > { %v965_v42 = vpack.c.bf16 %v10058_v57, %v10057_v24  ;;  %v10064_v57 = vld [vmem:[#allocation139_spill] sm:$0xff]  ;;  %v10065_v24 = vld [vmem:[#allocation134_spill] sm:$0xff] }
 0x487   : > { %v7089_v14 = vld [vmem:[#allocation1 + $0x20] ss:$4 sm:$0xff]  ;;  %v7091_v39 = vld [vmem:[#allocation1 + $0x21] ss:$4 sm:$0xff]  ;;  %v7093_v59 = vld [vmem:[#allocation1 + $0x22] ss:$4 sm:$0xff]  ;;  %4879 = vmatmul.msk.bf16.gmra.mxu3 %vm970_vm8, %v965_v42 }
 0x488   : > { %10050 = vst [vmem:[#allocation129_spill] sm:$0xff] %v7093_v59  ;;  %v7097_v10 = vld [vmem:[#allocation1 + $0x23] ss:$4 sm:$0xff]  ;;  %v7116_v60 = vpop.f32.mrf.mxu1 }
 0x489   : > { %10052 = vst [vmem:[#allocation308_spill] sm:$0xff] %v7097_v10  ;;  %v10067_v42 = vld [vmem:[#allocation108_spill] sm:$0xff] }
 0x48a   : > { %2402 = vst.sshfl [vmem:[#allocation1 + $0x20] sm:$0xff pattern:$0x73625140] %v9855_v27  ;;  %v7106_v47 = vld [vmem:[#allocation1 + $0x1] ss:$4 sm:$0xff] }
 0x48b   : > { %10055 = vst [vmem:[#allocation99_spill] sm:$0xff] %v7106_v47  ;;  %v7108_v32 = vld [vmem:[#allocation1 + $0x2] ss:$4 sm:$0xff]  ;;  %v7110_v59 = vld [vmem:[#allocation1 + $0x3] ss:$4 sm:$0xff] }
 0x48c   : > { %10056 = vst [vmem:[#allocation103_spill] sm:$0xff] %v7108_v32  ;;  %v10068_v47 = vld [vmem:[#allocation112_spill] sm:$0xff] }
 0x48d   : > { %2401 = vst.sshfl [vmem:[#allocation1] sm:$0xff pattern:$0x73625140] %v9840_v31 }
 0x48e   : > { %10059 = vst [vmem:[#allocation212_spill] sm:$0xff] %v7116_v60  ;;  %v956_v60 = vpack.c.bf16 %v10065_v24, %v10064_v57  ;;  %v1494_v57 = vpack.c.bf16 %v6440_v12, %v6435_v22 }
 0x490   : > { %v7137_v32 = vpop.f32.mrf.mxu1 }
 0x491   : > { %v7118_v27 = vld [vmem:[#allocation1 + $0x20] ss:$4 sm:$0xff]  ;;  %v7120_v56 = vld [vmem:[#allocation1 + $0x21] ss:$4 sm:$0xff]  ;;  %v7122_v28 = vld [vmem:[#allocation1 + $0x22] ss:$4 sm:$0xff]  ;;  %4870 = vmatmul.msk.bf16.gmra.mxu0 %vm970_vm8, %v956_v60  ;;  %4900 = vmatmul.msk.bf16.gmra.mxu2 %vm970_vm8, %v1494_v57 }
 0x492   : > { %10060 = vst [vmem:[#allocation217_spill] sm:$0xff] %v7122_v28  ;;  %v7125_v20 = vld [vmem:[#allocation1 + $0x23] ss:$4 sm:$0xff] }
 0x493   : > { %10061 = vst [vmem:[#allocation309_spill] sm:$0xff] %v7125_v20  ;;  %v467_v20 = vpack.c.bf16 %v10068_v47, %v10067_v42  ;;  %v10070_v47 = vld [vmem:[#allocation221_spill] sm:$0xff]  ;;  %v10071_v42 = vld [vmem:[#allocation18_spill] sm:$0xff] }
 0x494   : > { %2411 = vst.sshfl [vmem:[#allocation1 + $0x20] sm:$0xff pattern:$0x73625140] %v9864_v30  ;;  %v7128_v31 = vld [vmem:[#allocation1 + $0x1] ss:$4 sm:$0xff] }
 0x495   : > { %10062 = vst [vmem:[#allocation310_spill] sm:$0xff] %v7128_v31  ;;  %v7130_v35 = vld [vmem:[#allocation1 + $0x2] ss:$4 sm:$0xff]  ;;  %v7132_v10 = vld [vmem:[#allocation1 + $0x3] ss:$4 sm:$0xff]  ;;  %4892 = vmatmul.msk.bf16.gmra.mxu1 %vm970_vm8, %v467_v20  ;;  %v966_v20 = vpack.c.bf16 %v10071_v42, %v10070_v47 }
 0x496   : > { %10063 = vst [vmem:[#allocation311_spill] sm:$0xff] %v7130_v35  ;;  %v10074_v47 = vld [vmem:[#allocation144_spill] sm:$0xff] }
 0x497   : > { %2410 = vst.sshfl [vmem:[#allocation1] sm:$0xff pattern:$0x73625140] %v9637_v52  ;;  %4880 = vmatmul.msk.bf16.gmra.mxu3 %vm970_vm8, %v966_v20 }
 0x498   : > { %10066 = vst [vmem:[#allocation139_spill] sm:$0xff] %v7137_v32  ;;  %v7165_v32 = vpop.f32.mrf.mxu1 }
 0x499   : > { %10072 = vst [vmem:[#allocation108_spill] sm:$0xff] %v7165_v32  ;;  %v10076_v32 = vld [vmem:[#allocation118_spill] sm:$0xff] }
 0x49b   : > { %v7142_v28 = vld [vmem:[#allocation1 + $0x20] ss:$4 sm:$0xff]  ;;  %v7144_v30 = vld [vmem:[#allocation1 + $0x21] ss:$4 sm:$0xff]  ;;  %v7146_v31 = vld [vmem:[#allocation1 + $0x22] ss:$4 sm:$0xff] }
 0x49c   : > { %10069 = vst [vmem:[#allocation134_spill] sm:$0xff] %v7142_v28  ;;  %v7148_v35 = vld [vmem:[#allocation1 + $0x23] ss:$4 sm:$0xff] }
 0x49d   : > { %2420 = vst.sshfl [vmem:[#allocation1 + $0x20] sm:$0xff pattern:$0x73625140] %v6672_v13  ;;  %v10075_v13 = vld [vmem:[#allocation116_spill] sm:$0xff] }
 0x49e   : > { %v7153_v24 = vld [vmem:[#allocation1 + $0x1] ss:$4 sm:$0xff]  ;;  %v7155_v52 = vld [vmem:[#allocation1 + $0x2] ss:$4 sm:$0xff]  ;;  %v7157_v60 = vld [vmem:[#allocation1 + $0x3] ss:$4 sm:$0xff] }
 0x49f   : > { %2419 = vst.sshfl [vmem:[#allocation1] sm:$0xff pattern:$0x73625140] %v6653_v44 }
 0x4a0   : > { %2428 = vst [vmem:[#allocation1] ss:$4 sm:$0xff] %v6904_v21  ;;  %v10073_v21 = vld [vmem:[#allocation149_spill] sm:$0xff]  ;;  %v7184_v20 = vpop.f32.mrf.mxu1 }
 0x4a1   : > { %v957_v42 = vpack.c.bf16 %v10074_v47, %v10073_v21 }
 0x4a3   : > { %4871 = vmatmul.msk.bf16.gmra.mxu0 %vm970_vm8, %v957_v42 }
 0x4a4   : > { %v7174_v44 = vld [vmem:[#allocation1 + $0x22] ss:$4 sm:$0xff]  ;;  %v7177_v57 = vld [vmem:[#allocation1 + $0x23] ss:$4 sm:$0xff] }
 0x4a5   : > { %2440 = vst [vmem:[#allocation1 + $0x22] ss:$4 sm:$0xff] %v6885_v6  ;;  %v10077_v6 = vld [vmem:[#allocation23_spill] sm:$0xff] }
 0x4a6   : > { %v7168_v22 = vld [vmem:[#allocation1 + $0x1] ss:$4 sm:$0xff]  ;;  %v7170_v12 = vld [vmem:[#allocation1 + $0x2] ss:$4 sm:$0xff]  ;;  %v7172_v28 = vld [vmem:[#allocation1 + $0x3] ss:$4 sm:$0xff]  ;;  %v967_v21 = vpack.c.bf16 %v10077_v6, %v10077_v6 }
 0x4a7   : > { %2430 = vst [vmem:[#allocation1 + $0x1] ss:$4 sm:$0xff] %v6906_v34  ;;  %v468_v34 = vpack.c.bf16 %v10076_v32, %v10075_v13  ;;  %v10078_v32 = vld [vmem:[#allocation159_spill] sm:$0xff] }
 0x4a8   : > { %2432 = vst [vmem:[#allocation1 + $0x2] ss:$4 sm:$0xff] %v6908_v0  ;;  %v1495_v0 = vpack.c.bf16 %v6452_v16, %v6447_v11  ;;  %4881 = vmatmul.msk.bf16.gmra.mxu3 %vm970_vm8, %v967_v21  ;;  %v10079_v11 = vld [vmem:[#allocation154_spill] sm:$0xff]  ;;  %v10084_v21 = vld [vmem:[#allocation273_spill] sm:$0xff] }
 0x4a9   : > { %2434 = vst [vmem:[#allocation1 + $0x3] ss:$4 sm:$0xff] %v6878_v2  ;;  %4893 = vmatmul.msk.bf16.gmra.mxu1 %vm970_vm8, %v468_v34  ;;  %v958_v16 = vpack.c.bf16 %v10079_v11, %v10078_v32  ;;  %v7228_v34 = vld [vmem:[#allocation1 + $0x20] ss:$4 sm:$0xff] }
 0x4aa   : > { %2442 = vst [vmem:[#allocation1 + $0x23] ss:$4 sm:$0xff] %v6920_v50  ;;  %4901 = vmatmul.msk.bf16.gmra.mxu2 %vm970_vm8, %v1495_v0  ;;  %v7198_v50 = vpop.f32.mrf.mxu1  ;;  %v10085_v32 = vld [vmem:[#allocation274_spill] sm:$0xff] }
 0x4ab   : > { %2436 = vst [vmem:[#allocation1 + $0x20] ss:$4 sm:$0xff] %v6880_v58  ;;  %v10082_v58 = vld [vmem:[#allocation130_spill] sm:$0xff] }
 0x4ac   : > { %v10086_v11 = vld [vmem:[#allocation2_spill] sm:$0xff] }
 0x4b0   : > { %v2443_v2 = vld.sshfl [vmem:[#allocation1] sm:$0xff pattern:$0x73625140] }
 0x4b1   : > { %2445 = vst [vmem:[#allocation1] ss:$4 sm:$0xff] %v6922_v41  ;;  %v10080_v41 = vld [vmem:[#allocation120_spill] sm:$0xff] }
 0x4b2   : > { %2446 = vst [vmem:[#allocation1 + $0x1] ss:$4 sm:$0xff] %v6924_v43  ;;  %v7205_v13 = vpop.f32.mrf.mxu1  ;;  %v469_v43 = vpack.c.bf16 %v10080_v41, %v10080_v41  ;;  %v10088_v41 = vld [vmem:[#allocation278_spill] sm:$0xff] }
 0x4b3   : > { %2447 = vst [vmem:[#allocation1 + $0x2] ss:$4 sm:$0xff] %v6893_v62  ;;  %4872 = vmatmul.msk.bf16.gmra.mxu0 %vm970_vm8, %v958_v16  ;;  %v1496_v62 = vpack.c.bf16 %v6464_v46, %v6459_v17  ;;  %v7230_v17 = vld [vmem:[#allocation1 + $0x21] ss:$4 sm:$0xff] }
 0x4b4   : > { %2448 = vst [vmem:[#allocation1 + $0x3] ss:$4 sm:$0xff] %v6895_v9  ;;  %v4909_v9 = vld [vmem:[%s8956_s1 + $0xc] sm:$0xf] }
 0x4b5   : > { %v1862_v42 = vsel %vm1010_vm0, %v4909_v9, 0  ;;  %2438 = vst [vmem:[#allocation1 + $0x21] ss:$4 sm:$0xff] %v6883_v61  ;;  %v10083_v61 = vld [vmem:[#allocation5_spill] sm:$0xff]  ;;  %v10091_v9 = vld [vmem:[#allocation224_spill] sm:$0xff] }
 0x4b6   : > { %1871 = vmatpush.bf16.msrb.mxu3 %v1862_v42  ;;  %v2140_v0 = vpack.c.bf16 %v10083_v61, %v10082_v58  ;;  %v10092_v42 = vld [vmem:[#allocation281_spill] sm:$0xff]  ;;  %v10096_v58 = vld [vmem:[#allocation276_spill] sm:$0xff] }
 0x4b7   : > { %v10097_v61 = vld [vmem:[#allocation285_spill] sm:$0xff] }
 0x4b9   : > { %4894 = vmatmul.msk.bf16.gmra.mxu1 %vm970_vm8, %v469_v43  ;;  %v10089_v43 = vld [vmem:[#allocation279_spill] sm:$0xff] }
 0x4ba   : > { %4902 = vmatmul.msk.bf16.gmra.mxu2 %vm970_vm8, %v1496_v62  ;;  %v10090_v62 = vld [vmem:[#allocation225_spill] sm:$0xff] }
 0x4bb   : > { %v7207_v47 = vld.sshfl [vmem:[#allocation1] sm:$0xff pattern:$0x73625140] }
 0x4bc   : > { %2455 = vst [vmem:[#allocation1] ss:$4 sm:$0xff] %v6942_v29  ;;  %v1807_v29 = vpack.c.bf16 %v6535_v38, %v6541_v37  ;;  %v4939_v37 = vld [vmem:[%s8956_s1 + $0x14] sm:$0xf] }
 0x4bd   : > { %2456 = vst [vmem:[#allocation1 + $0x1] ss:$4 sm:$0xff] %v6911_v51  ;;  %v7226_v51 = vpop.f32.mrf.mxu1 }
 0x4be   : > { %2457 = vst [vmem:[#allocation1 + $0x2] ss:$4 sm:$0xff] %v6913_v25  ;;  %4910 = vmatmul.msk.bf16.vlgmr.msrb.gmra.mxu3 %vm970_vm8, %v1807_v29  ;;  %v4925_v25 = vld [vmem:[%s8956_s1 + $0x10] sm:$0xf]  ;;  %v7267_v29 = vpop.f32.mrf.mxu2 }
 0x4bf   : > { %2458 = vst [vmem:[#allocation1 + $0x3] ss:$4 sm:$0xff] %v6915_v1  ;;  %v2195_v38 = vsel %vm1010_vm0, %v4925_v25, 0  ;;  %v2638_v1 = vsel %vm1010_vm0, %v4939_v37, 0  ;;  %v10095_v37 = vld [vmem:[#allocation284_spill] sm:$0xff] }
 0x4c0   : > { %10081 = vst [vmem:[#allocation112_spill] sm:$0xff] %v7226_v51  ;;  %2204 = vmatpush.bf16.msrb.mxu0 %v2195_v38  ;;  %2647 = vmatpush.bf16.msra.mxu1 %v2638_v1  ;;  %v10094_v38 = vld [vmem:[#allocation282_spill] sm:$0xff] }
 0x4c3   : > { %4926 = vmatmul.msk.bf16.vlgmr.msrb.gmra.mxu0 %vm970_vm8, %v2140_v0  ;;  %v10098_v0 = vld [vmem:[#allocation122_spill] sm:$0xff] }
 0x4c5   : > { %v7251_v6 = vpop.f32.mrf.mxu1 }
 0x4c6   : > { %v7235_v46 = vld.sshfl [vmem:[#allocation1] sm:$0xff pattern:$0x73625140] }
 0x4c7   : > { %2465 = vst [vmem:[#allocation1] ss:$4 sm:$0xff] %v6929_v45  ;;  %v2444_v45 = vld.sshfl [vmem:[#allocation1 + $0x20] sm:$0xff pattern:$0x73625140] }
 0x4c8   : > { %2466 = vst [vmem:[#allocation1 + $0x1] ss:$4 sm:$0xff] %v6931_v53  ;;  %v2583_v53 = vpack.c.bf16 %v2444_v45, %v2443_v2  ;;  %v1808_v2 = vpack.c.bf16 %v10091_v9, %v10090_v62  ;;  %v10099_v45 = vld [vmem:[#allocation121_spill] sm:$0xff]  ;;  %v10105_v9 = vld [vmem:[#allocation227_spill] sm:$0xff] }
 0x4c9   : > { %2467 = vst [vmem:[#allocation1 + $0x2] ss:$4 sm:$0xff] %v6933_v5  ;;  %v10087_v5 = vld [vmem:[#allocation29_spill] sm:$0xff] }
 0x4ca   : > { %2468 = vst [vmem:[#allocation1 + $0x3] ss:$4 sm:$0xff] %v6935_v33  ;;  %v1497_v16 = vpack.c.bf16 %v10087_v5, %v10086_v11  ;;  %4940 = vmatmul.msk.bf16.vlgmr.msra.gmra.mxu1 %vm970_vm8, %v2583_v53  ;;  %v2141_v53 = vpack.c.bf16 %v10099_v45, %v10098_v0  ;;  %v10102_v5 = vld [vmem:[#allocation287_spill] sm:$0xff]  ;;  %v10112_v0 = vld [vmem:[#allocation42_spill] sm:$0xff]  ;;  %v10113_v45 = vld [vmem:[#allocation48_spill] sm:$0xff] }
 0x4cb   : > { %2449 = vst [vmem:[#allocation1 + $0x20] ss:$4 sm:$0xff] %v10084_v21  ;;  %v10100_v21 = vld [vmem:[#allocation286_spill] sm:$0xff] }
 0x4cc   : > { %2450 = vst [vmem:[#allocation1 + $0x21] ss:$4 sm:$0xff] %v10085_v32  ;;  %4903 = vmatmul.msk.bf16.gmra.mxu2 %vm970_vm8, %v1497_v16  ;;  %v7280_v32 = vpop.f32.mrf.mxu2 }
 0x4cd   : > { %2451 = vst [vmem:[#allocation1 + $0x22] ss:$4 sm:$0xff] %v10088_v41  ;;  %v7269_v25 = vpop.f32.mrf.mxu1  ;;  %v10103_v41 = vld [vmem:[#allocation33_spill] sm:$0xff] }
 0x4ce   : > { %2452 = vst [vmem:[#allocation1 + $0x23] ss:$4 sm:$0xff] %v10089_v43  ;;  %4911 = vmatmul.msk.bf16.gmra.mxu3 %vm970_vm8, %v1808_v2  ;;  %v10104_v43 = vld [vmem:[#allocation38_spill] sm:$0xff] }
 0x4cf   : > { %10093 = vst [vmem:[#allocation221_spill] sm:$0xff] %v7269_v25  ;;  %v1498_v62 = vpack.c.bf16 %v10104_v43, %v10103_v41  ;;  %v10106_v2 = vld [vmem:[#allocation226_spill] sm:$0xff] }
 0x4d0   : > { %10101 = vst [vmem:[#allocation18_spill] sm:$0xff] %v7280_v32 }
 0x4d1   : > { %v7262_v33 = vld.sshfl [vmem:[#allocation1] sm:$0xff pattern:$0x73625140] }
 0x4d2   : > { %2475 = vst [vmem:[#allocation1] ss:$4 sm:$0xff] %v10092_v42 }
 0x4d3   : > { %2476 = vst [vmem:[#allocation1 + $0x1] ss:$4 sm:$0xff] %v10094_v38  ;;  %4927 = vmatmul.msk.bf16.gmra.mxu0 %vm970_vm8, %v2141_v53  ;;  %v1499_v53 = vpack.c.bf16 %v10113_v45, %v10112_v0  ;;  %v10130_v45 = vld [vmem:[#allocation307_spill] sm:$0xff] }
 0x4d4   : > { %2477 = vst [vmem:[#allocation1 + $0x2] ss:$4 sm:$0xff] %v10095_v37  ;;  %v10110_v37 = vld [vmem:[#allocation126_spill] sm:$0xff] }
 0x4d5   : > { %2478 = vst [vmem:[#allocation1 + $0x3] ss:$4 sm:$0xff] %v7001_v8  ;;  %v2454_v1 = vld.sshfl [vmem:[#allocation1 + $0x20] sm:$0xff pattern:$0x73625140]  ;;  %v7282_v11 = vpop.f32.mrf.mxu1 }
 0x4d6   : > { %2459 = vst [vmem:[#allocation1 + $0x20] ss:$4 sm:$0xff] %v10096_v58  ;;  %v2584_v8 = vpack.c.bf16 %v2454_v1, %v7207_v47  ;;  %v1809_v47 = vpack.c.bf16 %v10106_v2, %v10105_v9  ;;  %v10111_v1 = vld [vmem:[#allocation119_spill] sm:$0xff]  ;;  %v10121_v9 = vld [vmem:[#allocation78_spill] sm:$0xff]  ;;  %v10122_v2 = vld [vmem:[#allocation128_spill] sm:$0xff] }
 0x4d7   : > { %2460 = vst [vmem:[#allocation1 + $0x21] ss:$4 sm:$0xff] %v10097_v61  ;;  %v2142_v58 = vpack.c.bf16 %v10111_v1, %v10110_v37 }
 0x4d8   : > { %2461 = vst [vmem:[#allocation1 + $0x22] ss:$4 sm:$0xff] %v10100_v21  ;;  %v10117_v21 = vld [vmem:[#allocation229_spill] sm:$0xff] }
 0x4d9   : > { %2462 = vst [vmem:[#allocation1 + $0x23] ss:$4 sm:$0xff] %v10102_v5  ;;  %v10118_v5 = vld [vmem:[#allocation228_spill] sm:$0xff] }
 0x4da   : > { %4941 = vmatmul.msk.bf16.gmra.mxu1 %vm970_vm8, %v2584_v8  ;;  %v1810_v8 = vpack.c.bf16 %v10118_v5, %v10117_v21 }
 0x4dc   : > { %v7287_v16 = vld.sshfl [vmem:[#allocation1] sm:$0xff pattern:$0x73625140]  ;;  %4904 = vmatmul.msk.bf16.gmra.mxu2 %vm970_vm8, %v1498_v62 }
 0x4dd   : > { %2485 = vst [vmem:[#allocation1] ss:$4 sm:$0xff] %v6972_v7  ;;  %v7299_v38 = vpop.f32.mrf.mxu1  ;;  %v7302_v7 = vpop.f32.mrf.mxu2 }
 0x4de   : > { %2486 = vst [vmem:[#allocation1 + $0x1] ss:$4 sm:$0xff] %v6976_v49  ;;  %4912 = vmatmul.msk.bf16.gmra.mxu3 %vm970_vm8, %v1809_v47  ;;  %v10108_v49 = vld [vmem:[#allocation280_spill] sm:$0xff]  ;;  %v10123_v47 = vld [vmem:[#allocation127_spill] sm:$0xff] }
 0x4df   : > { %2487 = vst [vmem:[#allocation1 + $0x2] ss:$4 sm:$0xff] %v7016_v54 }
 0x4e0   : > { %2488 = vst [vmem:[#allocation1 + $0x3] ss:$4 sm:$0xff] %v7018_v15  ;;  %v2464_v42 = vld.sshfl [vmem:[#allocation1 + $0x20] sm:$0xff pattern:$0x73625140] }
 0x4e1   : > { %10107 = vst [vmem:[#allocation149_spill] sm:$0xff] %v7299_v38  ;;  %v10109_v15 = vld [vmem:[#allocation293_spill] sm:$0xff]  ;;  %v10184_v38 = vld [vmem:[#allocation239_spill] sm:$0xff] }
 0x4e2   : > { %2469 = vst [vmem:[#allocation1 + $0x20] ss:$4 sm:$0xff] %v6983_v55 }
 0x4e3   : > { %2470 = vst [vmem:[#allocation1 + $0x21] ss:$4 sm:$0xff] %v6985_v23  ;;  %4928 = vmatmul.msk.bf16.gmra.mxu0 %vm970_vm8, %v2142_v58  ;;  %v10128_v58 = vld [vmem:[#allocation53_spill] sm:$0xff] }
 0x4e4   : > { %2471 = vst [vmem:[#allocation1 + $0x22] ss:$4 sm:$0xff] %v6987_v26  ;;  %v2585_v26 = vpack.c.bf16 %v2464_v42, %v7235_v46  ;;  %v2143_v42 = vpack.c.bf16 %v10123_v47, %v10122_v2  ;;  %v10139_v2 = vld [vmem:[#allocation298_spill] sm:$0xff] }
 0x4e5   : > { %2472 = vst [vmem:[#allocation1 + $0x23] ss:$4 sm:$0xff] %v10108_v49  ;;  %v7315_v55 = vpop.f32.mrf.mxu1  ;;  %v7318_v23 = vpop.f32.mrf.mxu2  ;;  %v10124_v49 = vld [vmem:[#allocation72_spill] sm:$0xff] }
 0x4e7   : > { %v7308_v54 = vld.sshfl [vmem:[#allocation1] sm:$0xff pattern:$0x73625140] }
 0x4e8   : > { %2495 = vst [vmem:[#allocation1] ss:$4 sm:$0xff] %v10109_v15 }
 0x4e9   : > { %2496 = vst [vmem:[#allocation1 + $0x1] ss:$4 sm:$0xff] %v7035_v4  ;;  %v10114_v4 = vld [vmem:[#allocation294_spill] sm:$0xff] }
 0x4ea   : > { %2497 = vst [vmem:[#allocation1 + $0x2] ss:$4 sm:$0xff] %v7037_v19  ;;  %4942 = vmatmul.msk.bf16.gmra.mxu1 %vm970_vm8, %v2585_v26  ;;  %v10115_v19 = vld [vmem:[#allocation289_spill] sm:$0xff]  ;;  %v10129_v26 = vld [vmem:[#allocation59_spill] sm:$0xff] }
 0x4eb   : > { %2498 = vst [vmem:[#allocation1 + $0x3] ss:$4 sm:$0xff] %v7039_v36  ;;  %v10116_v36 = vld [vmem:[#allocation290_spill] sm:$0xff]  ;;  %v1500_v0 = vpack.c.bf16 %v10129_v26, %v10128_v58 }
 0x4ec   : > { %v2474_v61 = vld.sshfl [vmem:[#allocation1 + $0x20] sm:$0xff pattern:$0x73625140]  ;;  %4905 = vmatmul.msk.bf16.gmra.mxu2 %vm970_vm8, %v1499_v53  ;;  %v10131_v53 = vld [vmem:[#allocation88_spill] sm:$0xff] }
 0x4ed   : > { %2479 = vst [vmem:[#allocation1 + $0x20] ss:$4 sm:$0xff] %v10114_v4  ;;  %v7334_v41 = vpop.f32.mrf.mxu1  ;;  %v7337_v43 = vpop.f32.mrf.mxu2  ;;  %v10132_v4 = vld [vmem:[#allocation93_spill] sm:$0xff] }
 0x4ee   : > { %2480 = vst [vmem:[#allocation1 + $0x21] ss:$4 sm:$0xff] %v7005_v18  ;;  %4913 = vmatmul.msk.bf16.gmra.mxu3 %vm970_vm8, %v1810_v8  ;;  %v10120_v18 = vld [vmem:[#allocation300_spill] sm:$0xff] }
 0x4ef   : > { %2481 = vst [vmem:[#allocation1 + $0x22] ss:$4 sm:$0xff] %v10115_v19  ;;  %v10137_v8 = vld [vmem:[#allocation296_spill] sm:$0xff] }
 0x4f0   : > { %2482 = vst [vmem:[#allocation1 + $0x23] ss:$4 sm:$0xff] %v10116_v36 }
 0x4f1   : > { %10119 = vst [vmem:[#allocation144_spill] sm:$0xff] %v7334_v41 }
 0x4f2   : > { %v7332_v46 = vld.sshfl [vmem:[#allocation1] sm:$0xff pattern:$0x73625140] }
 0x4f3   : > { %2505 = vst [vmem:[#allocation1] ss:$4 sm:$0xff] %v7058_v48  ;;  %v10126_v48 = vld [vmem:[#allocation291_spill] sm:$0xff]  ;;  %4929 = vmatmul.msk.bf16.gmra.mxu0 %vm970_vm8, %v2143_v42 }
 0x4f4   : > { %2506 = vst [vmem:[#allocation1 + $0x1] ss:$4 sm:$0xff] %v7060_v63  ;;  %v10127_v63 = vld [vmem:[#allocation292_spill] sm:$0xff] }
 0x4f5   : > { %2507 = vst [vmem:[#allocation1 + $0x2] ss:$4 sm:$0xff] %v7062_v3  ;;  %v7347_v15 = vpop.f32.mrf.mxu1  ;;  %v7350_v37 = vpop.f32.mrf.mxu2  ;;  %v2586_v3 = vpack.c.bf16 %v2474_v61, %v7262_v33  ;;  %v10133_v33 = vld [vmem:[#allocation231_spill] sm:$0xff]  ;;  %v10134_v61 = vld [vmem:[#allocation230_spill] sm:$0xff] }
 0x4f6   : > { %2508 = vst [vmem:[#allocation1 + $0x3] ss:$4 sm:$0xff] %v10120_v18  ;;  %v1811_v19 = vpack.c.bf16 %v10134_v61, %v10133_v33  ;;  %v10138_v18 = vld [vmem:[#allocation297_spill] sm:$0xff] }
 0x4f7   : > { %v2484_v62 = vld.sshfl [vmem:[#allocation1 + $0x20] sm:$0xff pattern:$0x73625140]  ;;  %10125 = vst [vmem:[#allocation116_spill] sm:$0xff] %v7347_v15 }
 0x4f8   : > { %2489 = vst [vmem:[#allocation1 + $0x20] ss:$4 sm:$0xff] %v10121_v9  ;;  %v7375_v9 = vpop.f32.mrf.mxu3  ;;  %v2587_v26 = vpack.c.bf16 %v2484_v62, %v7287_v16  ;;  %v10145_v33 = vld [vmem:[#allocation301_spill] sm:$0xff]  ;;  %v10147_v16 = vld [vmem:[#allocation303_spill] sm:$0xff] }
 0x4f9   : > { %2490 = vst [vmem:[#allocation1 + $0x21] ss:$4 sm:$0xff] %v10124_v49  ;;  %v10140_v49 = vld [vmem:[#allocation249_spill] sm:$0xff] }
 0x4fa   : > { %2491 = vst [vmem:[#allocation1 + $0x22] ss:$4 sm:$0xff] %v10126_v48  ;;  %4943 = vmatmul.msk.bf16.gmra.mxu1 %vm970_vm8, %v2586_v3  ;;  %v10141_v48 = vld [vmem:[#allocation248_spill] sm:$0xff]  ;;  %v10148_v62 = vld [vmem:[#allocation233_spill] sm:$0xff] }
 0x4fb   : > { %2492 = vst [vmem:[#allocation1 + $0x23] ss:$4 sm:$0xff] %v10127_v63  ;;  %v2144_v3 = vpack.c.bf16 %v10141_v48, %v10140_v49  ;;  %v10151_v48 = vld [vmem:[#allocation217_spill] sm:$0xff] }
 0x4fc   : > { %4906 = vmatmul.msk.bf16.gmra.mxu2 %vm970_vm8, %v1500_v0  ;;  %v10142_v0 = vld [vmem:[#allocation129_spill] sm:$0xff] }
 0x4fd   : > { %v7355_v1 = vld.sshfl [vmem:[#allocation1] sm:$0xff pattern:$0x73625140]  ;;  %v7367_v36 = vpop.f32.mrf.mxu1  ;;  %v7369_v5 = vpop.f32.mrf.mxu2 }
 0x4fe   : > { %2515 = vst [vmem:[#allocation1] ss:$4 sm:$0xff] %v7082_v40  ;;  %4914 = vmatmul.msk.bf16.gmra.mxu3 %vm970_vm8, %v1811_v19  ;;  %v10136_v40 = vld [vmem:[#allocation83_spill] sm:$0xff]  ;;  %v7380_v42 = vpop.f32.mrf.mxu0  ;;  %v10149_v19 = vld [vmem:[#allocation232_spill] sm:$0xff] }
 0x4ff   : > { %2516 = vst [vmem:[#allocation1 + $0x1] ss:$4 sm:$0xff] %v10130_v45  ;;  %v10143_v45 = vld [vmem:[#allocation63_spill] sm:$0xff] }
 0x500   : > { %2517 = vst [vmem:[#allocation1 + $0x2] ss:$4 sm:$0xff] %v10131_v53  ;;  %v10144_v53 = vld [vmem:[#allocation222_spill] sm:$0xff] }
 0x501   : > { %2518 = vst [vmem:[#allocation1 + $0x3] ss:$4 sm:$0xff] %v10132_v4 }
 0x502   : > { %10135 = vst [vmem:[#allocation118_spill] sm:$0xff] %v7367_v36  ;;  %v2494_v21 = vld.sshfl [vmem:[#allocation1 + $0x20] sm:$0xff pattern:$0x73625140] }
 0x503   : > { %2499 = vst [vmem:[#allocation1 + $0x20] ss:$4 sm:$0xff] %v10136_v40  ;;  %4930 = vmatmul.msk.bf16.gmra.mxu0 %vm970_vm8, %v2144_v3  ;;  %v1812_v40 = vpack.c.bf16 %v10149_v19, %v10148_v62  ;;  %v2588_v62 = vpack.c.bf16 %v2494_v21, %v7308_v54  ;;  %v10157_v19 = vld [vmem:[#allocation99_spill] sm:$0xff] }
 0x504   : > { %2500 = vst [vmem:[#allocation1 + $0x21] ss:$4 sm:$0xff] %v10137_v8  ;;  %v10150_v8 = vld [vmem:[#allocation306_spill] sm:$0xff]  ;;  %v10160_v21 = vld [vmem:[#allocation235_spill] sm:$0xff] }
 0x505   : > { %2501 = vst [vmem:[#allocation1 + $0x22] ss:$4 sm:$0xff] %v10138_v18  ;;  %v7386_v63 = vpop.f32.mrf.mxu1  ;;  %v7389_v58 = vpop.f32.mrf.mxu2 }
 0x506   : > { %2502 = vst [vmem:[#allocation1 + $0x23] ss:$4 sm:$0xff] %v10139_v2  ;;  %v7404_v61 = vpop.f32.mrf.mxu0 }
 0x508   : > { %v7378_v47 = vld.sshfl [vmem:[#allocation1] sm:$0xff pattern:$0x73625140] }
 0x509   : > { %2525 = vst [vmem:[#allocation1] ss:$4 sm:$0xff] %v7110_v59  ;;  %v1501_v59 = vpack.c.bf16 %v10144_v53, %v10143_v45  ;;  %v10153_v53 = vld [vmem:[#allocation251_spill] sm:$0xff] }
 0x50a   : > { %2526 = vst [vmem:[#allocation1 + $0x1] ss:$4 sm:$0xff] %v7089_v14  ;;  %4944 = vmatmul.msk.bf16.gmra.mxu1 %vm970_vm8, %v2587_v26  ;;  %v7399_v14 = vpop.f32.mrf.mxu3  ;;  %v10152_v26 = vld [vmem:[#allocation309_spill] sm:$0xff] }
 0x50b   : > { %2527 = vst [vmem:[#allocation1 + $0x2] ss:$4 sm:$0xff] %v7091_v39  ;;  %v10146_v39 = vld [vmem:[#allocation302_spill] sm:$0xff] }
 0x50c   : > { %2528 = vst [vmem:[#allocation1 + $0x3] ss:$4 sm:$0xff] %v10142_v0  ;;  %4907 = vmatmul.msk.bf16.gmra.mxu2 %vm970_vm8, %v1501_v59  ;;  %v10154_v59 = vld [vmem:[#allocation250_spill] sm:$0xff] }
 0x50d   : > { %v7396_v4 = vld.sshfl [vmem:[#allocation1 + $0x20] sm:$0xff pattern:$0x73625140]  ;;  %v7410_v18 = vpop.f32.mrf.mxu1  ;;  %v7414_v49 = vpop.f32.mrf.mxu2 }
 0x50e   : > { %2509 = vst [vmem:[#allocation1 + $0x20] ss:$4 sm:$0xff] %v10145_v33  ;;  %4915 = vmatmul.msk.bf16.gmra.mxu3 %vm970_vm8, %v1812_v40  ;;  %v7423_v0 = vpop.f32.mrf.mxu0  ;;  %v2145_v33 = vpack.c.bf16 %v10154_v59, %v10153_v53  ;;  %v10158_v40 = vld [vmem:[#allocation103_spill] sm:$0xff]  ;;  %v10161_v59 = vld [vmem:[#allocation234_spill] sm:$0xff]  ;;  %v7552_v51 = vadd.f32 %v7410_v18, %v7399_v14 }
 0x50f   : > { %2510 = vst [vmem:[#allocation1 + $0x21] ss:$4 sm:$0xff] %v10146_v39  ;;  %v10155_v39 = vld [vmem:[#allocation305_spill] sm:$0xff] }
 0x510   : > { %2511 = vst [vmem:[#allocation1 + $0x22] ss:$4 sm:$0xff] %v10147_v16 }
 0x511   : > { %2512 = vst [vmem:[#allocation1 + $0x23] ss:$4 sm:$0xff] %v10150_v8  ;;  %v10159_v8 = vld [vmem:[#allocation223_spill] sm:$0xff] }
 0x512   : > { %v7420_v3 = vpop.f32.mrf.mxu3 }
 0x513   : > { %v7412_v2 = vld.sshfl [vmem:[#allocation1] sm:$0xff pattern:$0x73625140]  ;;  %4931 = vmatmul.msk.bf16.gmra.mxu0 %vm970_vm8, %v2145_v33  ;;  %v1813_v33 = vpack.c.bf16 %v10161_v59, %v10160_v21  ;;  %v4953_v21 = vld [vmem:[%s8956_s1 + $0x18] sm:$0xf] }
 0x514   : > { %2535 = vst [vmem:[#allocation1] ss:$4 sm:$0xff] %v7118_v27  ;;  %v10156_v27 = vld [vmem:[#allocation204_spill] sm:$0xff] }
 0x515   : > { %2536 = vst [vmem:[#allocation1 + $0x1] ss:$4 sm:$0xff] %v7120_v56  ;;  %v7430_v16 = vpop.f32.mrf.mxu1  ;;  %v7433_v56 = vpop.f32.mrf.mxu2 }
 0x516   : > { %2537 = vst [vmem:[#allocation1 + $0x2] ss:$4 sm:$0xff] %v10151_v48  ;;  %v1502_v48 = vpack.c.bf16 %v10159_v8, %v10159_v8  ;;  %v7450_v54 = vpop.f32.mrf.mxu0  ;;  %v10166_v8 = vld [vmem:[#allocation252_spill] sm:$0xff] }
 0x517   : > { %2538 = vst [vmem:[#allocation1 + $0x3] ss:$4 sm:$0xff] %v10152_v26 }
 0x518   : > { %v7425_v45 = vld.sshfl [vmem:[#allocation1 + $0x20] sm:$0xff pattern:$0x73625140] }
 0x519   : > { %2519 = vst [vmem:[#allocation1 + $0x20] ss:$4 sm:$0xff] %v10155_v39 }
 0x51a   : > { %2520 = vst [vmem:[#allocation1 + $0x21] ss:$4 sm:$0xff] %v10156_v27  ;;  %4945 = vmatmul.msk.bf16.gmra.mxu1 %vm970_vm8, %v2588_v62  ;;  %v7444_v53 = vpop.f32.mrf.mxu3  ;;  %v10163_v62 = vld [vmem:[#allocation310_spill] sm:$0xff] }
 0x51b   : > { %2521 = vst [vmem:[#allocation1 + $0x22] ss:$4 sm:$0xff] %v10157_v19 }
 0x51c   : > { %2522 = vst [vmem:[#allocation1 + $0x23] ss:$4 sm:$0xff] %v10158_v40  ;;  %4908 = vmatmul.msk.bf16.gmra.mxu2 %vm970_vm8, %v1502_v48 }
 0x51d   : > { %v7455_v39 = vpop.f32.mrf.mxu1  ;;  %v7457_v27 = vpop.f32.mrf.mxu2 }
 0x51e   : > { %v7441_v26 = vld.sshfl [vmem:[#allocation1] sm:$0xff pattern:$0x73625140]  ;;  %4916 = vmatmul.msk.bf16.gmra.mxu3 %vm970_vm8, %v1813_v33  ;;  %v2955_v33 = vsel %vm1010_vm0, %v4953_v21, 0  ;;  %v10172_v21 = vld [vmem:[#allocation16_spill] sm:$0xff] }
 0x51f   : > { %2545 = vst [vmem:[#allocation1] ss:$4 sm:$0xff] %v7144_v30  ;;  %2964 = vmatpush.bf16.msra.mxu2 %v2955_v33 }
 0x520   : > { %2546 = vst [vmem:[#allocation1 + $0x1] ss:$4 sm:$0xff] %v7146_v31  ;;  %v10162_v31 = vld [vmem:[#allocation308_spill] sm:$0xff]  ;;  %v7477_v59 = vpop.f32.mrf.mxu0 }
 0x521   : > { %2547 = vst [vmem:[#allocation1 + $0x2] ss:$4 sm:$0xff] %v7148_v35  ;;  %v10164_v35 = vld [vmem:[#allocation311_spill] sm:$0xff] }
 0x522   : > { %2548 = vst [vmem:[#allocation1 + $0x3] ss:$4 sm:$0xff] %v7168_v22  ;;  %v7465_v19 = vpop.f32.mrf.mxu3  ;;  %v10165_v22 = vld [vmem:[#allocation253_spill] sm:$0xff] }
 0x523   : > { %v7460_v30 = vld.sshfl [vmem:[#allocation1 + $0x20] sm:$0xff pattern:$0x73625140]  ;;  %v2146_v48 = vpack.c.bf16 %v10166_v8, %v10165_v22  ;;  %v10170_v22 = vld [vmem:[#allocation12_spill] sm:$0xff]  ;;  %v10171_v8 = vld [vmem:[#allocation15_spill] sm:$0xff] }
 0x524   : > { %2529 = vst [vmem:[#allocation1 + $0x20] ss:$4 sm:$0xff] %v10162_v31 }
 0x525   : > { %2530 = vst [vmem:[#allocation1 + $0x21] ss:$4 sm:$0xff] %v10163_v62  ;;  %4932 = vmatmul.msk.bf16.gmra.mxu0 %vm970_vm8, %v2146_v48  ;;  %v7485_v62 = vpop.f32.mrf.mxu2 }
 0x526   : > { %2531 = vst [vmem:[#allocation1 + $0x22] ss:$4 sm:$0xff] %v10164_v35  ;;  %v7483_v31 = vpop.f32.mrf.mxu1 }
 0x527   : > { %2532 = vst [vmem:[#allocation1 + $0x23] ss:$4 sm:$0xff] %v7132_v10  ;;  %v2589_v10 = vpack.c.bf16 %v7396_v4, %v7332_v46  ;;  %v10168_v46 = vld [vmem:[#allocation134_spill] sm:$0xff]  ;;  %v10169_v4 = vld [vmem:[#allocation11_spill] sm:$0xff]  ;;  %v7570_v14 = vadd.f32 %v7483_v31, %v7465_v19 }
 0x528   : > { %10167 = vst [vmem:[#allocation23_spill] sm:$0xff] %v7485_v62  ;;  %v7501_v48 = vpop.f32.mrf.mxu0  ;;  %v10191_v62 = vld [vmem:[#allocation35_spill] sm:$0xff] }
 0x529   : > { %v7468_v40 = vld.sshfl [vmem:[#allocation1] sm:$0xff pattern:$0x73625140]  ;;  %v10201_v19 = vld [vmem:[#allocation43_spill] sm:$0xff] }
 0x52a   : > { %2555 = vst [vmem:[#allocation1] ss:$4 sm:$0xff] %v7174_v44  ;;  %4946 = vmatmul.msk.bf16.gmra.mxu1 %vm970_vm8, %v2589_v10 }
 0x52b   : > { %2556 = vst [vmem:[#allocation1 + $0x1] ss:$4 sm:$0xff] %v7177_v57  ;;  %v7492_v57 = vpop.f32.mrf.mxu3 }
 0x52d   : > { %v7506_v36 = vpop.f32.mrf.mxu2 }
 0x52e   : > { %v7488_v44 = vld.sshfl [vmem:[#allocation1 + $0x20] sm:$0xff pattern:$0x73625140]  ;;  %v1195_v10 = vpop.f32.mrf.mxu1 }
 0x52f   : > { %2539 = vst [vmem:[#allocation1 + $0x20] ss:$4 sm:$0xff] %v7153_v24  ;;  %v10173_v24 = vld [vmem:[#allocation237_spill] sm:$0xff] }
 0x530   : > { %2540 = vst [vmem:[#allocation1 + $0x21] ss:$4 sm:$0xff] %v7155_v52  ;;  %v10174_v52 = vld [vmem:[#allocation236_spill] sm:$0xff] }
 0x531   : > { %2541 = vst [vmem:[#allocation1 + $0x22] ss:$4 sm:$0xff] %v7157_v60  ;;  %v1814_v33 = vpack.c.bf16 %v10174_v52, %v10173_v24  ;;  %v10176_v24 = vld [vmem:[#allocation255_spill] sm:$0xff]  ;;  %v10177_v52 = vld [vmem:[#allocation254_spill] sm:$0xff] }
 0x532   : > { %v7495_v35 = vld.sshfl [vmem:[#allocation1] sm:$0xff pattern:$0x73625140]  ;;  %2542 = vst [vmem:[#allocation1 + $0x23] ss:$4 sm:$0xff] %v10168_v46 }
 0x533   : > { %2745 = vst [vmem:[#allocation1] ss:$4 sm:$0xff] %v10169_v4  ;;  %4917 = vmatmul.msk.bf16.gmra.mxu3 %vm970_vm8, %v1814_v33  ;;  %v1083_v46 = vpop.f32.mrf.mxu3  ;;  %v2147_v4 = vpack.c.bf16 %v10177_v52, %v10176_v24  ;;  %v10178_v33 = vld [vmem:[#allocation22_spill] sm:$0xff] }
 0x534   : > { %2747 = vst [vmem:[#allocation1 + $0x1] ss:$4 sm:$0xff] %v10170_v22  ;;  %v10182_v24 = vld [vmem:[#allocation14_spill] sm:$0xff] }
 0x535   : > { %2749 = vst [vmem:[#allocation1 + $0x2] ss:$4 sm:$0xff] %v10171_v8  ;;  %v7515_v8 = vpop.f32.mrf.mxu0  ;;  %v7521_v41 = vpop.f32.mrf.mxu2  ;;  %4933 = vmatmul.msk.bf16.gmra.mxu0 %vm970_vm8, %v2147_v4  ;;  %v10186_v4 = vld [vmem:[#allocation19_spill] sm:$0xff] }
 0x536   : > { %2751 = vst [vmem:[#allocation1 + $0x3] ss:$4 sm:$0xff] %v10172_v21  ;;  %v10175_v21 = vld [vmem:[#allocation21_spill] sm:$0xff]  ;;  %v1198_v32 = vpop.f32.mrf.mxu1 }
 0x537   : > { %10179 = vst [vmem:[#allocation159_spill] sm:$0xff] %v7521_v41 }
 0x539   : > { %v7509_v60 = vld.sshfl [vmem:[#allocation1 + $0x20] sm:$0xff pattern:$0x73625140] }
 0x53a   : > { %2549 = vst [vmem:[#allocation1 + $0x20] ss:$4 sm:$0xff] %v7170_v12  ;;  %v10180_v12 = vld [vmem:[#allocation25_spill] sm:$0xff] }
 0x53b   : > { %2550 = vst [vmem:[#allocation1 + $0x21] ss:$4 sm:$0xff] %v7172_v28  ;;  %v2590_v28 = vpack.c.bf16 %v7425_v45, %v7355_v1 }
 0x53c   : > { %2551 = vst [vmem:[#allocation1 + $0x22] ss:$4 sm:$0xff] %v7228_v34  ;;  %v10181_v34 = vld [vmem:[#allocation24_spill] sm:$0xff] }
 0x53d   : > { %v2760_v22 = vld.sshfl [vmem:[#allocation1] sm:$0xff pattern:$0x73625140]  ;;  %2552 = vst [vmem:[#allocation1 + $0x23] ss:$4 sm:$0xff] %v7230_v17  ;;  %4947 = vmatmul.msk.bf16.gmra.mxu1 %vm970_vm8, %v2590_v28  ;;  %v1085_v17 = vpop.f32.mrf.mxu3  ;;  %v7532_v52 = vpop.f32.mrf.mxu0  ;;  %v10187_v28 = vld [vmem:[#allocation20_spill] sm:$0xff] }
 0x53e   : > { %2762 = vst [vmem:[#allocation1] ss:$4 sm:$0xff] %v10175_v21  ;;  %v1200_v25 = vpop.f32.mrf.mxu1  ;;  %v7538_v1 = vpop.f32.mrf.mxu2  ;;  %v10188_v17 = vld [vmem:[#allocation31_spill] sm:$0xff] }
 0x53f   : > { %2763 = vst [vmem:[#allocation1 + $0x1] ss:$4 sm:$0xff] %v10178_v33  ;;  %v10183_v33 = vld [vmem:[#allocation17_spill] sm:$0xff] }
 0x540   : > { %2764 = vst [vmem:[#allocation1 + $0x2] ss:$4 sm:$0xff] %v10180_v12  ;;  %v10185_v12 = vld [vmem:[#allocation238_spill] sm:$0xff] }
 0x541   : > { %2765 = vst [vmem:[#allocation1 + $0x3] ss:$4 sm:$0xff] %v10181_v34  ;;  %v1815_v41 = vpack.c.bf16 %v10185_v12, %v10184_v38  ;;  %v10189_v34 = vld [vmem:[#allocation32_spill] sm:$0xff] }
 0x543   : > { %4918 = vmatmul.msk.bf16.gmra.mxu3 %vm970_vm8, %v1815_v41  ;;  %v7556_v41 = vadd.f32 %v7430_v16, %v7420_v3  ;;  %v10197_v3 = vld [vmem:[#allocation26_spill] sm:$0xff] }
 0x544   : > { %v7529_v21 = vld.sshfl [vmem:[#allocation1 + $0x20] sm:$0xff pattern:$0x73625140] }
 0x545   : > { %2753 = vst [vmem:[#allocation1 + $0x20] ss:$4 sm:$0xff] %v10182_v24  ;;  %v10190_v24 = vld [vmem:[#allocation34_spill] sm:$0xff]  ;;  %v2206_v38 = vpop.f32.mrf.mxu0 }
 0x546   : > { %2755 = vst [vmem:[#allocation1 + $0x21] ss:$4 sm:$0xff] %v10183_v33  ;;  %v1873_v33 = vpop.f32.mrf.mxu3  ;;  %v7548_v25 = vpop.f32.mrf.mxu2 }
 0x547   : > { %2757 = vst [vmem:[#allocation1 + $0x22] ss:$4 sm:$0xff] %v10186_v4  ;;  %v2649_v4 = vpop.f32.mrf.mxu1 }
 0x548   : > { %v7540_v45 = vld.sshfl [vmem:[#allocation1] sm:$0xff pattern:$0x73625140]  ;;  %2759 = vst [vmem:[#allocation1 + $0x23] ss:$4 sm:$0xff] %v10187_v28  ;;  %v10195_v28 = vld [vmem:[#allocation28_spill] sm:$0xff] }
 0x549   : > { %2772 = vst [vmem:[#allocation1] ss:$4 sm:$0xff] %v10188_v17  ;;  %v10193_v17 = vld [vmem:[#allocation27_spill] sm:$0xff] }
 0x54a   : > { %2773 = vst [vmem:[#allocation1 + $0x1] ss:$4 sm:$0xff] %v10189_v34  ;;  %v10194_v34 = vld [vmem:[#allocation304_spill] sm:$0xff] }
 0x54b   : > { %2774 = vst [vmem:[#allocation1 + $0x2] ss:$4 sm:$0xff] %v10190_v24  ;;  %v1139_v24 = vadd.f32 %v10194_v34, %v7380_v42  ;;  %v7577_v42 = vadd.f32 %v1195_v10, %v7492_v57  ;;  %v2591_v57 = vpack.c.bf16 %v7460_v30, %v7378_v47  ;;  %v10204_v10 = vld [vmem:[#allocation45_spill] sm:$0xff] }
 0x54c   : > { %2775 = vst [vmem:[#allocation1 + $0x3] ss:$4 sm:$0xff] %v10191_v62  ;;  %v7563_v62 = vadd.f32 %v7455_v39, %v7444_v53  ;;  %v7579_v53 = vadd.f32 %v1198_v32, %v1083_v46 }
 0x54d   : > { %10192 = vst [vmem:[#allocation154_spill] sm:$0xff] %v7548_v25  ;;  %v10196_v25 = vld [vmem:[#allocation209_spill] sm:$0xff]  ;;  %v1620_v31 = vadd.f32 %v7302_v7, %v1139_v24  ;;  %v2208_v32 = vpop.f32.mrf.mxu0  ;;  %4948 = vmatmul.msk.bf16.gmra.mxu1 %vm970_vm8, %v2591_v57 }
 0x54e   : > { %v1141_v15 = vadd.f32 %v10196_v25, %v7404_v61  ;;  %v1875_v39 = vpop.f32.mrf.mxu3  ;;  %v10200_v61 = vld [vmem:[#allocation124_spill] sm:$0xff]  ;;  %v10210_v57 = vld [vmem:[#allocation37_spill] sm:$0xff] }
 0x54f   : > { %v2761_v12 = vld.sshfl [vmem:[#allocation1 + $0x20] sm:$0xff pattern:$0x73625140]  ;;  %v1144_v25 = vadd.f32 %v10200_v61, %v7423_v0  ;;  %v10207_v61 = vld [vmem:[#allocation46_spill] sm:$0xff]  ;;  %v7598_v7 = vpop.f32.mrf.mxu2  ;;  %v2651_v24 = vpop.f32.mrf.mxu1 }
 0x550   : > { %2766 = vst [vmem:[#allocation1 + $0x20] ss:$4 sm:$0xff] %v10193_v17  ;;  %v2900_v18 = vpack.c.bf16 %v2761_v12, %v2760_v22  ;;  %v10198_v17 = vld [vmem:[#allocation30_spill] sm:$0xff]  ;;  %v10202_v22 = vld [vmem:[#allocation257_spill] sm:$0xff]  ;;  %v10203_v12 = vld [vmem:[#allocation256_spill] sm:$0xff]  ;;  %v1621_v46 = vadd.f32 %v7318_v23, %v1141_v15 }
 0x551   : > { %2767 = vst [vmem:[#allocation1 + $0x21] ss:$4 sm:$0xff] %v10195_v28  ;;  %v10199_v28 = vld [vmem:[#allocation41_spill] sm:$0xff]  ;;  %v2148_v34 = vpack.c.bf16 %v10203_v12, %v10202_v22  ;;  %v1622_v47 = vadd.f32 %v7337_v43, %v1144_v25  ;;  %v10208_v12 = vld [vmem:[#allocation36_spill] sm:$0xff] }
 0x552   : > { %2768 = vst [vmem:[#allocation1 + $0x22] ss:$4 sm:$0xff] %v10197_v3  ;;  %4954 = vmatmul.msk.bf16.vlgmr.msra.gmra.mxu2 %vm970_vm8, %v2900_v18  ;;  %v1937_v18 = vadd.f32 %v1873_v33, %v1620_v31  ;;  %v1938_v22 = vadd.f32 %v1875_v39, %v1621_v46  ;;  %v10209_v31 = vld [vmem:[#allocation212_spill] sm:$0xff]  ;;  %v10211_v46 = vld [vmem:[#allocation39_spill] sm:$0xff] }
 0x553   : > { %v7573_v16 = vld.sshfl [vmem:[#allocation1] sm:$0xff pattern:$0x73625140]  ;;  %2769 = vst [vmem:[#allocation1 + $0x23] ss:$4 sm:$0xff] %v10198_v17  ;;  %4934 = vmatmul.msk.bf16.gmra.mxu0 %vm970_vm8, %v2148_v34  ;;  %v1146_v34 = vadd.f32 %v10209_v31, %v7450_v54 }
 0x554   : > { %2782 = vst [vmem:[#allocation1] ss:$4 sm:$0xff] %v10199_v28  ;;  %v10205_v17 = vld [vmem:[#allocation241_spill] sm:$0xff]  ;;  %v10206_v28 = vld [vmem:[#allocation240_spill] sm:$0xff]  ;;  %v2270_v30 = vadd.f32 %v2206_v38, %v1937_v18  ;;  %v2271_v15 = vadd.f32 %v2208_v32, %v1938_v22  ;;  %v10213_v32 = vld [vmem:[#allocation51_spill] sm:$0xff] }
 0x555   : > { %2783 = vst [vmem:[#allocation1 + $0x1] ss:$4 sm:$0xff] %v10201_v19  ;;  %v1816_v0 = vpack.c.bf16 %v10206_v28, %v10205_v17  ;;  %v2211_v28 = vpop.f32.mrf.mxu0  ;;  %v10212_v38 = vld [vmem:[#allocation40_spill] sm:$0xff]  ;;  %v10215_v22 = vld [vmem:[#allocation55_spill] sm:$0xff] }
 0x556   : > { %2784 = vst [vmem:[#allocation1 + $0x2] ss:$4 sm:$0xff] %v10204_v10  ;;  %v7603_v10 = vadd.f32 %v2649_v4, %v2270_v30  ;;  %v1878_v33 = vpop.f32.mrf.mxu3  ;;  %v7608_v17 = vadd.f32 %v2651_v24, %v2271_v15  ;;  %v1623_v24 = vadd.f32 %v7350_v37, %v1146_v34  ;;  %v10217_v30 = vld [vmem:[#allocation259_spill] sm:$0xff]  ;;  %v10218_v15 = vld [vmem:[#allocation258_spill] sm:$0xff] }
 0x557   : > { %2785 = vst [vmem:[#allocation1 + $0x3] ss:$4 sm:$0xff] %v10207_v61  ;;  %4919 = vmatmul.msk.bf16.gmra.mxu3 %vm970_vm8, %v1816_v0  ;;  %v1939_v39 = vadd.f32 %v1878_v33, %v1622_v47  ;;  %v7615_v4 = vpop.f32.mrf.mxu2  ;;  %v2654_v0 = vpop.f32.mrf.mxu1  ;;  %v10214_v61 = vld [vmem:[#allocation52_spill] sm:$0xff]  ;;  %v10216_v47 = vld [vmem:[#allocation54_spill] sm:$0xff]  ;;  %v2592_v33 = vpack.c.bf16 %v7488_v44, %v7412_v2  ;;  %v10224_v44 = vld [vmem:[#allocation49_spill] sm:$0xff] }
 0x559   : > { %v2272_v25 = vadd.f32 %v2211_v28, %v1939_v39  ;;  %v10219_v39 = vld [vmem:[#allocation139_spill] sm:$0xff]  ;;  %v10221_v28 = vld [vmem:[#allocation246_spill] sm:$0xff] }
 0x55a   : > { %v2771_v23 = vld.sshfl [vmem:[#allocation1 + $0x20] sm:$0xff pattern:$0x73625140] }
 0x55b   : > { %2776 = vst [vmem:[#allocation1 + $0x20] ss:$4 sm:$0xff] %v10208_v12  ;;  %v2901_v54 = vpack.c.bf16 %v2771_v23, %v7540_v45  ;;  %v7619_v18 = vadd.f32 %v2654_v0, %v2272_v25  ;;  %v2149_v12 = vpack.c.bf16 %v10218_v15, %v10217_v30  ;;  %v10220_v23 = vld [vmem:[#allocation7_spill] sm:$0xff]  ;;  %v10222_v25 = vld [vmem:[#allocation44_spill] sm:$0xff]  ;;  %v10225_v30 = vld [vmem:[#allocation50_spill] sm:$0xff] }
 0x55c   : > { %2777 = vst [vmem:[#allocation1 + $0x21] ss:$4 sm:$0xff] %v10210_v57  ;;  %v1817_v37 = vpack.c.bf16 %v10221_v28, %v10220_v23  ;;  %v10226_v15 = vld [vmem:[#allocation61_spill] sm:$0xff] }
 0x55d   : > { %2778 = vst [vmem:[#allocation1 + $0x22] ss:$4 sm:$0xff] %v10211_v46  ;;  %v1149_v46 = vadd.f32 %v10219_v39, %v7477_v59  ;;  %4949 = vmatmul.msk.bf16.gmra.mxu1 %vm970_vm8, %v2592_v33  ;;  %v10229_v39 = vld [vmem:[#allocation108_spill] sm:$0xff]  ;;  %v10230_v28 = vld [vmem:[#allocation65_spill] sm:$0xff] }
 0x55e   : > { %v7611_v43 = vld.sshfl [vmem:[#allocation1] sm:$0xff pattern:$0x73625140]  ;;  %2779 = vst [vmem:[#allocation1 + $0x23] ss:$4 sm:$0xff] %v10212_v38  ;;  %v1880_v31 = vpop.f32.mrf.mxu3  ;;  %v2213_v38 = vpop.f32.mrf.mxu0 }
 0x55f   : > { %2792 = vst [vmem:[#allocation1] ss:$4 sm:$0xff] %v10213_v32  ;;  %v1940_v45 = vadd.f32 %v1880_v31, %v1623_v24  ;;  %v7637_v2 = vpop.f32.mrf.mxu2  ;;  %v2656_v59 = vpop.f32.mrf.mxu1  ;;  %v1624_v24 = vadd.f32 %v7369_v5, %v1149_v46  ;;  %v10228_v31 = vld [vmem:[#allocation64_spill] sm:$0xff] }
 0x560   : > { %2793 = vst [vmem:[#allocation1 + $0x1] ss:$4 sm:$0xff] %v10214_v61  ;;  %v10223_v61 = vld [vmem:[#allocation47_spill] sm:$0xff] }
 0x561   : > { %2794 = vst [vmem:[#allocation1 + $0x2] ss:$4 sm:$0xff] %v10215_v22  ;;  %v2273_v0 = vadd.f32 %v2213_v38, %v1940_v45  ;;  %v1151_v45 = vadd.f32 %v10229_v39, %v7501_v48  ;;  %v1184_v48 = vadd.f32 %v7386_v63, %v7375_v9 }
 0x562   : > { %2795 = vst [vmem:[#allocation1 + $0x3] ss:$4 sm:$0xff] %v10216_v47  ;;  %4955 = vmatmul.msk.bf16.gmra.mxu2 %vm970_vm8, %v2901_v54 }
 0x563   : > { %4935 = vmatmul.msk.bf16.gmra.mxu0 %vm970_vm8, %v2149_v12  ;;  %v7640_v54 = vadd.f32 %v2656_v59, %v2273_v0  ;;  %v10227_v12 = vld [vmem:[#allocation62_spill] sm:$0xff] }
 0x565   : > { %v2781_v34 = vld.sshfl [vmem:[#allocation1 + $0x20] sm:$0xff pattern:$0x73625140] }
 0x566   : > { %2786 = vst [vmem:[#allocation1 + $0x20] ss:$4 sm:$0xff] %v10222_v25  ;;  %v1883_v33 = vpop.f32.mrf.mxu3  ;;  %v2902_v0 = vpack.c.bf16 %v2781_v34, %v7573_v16  ;;  %v2593_v16 = vpack.c.bf16 %v7509_v60, %v7441_v26  ;;  %v10241_v60 = vld [vmem:[#allocation74_spill] sm:$0xff] }
 0x567   : > { %2787 = vst [vmem:[#allocation1 + $0x21] ss:$4 sm:$0xff] %v10223_v61  ;;  %4920 = vmatmul.msk.bf16.gmra.mxu3 %vm970_vm8, %v1817_v37  ;;  %v1941_v23 = vadd.f32 %v1883_v33, %v1624_v24  ;;  %v2216_v37 = vpop.f32.mrf.mxu0  ;;  %v7653_v5 = vpop.f32.mrf.mxu2  ;;  %v10233_v24 = vld [vmem:[#allocation60_spill] sm:$0xff]  ;;  %v10235_v33 = vld [vmem:[#allocation263_spill] sm:$0xff]  ;;  %v10340_v25 = vld [vmem:[#allocation182_spill] sm:$0xff] }
 0x568   : > { %2788 = vst [vmem:[#allocation1 + $0x22] ss:$4 sm:$0xff] %v10224_v44  ;;  %v2659_v46 = vpop.f32.mrf.mxu1  ;;  %v1625_v44 = vadd.f32 %v7389_v58, %v1151_v45  ;;  %v10236_v58 = vld [vmem:[#allocation57_spill] sm:$0xff] }
 0x569   : > { %v7644_v22 = vld.sshfl [vmem:[#allocation1] sm:$0xff pattern:$0x73625140]  ;;  %2789 = vst [vmem:[#allocation1 + $0x23] ss:$4 sm:$0xff] %v10225_v30  ;;  %v2274_v38 = vadd.f32 %v2216_v37, %v1941_v23  ;;  %v10231_v30 = vld [vmem:[#allocation56_spill] sm:$0xff]  ;;  %v1154_v23 = vadd.f32 %v7184_v20, %v7515_v8 }
 0x56a   : > { %2802 = vst [vmem:[#allocation1] ss:$4 sm:$0xff] %v10226_v15  ;;  %v10232_v15 = vld [vmem:[#allocation58_spill] sm:$0xff]  ;;  %v10238_v37 = vld [vmem:[#allocation9_spill] sm:$0xff] }
 0x56b   : > { %2803 = vst [vmem:[#allocation1 + $0x1] ss:$4 sm:$0xff] %v10227_v12  ;;  %v7656_v59 = vadd.f32 %v2659_v46, %v2274_v38  ;;  %v10234_v12 = vld [vmem:[#allocation265_spill] sm:$0xff]  ;;  %v10239_v46 = vld [vmem:[#allocation71_spill] sm:$0xff] }
 0x56c   : > { %2804 = vst [vmem:[#allocation1 + $0x2] ss:$4 sm:$0xff] %v10228_v31  ;;  %v2150_v39 = vpack.c.bf16 %v10235_v33, %v10234_v12  ;;  %v10298_v31 = vld [vmem:[#allocation295_spill] sm:$0xff] }
 0x56d   : > { %2805 = vst [vmem:[#allocation1 + $0x3] ss:$4 sm:$0xff] %v10230_v28  ;;  %v10237_v28 = vld [vmem:[#allocation4_spill] sm:$0xff]  ;;  %4950 = vmatmul.msk.bf16.gmra.mxu1 %vm970_vm8, %v2593_v16  ;;  %v10243_v16 = vld [vmem:[#allocation67_spill] sm:$0xff] }
 0x56e   : > { %v1885_v34 = vpop.f32.mrf.mxu3  ;;  %v1818_v9 = vpack.c.bf16 %v10238_v37, %v10237_v28  ;;  %v10245_v28 = vld [vmem:[#allocation66_spill] sm:$0xff] }
 0x56f   : > { %v1942_v45 = vadd.f32 %v1885_v34, %v1625_v44  ;;  %v2218_v38 = vpop.f32.mrf.mxu0  ;;  %v1601_v20 = vpop.f32.mrf.mxu2  ;;  %v1626_v44 = vadd.f32 %v7414_v49, %v1154_v23 }
 0x570   : > { %v2791_v61 = vld.sshfl [vmem:[#allocation1 + $0x20] sm:$0xff pattern:$0x73625140]  ;;  %v2661_v26 = vpop.f32.mrf.mxu1  ;;  %v7681_v8 = vadd.f32 %v1601_v20, %v1184_v48  ;;  %v10248_v20 = vld [vmem:[#allocation82_spill] sm:$0xff] }
 0x571   : > { %2796 = vst [vmem:[#allocation1 + $0x20] ss:$4 sm:$0xff] %v10231_v30  ;;  %v2275_v30 = vadd.f32 %v2218_v38, %v1942_v45  ;;  %v10244_v45 = vld [vmem:[#allocation68_spill] sm:$0xff]  ;;  %v10246_v38 = vld [vmem:[#allocation70_spill] sm:$0xff] }
 0x572   : > { %2797 = vst [vmem:[#allocation1 + $0x21] ss:$4 sm:$0xff] %v10232_v15  ;;  %4956 = vmatmul.msk.bf16.gmra.mxu2 %vm970_vm8, %v2902_v0  ;;  %v10240_v15 = vld [vmem:[#allocation73_spill] sm:$0xff] }
 0x573   : > { %2798 = vst [vmem:[#allocation1 + $0x22] ss:$4 sm:$0xff] %v10233_v24  ;;  %4936 = vmatmul.msk.bf16.gmra.mxu0 %vm970_vm8, %v2150_v39  ;;  %v7683_v0 = vadd.f32 %v2661_v26, %v2275_v30  ;;  %v10242_v24 = vld [vmem:[#allocation75_spill] sm:$0xff]  ;;  %v1156_v39 = vadd.f32 %v7198_v50, %v7532_v52  ;;  %v10247_v52 = vld [vmem:[#allocation81_spill] sm:$0xff] }
 0x574   : > { %2799 = vst [vmem:[#allocation1 + $0x23] ss:$4 sm:$0xff] %v10236_v58  ;;  %v7674_v63 = vld.sshfl [vmem:[#allocation1] sm:$0xff pattern:$0x73625140]  ;;  %v10321_v58 = vld [vmem:[#allocation155_spill] sm:$0xff] }
 0x575   : > { %2812 = vst [vmem:[#allocation1] ss:$4 sm:$0xff] %v10239_v46  ;;  %v2903_v46 = vpack.c.bf16 %v2791_v61, %v7611_v43  ;;  %v1627_v50 = vadd.f32 %v7433_v56, %v1156_v39  ;;  %v10249_v26 = vld [vmem:[#allocation85_spill] sm:$0xff]  ;;  %v10253_v43 = vld [vmem:[#allocation271_spill] sm:$0xff]  ;;  %v10254_v39 = vld [vmem:[#allocation6_spill] sm:$0xff] }
 0x576   : > { %2813 = vst [vmem:[#allocation1 + $0x1] ss:$4 sm:$0xff] %v10240_v15  ;;  %v1888_v33 = vpop.f32.mrf.mxu3  ;;  %v1159_v61 = vadd.f32 %v7205_v13, %v10253_v43  ;;  %v10261_v43 = vld [vmem:[#allocation95_spill] sm:$0xff] }
 0x577   : > { %2814 = vst [vmem:[#allocation1 + $0x2] ss:$4 sm:$0xff] %v10241_v60  ;;  %4921 = vmatmul.msk.bf16.gmra.mxu3 %vm970_vm8, %v1818_v9  ;;  %v1943_v34 = vadd.f32 %v1888_v33, %v1626_v44  ;;  %v2221_v48 = vpop.f32.mrf.mxu0  ;;  %v7694_v9 = vpop.f32.mrf.mxu2  ;;  %v10250_v60 = vld [vmem:[#allocation270_spill] sm:$0xff]  ;;  %v10251_v44 = vld [vmem:[#allocation267_spill] sm:$0xff]  ;;  %v2594_v33 = vpack.c.bf16 %v7529_v21, %v7468_v40  ;;  %v10255_v40 = vld [vmem:[#allocation76_spill] sm:$0xff] }
 0x578   : > { %2815 = vst [vmem:[#allocation1 + $0x3] ss:$4 sm:$0xff] %v10242_v24  ;;  %v2664_v49 = vpop.f32.mrf.mxu1  ;;  %v2151_v24 = vpack.c.bf16 %v10251_v44, %v10250_v60  ;;  %v1628_v13 = vadd.f32 %v7457_v27, %v1159_v61  ;;  %v10258_v60 = vld [vmem:[#allocation80_spill] sm:$0xff]  ;;  %v10262_v61 = vld [vmem:[#allocation94_spill] sm:$0xff] }
 0x579   : > { %v2276_v37 = vadd.f32 %v2221_v48, %v1943_v34  ;;  %v10252_v34 = vld [vmem:[#allocation86_spill] sm:$0xff]  ;;  %v10260_v27 = vld [vmem:[#allocation92_spill] sm:$0xff] }
 0x57b   : > { %v2801_v12 = vld.sshfl [vmem:[#allocation1 + $0x20] sm:$0xff pattern:$0x73625140]  ;;  %v7699_v30 = vadd.f32 %v2664_v49, %v2276_v37 }
 0x57c   : > { %2806 = vst [vmem:[#allocation1 + $0x20] ss:$4 sm:$0xff] %v10243_v16 }
 0x57d   : > { %2807 = vst [vmem:[#allocation1 + $0x21] ss:$4 sm:$0xff] %v10244_v45  ;;  %v1819_v45 = vpack.c.bf16 %v10254_v39, %v10254_v39  ;;  %4951 = vmatmul.msk.bf16.gmra.mxu1 %vm970_vm8, %v2594_v33  ;;  %v10259_v33 = vld [vmem:[#allocation91_spill] sm:$0xff] }
 0x57e   : > { %2808 = vst [vmem:[#allocation1 + $0x22] ss:$4 sm:$0xff] %v10245_v28  ;;  %v1890_v16 = vpop.f32.mrf.mxu3  ;;  %v10305_v28 = vld [vmem:[#allocation146_spill] sm:$0xff] }
 0x57f   : > { %2809 = vst [vmem:[#allocation1 + $0x23] ss:$4 sm:$0xff] %v10246_v38  ;;  %v7696_v23 = vld.sshfl [vmem:[#allocation1] sm:$0xff pattern:$0x73625140]  ;;  %v1944_v56 = vadd.f32 %v1890_v16, %v1627_v50  ;;  %v2223_v48 = vpop.f32.mrf.mxu0  ;;  %v1606_v21 = vpop.f32.mrf.mxu2 }
 0x580   : > { %2822 = vst [vmem:[#allocation1] ss:$4 sm:$0xff] %v10247_v52  ;;  %v2666_v49 = vpop.f32.mrf.mxu1 }
 0x581   : > { %2823 = vst [vmem:[#allocation1 + $0x1] ss:$4 sm:$0xff] %v10248_v20  ;;  %v2277_v38 = vadd.f32 %v2223_v48, %v1944_v56  ;;  %v10256_v20 = vld [vmem:[#allocation77_spill] sm:$0xff] }
 0x582   : > { %2824 = vst [vmem:[#allocation1 + $0x2] ss:$4 sm:$0xff] %v10249_v26  ;;  %4957 = vmatmul.msk.bf16.gmra.mxu2 %vm970_vm8, %v2903_v46  ;;  %v7723_v46 = vadd.f32 %v1606_v21, %v7556_v41  ;;  %v10257_v26 = vld [vmem:[#allocation79_spill] sm:$0xff] }
 0x583   : > { %2825 = vst [vmem:[#allocation1 + $0x3] ss:$4 sm:$0xff] %v10252_v34  ;;  %4937 = vmatmul.msk.bf16.gmra.mxu0 %vm970_vm8, %v2151_v24  ;;  %v7725_v50 = vadd.f32 %v2666_v49, %v2277_v38  ;;  %v10264_v49 = vld [vmem:[#allocation87_spill] sm:$0xff] }
 0x586   : > { %v7715_v37 = vld.sshfl [vmem:[#allocation1 + $0x20] sm:$0xff pattern:$0x73625140]  ;;  %v1893_v24 = vpop.f32.mrf.mxu3 }
 0x587   : > { %2816 = vst [vmem:[#allocation1 + $0x20] ss:$4 sm:$0xff] %v10255_v40  ;;  %4922 = vmatmul.msk.bf16.gmra.mxu3 %vm970_vm8, %v1819_v45  ;;  %v1945_v16 = vadd.f32 %v1893_v24, %v1628_v13  ;;  %v2226_v34 = vpop.f32.mrf.mxu0  ;;  %v7736_v56 = vpop.f32.mrf.mxu2  ;;  %v2904_v45 = vpack.c.bf16 %v2801_v12, %v7644_v22  ;;  %v10263_v40 = vld [vmem:[#allocation84_spill] sm:$0xff]  ;;  %v10265_v13 = vld [vmem:[#allocation277_spill] sm:$0xff]  ;;  %v2595_v12 = vpack.c.bf16 %v7495_v35, %v7495_v35 }
 0x588   : > { %2817 = vst [vmem:[#allocation1 + $0x21] ss:$4 sm:$0xff] %v10256_v20  ;;  %v2669_v39 = vpop.f32.mrf.mxu1  ;;  %v10267_v24 = vld [vmem:[#allocation272_spill] sm:$0xff] }
 0x589   : > { %2818 = vst [vmem:[#allocation1 + $0x22] ss:$4 sm:$0xff] %v10257_v26  ;;  %v2278_v41 = vadd.f32 %v2226_v34, %v1945_v16  ;;  %v1164_v26 = vadd.f32 %v7251_v6, %v10265_v13  ;;  %v4969_v22 = vld [vmem:[%s8956_s1 + $0x1c] sm:$0xf]  ;;  %v10268_v16 = vld [vmem:[#allocation90_spill] sm:$0xff]  ;;  %v10269_v6 = vld [vmem:[#allocation101_spill] sm:$0xff] }
 0x58a   : > { %2819 = vst [vmem:[#allocation1 + $0x23] ss:$4 sm:$0xff] %v10258_v60  ;;  %v7730_v44 = vld.sshfl [vmem:[#allocation1] sm:$0xff pattern:$0x73625140] }
 0x58b   : > { %2832 = vst [vmem:[#allocation1] ss:$4 sm:$0xff] %v10259_v33  ;;  %v7739_v48 = vadd.f32 %v2669_v39, %v2278_v41  ;;  %v10266_v60 = vld [vmem:[#allocation89_spill] sm:$0xff]  ;;  %v2152_v33 = vpack.c.bf16 %v10267_v24, %v10267_v24  ;;  %v10270_v41 = vld [vmem:[#allocation102_spill] sm:$0xff]  ;;  %v1630_v39 = vadd.f32 %v7506_v36, %v1164_v26  ;;  %v2905_v36 = vpack.c.bf16 %v7715_v37, %v7674_v63  ;;  %v10282_v63 = vld [vmem:[#allocation107_spill] sm:$0xff] }
 0x58c   : > { %2833 = vst [vmem:[#allocation1 + $0x1] ss:$4 sm:$0xff] %v10260_v27  ;;  %v3288_v27 = vsel %vm1010_vm0, %v4969_v22, 0  ;;  %v10273_v22 = vld [vmem:[#allocation97_spill] sm:$0xff] }
 0x58d   : > { %2834 = vst [vmem:[#allocation1 + $0x2] ss:$4 sm:$0xff] %v10261_v43  ;;  %3297 = vmatpush.bf16.msra.mxu3 %v3288_v27  ;;  %4952 = vmatmul.msk.bf16.gmra.mxu1 %vm970_vm8, %v2595_v12  ;;  %v10275_v12 = vld [vmem:[#allocation96_spill] sm:$0xff]  ;;  %v10277_v27 = vld [vmem:[#allocation111_spill] sm:$0xff]  ;;  %v10283_v37 = vld [vmem:[#allocation109_spill] sm:$0xff] }
 0x58e   : > { %2835 = vst [vmem:[#allocation1 + $0x3] ss:$4 sm:$0xff] %v10262_v61  ;;  %v7742_v21 = vpop.f32.mrf.mxu3  ;;  %v10293_v61 = vld [vmem:[#allocation288_spill] sm:$0xff] }
 0x58f   : > { %v1611_v43 = vpop.f32.mrf.mxu2 }
 0x590   : > { %v7766_v35 = vadd.f32 %v1611_v43, %v7570_v14  ;;  %v10276_v14 = vld [vmem:[#allocation100_spill] sm:$0xff]  ;;  %v10279_v43 = vld [vmem:[#allocation114_spill] sm:$0xff] }
 0x591   : > { %v2821_v38 = vld.sshfl [vmem:[#allocation1 + $0x20] sm:$0xff pattern:$0x73625140] }
 0x592   : > { %2826 = vst [vmem:[#allocation1 + $0x20] ss:$4 sm:$0xff] %v10263_v40  ;;  %4958 = vmatmul.msk.bf16.gmra.mxu2 %vm970_vm8, %v2904_v45  ;;  %v10271_v45 = vld [vmem:[#allocation104_spill] sm:$0xff] }
 0x593   : > { %2827 = vst [vmem:[#allocation1 + $0x21] ss:$4 sm:$0xff] %v10264_v49  ;;  %4938 = vmatmul.msk.bf16.gmra.mxu0 %vm970_vm8, %v2152_v33  ;;  %v10272_v49 = vld [vmem:[#allocation105_spill] sm:$0xff]  ;;  %v10274_v33 = vld [vmem:[#allocation98_spill] sm:$0xff] }
 0x594   : > { %2828 = vst [vmem:[#allocation1 + $0x22] ss:$4 sm:$0xff] %v10266_v60 }
 0x595   : > { %2829 = vst [vmem:[#allocation1 + $0x23] ss:$4 sm:$0xff] %v10268_v16  ;;  %v7758_v34 = vld.sshfl [vmem:[#allocation1] sm:$0xff pattern:$0x73625140] }
 0x596   : > { %2842 = vst [vmem:[#allocation1] ss:$4 sm:$0xff] %v10269_v6  ;;  %v1898_v13 = vpop.f32.mrf.mxu3  ;;  %v10278_v6 = vld [vmem:[#allocation113_spill] sm:$0xff] }
 0x597   : > { %2843 = vst [vmem:[#allocation1 + $0x1] ss:$4 sm:$0xff] %v10270_v41  ;;  %v1947_v60 = vadd.f32 %v1898_v13, %v1630_v39  ;;  %v10280_v41 = vld [vmem:[#allocation115_spill] sm:$0xff]  ;;  %v10284_v13 = vld [vmem:[#allocation110_spill] sm:$0xff] }
 0x598   : > { %2844 = vst [vmem:[#allocation1 + $0x2] ss:$4 sm:$0xff] %v10271_v45 }
 0x599   : > { %2845 = vst [vmem:[#allocation1 + $0x3] ss:$4 sm:$0xff] %v10272_v49  ;;  %v10281_v49 = vld [vmem:[#allocation106_spill] sm:$0xff] }
 0x59c   : > { %v7770_v24 = vld.sshfl [vmem:[#allocation1 + $0x20] sm:$0xff pattern:$0x73625140] }
 0x59d   : > { %2836 = vst [vmem:[#allocation1 + $0x20] ss:$4 sm:$0xff] %v10273_v22 }
 0x59e   : > { %2837 = vst [vmem:[#allocation1 + $0x21] ss:$4 sm:$0xff] %v10274_v33  ;;  %v7794_v33 = vld [vmem:[%s5060_s19 + $0xf0] sm:$0xff] }
 0x59f   : > { %2838 = vst [vmem:[#allocation1 + $0x22] ss:$4 sm:$0xff] %v10275_v12  ;;  %v10291_v12 = vld [vmem:[#allocation244_spill] sm:$0xff]  ;;  %v9376_v52 = vrot.slane %v7794_v33, 2  ;;  %v9374_v15 = vrot.slane %v7794_v33, 4 }
 0x5a0   : > { %2839 = vst [vmem:[#allocation1 + $0x23] ss:$4 sm:$0xff] %v10276_v14  ;;  %v7778_v26 = vld.sshfl [vmem:[#allocation1] sm:$0xff pattern:$0x73625140]  ;;  %v10286_v14 = vld [vmem:[#allocation247_spill] sm:$0xff] }
 0x5a1   : > { %2852 = vst [vmem:[#allocation1] ss:$4 sm:$0xff] %v10277_v27  ;;  %v10287_v27 = vld [vmem:[#allocation10_spill] sm:$0xff] }
 0x5a2   : > { %2853 = vst [vmem:[#allocation1 + $0x1] ss:$4 sm:$0xff] %v10278_v6  ;;  %4959 = vmatmul.msk.bf16.gmra.mxu2 %vm970_vm8, %v2905_v36  ;;  %v7797_v36 = vpop.f32.mrf.mxu0  ;;  %v10289_v6 = vld [vmem:[#allocation242_spill] sm:$0xff] }
 0x5a3   : > { %2854 = vst [vmem:[#allocation1 + $0x2] ss:$4 sm:$0xff] %v10279_v43  ;;  %v7800_v43 = vpop.f32.mrf.mxu1 }
 0x5a4   : > { %2855 = vst [vmem:[#allocation1 + $0x3] ss:$4 sm:$0xff] %v10280_v41  ;;  %v10288_v41 = vld [vmem:[#allocation3_spill] sm:$0xff] }
 0x5a5   : > { %10285 = vst [vmem:[#allocation120_spill] sm:$0xff] %v7794_v33 }
 0x5a7   : > { %v7785_v39 = vld.sshfl [vmem:[#allocation1 + $0x20] sm:$0xff pattern:$0x73625140] }
 0x5a8   : > { %2846 = vst [vmem:[#allocation1 + $0x20] ss:$4 sm:$0xff] %v10281_v49  ;;  %v2906_v49 = vpack.c.bf16 %v2821_v38, %v7696_v23  ;;  %v1613_v38 = vpop.f32.mrf.mxu2 }
 0x5a9   : > { %2847 = vst [vmem:[#allocation1 + $0x21] ss:$4 sm:$0xff] %v10282_v63 }
 0x5aa   : > { %2848 = vst [vmem:[#allocation1 + $0x22] ss:$4 sm:$0xff] %v10283_v37  ;;  %v7806_v37 = vld [vmem:[%s5060_s19 + $0xf8] sm:$0xff]  ;;  %v2231_v23 = vpop.f32.mrf.mxu0 }
 0x5ab   : > { %2849 = vst [vmem:[#allocation1 + $0x23] ss:$4 sm:$0xff] %v10284_v13  ;;  %v7791_v22 = vld.sshfl [vmem:[#allocation1] sm:$0xff pattern:$0x73625140]  ;;  %v9372_v63 = vrot.slane %v7806_v37, 2 }
 0x5ac   : > { %2862 = vst [vmem:[#allocation1] ss:$4 sm:$0xff] %v10286_v14  ;;  %v10290_v14 = vld [vmem:[#allocation243_spill] sm:$0xff] }
 0x5ad   : > { %2863 = vst [vmem:[#allocation1 + $0x1] ss:$4 sm:$0xff] %v10287_v27  ;;  %v9373_v27 = vrot.slane %v7806_v37, 4 }
 0x5ae   : > { %2864 = vst [vmem:[#allocation1 + $0x2] ss:$4 sm:$0xff] %v10288_v41  ;;  %v10292_v41 = vld [vmem:[#allocation245_spill] sm:$0xff] }
 0x5af   : > { %2865 = vst [vmem:[#allocation1 + $0x3] ss:$4 sm:$0xff] %v7794_v33 }
 0x5b2   : > { %v7808_v13 = vld.sshfl [vmem:[#allocation1 + $0x20] sm:$0xff pattern:$0x73625140]  ;;  %4960 = vmatmul.msk.bf16.gmra.mxu2 %vm970_vm8, %v2906_v49  ;;  %v2280_v49 = vadd.f32 %v2231_v23, %v1947_v60  ;;  %v9375_v60 = vrot.slane %v7794_v33, 6 }
 0x5b3   : > { %2856 = vst [vmem:[#allocation1 + $0x20] ss:$4 sm:$0xff] %v10289_v6  ;;  %v4983_v6 = vld [vmem:[%s8956_s1 + $0x20] sm:$0xf] }
 0x5b4   : > { %2857 = vst [vmem:[#allocation1 + $0x21] ss:$4 sm:$0xff] %v10290_v14  ;;  %v7827_v14 = vadd.f32 %v1613_v38, %v7577_v42  ;;  %v3731_v16 = vsel %vm1010_vm0, %v4983_v6, 0  ;;  %v2907_v6 = vpack.c.bf16 %v7770_v24, %v7730_v44 }
 0x5b5   : > { %2858 = vst [vmem:[#allocation1 + $0x22] ss:$4 sm:$0xff] %v10291_v12  ;;  %v2674_v12 = vpop.f32.mrf.mxu1  ;;  %3740 = vmatpush.bf16.msra.mxu0 %v3731_v16  ;;  %v1616_v16 = vpop.f32.mrf.mxu2 }
 0x5b6   : > { %2859 = vst [vmem:[#allocation1 + $0x23] ss:$4 sm:$0xff] %v10292_v41  ;;  %v7817_v45 = vld.sshfl [vmem:[#allocation1] sm:$0xff pattern:$0x73625140]  ;;  %v7829_v41 = vpop.f32.mrf.mxu3  ;;  %v7835_v40 = vadd.f32 %v2674_v12, %v2280_v49  ;;  %v10294_v12 = vld [vmem:[#allocation123_spill] sm:$0xff] }
 0x5b7   : > { %2872 = vst [vmem:[#allocation1] ss:$4 sm:$0xff] %v9372_v63  ;;  %v1169_v63 = vadd.f32 %v7282_v11, %v10293_v61  ;;  %v7848_v61 = vpop.f32.mrf.mxu0 }
 0x5b8   : > { %2873 = vst [vmem:[#allocation1 + $0x1] ss:$4 sm:$0xff] %v9373_v27  ;;  %v10295_v27 = vld [vmem:[#allocation125_spill] sm:$0xff] }
 0x5b9   : > { %v1632_v42 = vadd.f32 %v7538_v1, %v1169_v63  ;;  %v7855_v1 = vadd.f32 %v1616_v16, %v7579_v53 }
 0x5bd   : > { %v7840_v23 = vld.sshfl [vmem:[#allocation1 + $0x20] sm:$0xff pattern:$0x73625140]  ;;  %v7857_v63 = vpop.f32.mrf.mxu1  ;;  %v1618_v24 = vpop.f32.mrf.mxu2 }
 0x5be   : > { %2866 = vst [vmem:[#allocation1 + $0x20] ss:$4 sm:$0xff] %v9376_v52  ;;  %v1903_v38 = vpop.f32.mrf.mxu3 }
 0x5bf   : > { %2867 = vst [vmem:[#allocation1 + $0x21] ss:$4 sm:$0xff] %v9374_v15  ;;  %v7846_v11 = vld.sshfl [vmem:[#allocation1] sm:$0xff pattern:$0x73625140]  ;;  %v1949_v49 = vadd.f32 %v1903_v38, %v1632_v42  ;;  %v10296_v15 = vld [vmem:[#allocation136_spill] sm:$0xff]  ;;  %v2236_v44 = vpop.f32.mrf.mxu0  ;;  %v1174_v42 = vadd.f32 %v7315_v55, %v10298_v31 }
 0x5c0   : > { %2868 = vst [vmem:[#allocation1 + $0x22] ss:$4 sm:$0xff] %v9375_v60  ;;  %v10297_v60 = vld [vmem:[#allocation137_spill] sm:$0xff]  ;;  %v10299_v38 = vld [vmem:[#allocation138_spill] sm:$0xff]  ;;  %v10306_v31 = vld [vmem:[#allocation147_spill] sm:$0xff] }
 0x5c1   : > { %2869 = vst [vmem:[#allocation1 + $0x23] ss:$4 sm:$0xff] %v7806_v37  ;;  %v2282_v16 = vadd.f32 %v2236_v44, %v1949_v49  ;;  %v1634_v24 = vadd.f32 %v7598_v7, %v1174_v42  ;;  %v10303_v49 = vld [vmem:[#allocation133_spill] sm:$0xff]  ;;  %v10304_v44 = vld [vmem:[#allocation135_spill] sm:$0xff]  ;;  %v10307_v7 = vld [vmem:[#allocation148_spill] sm:$0xff] }
 0x5c2   : > { %3078 = vst [vmem:[#allocation1] ss:$4 sm:$0xff] %v10294_v12  ;;  %4961 = vmatmul.msk.bf16.gmra.mxu2 %vm970_vm8, %v2907_v6  ;;  %v10301_v6 = vld [vmem:[#allocation131_spill] sm:$0xff]  ;;  %v10308_v42 = vld [vmem:[#allocation150_spill] sm:$0xff] }
 0x5c3   : > { %3080 = vst [vmem:[#allocation1 + $0x1] ss:$4 sm:$0xff] %v10295_v27  ;;  %v10300_v27 = vld [vmem:[#allocation140_spill] sm:$0xff] }
 0x5c4   : > { %3082 = vst [vmem:[#allocation1 + $0x2] ss:$4 sm:$0xff] %v10296_v15 }
 0x5c5   : > { %3084 = vst [vmem:[#allocation1 + $0x3] ss:$4 sm:$0xff] %v10297_v60  ;;  %v2679_v52 = vpop.f32.mrf.mxu1  ;;  %v10302_v60 = vld [vmem:[#allocation132_spill] sm:$0xff] }
 0x5c6   : > { %v7867_v20 = vpop.f32.mrf.mxu3  ;;  %v7873_v15 = vadd.f32 %v2679_v52, %v2282_v16  ;;  %v2908_v52 = vpack.c.bf16 %v7785_v39, %v7758_v34 }
 0x5c7   : > { %v7881_v55 = vpop.f32.mrf.mxu0 }
 0x5c8   : > { %v7865_v53 = vld.sshfl [vmem:[#allocation1 + $0x20] sm:$0xff pattern:$0x73625140] }
 0x5c9   : > { %3086 = vst [vmem:[#allocation1 + $0x20] ss:$4 sm:$0xff] %v10299_v38 }
 0x5ca   : > { %3088 = vst [vmem:[#allocation1 + $0x21] ss:$4 sm:$0xff] %v10300_v27 }
 0x5cb   : > { %3090 = vst [vmem:[#allocation1 + $0x22] ss:$4 sm:$0xff] %v10301_v6 }
 0x5cc   : > { %3092 = vst [vmem:[#allocation1 + $0x23] ss:$4 sm:$0xff] %v10302_v60  ;;  %v3093_v12 = vld.sshfl [vmem:[#allocation1] sm:$0xff pattern:$0x73625140] }
 0x5cd   : > { %3095 = vst [vmem:[#allocation1] ss:$4 sm:$0xff] %v10303_v49  ;;  %v7886_v16 = vpop.f32.mrf.mxu1  ;;  %v10310_v49 = vld [vmem:[#allocation142_spill] sm:$0xff] }
 0x5ce   : > { %3096 = vst [vmem:[#allocation1 + $0x1] ss:$4 sm:$0xff] %v10304_v44  ;;  %v1908_v38 = vpop.f32.mrf.mxu3 }
 0x5cf   : > { %3097 = vst [vmem:[#allocation1 + $0x2] ss:$4 sm:$0xff] %v10305_v28  ;;  %v1951_v27 = vadd.f32 %v1908_v38, %v1634_v24  ;;  %v10309_v28 = vld [vmem:[#allocation141_spill] sm:$0xff]  ;;  %v2241_v39 = vpop.f32.mrf.mxu0 }
 0x5d0   : > { %3098 = vst [vmem:[#allocation1 + $0x3] ss:$4 sm:$0xff] %v10306_v31  ;;  %v10311_v31 = vld [vmem:[#allocation143_spill] sm:$0xff] }
 0x5d2   : > { %4962 = vmatmul.msk.bf16.gmra.mxu2 %vm970_vm8, %v2908_v52  ;;  %v10312_v52 = vld [vmem:[#allocation116_spill] sm:$0xff] }
 0x5d3   : > { %v3094_v6 = vld.sshfl [vmem:[#allocation1 + $0x20] sm:$0xff pattern:$0x73625140] }
 0x5d4   : > { %v3233_v60 = vpack.c.bf16 %v3094_v6, %v3093_v12  ;;  %3099 = vst [vmem:[#allocation1 + $0x20] ss:$4 sm:$0xff] %v10307_v7  ;;  %v2284_v12 = vadd.f32 %v2241_v39, %v1951_v27  ;;  %v1179_v7 = vadd.f32 %v10312_v52, %v7267_v29  ;;  %v10317_v39 = vld [vmem:[#allocation160_spill] sm:$0xff]  ;;  %v2909_v52 = vpack.c.bf16 %v7808_v13, %v7778_v26  ;;  %v10323_v26 = vld [vmem:[#allocation166_spill] sm:$0xff] }
 0x5d5   : > { %3100 = vst [vmem:[#allocation1 + $0x21] ss:$4 sm:$0xff] %v10308_v42  ;;  %v2966_v34 = vpop.f32.mrf.mxu2  ;;  %v2684_v38 = vpop.f32.mrf.mxu1  ;;  %v10314_v42 = vld [vmem:[#allocation156_spill] sm:$0xff] }
 0x5d6   : > { %4970 = vmatmul.msk.bf16.vlgmr.msra.gmra.mxu3 %vm970_vm8, %v3233_v60  ;;  %3101 = vst [vmem:[#allocation1 + $0x22] ss:$4 sm:$0xff] %v10309_v28  ;;  %v7896_v24 = vadd.f32 %v2966_v34, %v7603_v10  ;;  %v7898_v6 = vpop.f32.mrf.mxu3  ;;  %v10313_v60 = vld [vmem:[#allocation145_spill] sm:$0xff]  ;;  %v7904_v28 = vadd.f32 %v2684_v38, %v2284_v12  ;;  %v10316_v10 = vld [vmem:[#allocation158_spill] sm:$0xff] }
 0x5d7   : > { %3102 = vst [vmem:[#allocation1 + $0x23] ss:$4 sm:$0xff] %v10310_v49  ;;  %v3103_v44 = vld.sshfl [vmem:[#allocation1] sm:$0xff pattern:$0x73625140]  ;;  %v7909_v34 = vpop.f32.mrf.mxu0 }
 0x5d8   : > { %3105 = vst [vmem:[#allocation1] ss:$4 sm:$0xff] %v10311_v31  ;;  %v10315_v49 = vld [vmem:[#allocation157_spill] sm:$0xff]  ;;  %v1636_v31 = vadd.f32 %v7637_v2, %v1179_v7 }
 0x5d9   : > { %3106 = vst [vmem:[#allocation1 + $0x1] ss:$4 sm:$0xff] %v10313_v60  ;;  %v10318_v60 = vld [vmem:[#allocation151_spill] sm:$0xff] }
 0x5da   : > { %3107 = vst [vmem:[#allocation1 + $0x2] ss:$4 sm:$0xff] %v10314_v42  ;;  %v10319_v42 = vld [vmem:[#allocation152_spill] sm:$0xff] }
 0x5db   : > { %3108 = vst [vmem:[#allocation1 + $0x3] ss:$4 sm:$0xff] %v10315_v49 }
 0x5dd   : > { %v2968_v27 = vpop.f32.mrf.mxu2  ;;  %v7917_v12 = vpop.f32.mrf.mxu1 }
 0x5de   : > { %v3104_v47 = vld.sshfl [vmem:[#allocation1 + $0x20] sm:$0xff pattern:$0x73625140]  ;;  %v7913_v29 = vadd.f32 %v2968_v27, %v7608_v17  ;;  %v1913_v38 = vpop.f32.mrf.mxu3 }
 0x5df   : > { %3109 = vst [vmem:[#allocation1 + $0x20] ss:$4 sm:$0xff] %v10316_v10  ;;  %v1953_v2 = vadd.f32 %v1913_v38, %v1636_v31  ;;  %v3234_v7 = vpack.c.bf16 %v3104_v47, %v3103_v44  ;;  %v10320_v10 = vld [vmem:[#allocation153_spill] sm:$0xff]  ;;  %v2246_v27 = vpop.f32.mrf.mxu0 }
 0x5e0   : > { %3110 = vst [vmem:[#allocation1 + $0x21] ss:$4 sm:$0xff] %v10317_v39  ;;  %v10322_v17 = vld [vmem:[#allocation165_spill] sm:$0xff] }
 0x5e1   : > { %3111 = vst [vmem:[#allocation1 + $0x22] ss:$4 sm:$0xff] %v10318_v60  ;;  %v2286_v47 = vadd.f32 %v2246_v27, %v1953_v2  ;;  %v10324_v60 = vld [vmem:[#allocation167_spill] sm:$0xff] }
 0x5e2   : > { %3112 = vst [vmem:[#allocation1 + $0x23] ss:$4 sm:$0xff] %v10319_v42  ;;  %v3113_v49 = vld.sshfl [vmem:[#allocation1] sm:$0xff pattern:$0x73625140]  ;;  %4963 = vmatmul.msk.bf16.gmra.mxu2 %vm970_vm8, %v2909_v52  ;;  %v10325_v52 = vld [vmem:[#allocation168_spill] sm:$0xff] }
 0x5e3   : > { %3115 = vst [vmem:[#allocation1] ss:$4 sm:$0xff] %v10320_v10  ;;  %v10326_v42 = vld [vmem:[#allocation161_spill] sm:$0xff] }
 0x5e4   : > { %3116 = vst [vmem:[#allocation1 + $0x1] ss:$4 sm:$0xff] %v10321_v58 }
 0x5e5   : > { %3117 = vst [vmem:[#allocation1 + $0x2] ss:$4 sm:$0xff] %v10322_v17  ;;  %v2971_v13 = vpop.f32.mrf.mxu2  ;;  %v2689_v44 = vpop.f32.mrf.mxu1  ;;  %v10328_v17 = vld [vmem:[#allocation163_spill] sm:$0xff] }
 0x5e6   : > { %4971 = vmatmul.msk.bf16.gmra.mxu3 %vm970_vm8, %v3234_v7  ;;  %3118 = vst [vmem:[#allocation1 + $0x3] ss:$4 sm:$0xff] %v10323_v26  ;;  %v7928_v31 = vadd.f32 %v2971_v13, %v7619_v18  ;;  %v7930_v39 = vpop.f32.mrf.mxu3  ;;  %v7933_v58 = vadd.f32 %v2689_v44, %v2286_v47  ;;  %v10327_v7 = vld [vmem:[#allocation162_spill] sm:$0xff]  ;;  %v10329_v18 = vld [vmem:[#allocation164_spill] sm:$0xff]  ;;  %v10330_v13 = vld [vmem:[#allocation173_spill] sm:$0xff]  ;;  %v2910_v47 = vpack.c.bf16 %v7840_v23, %v7791_v22 }
 0x5e7   : > { %v7940_v26 = vpop.f32.mrf.mxu0 }
 0x5e9   : > { %v3114_v38 = vld.sshfl [vmem:[#allocation1 + $0x20] sm:$0xff pattern:$0x73625140] }
 0x5ea   : > { %3119 = vst [vmem:[#allocation1 + $0x20] ss:$4 sm:$0xff] %v10324_v60 }
 0x5eb   : > { %3120 = vst [vmem:[#allocation1 + $0x21] ss:$4 sm:$0xff] %v10325_v52  ;;  %v10331_v52 = vld [vmem:[#allocation174_spill] sm:$0xff] }
 0x5ec   : > { %3121 = vst [vmem:[#allocation1 + $0x22] ss:$4 sm:$0xff] %v10326_v42 }
 0x5ed   : > { %3122 = vst [vmem:[#allocation1 + $0x23] ss:$4 sm:$0xff] %v10327_v7  ;;  %v3123_v10 = vld.sshfl [vmem:[#allocation1] sm:$0xff pattern:$0x73625140]  ;;  %v2973_v2 = vpop.f32.mrf.mxu2  ;;  %v7948_v44 = vpop.f32.mrf.mxu1  ;;  %v3235_v7 = vpack.c.bf16 %v3114_v38, %v3113_v49 }
 0x5ee   : > { %3125 = vst [vmem:[#allocation1] ss:$4 sm:$0xff] %v10328_v17  ;;  %v7944_v27 = vadd.f32 %v2973_v2, %v7640_v54  ;;  %v1918_v60 = vpop.f32.mrf.mxu3  ;;  %v10333_v54 = vld [vmem:[#allocation176_spill] sm:$0xff]  ;;  %v10334_v2 = vld [vmem:[#allocation169_spill] sm:$0xff] }
 0x5ef   : > { %3126 = vst [vmem:[#allocation1 + $0x1] ss:$4 sm:$0xff] %v10329_v18  ;;  %v1955_v42 = vadd.f32 %v1918_v60, %v7681_v8  ;;  %v10332_v18 = vld [vmem:[#allocation175_spill] sm:$0xff]  ;;  %v2251_v23 = vpop.f32.mrf.mxu0 }
 0x5f0   : > { %3127 = vst [vmem:[#allocation1 + $0x2] ss:$4 sm:$0xff] %v10330_v13  ;;  %v1639_v13 = vadd.f32 %v7694_v9, %v7552_v51 }
 0x5f1   : > { %3128 = vst [vmem:[#allocation1 + $0x3] ss:$4 sm:$0xff] %v10331_v52  ;;  %v10335_v52 = vld [vmem:[#allocation170_spill] sm:$0xff]  ;;  %v2288_v38 = vadd.f32 %v2251_v23, %v1955_v42  ;;  %v2911_v23 = vpack.c.bf16 %v7865_v53, %v7817_v45  ;;  %v10346_v45 = vld [vmem:[#allocation180_spill] sm:$0xff]  ;;  %v10347_v53 = vld [vmem:[#allocation185_spill] sm:$0xff] }
 0x5f2   : > { %4964 = vmatmul.msk.bf16.gmra.mxu2 %vm970_vm8, %v2910_v47 }
 0x5f4   : > { %v3124_v17 = vld.sshfl [vmem:[#allocation1 + $0x20] sm:$0xff pattern:$0x73625140] }
 0x5f5   : > { %3129 = vst [vmem:[#allocation1 + $0x20] ss:$4 sm:$0xff] %v10332_v18  ;;  %v2976_v22 = vpop.f32.mrf.mxu2  ;;  %v2694_v47 = vpop.f32.mrf.mxu1  ;;  %v10338_v18 = vld [vmem:[#allocation172_spill] sm:$0xff] }
 0x5f6   : > { %4972 = vmatmul.msk.bf16.gmra.mxu3 %vm970_vm8, %v3235_v7  ;;  %3130 = vst [vmem:[#allocation1 + $0x21] ss:$4 sm:$0xff] %v10333_v54  ;;  %v7961_v8 = vadd.f32 %v2976_v22, %v7656_v59  ;;  %v1920_v60 = vpop.f32.mrf.mxu3  ;;  %v10337_v7 = vld [vmem:[#allocation171_spill] sm:$0xff]  ;;  %v7967_v54 = vadd.f32 %v2694_v47, %v2288_v38  ;;  %v10342_v47 = vld [vmem:[#allocation184_spill] sm:$0xff] }
 0x5f7   : > { %3131 = vst [vmem:[#allocation1 + $0x22] ss:$4 sm:$0xff] %v10334_v2  ;;  %v10339_v2 = vld [vmem:[#allocation181_spill] sm:$0xff]  ;;  %v1956_v51 = vadd.f32 %v1920_v60, %v1639_v13  ;;  %v2253_v59 = vpop.f32.mrf.mxu0  ;;  %v10341_v22 = vld [vmem:[#allocation183_spill] sm:$0xff] }
 0x5f8   : > { %3132 = vst [vmem:[#allocation1 + $0x23] ss:$4 sm:$0xff] %v10335_v52  ;;  %v7963_v49 = vld.sshfl [vmem:[#allocation1] sm:$0xff pattern:$0x73625140] }
 0x5f9   : > { %10336 = vst [vmem:[#allocation130_spill] sm:$0xff] %v7961_v8  ;;  %v10343_v13 = vld [vmem:[#allocation177_spill] sm:$0xff]  ;;  %v10344_v8 = vld [vmem:[#allocation178_spill] sm:$0xff] }
 0x5fa   : > { %3135 = vst [vmem:[#allocation1] ss:$4 sm:$0xff] %v10337_v7  ;;  %v2289_v7 = vadd.f32 %v2253_v59, %v1956_v51  ;;  %v1641_v51 = vadd.f32 %v7736_v56, %v7563_v62  ;;  %v10354_v56 = vld [vmem:[#allocation190_spill] sm:$0xff] }
 0x5fb   : > { %3136 = vst [vmem:[#allocation1 + $0x1] ss:$4 sm:$0xff] %v10338_v18 }
 0x5fc   : > { %3137 = vst [vmem:[#allocation1 + $0x2] ss:$4 sm:$0xff] %v10339_v2 }
 0x5fd   : > { %3138 = vst [vmem:[#allocation1 + $0x3] ss:$4 sm:$0xff] %v10340_v25  ;;  %v2978_v52 = vpop.f32.mrf.mxu2  ;;  %v2696_v18 = vpop.f32.mrf.mxu1  ;;  %v3236_v25 = vpack.c.bf16 %v3124_v17, %v3123_v10  ;;  %v10348_v10 = vld [vmem:[#allocation186_spill] sm:$0xff] }
 0x5fe   : > { %v7973_v42 = vadd.f32 %v2978_v52, %v7683_v0  ;;  %v1923_v38 = vpop.f32.mrf.mxu3  ;;  %v7980_v60 = vadd.f32 %v2696_v18, %v2289_v7  ;;  %v10345_v0 = vld [vmem:[#allocation179_spill] sm:$0xff] }
 0x5ff   : > { %v3134_v9 = vld.sshfl [vmem:[#allocation1 + $0x20] sm:$0xff pattern:$0x73625140]  ;;  %v1957_v2 = vadd.f32 %v1923_v38, %v7723_v46  ;;  %v2256_v17 = vpop.f32.mrf.mxu0  ;;  %v10349_v38 = vld [vmem:[#allocation187_spill] sm:$0xff] }
 0x600   : > { %3139 = vst [vmem:[#allocation1 + $0x20] ss:$4 sm:$0xff] %v10341_v22 }
 0x601   : > { %3140 = vst [vmem:[#allocation1 + $0x21] ss:$4 sm:$0xff] %v10342_v47  ;;  %v2290_v52 = vadd.f32 %v2256_v17, %v1957_v2  ;;  %v10350_v47 = vld [vmem:[#allocation188_spill] sm:$0xff]  ;;  %v2912_v17 = vpack.c.bf16 %v7846_v11, %v7846_v11 }
 0x602   : > { %3141 = vst [vmem:[#allocation1 + $0x22] ss:$4 sm:$0xff] %v10343_v13  ;;  %4965 = vmatmul.msk.bf16.gmra.mxu2 %vm970_vm8, %v2911_v23  ;;  %v10351_v13 = vld [vmem:[#allocation189_spill] sm:$0xff] }
 0x603   : > { %3142 = vst [vmem:[#allocation1 + $0x23] ss:$4 sm:$0xff] %v10344_v8 }
 0x604   : > { %v7983_v22 = vld.sshfl [vmem:[#allocation1] sm:$0xff pattern:$0x73625140] }
 0x605   : > { %3145 = vst [vmem:[#allocation1] ss:$4 sm:$0xff] %v10345_v0  ;;  %v2981_v46 = vpop.f32.mrf.mxu2  ;;  %v2699_v59 = vpop.f32.mrf.mxu1  ;;  %v10352_v0 = vld [vmem:[#allocation275_spill] sm:$0xff] }
 0x606   : > { %3146 = vst [vmem:[#allocation1 + $0x1] ss:$4 sm:$0xff] %v10346_v45  ;;  %4973 = vmatmul.msk.bf16.gmra.mxu3 %vm970_vm8, %v3236_v25  ;;  %v7994_v8 = vadd.f32 %v2981_v46, %v7699_v30  ;;  %v1925_v23 = vpop.f32.mrf.mxu3  ;;  %v7998_v18 = vadd.f32 %v2699_v59, %v2290_v52  ;;  %v10353_v45 = vld [vmem:[#allocation112_spill] sm:$0xff]  ;;  %v10355_v46 = vld [vmem:[#allocation191_spill] sm:$0xff] }
 0x607   : > { %3147 = vst [vmem:[#allocation1 + $0x2] ss:$4 sm:$0xff] %v10347_v53  ;;  %v1958_v25 = vadd.f32 %v1925_v23, %v1641_v51  ;;  %v1161_v62 = vadd.f32 %v10353_v45, %v10352_v0  ;;  %v2258_v53 = vpop.f32.mrf.mxu0  ;;  %v10356_v23 = vld [vmem:[#allocation192_spill] sm:$0xff]  ;;  %v3237_v45 = vpack.c.bf16 %v3134_v9, %v7963_v49  ;;  %v10362_v9 = vld [vmem:[#allocation197_spill] sm:$0xff] }
 0x608   : > { %3148 = vst [vmem:[#allocation1 + $0x3] ss:$4 sm:$0xff] %v10348_v10 }
 0x609   : > { %v2291_v51 = vadd.f32 %v2258_v53, %v1958_v25  ;;  %v10361_v53 = vld [vmem:[#allocation196_spill] sm:$0xff] }
 0x60a   : > { %v7996_v7 = vld.sshfl [vmem:[#allocation1 + $0x20] sm:$0xff pattern:$0x73625140] }
 0x60b   : > { %3149 = vst [vmem:[#allocation1 + $0x20] ss:$4 sm:$0xff] %v10349_v38 }
 0x60c   : > { %3150 = vst [vmem:[#allocation1 + $0x21] ss:$4 sm:$0xff] %v10350_v47  ;;  %v10357_v47 = vld [vmem:[#allocation193_spill] sm:$0xff] }
 0x60d   : > { %3151 = vst [vmem:[#allocation1 + $0x22] ss:$4 sm:$0xff] %v10351_v13  ;;  %v2983_v2 = vpop.f32.mrf.mxu2  ;;  %v2701_v52 = vpop.f32.mrf.mxu1  ;;  %v10358_v13 = vld [vmem:[#allocation23_spill] sm:$0xff] }
 0x60e   : > { %3152 = vst [vmem:[#allocation1 + $0x23] ss:$4 sm:$0xff] %v10354_v56  ;;  %v8010_v10 = vadd.f32 %v2983_v2, %v7725_v50  ;;  %v1928_v59 = vpop.f32.mrf.mxu3  ;;  %v1629_v0 = vadd.f32 %v10358_v13, %v1161_v62  ;;  %v8019_v56 = vadd.f32 %v2701_v52, %v2291_v51  ;;  %v10359_v50 = vld [vmem:[#allocation194_spill] sm:$0xff]  ;;  %v10360_v2 = vld [vmem:[#allocation195_spill] sm:$0xff]  ;;  %v10365_v13 = vld [vmem:[#allocation200_spill] sm:$0xff] }
 0x60f   : > { %v8006_v30 = vld.sshfl [vmem:[#allocation1] sm:$0xff pattern:$0x73625140]  ;;  %v1959_v38 = vadd.f32 %v1928_v59, %v7766_v35  ;;  %v2261_v62 = vpop.f32.mrf.mxu0 }
 0x610   : > { %3155 = vst [vmem:[#allocation1] ss:$4 sm:$0xff] %v10355_v46  ;;  %v1946_v25 = vadd.f32 %v7742_v21, %v1629_v0  ;;  %v10366_v0 = vld [vmem:[#allocation201_spill] sm:$0xff] }
 0x611   : > { %3156 = vst [vmem:[#allocation1 + $0x1] ss:$4 sm:$0xff] %v10356_v23  ;;  %v2292_v46 = vadd.f32 %v2261_v62, %v1959_v38  ;;  %v10368_v38 = vld [vmem:[#allocation283_spill] sm:$0xff] }
 0x612   : > { %3157 = vst [vmem:[#allocation1 + $0x2] ss:$4 sm:$0xff] %v10357_v47  ;;  %4966 = vmatmul.msk.bf16.gmra.mxu2 %vm970_vm8, %v2912_v17  ;;  %v10363_v17 = vld [vmem:[#allocation198_spill] sm:$0xff]  ;;  %v2279_v21 = vadd.f32 %v7797_v36, %v1946_v25  ;;  %v10364_v47 = vld [vmem:[#allocation199_spill] sm:$0xff] }
 0x613   : > { %3158 = vst [vmem:[#allocation1 + $0x3] ss:$4 sm:$0xff] %v10359_v50  ;;  %v10369_v50 = vld [vmem:[#allocation221_spill] sm:$0xff] }
 0x615   : > { %v8023_v11 = vld.sshfl [vmem:[#allocation1 + $0x20] sm:$0xff pattern:$0x73625140]  ;;  %v2986_v35 = vpop.f32.mrf.mxu2  ;;  %v2704_v51 = vpop.f32.mrf.mxu1 }
 0x616   : > { %4974 = vmatmul.msk.bf16.gmra.mxu3 %vm970_vm8, %v3237_v45  ;;  %3159 = vst [vmem:[#allocation1 + $0x20] ss:$4 sm:$0xff] %v10360_v2  ;;  %v8030_v49 = vadd.f32 %v2986_v35, %v7739_v48  ;;  %v1930_v52 = vpop.f32.mrf.mxu3  ;;  %v8037_v23 = vadd.f32 %v2704_v51, %v2292_v46  ;;  %v10367_v45 = vld [vmem:[#allocation202_spill] sm:$0xff]  ;;  %v1166_v2 = vadd.f32 %v10369_v50, %v10368_v38  ;;  %v10370_v51 = vld [vmem:[#allocation203_spill] sm:$0xff]  ;;  %v10376_v50 = vld [vmem:[#allocation8_spill] sm:$0xff] }
 0x617   : > { %3160 = vst [vmem:[#allocation1 + $0x21] ss:$4 sm:$0xff] %v10361_v53  ;;  %v1960_v48 = vadd.f32 %v1930_v52, %v7827_v14  ;;  %v2722_v35 = vadd.f32 %v7800_v43, %v2279_v21  ;;  %v2263_v62 = vpop.f32.mrf.mxu0  ;;  %v10371_v14 = vld [vmem:[#allocation159_spill] sm:$0xff]  ;;  %v3238_v52 = vpack.c.bf16 %v7996_v7, %v7983_v22  ;;  %v10373_v43 = vld [vmem:[#allocation206_spill] sm:$0xff] }
 0x618   : > { %3161 = vst [vmem:[#allocation1 + $0x22] ss:$4 sm:$0xff] %v10362_v9  ;;  %v10374_v21 = vld [vmem:[#allocation207_spill] sm:$0xff] }
 0x619   : > { %3162 = vst [vmem:[#allocation1 + $0x23] ss:$4 sm:$0xff] %v10363_v17  ;;  %v2293_v25 = vadd.f32 %v2263_v62, %v1960_v48  ;;  %v1631_v17 = vadd.f32 %v10371_v14, %v1166_v2  ;;  %v10375_v48 = vld [vmem:[#allocation208_spill] sm:$0xff] }
 0x61a   : > { %v8034_v59 = vld.sshfl [vmem:[#allocation1] sm:$0xff pattern:$0x73625140] }
 0x61b   : > { %3165 = vst [vmem:[#allocation1] ss:$4 sm:$0xff] %v10364_v47 }
 0x61c   : > { %3166 = vst [vmem:[#allocation1 + $0x1] ss:$4 sm:$0xff] %v10365_v13  ;;  %v10372_v13 = vld [vmem:[#allocation205_spill] sm:$0xff] }
 0x61d   : > { %3167 = vst [vmem:[#allocation1 + $0x2] ss:$4 sm:$0xff] %v10366_v0  ;;  %v2988_v53 = vpop.f32.mrf.mxu2  ;;  %v2706_v9 = vpop.f32.mrf.mxu1 }
 0x61e   : > { %3168 = vst [vmem:[#allocation1 + $0x3] ss:$4 sm:$0xff] %v10367_v45  ;;  %v8047_v36 = vadd.f32 %v2988_v53, %v2722_v35  ;;  %v8055_v47 = vadd.f32 %v2706_v9, %v2293_v25  ;;  %v1948_v45 = vadd.f32 %v7829_v41, %v1631_v17  ;;  %v1933_v38 = vpop.f32.mrf.mxu3  ;;  %v10377_v35 = vld [vmem:[#allocation13_spill] sm:$0xff]  ;;  %v10378_v25 = vld [vmem:[#allocation210_spill] sm:$0xff]  ;;  %v10379_v17 = vld [vmem:[#allocation211_spill] sm:$0xff] }
 0x61f   : > { %v1961_v7 = vadd.f32 %v1933_v38, %v7855_v1  ;;  %v2266_v2 = vpop.f32.mrf.mxu0  ;;  %v10381_v1 = vld [vmem:[#allocation69_spill] sm:$0xff] }
 0x620   : > { %v8049_v46 = vld.sshfl [vmem:[#allocation1 + $0x20] sm:$0xff pattern:$0x73625140]  ;;  %v2281_v41 = vadd.f32 %v7848_v61, %v1948_v45 }
 0x621   : > { %3169 = vst [vmem:[#allocation1 + $0x20] ss:$4 sm:$0xff] %v10370_v51  ;;  %v2294_v9 = vadd.f32 %v2266_v2, %v1961_v7  ;;  %v10386_v7 = vld [vmem:[#allocation216_spill] sm:$0xff] }
 0x622   : > { %3170 = vst [vmem:[#allocation1 + $0x21] ss:$4 sm:$0xff] %v10372_v13  ;;  %v10382_v13 = vld [vmem:[#allocation149_spill] sm:$0xff] }
 0x623   : > { %3171 = vst [vmem:[#allocation1 + $0x22] ss:$4 sm:$0xff] %v10373_v43  ;;  %v1171_v43 = vadd.f32 %v10382_v13, %v10381_v1  ;;  %v10391_v13 = vld [vmem:[#allocation266_spill] sm:$0xff] }
 0x624   : > { %3172 = vst [vmem:[#allocation1 + $0x23] ss:$4 sm:$0xff] %v10374_v21 }
 0x625   : > { %v8060_v0 = vld.sshfl [vmem:[#allocation1] sm:$0xff pattern:$0x73625140]  ;;  %v2991_v22 = vpop.f32.mrf.mxu2  ;;  %v2709_v62 = vpop.f32.mrf.mxu1 }
 0x626   : > { %3175 = vst [vmem:[#allocation1] ss:$4 sm:$0xff] %v10375_v48  ;;  %4975 = vmatmul.msk.bf16.gmra.mxu3 %vm970_vm8, %v3238_v52  ;;  %v8069_v53 = vadd.f32 %v2991_v22, %v7835_v40  ;;  %v8073_v51 = vadd.f32 %v2709_v62, %v2294_v9  ;;  %v10380_v52 = vld [vmem:[#allocation213_spill] sm:$0xff]  ;;  %v2724_v40 = vadd.f32 %v7857_v63, %v2281_v41  ;;  %v1935_v21 = vpop.f32.mrf.mxu3  ;;  %v10383_v48 = vld [vmem:[#allocation214_spill] sm:$0xff]  ;;  %v10389_v9 = vld [vmem:[#allocation219_spill] sm:$0xff] }
 0x627   : > { %3176 = vst [vmem:[#allocation1 + $0x1] ss:$4 sm:$0xff] %v10376_v50  ;;  %v10384_v50 = vld [vmem:[#allocation215_spill] sm:$0xff]  ;;  %v2268_v45 = vpop.f32.mrf.mxu0  ;;  %v10388_v62 = vld [vmem:[#allocation154_spill] sm:$0xff]  ;;  %v3239_v63 = vpack.c.bf16 %v8023_v11, %v8006_v30  ;;  %v10390_v41 = vld [vmem:[#allocation220_spill] sm:$0xff] }
 0x628   : > { %3177 = vst [vmem:[#allocation1 + $0x2] ss:$4 sm:$0xff] %v10377_v35  ;;  %v10387_v35 = vld [vmem:[#allocation218_spill] sm:$0xff]  ;;  %v10394_v11 = vld [vmem:[#allocation260_spill] sm:$0xff] }
 0x629   : > { %3178 = vst [vmem:[#allocation1 + $0x3] ss:$4 sm:$0xff] %v10378_v25  ;;  %v1633_v25 = vadd.f32 %v10388_v62, %v1171_v43  ;;  %v10392_v43 = vrot.slane %v7794_v33, 2  ;;  %v3067_v62 = vrot.slane %v7806_v37, 7 }
 0x62b   : > { %v8075_v14 = vld.sshfl [vmem:[#allocation1 + $0x20] sm:$0xff pattern:$0x73625140]  ;;  %v3058_v21 = vrot.slane %v10392_v43, 7 }
 0x62c   : > { %3179 = vst [vmem:[#allocation1 + $0x20] ss:$4 sm:$0xff] %v10379_v17  ;;  %v1950_v17 = vadd.f32 %v7867_v20, %v1633_v25  ;;  %v10409_v25 = vld [vmem:[#allocation118_spill] sm:$0xff] }
 0x62d   : > { %3180 = vst [vmem:[#allocation1 + $0x21] ss:$4 sm:$0xff] %v10380_v52  ;;  %v2993_v38 = vpop.f32.mrf.mxu2  ;;  %v2711_v2 = vpop.f32.mrf.mxu1 }
 0x62e   : > { %3181 = vst [vmem:[#allocation1 + $0x22] ss:$4 sm:$0xff] %v10383_v48  ;;  %v8086_v22 = vadd.f32 %v2993_v38, %v2724_v40  ;;  %v4967_v40 = vrot.slane %v7794_v33, 9  ;;  %v10395_v48 = vrot.slane %v7794_v33, 4  ;;  %v10396_v38 = vld [vmem:[#allocation261_spill] sm:$0xff]  ;;  %v10398_v2 = vld [vmem:[#allocation262_spill] sm:$0xff] }
 0x62f   : > { %3182 = vst [vmem:[#allocation1 + $0x23] ss:$4 sm:$0xff] %v10384_v50  ;;  %v10397_v50 = vrot.slane %v7794_v33, 6 }
 0x630   : > { %v8084_v61 = vld.sshfl [vmem:[#allocation1] sm:$0xff pattern:$0x73625140]  ;;  %10385 = vst [vmem:[#allocation5_spill] sm:$0xff] %v8086_v22  ;;  %v3061_v20 = vrot.slane %v10395_v48, 7 }
 0x631   : > { %3185 = vst [vmem:[#allocation1] ss:$4 sm:$0xff] %v10386_v7  ;;  %v3064_v45 = vrot.slane %v10397_v50, 7  ;;  %v2283_v7 = vadd.f32 %v7881_v55, %v1950_v17  ;;  %v10403_v55 = vrot.slane %v7806_v37, 4  ;;  %v10406_v50 = vld [vmem:[#allocation144_spill] sm:$0xff] }
 0x632   : > { %3186 = vst [vmem:[#allocation1 + $0x1] ss:$4 sm:$0xff] %v10387_v35  ;;  %v3063_v43 = vrot.slane %v3061_v20, 2 }
 0x633   : > { %3187 = vst [vmem:[#allocation1 + $0x2] ss:$4 sm:$0xff] %v10389_v9  ;;  %v3060_v9 = vrot.slane %v3058_v21, 2  ;;  %v3073_v17 = vrot.slane %v10403_v55, 7  ;;  %v3066_v48 = vrot.slane %v3064_v45, 2 }
 0x634   : > { %3188 = vst [vmem:[#allocation1 + $0x3] ss:$4 sm:$0xff] %v10390_v41  ;;  %v10401_v41 = vrot.slane %v7806_v37, 2  ;;  %v3065_v55 = vsel %vm5505_vm7, %v3063_v43, %v3064_v45 }
 0x635   : > { %v2996_v1 = vpop.f32.mrf.mxu2  ;;  %v3075_v33 = vrot.slane %v3073_v17, 2 }
 0x636   : > { %4976 = vmatmul.msk.bf16.gmra.mxu3 %vm970_vm8, %v3239_v63  ;;  %v8097_v52 = vld.sshfl [vmem:[#allocation1 + $0x20] sm:$0xff pattern:$0x73625140]  ;;  %v8104_v30 = vadd.f32 %v2996_v1, %v7873_v15  ;;  %v10399_v15 = vld [vmem:[#allocation264_spill] sm:$0xff]  ;;  %v3059_v63 = vsel %vm5505_vm7, %v4967_v40, %v3058_v21  ;;  %v3070_v1 = vrot.slane %v10401_v41, 7  ;;  %v3062_v21 = vsel %vm5505_vm7, %v3060_v9, %v3061_v20 }
 0x637   : > { %3189 = vst [vmem:[#allocation1 + $0x20] ss:$4 sm:$0xff] %v10391_v13  ;;  %v10402_v13 = vld [vmem:[#allocation268_spill] sm:$0xff] }
 0x638   : > { %10393 = vst [vmem:[#allocation273_spill] sm:$0xff] %v8104_v30  ;;  %v3069_v30 = vrot.slane %v3067_v62, 2  ;;  %v3072_v41 = vrot.slane %v3070_v1, 2 }
 0x639   : > { %3190 = vst [vmem:[#allocation1 + $0x21] ss:$4 sm:$0xff] %v10394_v11  ;;  %v10404_v11 = vld [vmem:[#allocation269_spill] sm:$0xff] }
 0x63a   : > { %3191 = vst [vmem:[#allocation1 + $0x22] ss:$4 sm:$0xff] %v10396_v38  ;;  %v10405_v38 = vld [vmem:[#allocation299_spill] sm:$0xff]  ;;  %v3071_v20 = vsel %vm5505_vm7, %v3069_v30, %v3070_v1  ;;  %v3074_v45 = vsel %vm5505_vm7, %v3072_v41, %v3073_v17  ;;  %v10407_v1 = vld [vmem:[#allocation14_spill] sm:$0xff] }
 0x63b   : > { %3192 = vst [vmem:[#allocation1 + $0x23] ss:$4 sm:$0xff] %v10398_v2  ;;  %v8114_v35 = vld.sshfl [vmem:[#allocation1] sm:$0xff pattern:$0x73625140]  ;;  %v1176_v2 = vadd.f32 %v10406_v50, %v10405_v38  ;;  %v10410_v50 = vld [vmem:[#allocation11_spill] sm:$0xff] }
 0x63c   : > { %3195 = vst [vmem:[#allocation1] ss:$4 sm:$0xff] %v10399_v15  ;;  %v2726_v15 = vadd.f32 %v7886_v16, %v2283_v7  ;;  %v3068_v16 = vsel %vm5505_vm7, %v3066_v48, %v3067_v62 }
 0x63d   : > { %3196 = vst [vmem:[#allocation1 + $0x1] ss:$4 sm:$0xff] %v10402_v13  ;;  %v2998_v40 = vpop.f32.mrf.mxu2  ;;  %v1635_v7 = vadd.f32 %v7615_v4, %v1176_v2 }
 0x63e   : > { %3197 = vst [vmem:[#allocation1 + $0x2] ss:$4 sm:$0xff] %v10404_v11  ;;  %v8131_v13 = vadd.f32 %v2998_v40, %v2726_v15  ;;  %v4968_v11 = vrot.slane %v7806_v37, 13 }
 0x63f   : > { %3198 = vst [vmem:[#allocation1 + $0x3] ss:$4 sm:$0xff] %v3059_v63  ;;  %v3240_v63 = vpack.c.bf16 %v8049_v46, %v8034_v59  ;;  %v1952_v4 = vadd.f32 %v7898_v6, %v1635_v7  ;;  %v10412_v7 = vld [vmem:[#allocation20_spill] sm:$0xff] }
 0x640   : > { %v3077_v9 = vsel %vm5505_vm7, %v3075_v33, %v4968_v11  ;;  %v10408_v33 = vld [vmem:[#allocation18_spill] sm:$0xff] }
 0x641   : > { %v2285_v30 = vadd.f32 %v7909_v34, %v1952_v4  ;;  %v1181_v17 = vadd.f32 %v10409_v25, %v10408_v33  ;;  %v3241_v34 = vpack.c.bf16 %v8075_v14, %v8060_v0 }
 0x642   : > { %v8136_v22 = vld.sshfl [vmem:[#allocation1 + $0x20] sm:$0xff pattern:$0x73625140] }
 0x643   : > { %3199 = vst [vmem:[#allocation1 + $0x20] ss:$4 sm:$0xff] %v3062_v21  ;;  %v2728_v48 = vadd.f32 %v7917_v12, %v2285_v30 }
 0x644   : > { %3200 = vst [vmem:[#allocation1 + $0x21] ss:$4 sm:$0xff] %v3065_v55  ;;  %v10411_v55 = vld [vmem:[#allocation24_spill] sm:$0xff] }
 0x645   : > { %3201 = vst [vmem:[#allocation1 + $0x22] ss:$4 sm:$0xff] %v3068_v16  ;;  %v3001_v59 = vpop.f32.mrf.mxu2 }
 0x646   : > { %3202 = vst [vmem:[#allocation1 + $0x23] ss:$4 sm:$0xff] %v3071_v20  ;;  %v8149_v43 = vld.sshfl [vmem:[#allocation1] sm:$0xff pattern:$0x73625140]  ;;  %4977 = vmatmul.msk.bf16.gmra.mxu3 %vm970_vm8, %v3240_v63  ;;  %v8154_v46 = vadd.f32 %v3001_v59, %v7904_v28  ;;  %v1637_v28 = vadd.f32 %v7653_v5, %v1181_v17 }
 0x647   : > { %3205 = vst [vmem:[#allocation1] ss:$4 sm:$0xff] %v3074_v45 }
 0x648   : > { %3206 = vst [vmem:[#allocation1 + $0x1] ss:$4 sm:$0xff] %v3077_v9  ;;  %v1954_v12 = vadd.f32 %v7930_v39, %v1637_v28 }
 0x64a   : > { %v2287_v20 = vadd.f32 %v7940_v26, %v1954_v12 }
 0x64c   : > { %v2730_v59 = vadd.f32 %v7948_v44, %v2287_v20  ;;  %v3242_v44 = vpack.c.bf16 %v8097_v52, %v8084_v61 }
 0x64d   : > { %v8157_v62 = vld.sshfl [vmem:[#allocation1 + $0x20] sm:$0xff pattern:$0x73625140]  ;;  %v3003_v38 = vpop.f32.mrf.mxu2 }
 0x64e   : > { %3389 = vst.sshfl [vmem:[#allocation1 + $0x20] sm:$0xff pattern:$0x73625140] %v10407_v1  ;;  %v8166_v2 = vadd.f32 %v3003_v38, %v2728_v48  ;;  %v10414_v1 = vld [vmem:[#allocation34_spill] sm:$0xff] }
 0x64f   : > { %v8163_v6 = vld.sshfl [vmem:[#allocation1] sm:$0xff pattern:$0x73625140] }
 0x650   : > { %3388 = vst.sshfl [vmem:[#allocation1] sm:$0xff pattern:$0x73625140] %v10410_v50 }
 0x655   : > { %v8171_v15 = vld [vmem:[#allocation1 + $0x20] ss:$4 sm:$0xff]  ;;  %v8173_v40 = vld [vmem:[#allocation1 + $0x21] ss:$4 sm:$0xff]  ;;  %v8175_v21 = vld [vmem:[#allocation1 + $0x22] ss:$4 sm:$0xff]  ;;  %v3006_v5 = vpop.f32.mrf.mxu2 }
 0x656   : > { %v8177_v41 = vld [vmem:[#allocation1 + $0x23] ss:$4 sm:$0xff]  ;;  %4978 = vmatmul.msk.bf16.gmra.mxu3 %vm970_vm8, %v3241_v34  ;;  %v8189_v14 = vadd.f32 %v3006_v5, %v7933_v58 }
 0x657   : > { %3405 = vst.sshfl [vmem:[#allocation1 + $0x20] sm:$0xff pattern:$0x73625140] %v10411_v55  ;;  %v8182_v11 = vld [vmem:[#allocation1 + $0x1] ss:$4 sm:$0xff] }
 0x658   : > { %v8184_v16 = vld [vmem:[#allocation1 + $0x2] ss:$4 sm:$0xff]  ;;  %v8186_v0 = vld [vmem:[#allocation1 + $0x3] ss:$4 sm:$0xff] }
 0x659   : > { %3404 = vst.sshfl [vmem:[#allocation1] sm:$0xff pattern:$0x73625140] %v10412_v7  ;;  %v3299_v63 = vpop.f32.mrf.mxu3 }
 0x65a   : > { %v8194_v39 = vadd.f32 %v3299_v63, %v7896_v24 }
 0x65c   : > { %10413 = vst [vmem:[#allocation274_spill] sm:$0xff] %v8194_v39 }
 0x65d   : > { %v3008_v58 = vpop.f32.mrf.mxu2 }
 0x65e   : > { %v8196_v45 = vld [vmem:[#allocation1 + $0x20] ss:$4 sm:$0xff]  ;;  %v8198_v9 = vld [vmem:[#allocation1 + $0x21] ss:$4 sm:$0xff]  ;;  %v8200_v4 = vld [vmem:[#allocation1 + $0x22] ss:$4 sm:$0xff]  ;;  %v8208_v25 = vadd.f32 %v3008_v58, %v2730_v59 }
 0x65f   : > { %v8203_v30 = vld [vmem:[#allocation1 + $0x23] ss:$4 sm:$0xff] }
 0x660   : > { %3414 = vst.sshfl [vmem:[#allocation1 + $0x20] sm:$0xff pattern:$0x73625140] %v10414_v1  ;;  %v8206_v33 = vld [vmem:[#allocation1 + $0x1] ss:$4 sm:$0xff] }
 0x661   : > { %v8210_v26 = vld [vmem:[#allocation1 + $0x2] ss:$4 sm:$0xff]  ;;  %v8212_v24 = vld [vmem:[#allocation1 + $0x3] ss:$4 sm:$0xff]  ;;  %v3301_v17 = vpop.f32.mrf.mxu3 }
 0x662   : > { %3413 = vst.sshfl [vmem:[#allocation1] sm:$0xff pattern:$0x73625140] %v10197_v3  ;;  %v8216_v48 = vadd.f32 %v3301_v17, %v7913_v29  ;;  %v10419_v17 = vld [vmem:[#allocation44_spill] sm:$0xff] }
 0x664   : > { %10415 = vst [vmem:[#allocation2_spill] sm:$0xff] %v8216_v48 }
 0x665   : > { %v3011_v34 = vpop.f32.mrf.mxu2 }
 0x666   : > { %4979 = vmatmul.msk.bf16.gmra.mxu3 %vm970_vm8, %v3242_v44  ;;  %v8230_v55 = vadd.f32 %v3011_v34, %v7967_v54 }
 0x667   : > { %v8221_v38 = vld [vmem:[#allocation1 + $0x20] ss:$4 sm:$0xff]  ;;  %v8223_v50 = vld [vmem:[#allocation1 + $0x21] ss:$4 sm:$0xff]  ;;  %v8225_v28 = vld [vmem:[#allocation1 + $0x22] ss:$4 sm:$0xff] }
 0x668   : > { %v8227_v12 = vld [vmem:[#allocation1 + $0x23] ss:$4 sm:$0xff]  ;;  %10416 = vst [vmem:[#allocation29_spill] sm:$0xff] %v8230_v55 }
 0x669   : > { %3423 = vst.sshfl [vmem:[#allocation1 + $0x20] sm:$0xff pattern:$0x73625140] %v10201_v19  ;;  %v8233_v3 = vld [vmem:[#allocation1 + $0x1] ss:$4 sm:$0xff]  ;;  %v3304_v29 = vpop.f32.mrf.mxu3 }
 0x66a   : > { %v8235_v61 = vld [vmem:[#allocation1 + $0x2] ss:$4 sm:$0xff]  ;;  %v8237_v52 = vld [vmem:[#allocation1 + $0x3] ss:$4 sm:$0xff]  ;;  %v8240_v5 = vadd.f32 %v3304_v29, %v7928_v31  ;;  %v3243_v31 = vpack.c.bf16 %v8136_v22, %v8114_v35 }
 0x66b   : > { %3422 = vst.sshfl [vmem:[#allocation1] sm:$0xff pattern:$0x73625140] %v10210_v57  ;;  %v10425_v22 = vld [vmem:[#allocation57_spill] sm:$0xff] }
 0x66c   : > { %10417 = vst [vmem:[#allocation278_spill] sm:$0xff] %v8240_v5 }
 0x670   : > { %v8243_v7 = vld [vmem:[#allocation1 + $0x20] ss:$4 sm:$0xff]  ;;  %v8245_v63 = vld [vmem:[#allocation1 + $0x21] ss:$4 sm:$0xff]  ;;  %v8247_v54 = vld [vmem:[#allocation1 + $0x22] ss:$4 sm:$0xff] }
 0x671   : > { %v8249_v20 = vld [vmem:[#allocation1 + $0x23] ss:$4 sm:$0xff]  ;;  %v3306_v19 = vpop.f32.mrf.mxu3 }
 0x672   : > { %3432 = vst.sshfl [vmem:[#allocation1 + $0x20] sm:$0xff pattern:$0x73625140] %v10213_v32  ;;  %v8252_v59 = vld [vmem:[#allocation1 + $0x1] ss:$4 sm:$0xff]  ;;  %v8255_v58 = vadd.f32 %v3306_v19, %v7944_v27 }
 0x673   : > { %v8259_v57 = vld [vmem:[#allocation1 + $0x2] ss:$4 sm:$0xff]  ;;  %v8261_v1 = vld [vmem:[#allocation1 + $0x3] ss:$4 sm:$0xff] }
 0x674   : > { %10418 = vst [vmem:[#allocation279_spill] sm:$0xff] %v8255_v58  ;;  %v10423_v19 = vld [vmem:[#allocation130_spill] sm:$0xff] }
 0x675   : > { %3431 = vst.sshfl [vmem:[#allocation1] sm:$0xff pattern:$0x73625140] %v10419_v17 }
 0x676   : > { %4980 = vmatmul.msk.bf16.gmra.mxu3 %vm970_vm8, %v3243_v31  ;;  %v10426_v31 = vld [vmem:[#allocation54_spill] sm:$0xff] }
 0x679   : > { %v8265_v44 = vld [vmem:[#allocation1 + $0x20] ss:$4 sm:$0xff]  ;;  %v8267_v34 = vld [vmem:[#allocation1 + $0x21] ss:$4 sm:$0xff]  ;;  %v8269_v32 = vld [vmem:[#allocation1 + $0x22] ss:$4 sm:$0xff]  ;;  %v3309_v29 = vpop.f32.mrf.mxu3 }
 0x67a   : > { %10420 = vst [vmem:[#allocation225_spill] sm:$0xff] %v8267_v34  ;;  %v8271_v27 = vld [vmem:[#allocation1 + $0x23] ss:$4 sm:$0xff]  ;;  %v8274_v58 = vadd.f32 %v3309_v29, %v10423_v19  ;;  %v3244_v19 = vpack.c.bf16 %v8157_v62, %v8149_v43 }
 0x67b   : > { %10421 = vst [vmem:[#allocation224_spill] sm:$0xff] %v8269_v32  ;;  %v10439_v62 = vld [vmem:[#allocation77_spill] sm:$0xff] }
 0x67c   : > { %10422 = vst [vmem:[#allocation281_spill] sm:$0xff] %v8271_v27  ;;  %v8277_v35 = vld [vmem:[#allocation1 + $0x1] ss:$4 sm:$0xff]  ;;  %v8279_v5 = vld [vmem:[#allocation1 + $0x2] ss:$4 sm:$0xff] }
 0x67d   : > { %10424 = vst [vmem:[#allocation282_spill] sm:$0xff] %v8274_v58  ;;  %v8281_v17 = vld [vmem:[#allocation1 + $0x3] ss:$4 sm:$0xff] }
 0x67e   : > { %3441 = vst.sshfl [vmem:[#allocation1 + $0x20] sm:$0xff pattern:$0x73625140] %v10425_v22  ;;  %v10432_v58 = vld [vmem:[#allocation66_spill] sm:$0xff] }
 0x67f   : > { %3440 = vst.sshfl [vmem:[#allocation1] sm:$0xff pattern:$0x73625140] %v10426_v31 }
 0x681   : > { %v3311_v48 = vpop.f32.mrf.mxu3 }
 0x682   : > { %v8291_v29 = vadd.f32 %v3311_v48, %v7973_v42 }
 0x684   : > { %10430 = vst [vmem:[#allocation122_spill] sm:$0xff] %v8291_v29 }
 0x685   : > { %v8284_v39 = vld [vmem:[#allocation1 + $0x20] ss:$4 sm:$0xff]  ;;  %v8286_v32 = vld [vmem:[#allocation1 + $0x21] ss:$4 sm:$0xff]  ;;  %v8288_v34 = vld [vmem:[#allocation1 + $0x22] ss:$4 sm:$0xff] }
 0x686   : > { %10427 = vst [vmem:[#allocation284_spill] sm:$0xff] %v8284_v39  ;;  %v8295_v22 = vld [vmem:[#allocation1 + $0x23] ss:$4 sm:$0xff]  ;;  %v8298_v27 = vld [vmem:[#allocation1 + $0x1] ss:$4 sm:$0xff]  ;;  %4981 = vmatmul.msk.bf16.gmra.mxu3 %vm970_vm8, %v3244_v19 }
 0x687   : > { %10428 = vst [vmem:[#allocation276_spill] sm:$0xff] %v8286_v32  ;;  %v8300_v31 = vld [vmem:[#allocation1 + $0x2] ss:$4 sm:$0xff]  ;;  %v8302_v55 = vld [vmem:[#allocation1 + $0x3] ss:$4 sm:$0xff] }
 0x688   : > { %10429 = vst [vmem:[#allocation285_spill] sm:$0xff] %v8288_v34  ;;  %v10434_v39 = vld [vmem:[#allocation64_spill] sm:$0xff]  ;;  %v10443_v32 = vld [vmem:[#allocation73_spill] sm:$0xff] }
 0x689   : > { %10431 = vst [vmem:[#allocation121_spill] sm:$0xff] %v8295_v22  ;;  %v3314_v19 = vpop.f32.mrf.mxu3 }
 0x68a   : > { %3450 = vst.sshfl [vmem:[#allocation1 + $0x20] sm:$0xff pattern:$0x73625140] %v10432_v58 }
 0x68b   : > { %10433 = vst [vmem:[#allocation286_spill] sm:$0xff] %v8302_v55 }
 0x68c   : > { %3449 = vst.sshfl [vmem:[#allocation1] sm:$0xff pattern:$0x73625140] %v10434_v39  ;;  %v3013_v39 = vpop.f32.mrf.mxu2 }
 0x691   : > { %v8306_v34 = vld [vmem:[#allocation1 + $0x20] ss:$4 sm:$0xff]  ;;  %v8308_v42 = vld [vmem:[#allocation1 + $0x21] ss:$4 sm:$0xff]  ;;  %v8310_v48 = vld [vmem:[#allocation1 + $0x22] ss:$4 sm:$0xff] }
 0x692   : > { %10435 = vst [vmem:[#allocation287_spill] sm:$0xff] %v8306_v34  ;;  %v8312_v43 = vld [vmem:[#allocation1 + $0x23] ss:$4 sm:$0xff]  ;;  %v8323_v34 = vadd.f32 %v3013_v39, %v7980_v60  ;;  %v3316_v39 = vpop.f32.mrf.mxu3 }
 0x693   : > { %10436 = vst [vmem:[#allocation33_spill] sm:$0xff] %v8308_v42  ;;  %v8315_v58 = vld [vmem:[#allocation1 + $0x1] ss:$4 sm:$0xff]  ;;  %v8317_v29 = vld [vmem:[#allocation1 + $0x2] ss:$4 sm:$0xff]  ;;  %v8326_v42 = vadd.f32 %v3314_v19, %v7994_v8 }
 0x694   : > { %10437 = vst [vmem:[#allocation38_spill] sm:$0xff] %v8310_v48  ;;  %v8319_v22 = vld [vmem:[#allocation1 + $0x3] ss:$4 sm:$0xff]  ;;  %v3016_v8 = vpop.f32.mrf.mxu2 }
 0x695   : > { %10438 = vst [vmem:[#allocation227_spill] sm:$0xff] %v8312_v43  ;;  %v10451_v60 = vld [vmem:[#allocation81_spill] sm:$0xff]  ;;  %v8345_v19 = vadd.f32 %v3016_v8, %v7998_v18 }
 0x696   : > { %3459 = vst.sshfl [vmem:[#allocation1 + $0x20] sm:$0xff pattern:$0x73625140] %v10439_v62 }
 0x697   : > { %10440 = vst [vmem:[#allocation226_spill] sm:$0xff] %v8315_v58 }
 0x698   : > { %10441 = vst [vmem:[#allocation280_spill] sm:$0xff] %v8317_v29  ;;  %v10449_v29 = vld [vmem:[#allocation84_spill] sm:$0xff] }
 0x699   : > { %10442 = vst [vmem:[#allocation293_spill] sm:$0xff] %v8319_v22 }
 0x69a   : > { %3458 = vst.sshfl [vmem:[#allocation1] sm:$0xff pattern:$0x73625140] %v10443_v32 }
 0x69b   : > { %10444 = vst [vmem:[#allocation126_spill] sm:$0xff] %v8326_v42  ;;  %v8348_v42 = vadd.f32 %v3316_v39, %v8010_v10  ;;  %v10461_v39 = vld [vmem:[#allocation90_spill] sm:$0xff] }
 0x69d   : > { %v8328_v48 = vld [vmem:[#allocation1 + $0x20] ss:$4 sm:$0xff]  ;;  %v8330_v43 = vld [vmem:[#allocation1 + $0x21] ss:$4 sm:$0xff]  ;;  %v8332_v62 = vld [vmem:[#allocation1 + $0x22] ss:$4 sm:$0xff] }
 0x69e   : > { %10445 = vst [vmem:[#allocation119_spill] sm:$0xff] %v8328_v48  ;;  %v8334_v58 = vld [vmem:[#allocation1 + $0x23] ss:$4 sm:$0xff] }
 0x69f   : > { %10446 = vst [vmem:[#allocation42_spill] sm:$0xff] %v8330_v43  ;;  %v3245_v43 = vpack.c.bf16 %v8163_v6, %v8163_v6  ;;  %v3018_v6 = vpop.f32.mrf.mxu2 }
 0x6a0   : > { %10447 = vst [vmem:[#allocation48_spill] sm:$0xff] %v8332_v62 }
 0x6a1   : > { %10448 = vst [vmem:[#allocation294_spill] sm:$0xff] %v8334_v58  ;;  %v8337_v22 = vld [vmem:[#allocation1 + $0x1] ss:$4 sm:$0xff]  ;;  %v8339_v32 = vld [vmem:[#allocation1 + $0x2] ss:$4 sm:$0xff]  ;;  %4982 = vmatmul.msk.bf16.gmra.mxu3 %vm970_vm8, %v3245_v43  ;;  %v8378_v43 = vadd.f32 %v3018_v6, %v8019_v56 }
 0x6a2   : > { %3468 = vst.sshfl [vmem:[#allocation1 + $0x20] sm:$0xff pattern:$0x73625140] %v10449_v29  ;;  %v8341_v55 = vld [vmem:[#allocation1 + $0x3] ss:$4 sm:$0xff] }
 0x6a3   : > { %10450 = vst [vmem:[#allocation289_spill] sm:$0xff] %v8341_v55  ;;  %v10475_v6 = vld [vmem:[#allocation113_spill] sm:$0xff] }
 0x6a4   : > { %3467 = vst.sshfl [vmem:[#allocation1] sm:$0xff pattern:$0x73625140] %v10451_v60  ;;  %v10457_v60 = vld [vmem:[#allocation94_spill] sm:$0xff] }
 0x6a5   : > { %10452 = vst [vmem:[#allocation290_spill] sm:$0xff] %v8348_v42 }
 0x6a9   : > { %v8350_v62 = vld [vmem:[#allocation1 + $0x20] ss:$4 sm:$0xff]  ;;  %v8352_v58 = vld [vmem:[#allocation1 + $0x21] ss:$4 sm:$0xff]  ;;  %v8354_v29 = vld [vmem:[#allocation1 + $0x22] ss:$4 sm:$0xff] }
 0x6aa   : > { %10453 = vst [vmem:[#allocation229_spill] sm:$0xff] %v8350_v62  ;;  %v8358_v48 = vld [vmem:[#allocation1 + $0x23] ss:$4 sm:$0xff] }
 0x6ab   : > { %10454 = vst [vmem:[#allocation228_spill] sm:$0xff] %v8352_v58  ;;  %v8362_v18 = vld [vmem:[#allocation1 + $0x1] ss:$4 sm:$0xff]  ;;  %v8364_v8 = vld [vmem:[#allocation1 + $0x2] ss:$4 sm:$0xff] }
 0x6ac   : > { %10455 = vst [vmem:[#allocation300_spill] sm:$0xff] %v8354_v29  ;;  %v8366_v10 = vld [vmem:[#allocation1 + $0x3] ss:$4 sm:$0xff] }
 0x6ad   : > { %10456 = vst [vmem:[#allocation78_spill] sm:$0xff] %v8358_v48  ;;  %v3319_v48 = vpop.f32.mrf.mxu3 }
 0x6ae   : > { %3477 = vst.sshfl [vmem:[#allocation1 + $0x20] sm:$0xff pattern:$0x73625140] %v10457_v60  ;;  %v8381_v60 = vadd.f32 %v3319_v48, %v8030_v49 }
 0x6af   : > { %10458 = vst [vmem:[#allocation128_spill] sm:$0xff] %v8362_v18 }
 0x6b0   : > { %10459 = vst [vmem:[#allocation127_spill] sm:$0xff] %v8364_v8  ;;  %v10467_v8 = vld [vmem:[#allocation104_spill] sm:$0xff] }
 0x6b1   : > { %10460 = vst [vmem:[#allocation72_spill] sm:$0xff] %v8366_v10 }
 0x6b2   : > { %3476 = vst.sshfl [vmem:[#allocation1] sm:$0xff pattern:$0x73625140] %v10461_v39 }
 0x6b3   : > { %10466 = vst [vmem:[#allocation307_spill] sm:$0xff] %v8381_v60 }
 0x6b5   : > { %v8369_v42 = vld [vmem:[#allocation1 + $0x20] ss:$4 sm:$0xff]  ;;  %v8371_v29 = vld [vmem:[#allocation1 + $0x21] ss:$4 sm:$0xff]  ;;  %v8373_v58 = vld [vmem:[#allocation1 + $0x22] ss:$4 sm:$0xff]  ;;  %v3321_v18 = vpop.f32.mrf.mxu3 }
 0x6b6   : > { %10462 = vst [vmem:[#allocation291_spill] sm:$0xff] %v8369_v42  ;;  %v8375_v62 = vld [vmem:[#allocation1 + $0x23] ss:$4 sm:$0xff]  ;;  %v8401_v48 = vadd.f32 %v3321_v18, %v8047_v36 }
 0x6b7   : > { %10463 = vst [vmem:[#allocation292_spill] sm:$0xff] %v8371_v29  ;;  %v10469_v29 = vld [vmem:[#allocation96_spill] sm:$0xff] }
 0x6b8   : > { %10464 = vst [vmem:[#allocation53_spill] sm:$0xff] %v8373_v58  ;;  %v3021_v58 = vpop.f32.mrf.mxu2 }
 0x6b9   : > { %10465 = vst [vmem:[#allocation59_spill] sm:$0xff] %v8375_v62  ;;  %v8384_v10 = vld [vmem:[#allocation1 + $0x1] ss:$4 sm:$0xff]  ;;  %v8386_v39 = vld [vmem:[#allocation1 + $0x2] ss:$4 sm:$0xff]  ;;  %v8398_v49 = vadd.f32 %v3021_v58, %v8037_v23 }
 0x6ba   : > { %3486 = vst.sshfl [vmem:[#allocation1 + $0x20] sm:$0xff pattern:$0x73625140] %v10467_v8  ;;  %v8388_v42 = vld [vmem:[#allocation1 + $0x3] ss:$4 sm:$0xff] }
 0x6bb   : > { %10468 = vst [vmem:[#allocation88_spill] sm:$0xff] %v8388_v42 }
 0x6bc   : > { %3485 = vst.sshfl [vmem:[#allocation1] sm:$0xff pattern:$0x73625140] %v10469_v29 }
 0x6bd   : > { %10473 = vst [vmem:[#allocation83_spill] sm:$0xff] %v8401_v48 }
 0x6c1   : > { %v8391_v55 = vld [vmem:[#allocation1 + $0x20] ss:$4 sm:$0xff]  ;;  %v8393_v62 = vld [vmem:[#allocation1 + $0x21] ss:$4 sm:$0xff]  ;;  %v8395_v56 = vld [vmem:[#allocation1 + $0x22] ss:$4 sm:$0xff] }
 0x6c2   : > { %10470 = vst [vmem:[#allocation93_spill] sm:$0xff] %v8391_v55  ;;  %v8403_v8 = vld [vmem:[#allocation1 + $0x23] ss:$4 sm:$0xff] }
 0x6c3   : > { %10471 = vst [vmem:[#allocation231_spill] sm:$0xff] %v8393_v62  ;;  %v8406_v60 = vld [vmem:[#allocation1 + $0x1] ss:$4 sm:$0xff]  ;;  %v8408_v29 = vld [vmem:[#allocation1 + $0x2] ss:$4 sm:$0xff]  ;;  %v3023_v62 = vpop.f32.mrf.mxu2 }
 0x6c4   : > { %10472 = vst [vmem:[#allocation230_spill] sm:$0xff] %v8395_v56  ;;  %v8410_v42 = vld [vmem:[#allocation1 + $0x3] ss:$4 sm:$0xff]  ;;  %v3324_v56 = vpop.f32.mrf.mxu3  ;;  %v8414_v23 = vadd.f32 %v3023_v62, %v8055_v47 }
 0x6c5   : > { %10474 = vst [vmem:[#allocation296_spill] sm:$0xff] %v8403_v8  ;;  %v10478_v55 = vld [vmem:[#allocation107_spill] sm:$0xff]  ;;  %v8417_v36 = vadd.f32 %v3324_v56, %v8069_v53  ;;  %v10487_v47 = vld [vmem:[#allocation242_spill] sm:$0xff] }
 0x6c6   : > { %3495 = vst.sshfl [vmem:[#allocation1 + $0x20] sm:$0xff pattern:$0x73625140] %v10475_v6  ;;  %v10484_v8 = vld [vmem:[#allocation247_spill] sm:$0xff] }
 0x6c7   : > { %10476 = vst [vmem:[#allocation297_spill] sm:$0xff] %v8408_v29 }
 0x6c8   : > { %10477 = vst [vmem:[#allocation298_spill] sm:$0xff] %v8410_v42 }
 0x6c9   : > { %3494 = vst.sshfl [vmem:[#allocation1] sm:$0xff pattern:$0x73625140] %v10478_v55 }
 0x6ca   : > { %10479 = vst [vmem:[#allocation249_spill] sm:$0xff] %v8417_v36  ;;  %v10488_v36 = vld [vmem:[#allocation5_spill] sm:$0xff] }
 0x6cb   : > { %v3026_v53 = vpop.f32.mrf.mxu2 }
 0x6cc   : > { %v3326_v62 = vpop.f32.mrf.mxu3  ;;  %v8436_v56 = vadd.f32 %v3026_v53, %v8073_v51  ;;  %v10493_v51 = vld [vmem:[#allocation120_spill] sm:$0xff] }
 0x6cd   : > { %v8419_v58 = vld [vmem:[#allocation1 + $0x20] ss:$4 sm:$0xff]  ;;  %v8421_v18 = vld [vmem:[#allocation1 + $0x21] ss:$4 sm:$0xff]  ;;  %v8423_v6 = vld [vmem:[#allocation1 + $0x22] ss:$4 sm:$0xff] }
 0x6ce   : > { %10480 = vst [vmem:[#allocation248_spill] sm:$0xff] %v8419_v58  ;;  %v8425_v48 = vld [vmem:[#allocation1 + $0x23] ss:$4 sm:$0xff] }
 0x6cf   : > { %10481 = vst [vmem:[#allocation129_spill] sm:$0xff] %v8421_v18  ;;  %v8439_v18 = vadd.f32 %v3326_v62, %v10488_v36  ;;  %v10494_v62 = vld [vmem:[#allocation273_spill] sm:$0xff] }
 0x6d0   : > { %10482 = vst [vmem:[#allocation63_spill] sm:$0xff] %v8423_v6  ;;  %v8428_v42 = vld [vmem:[#allocation1 + $0x1] ss:$4 sm:$0xff]  ;;  %v8430_v55 = vld [vmem:[#allocation1 + $0x2] ss:$4 sm:$0xff] }
 0x6d1   : > { %10483 = vst [vmem:[#allocation222_spill] sm:$0xff] %v8425_v48  ;;  %v8432_v29 = vld [vmem:[#allocation1 + $0x3] ss:$4 sm:$0xff] }
 0x6d2   : > { %3504 = vst.sshfl [vmem:[#allocation1 + $0x20] sm:$0xff pattern:$0x73625140] %v10484_v8 }
 0x6d3   : > { %10485 = vst [vmem:[#allocation301_spill] sm:$0xff] %v8430_v55  ;;  %v3028_v53 = vpop.f32.mrf.mxu2 }
 0x6d4   : > { %10486 = vst [vmem:[#allocation302_spill] sm:$0xff] %v8432_v29  ;;  %v3329_v36 = vpop.f32.mrf.mxu3 }
 0x6d5   : > { %3503 = vst.sshfl [vmem:[#allocation1] sm:$0xff pattern:$0x73625140] %v10487_v47 }
 0x6d6   : > { %10489 = vst [vmem:[#allocation303_spill] sm:$0xff] %v8439_v18  ;;  %v8459_v18 = vadd.f32 %v3329_v36, %v10494_v62 }
 0x6d8   : > { %10495 = vst [vmem:[#allocation217_spill] sm:$0xff] %v8459_v18 }
 0x6d9   : > { %v8441_v6 = vld [vmem:[#allocation1 + $0x20] ss:$4 sm:$0xff]  ;;  %v8443_v48 = vld [vmem:[#allocation1 + $0x21] ss:$4 sm:$0xff]  ;;  %v8445_v8 = vld [vmem:[#allocation1 + $0x22] ss:$4 sm:$0xff] }
 0x6da   : > { %10490 = vst [vmem:[#allocation233_spill] sm:$0xff] %v8443_v48  ;;  %v8447_v58 = vld [vmem:[#allocation1 + $0x23] ss:$4 sm:$0xff] }
 0x6db   : > { %10491 = vst [vmem:[#allocation232_spill] sm:$0xff] %v8445_v8 }
 0x6dc   : > { %10492 = vst [vmem:[#allocation306_spill] sm:$0xff] %v8447_v58  ;;  %v8450_v29 = vld [vmem:[#allocation1 + $0x1] ss:$4 sm:$0xff]  ;;  %v8452_v47 = vld [vmem:[#allocation1 + $0x2] ss:$4 sm:$0xff]  ;;  %v3331_v53 = vpop.f32.mrf.mxu3 }
 0x6dd   : > { %3513 = vst.sshfl [vmem:[#allocation1 + $0x20] sm:$0xff pattern:$0x73625140] %v7806_v37  ;;  %v8454_v55 = vld [vmem:[#allocation1 + $0x3] ss:$4 sm:$0xff]  ;;  %v8481_v62 = vadd.f32 %v3331_v53, %v8131_v13 }
 0x6de   : > { %3512 = vst.sshfl [vmem:[#allocation1] sm:$0xff pattern:$0x73625140] %v10493_v51  ;;  %v10509_v53 = vld [vmem:[#allocation33_spill] sm:$0xff] }
 0x6df   : > { %3521 = vst [vmem:[#allocation1] ss:$4 sm:$0xff] %v8182_v11 }
 0x6e4   : > { %v8461_v8 = vld [vmem:[#allocation1 + $0x20] ss:$4 sm:$0xff]  ;;  %v8463_v58 = vld [vmem:[#allocation1 + $0x21] ss:$4 sm:$0xff]  ;;  %v8465_v37 = vld [vmem:[#allocation1 + $0x22] ss:$4 sm:$0xff] }
 0x6e5   : > { %3529 = vst [vmem:[#allocation1 + $0x20] ss:$4 sm:$0xff] %v8173_v40  ;;  %v8469_v48 = vld [vmem:[#allocation1 + $0x1] ss:$4 sm:$0xff]  ;;  %v8471_v51 = vld [vmem:[#allocation1 + $0x2] ss:$4 sm:$0xff]  ;;  %v3334_v40 = vpop.f32.mrf.mxu3 }
 0x6e6   : > { %3531 = vst [vmem:[#allocation1 + $0x21] ss:$4 sm:$0xff] %v8175_v21  ;;  %v8474_v11 = vld [vmem:[#allocation1 + $0x3] ss:$4 sm:$0xff] }
 0x6e7   : > { %3533 = vst [vmem:[#allocation1 + $0x22] ss:$4 sm:$0xff] %v8177_v41  ;;  %v8476_v36 = vld [vmem:[#allocation1 + $0x23] ss:$4 sm:$0xff]  ;;  %v8486_v41 = vadd.f32 %v3334_v40, %v8154_v46 }
 0x6e8   : > { %3523 = vst [vmem:[#allocation1 + $0x1] ss:$4 sm:$0xff] %v8184_v16  ;;  %v10510_v40 = vld [vmem:[#allocation38_spill] sm:$0xff] }
 0x6e9   : > { %3525 = vst [vmem:[#allocation1 + $0x2] ss:$4 sm:$0xff] %v8186_v0 }
 0x6ea   : > { %3527 = vst [vmem:[#allocation1 + $0x3] ss:$4 sm:$0xff] %v8171_v15 }
 0x6eb   : > { %3535 = vst [vmem:[#allocation1 + $0x23] ss:$4 sm:$0xff] %v8206_v33 }
 0x6ed   : > { %v3336_v13 = vpop.f32.mrf.mxu3 }
 0x6ee   : > { %v8498_v46 = vadd.f32 %v3336_v13, %v8166_v2  ;;  %v10511_v13 = vld [vmem:[#allocation227_spill] sm:$0xff] }
 0x6f1   : > { %v3536_v21 = vld.sshfl [vmem:[#allocation1] sm:$0xff pattern:$0x73625140] }
 0x6f2   : > { %3538 = vst [vmem:[#allocation1] ss:$4 sm:$0xff] %v8210_v26  ;;  %v3537_v18 = vld.sshfl [vmem:[#allocation1 + $0x20] sm:$0xff pattern:$0x73625140] }
 0x6f3   : > { %3539 = vst [vmem:[#allocation1 + $0x1] ss:$4 sm:$0xff] %v8212_v24  ;;  %v3676_v16 = vpack.c.bf16 %v3537_v18, %v3536_v21  ;;  %v10507_v18 = vld [vmem:[#allocation293_spill] sm:$0xff] }
 0x6f4   : > { %3540 = vst [vmem:[#allocation1 + $0x2] ss:$4 sm:$0xff] %v8196_v45 }
 0x6f5   : > { %3541 = vst [vmem:[#allocation1 + $0x3] ss:$4 sm:$0xff] %v8198_v9  ;;  %4984 = vmatmul.msk.bf16.vlgmr.msra.gmra.mxu0 %vm970_vm8, %v3676_v16  ;;  %v3339_v45 = vpop.f32.mrf.mxu3 }
 0x6f6   : > { %3542 = vst [vmem:[#allocation1 + $0x20] ss:$4 sm:$0xff] %v8200_v4  ;;  %v8506_v4 = vadd.f32 %v3339_v45, %v8189_v14  ;;  %v10513_v45 = vld [vmem:[#allocation119_spill] sm:$0xff] }
 0x6f7   : > { %3543 = vst [vmem:[#allocation1 + $0x21] ss:$4 sm:$0xff] %v8203_v30 }
 0x6f8   : > { %3544 = vst [vmem:[#allocation1 + $0x22] ss:$4 sm:$0xff] %v8233_v3  ;;  %v10499_v3 = vld [vmem:[#allocation281_spill] sm:$0xff] }
 0x6f9   : > { %3545 = vst [vmem:[#allocation1 + $0x23] ss:$4 sm:$0xff] %v8235_v61 }
 0x6fc   : > { %v3546_v15 = vld.sshfl [vmem:[#allocation1] sm:$0xff pattern:$0x73625140] }
 0x6fd   : > { %3548 = vst [vmem:[#allocation1] ss:$4 sm:$0xff] %v8237_v52  ;;  %v3341_v30 = vpop.f32.mrf.mxu3  ;;  %v10500_v52 = vld [vmem:[#allocation286_spill] sm:$0xff] }
 0x6fe   : > { %3549 = vst [vmem:[#allocation1 + $0x1] ss:$4 sm:$0xff] %v8221_v38  ;;  %v8515_v33 = vadd.f32 %v3341_v30, %v8208_v25  ;;  %v10496_v38 = vld [vmem:[#allocation29_spill] sm:$0xff]  ;;  %v10516_v30 = vld [vmem:[#allocation294_spill] sm:$0xff] }
 0x6ff   : > { %3550 = vst [vmem:[#allocation1 + $0x2] ss:$4 sm:$0xff] %v8223_v50 }
 0x700   : > { %3551 = vst [vmem:[#allocation1 + $0x3] ss:$4 sm:$0xff] %v8225_v28  ;;  %v3547_v0 = vld.sshfl [vmem:[#allocation1 + $0x20] sm:$0xff pattern:$0x73625140] }
 0x701   : > { %v3677_v9 = vpack.c.bf16 %v3547_v0, %v3546_v15  ;;  %3552 = vst [vmem:[#allocation1 + $0x20] ss:$4 sm:$0xff] %v8227_v12  ;;  %v10497_v28 = vld [vmem:[#allocation225_spill] sm:$0xff]  ;;  %v10498_v12 = vld [vmem:[#allocation224_spill] sm:$0xff] }
 0x702   : > { %3553 = vst [vmem:[#allocation1 + $0x21] ss:$4 sm:$0xff] %v8252_v59  ;;  %v10503_v59 = vld [vmem:[#allocation285_spill] sm:$0xff] }
 0x703   : > { %3554 = vst [vmem:[#allocation1 + $0x22] ss:$4 sm:$0xff] %v8259_v57  ;;  %v10504_v57 = vld [vmem:[#allocation121_spill] sm:$0xff] }
 0x704   : > { %3555 = vst [vmem:[#allocation1 + $0x23] ss:$4 sm:$0xff] %v8261_v1  ;;  %v10505_v1 = vld [vmem:[#allocation226_spill] sm:$0xff] }
 0x705   : > { %4985 = vmatmul.msk.bf16.gmra.mxu0 %vm970_vm8, %v3677_v9  ;;  %v3344_v26 = vpop.f32.mrf.mxu3  ;;  %v10514_v9 = vld [vmem:[#allocation42_spill] sm:$0xff] }
 0x706   : > { %v8524_v50 = vadd.f32 %v3344_v26, %v10496_v38  ;;  %v10519_v38 = vld [vmem:[#allocation72_spill] sm:$0xff] }
 0x707   : > { %v3556_v2 = vld.sshfl [vmem:[#allocation1] sm:$0xff pattern:$0x73625140] }
 0x708   : > { %3558 = vst [vmem:[#allocation1] ss:$4 sm:$0xff] %v8243_v7  ;;  %v10501_v7 = vld [vmem:[#allocation284_spill] sm:$0xff] }
 0x709   : > { %3559 = vst [vmem:[#allocation1 + $0x1] ss:$4 sm:$0xff] %v8245_v63 }
 0x70a   : > { %3560 = vst [vmem:[#allocation1 + $0x2] ss:$4 sm:$0xff] %v8247_v54  ;;  %v10502_v54 = vld [vmem:[#allocation276_spill] sm:$0xff] }
 0x70b   : > { %3561 = vst [vmem:[#allocation1 + $0x3] ss:$4 sm:$0xff] %v8249_v20  ;;  %v3557_v14 = vld.sshfl [vmem:[#allocation1 + $0x20] sm:$0xff pattern:$0x73625140] }
 0x70c   : > { %3562 = vst [vmem:[#allocation1 + $0x20] ss:$4 sm:$0xff] %v8277_v35  ;;  %v3678_v24 = vpack.c.bf16 %v3557_v14, %v3556_v2  ;;  %v10515_v2 = vld [vmem:[#allocation48_spill] sm:$0xff] }
 0x70d   : > { %3563 = vst [vmem:[#allocation1 + $0x21] ss:$4 sm:$0xff] %v8279_v5  ;;  %v3346_v5 = vpop.f32.mrf.mxu3 }
 0x70e   : > { %3564 = vst [vmem:[#allocation1 + $0x22] ss:$4 sm:$0xff] %v8281_v17  ;;  %v8535_v63 = vadd.f32 %v3346_v5, %v8323_v34  ;;  %v10508_v34 = vld [vmem:[#allocation287_spill] sm:$0xff] }
 0x70f   : > { %3565 = vst [vmem:[#allocation1 + $0x23] ss:$4 sm:$0xff] %v8265_v44 }
 0x712   : > { %v3566_v25 = vld.sshfl [vmem:[#allocation1] sm:$0xff pattern:$0x73625140] }
 0x713   : > { %3568 = vst [vmem:[#allocation1] ss:$4 sm:$0xff] %v10497_v28 }
 0x714   : > { %3569 = vst [vmem:[#allocation1 + $0x1] ss:$4 sm:$0xff] %v10498_v12  ;;  %v10521_v12 = vld [vmem:[#allocation228_spill] sm:$0xff] }
 0x715   : > { %3570 = vst [vmem:[#allocation1 + $0x2] ss:$4 sm:$0xff] %v10499_v3  ;;  %4986 = vmatmul.msk.bf16.gmra.mxu0 %vm970_vm8, %v3678_v24  ;;  %v3349_v44 = vpop.f32.mrf.mxu3 }
 0x716   : > { %3571 = vst [vmem:[#allocation1 + $0x3] ss:$4 sm:$0xff] %v8298_v27  ;;  %v3567_v61 = vld.sshfl [vmem:[#allocation1 + $0x20] sm:$0xff pattern:$0x73625140]  ;;  %v10506_v27 = vld [vmem:[#allocation280_spill] sm:$0xff] }
 0x717   : > { %3572 = vst [vmem:[#allocation1 + $0x20] ss:$4 sm:$0xff] %v8300_v31  ;;  %v3679_v35 = vpack.c.bf16 %v3567_v61, %v3566_v25  ;;  %v8543_v31 = vadd.f32 %v3349_v44, %v8345_v19  ;;  %v10512_v19 = vld [vmem:[#allocation289_spill] sm:$0xff]  ;;  %v10522_v61 = vld [vmem:[#allocation300_spill] sm:$0xff] }
 0x718   : > { %3573 = vst [vmem:[#allocation1 + $0x21] ss:$4 sm:$0xff] %v10500_v52  ;;  %v10520_v25 = vld [vmem:[#allocation229_spill] sm:$0xff]  ;;  %v10523_v52 = vld [vmem:[#allocation78_spill] sm:$0xff]  ;;  %v10526_v44 = vld [vmem:[#allocation292_spill] sm:$0xff] }
 0x719   : > { %3574 = vst [vmem:[#allocation1 + $0x22] ss:$4 sm:$0xff] %v10501_v7 }
 0x71a   : > { %3575 = vst [vmem:[#allocation1 + $0x23] ss:$4 sm:$0xff] %v10502_v54  ;;  %v10524_v54 = vld [vmem:[#allocation88_spill] sm:$0xff] }
 0x71d   : > { %v3576_v20 = vld.sshfl [vmem:[#allocation1] sm:$0xff pattern:$0x73625140]  ;;  %v3351_v16 = vpop.f32.mrf.mxu3 }
 0x71e   : > { %3578 = vst [vmem:[#allocation1] ss:$4 sm:$0xff] %v10503_v59  ;;  %v8552_v15 = vadd.f32 %v3351_v16, %v8378_v43  ;;  %v10536_v16 = vld [vmem:[#allocation302_spill] sm:$0xff] }
 0x71f   : > { %3579 = vst [vmem:[#allocation1 + $0x1] ss:$4 sm:$0xff] %v10504_v57  ;;  %v10525_v57 = vld [vmem:[#allocation291_spill] sm:$0xff] }
 0x720   : > { %3580 = vst [vmem:[#allocation1 + $0x2] ss:$4 sm:$0xff] %v10505_v1 }
 0x721   : > { %3581 = vst [vmem:[#allocation1 + $0x3] ss:$4 sm:$0xff] %v10506_v27  ;;  %v3577_v17 = vld.sshfl [vmem:[#allocation1 + $0x20] sm:$0xff pattern:$0x73625140]  ;;  %v10528_v27 = vld [vmem:[#allocation59_spill] sm:$0xff] }
 0x722   : > { %3582 = vst [vmem:[#allocation1 + $0x20] ss:$4 sm:$0xff] %v10507_v18  ;;  %v3680_v26 = vpack.c.bf16 %v3577_v17, %v3576_v20  ;;  %v10531_v18 = vld [vmem:[#allocation93_spill] sm:$0xff] }
 0x723   : > { %3583 = vst [vmem:[#allocation1 + $0x21] ss:$4 sm:$0xff] %v10508_v34  ;;  %v10532_v34 = vld [vmem:[#allocation231_spill] sm:$0xff] }
 0x724   : > { %3584 = vst [vmem:[#allocation1 + $0x22] ss:$4 sm:$0xff] %v10509_v53 }
 0x725   : > { %4987 = vmatmul.msk.bf16.gmra.mxu0 %vm970_vm8, %v3679_v35  ;;  %3585 = vst [vmem:[#allocation1 + $0x23] ss:$4 sm:$0xff] %v10510_v40  ;;  %v3354_v14 = vpop.f32.mrf.mxu3  ;;  %v10533_v40 = vld [vmem:[#allocation230_spill] sm:$0xff] }
 0x726   : > { %v8562_v43 = vadd.f32 %v3354_v14, %v8398_v49 }
 0x728   : > { %v3586_v21 = vld.sshfl [vmem:[#allocation1] sm:$0xff pattern:$0x73625140] }
 0x729   : > { %3588 = vst [vmem:[#allocation1] ss:$4 sm:$0xff] %v10511_v13 }
 0x72a   : > { %3589 = vst [vmem:[#allocation1 + $0x1] ss:$4 sm:$0xff] %v8337_v22  ;;  %v10517_v22 = vld [vmem:[#allocation128_spill] sm:$0xff] }
 0x72b   : > { %3590 = vst [vmem:[#allocation1 + $0x2] ss:$4 sm:$0xff] %v8339_v32  ;;  %v10518_v32 = vld [vmem:[#allocation127_spill] sm:$0xff] }
 0x72c   : > { %3591 = vst [vmem:[#allocation1 + $0x3] ss:$4 sm:$0xff] %v10512_v19  ;;  %v3587_v0 = vld.sshfl [vmem:[#allocation1 + $0x20] sm:$0xff pattern:$0x73625140] }
 0x72d   : > { %3592 = vst [vmem:[#allocation1 + $0x20] ss:$4 sm:$0xff] %v10513_v45  ;;  %v3356_v3 = vpop.f32.mrf.mxu3  ;;  %v3681_v20 = vpack.c.bf16 %v3587_v0, %v3586_v21  ;;  %v10534_v21 = vld [vmem:[#allocation296_spill] sm:$0xff]  ;;  %v10538_v45 = vld [vmem:[#allocation129_spill] sm:$0xff] }
 0x72e   : > { %3593 = vst [vmem:[#allocation1 + $0x21] ss:$4 sm:$0xff] %v10514_v9  ;;  %v8572_v49 = vadd.f32 %v3356_v3, %v8414_v23  ;;  %v10527_v23 = vld [vmem:[#allocation53_spill] sm:$0xff]  ;;  %v10537_v0 = vld [vmem:[#allocation248_spill] sm:$0xff]  ;;  %v10539_v9 = vld [vmem:[#allocation63_spill] sm:$0xff] }
 0x72f   : > { %3594 = vst [vmem:[#allocation1 + $0x22] ss:$4 sm:$0xff] %v10515_v2 }
 0x730   : > { %3595 = vst [vmem:[#allocation1 + $0x23] ss:$4 sm:$0xff] %v10516_v30  ;;  %v10540_v30 = vld [vmem:[#allocation222_spill] sm:$0xff] }
 0x733   : > { %v3596_v24 = vld.sshfl [vmem:[#allocation1] sm:$0xff pattern:$0x73625140] }
 0x734   : > { %3598 = vst [vmem:[#allocation1] ss:$4 sm:$0xff] %v10517_v22  ;;  %v8611_v22 = vld [vmem:[%s8957_s2] ss:$0 sm:$0xff] }
 0x735   : > { %3599 = vst [vmem:[#allocation1 + $0x1] ss:$4 sm:$0xff] %v10518_v32  ;;  %4988 = vmatmul.msk.bf16.gmra.mxu0 %vm970_vm8, %v3680_v26  ;;  %v3359_v7 = vpop.f32.mrf.mxu3  ;;  %v10541_v26 = vld [vmem:[#allocation274_spill] sm:$0xff] }
 0x736   : > { %3600 = vst [vmem:[#allocation1 + $0x2] ss:$4 sm:$0xff] %v10519_v38  ;;  %v8579_v59 = vadd.f32 %v3359_v7, %v8436_v56  ;;  %v10530_v56 = vld [vmem:[#allocation298_spill] sm:$0xff] }
 0x737   : > { %3601 = vst [vmem:[#allocation1 + $0x3] ss:$4 sm:$0xff] %v10520_v25  ;;  %v3597_v28 = vld.sshfl [vmem:[#allocation1 + $0x20] sm:$0xff pattern:$0x73625140] }
 0x738   : > { %3602 = vst [vmem:[#allocation1 + $0x20] ss:$4 sm:$0xff] %v10521_v12  ;;  %v3682_v35 = vpack.c.bf16 %v3597_v28, %v3596_v24  ;;  %v10543_v25 = vld [vmem:[#allocation233_spill] sm:$0xff]  ;;  %v10545_v12 = vld [vmem:[#allocation306_spill] sm:$0xff] }
 0x739   : > { %3603 = vst [vmem:[#allocation1 + $0x21] ss:$4 sm:$0xff] %v10522_v61 }
 0x73a   : > { %3604 = vst [vmem:[#allocation1 + $0x22] ss:$4 sm:$0xff] %v10523_v52 }
 0x73b   : > { %3605 = vst [vmem:[#allocation1 + $0x23] ss:$4 sm:$0xff] %v8384_v10  ;;  %v10529_v10 = vld [vmem:[#allocation297_spill] sm:$0xff] }
 0x73e   : > { %v3606_v5 = vld.sshfl [vmem:[#allocation1] sm:$0xff pattern:$0x73625140] }
 0x73f   : > { %3608 = vst [vmem:[#allocation1] ss:$4 sm:$0xff] %v8386_v39  ;;  %v3361_v39 = vpop.f32.mrf.mxu3 }
 0x740   : > { %3609 = vst [vmem:[#allocation1 + $0x1] ss:$4 sm:$0xff] %v10524_v54 }
 0x741   : > { %3610 = vst [vmem:[#allocation1 + $0x2] ss:$4 sm:$0xff] %v10525_v57  ;;  %v10546_v57 = vld [vmem:[#allocation278_spill] sm:$0xff] }
 0x742   : > { %v3607_v1 = vld.sshfl [vmem:[#allocation1 + $0x20] sm:$0xff pattern:$0x73625140]  ;;  %3611 = vst [vmem:[#allocation1 + $0x3] ss:$4 sm:$0xff] %v10526_v44 }
 0x743   : > { %3612 = vst [vmem:[#allocation1 + $0x20] ss:$4 sm:$0xff] %v10527_v23  ;;  %v3683_v13 = vpack.c.bf16 %v3607_v1, %v3606_v5 }
 0x744   : > { %3613 = vst [vmem:[#allocation1 + $0x21] ss:$4 sm:$0xff] %v10528_v27 }
 0x745   : > { %4989 = vmatmul.msk.bf16.gmra.mxu0 %vm970_vm8, %v3681_v20  ;;  %3614 = vst [vmem:[#allocation1 + $0x22] ss:$4 sm:$0xff] %v8406_v60  ;;  %v10535_v60 = vld [vmem:[#allocation301_spill] sm:$0xff] }
 0x746   : > { %3615 = vst [vmem:[#allocation1 + $0x23] ss:$4 sm:$0xff] %v10529_v10 }
 0x749   : > { %v3616_v17 = vld.sshfl [vmem:[#allocation1] sm:$0xff pattern:$0x73625140] }
 0x74a   : > { %3618 = vst [vmem:[#allocation1] ss:$4 sm:$0xff] %v10530_v56 }
 0x74b   : > { %3619 = vst [vmem:[#allocation1 + $0x1] ss:$4 sm:$0xff] %v10531_v18 }
 0x74c   : > { %3620 = vst [vmem:[#allocation1 + $0x2] ss:$4 sm:$0xff] %v10532_v34 }
 0x74d   : > { %v3617_v53 = vld.sshfl [vmem:[#allocation1 + $0x20] sm:$0xff pattern:$0x73625140]  ;;  %3621 = vst [vmem:[#allocation1 + $0x3] ss:$4 sm:$0xff] %v10533_v40 }
 0x74e   : > { %3622 = vst [vmem:[#allocation1 + $0x20] ss:$4 sm:$0xff] %v10534_v21 }
 0x74f   : > { %3623 = vst [vmem:[#allocation1 + $0x21] ss:$4 sm:$0xff] %v8428_v42  ;;  %v3684_v42 = vpack.c.bf16 %v3617_v53, %v3616_v17 }
 0x750   : > { %3624 = vst [vmem:[#allocation1 + $0x22] ss:$4 sm:$0xff] %v10535_v60 }
 0x751   : > { %3625 = vst [vmem:[#allocation1 + $0x23] ss:$4 sm:$0xff] %v10536_v16 }
 0x754   : > { %v3626_v19 = vld.sshfl [vmem:[#allocation1] sm:$0xff pattern:$0x73625140] }
 0x755   : > { %4990 = vmatmul.msk.bf16.gmra.mxu0 %vm970_vm8, %v3682_v35  ;;  %3628 = vst [vmem:[#allocation1] ss:$4 sm:$0xff] %v10537_v0 }
 0x756   : > { %3629 = vst [vmem:[#allocation1 + $0x1] ss:$4 sm:$0xff] %v10538_v45 }
 0x757   : > { %3630 = vst [vmem:[#allocation1 + $0x2] ss:$4 sm:$0xff] %v10539_v9 }
 0x758   : > { %v3627_v2 = vld.sshfl [vmem:[#allocation1 + $0x20] sm:$0xff pattern:$0x73625140]  ;;  %3631 = vst [vmem:[#allocation1 + $0x3] ss:$4 sm:$0xff] %v10540_v30 }
 0x759   : > { %3632 = vst [vmem:[#allocation1 + $0x20] ss:$4 sm:$0xff] %v8450_v29  ;;  %v3685_v7 = vpack.c.bf16 %v3627_v2, %v3626_v19 }
 0x75a   : > { %3633 = vst [vmem:[#allocation1 + $0x21] ss:$4 sm:$0xff] %v8452_v47  ;;  %v10542_v47 = vld [vmem:[#allocation2_spill] sm:$0xff] }
 0x75b   : > { %3634 = vst [vmem:[#allocation1 + $0x22] ss:$4 sm:$0xff] %v8454_v55 }
 0x75c   : > { %3635 = vst [vmem:[#allocation1 + $0x23] ss:$4 sm:$0xff] %v8441_v6  ;;  %v10544_v6 = vld [vmem:[#allocation232_spill] sm:$0xff] }
 0x75f   : > { %v8613_v38 = vld.sshfl [vmem:[#allocation1] sm:$0xff pattern:$0x73625140] }
 0x760   : > { %3638 = vst [vmem:[#allocation1] ss:$4 sm:$0xff] %v10543_v25 }
 0x761   : > { %3639 = vst [vmem:[#allocation1 + $0x1] ss:$4 sm:$0xff] %v10544_v6 }
 0x762   : > { %3640 = vst [vmem:[#allocation1 + $0x2] ss:$4 sm:$0xff] %v10545_v12 }
 0x763   : > { %v8621_v3 = vld.sshfl [vmem:[#allocation1 + $0x20] sm:$0xff pattern:$0x73625140]  ;;  %3641 = vst [vmem:[#allocation1 + $0x3] ss:$4 sm:$0xff] %v8469_v48 }
 0x764   : > { %3642 = vst [vmem:[#allocation1 + $0x20] ss:$4 sm:$0xff] %v8471_v51 }
 0x765   : > { %4991 = vmatmul.msk.bf16.gmra.mxu0 %vm970_vm8, %v3683_v13  ;;  %3643 = vst [vmem:[#allocation1 + $0x21] ss:$4 sm:$0xff] %v8474_v11 }
 0x766   : > { %3644 = vst [vmem:[#allocation1 + $0x22] ss:$4 sm:$0xff] %v8461_v8 }
 0x767   : > { %3645 = vst [vmem:[#allocation1 + $0x23] ss:$4 sm:$0xff] %v8463_v58 }
 0x76a   : > { %v8645_v45 = vld.sshfl [vmem:[#allocation1] sm:$0xff pattern:$0x73625140] }
 0x76b   : > { %3648 = vst [vmem:[#allocation1] ss:$4 sm:$0xff] %v8465_v37 }
 0x76c   : > { %3649 = vst [vmem:[#allocation1 + $0x1] ss:$4 sm:$0xff] %v8476_v36 }
 0x772   : > { %v3742_v14 = vpop.f32.mrf.mxu0 }
 0x773   : > { %v3806_v24 = vadd.f32 %v3742_v14, %v10541_v26 }
 0x775   : > { %4992 = vmatmul.msk.bf16.gmra.mxu0 %vm970_vm8, %v3684_v42  ;;  %v3835_v29 = vadd.f32 %v8611_v22, %v3806_v24  ;;  %v10547_v42 = vld [vmem:[#allocation279_spill] sm:$0xff] }
 0x777   : > { %v3860_v61 = vmax.f32 %v3835_v29, 0.0 }
 0x779   : > { %v4057_v20 = vsel %vm4056_vm9, %v3860_v61, -inf  ;;  %v3911_v44 = vrot.slane %v3860_v61, 4  ;;  %v3910_v11 = vrot.slane %v3860_v61, 2  ;;  %v3912_v27 = vrot.slane %v3860_v61, 6 }
 0x77a   : > { %v3744_v32 = vpop.f32.mrf.mxu0 }
 0x77b   : > { %v3807_v55 = vadd.f32 %v3744_v32, %v10542_v47  ;;  %v4063_v58 = vsel %vm4056_vm9, %v3911_v44, -inf  ;;  %v4066_v34 = vsel %vm4056_vm9, %v3912_v27, -inf  ;;  %v4060_v40 = vsel %vm4056_vm9, %v3910_v11, -inf }
 0x77d   : > { %v3836_v28 = vadd.f32 %v8611_v22, %v3807_v55 }
 0x77f   : > { %v8624_v52 = vmax.f32 %v3836_v28, 0.0 }
 0x781   : > { %v3915_v5 = vrot.slane %v8624_v52, 6  ;;  %v4069_v53 = vsel %vm4056_vm9, %v8624_v52, -inf  ;;  %v3913_v26 = vrot.slane %v8624_v52, 2 }
 0x782   : > { %v3747_v54 = vpop.f32.mrf.mxu0 }
 0x783   : > { %v4058_v48 = vsel %vm4056_vm9, %v3915_v5, -inf  ;;  %v3808_v1 = vadd.f32 %v3747_v54, %v10546_v57  ;;  %v3686_v57 = vpack.c.bf16 %v8621_v3, %v8613_v38 }
 0x784   : > { %v4059_v23 = vmax.f32 %v4057_v20, %v4058_v48  ;;  %v3914_v20 = vrot.slane %v8624_v52, 4 }
 0x785   : > { %v3837_v51 = vadd.f32 %v8611_v22, %v3808_v1  ;;  %4993 = vmatmul.msk.bf16.gmra.mxu0 %vm970_vm8, %v3685_v7 }
 0x786   : > { %v4204_v10 = vsel %vm4056_vm9, %v4059_v23, -inf  ;;  %v4075_v38 = vsel %vm4056_vm9, %v3914_v20, -inf  ;;  %v10549_v20 = vld [vmem:[#allocation122_spill] sm:$0xff] }
 0x787   : > { %v4205_v8 = vrot.slane %v4204_v10, 4  ;;  %v3862_v39 = vmax.f32 %v3837_v51, 0.0 }
 0x789   : > { %v4206_v35 = vmax.f32 %v4204_v10, %v4205_v8  ;;  %v3916_v17 = vrot.slane %v3862_v39, 2  ;;  %v3917_v56 = vrot.slane %v3862_v39, 4  ;;  %v3918_v18 = vrot.slane %v3862_v39, 6 }
 0x78a   : > { %v4061_v21 = vsel %vm4056_vm9, %v3862_v39, -inf  ;;  %v3749_v60 = vpop.f32.mrf.mxu0  ;;  %v4072_v8 = vsel %vm4056_vm9, %v3913_v26, -inf  ;;  %v10548_v26 = vld [vmem:[#allocation282_spill] sm:$0xff] }
 0x78b   : > { %v4207_v16 = vrot.slane %v4206_v35, 2  ;;  %v4062_v13 = vmax.f32 %v4060_v40, %v4061_v21  ;;  %v4064_v19 = vsel %vm4056_vm9, %v3916_v17, -inf  ;;  %v4067_v0 = vsel %vm4056_vm9, %v3917_v56, -inf }
 0x78c   : > { %v4065_v9 = vmax.f32 %v4063_v58, %v4064_v19  ;;  %v4068_v2 = vmax.f32 %v4066_v34, %v4067_v0  ;;  %v4070_v30 = vsel %vm4056_vm9, %v3918_v18, -inf  ;;  %v3809_v14 = vadd.f32 %v3749_v60, %v10547_v42 }
 0x78d   : > { %v4208_v24 = vmax.f32 %v4206_v35, %v4207_v16  ;;  %v4071_v32 = vmax.f32 %v4069_v53, %v4070_v30  ;;  %v4211_v29 = vsel %vm4056_vm9, %v4062_v13, -inf }
 0x78e   : > { %v4212_v47 = vrot.slane %v4211_v29, 4  ;;  %v4218_v55 = vsel %vm4056_vm9, %v4065_v9, -inf  ;;  %v4225_v25 = vsel %vm4056_vm9, %v4068_v2, -inf  ;;  %v3838_v6 = vadd.f32 %v8611_v22, %v3809_v14 }
 0x78f   : > { %v4209_v28 = vrot.slane %v4208_v24, 1  ;;  %v4219_v12 = vrot.slane %v4218_v55, 4  ;;  %v4226_v61 = vrot.slane %v4225_v25, 4  ;;  %v4232_v37 = vsel %vm4056_vm9, %v4071_v32, -inf }
 0x790   : > { %v4213_v5 = vmax.f32 %v4211_v29, %v4212_v47  ;;  %v4233_v7 = vrot.slane %v4232_v37, 4  ;;  %v8657_v54 = vmax.f32 %v3838_v6, 0.0 }
 0x791   : > { %v4220_v48 = vmax.f32 %v4218_v55, %v4219_v12  ;;  %v4227_v36 = vmax.f32 %v4225_v25, %v4226_v61  ;;  %v4210_v1 = vmax.f32 %v4208_v24, %v4209_v28 }
 0x792   : > { %v4214_v44 = vrot.slane %v4213_v5, 2  ;;  %v4234_v23 = vmax.f32 %v4232_v37, %v4233_v7  ;;  %v3919_v51 = vrot.slane %v8657_v54, 2  ;;  %v3752_v11 = vpop.f32.mrf.mxu0  ;;  %v4073_v52 = vsel %vm4056_vm9, %v8657_v54, -inf }
 0x793   : > { %v4221_v27 = vrot.slane %v4220_v48, 2  ;;  %v4228_v10 = vrot.slane %v4227_v36, 2  ;;  %v4074_v56 = vmax.f32 %v4072_v8, %v4073_v52  ;;  %v4547_v18 = vpack.c.bf16 %v4210_v1, %v4210_v1 }
 0x794   : > { %v4215_v39 = vmax.f32 %v4213_v5, %v4214_v44  ;;  %v4235_v58 = vrot.slane %v4234_v23, 2  ;;  %v4076_v35 = vsel %vm4056_vm9, %v3919_v51, -inf  ;;  %v3920_v16 = vrot.slane %v8657_v54, 4 }
 0x795   : > { %v4222_v3 = vmax.f32 %v4220_v48, %v4221_v27  ;;  %v4229_v17 = vmax.f32 %v4227_v36, %v4228_v10  ;;  %4994 = vmatmul.msk.bf16.gmra.mxu0 %vm970_vm8, %v3686_v57  ;;  %v4077_v40 = vmax.f32 %v4075_v38, %v4076_v35  ;;  %v4239_v13 = vsel %vm4056_vm9, %v4074_v56, -inf }
 0x796   : > { %v4216_v34 = vrot.slane %v4215_v39, 1  ;;  %v4236_v53 = vmax.f32 %v4234_v23, %v4235_v58  ;;  %v4240_v9 = vrot.slane %v4239_v13, 4  ;;  %v3810_v24 = vadd.f32 %v3752_v11, %v10548_v26  ;;  %v3647_v23 = vld.sshfl [vmem:[#allocation1 + $0x20] sm:$0xff pattern:$0x73625140] }
 0x797   : > { %v4223_v21 = vrot.slane %v4222_v3, 1  ;;  %v4230_v60 = vrot.slane %v4229_v17, 1  ;;  %v4246_v2 = vsel %vm4056_vm9, %v4077_v40, -inf  ;;  %v4645_v32 = vunpack.c.l.b16 %v4547_v18 }
 0x798   : > { %v4217_v19 = vmax.f32 %v4215_v39, %v4216_v34  ;;  %v4237_v0 = vrot.slane %v4236_v53, 1  ;;  %v4247_v14 = vrot.slane %v4246_v2, 4  ;;  %v4241_v55 = vmax.f32 %v4239_v13, %v4240_v9 }
 0x799   : > { %v4224_v30 = vmax.f32 %v4222_v3, %v4223_v21  ;;  %v4231_v42 = vmax.f32 %v4229_v17, %v4230_v60  ;;  %v3839_v61 = vadd.f32 %v8611_v22, %v3810_v24  ;;  %v3921_v1 = vrot.slane %v8657_v54, 6 }
 0x79a   : > { %v4238_v29 = vmax.f32 %v4236_v53, %v4237_v0  ;;  %v4548_v47 = vpack.c.bf16 %v4217_v19, %v4217_v19  ;;  %v3754_v25 = vpop.f32.mrf.mxu0  ;;  %v4248_v12 = vmax.f32 %v4246_v2, %v4247_v14  ;;  %v4242_v7 = vrot.slane %v4241_v55, 2 }
 0x79b   : > { %v4549_v6 = vpack.c.bf16 %v4224_v30, %v4224_v30  ;;  %v4550_v28 = vpack.c.bf16 %v4231_v42, %v4231_v42  ;;  %v3811_v48 = vadd.f32 %v3754_v25, %v10549_v20  ;;  %v3864_v27 = vmax.f32 %v3839_v61, 0.0  ;;  %v10550_v30 = vld [vmem:[#allocation126_spill] sm:$0xff]  ;;  %v3650_v61 = vld.sshfl [vmem:[#allocation1] sm:$0xff pattern:$0x73625140] }
 0x79c   : > { %v4551_v37 = vpack.c.bf16 %v4238_v29, %v4238_v29  ;;  %v4646_v5 = vunpack.c.l.b16 %v4548_v47  ;;  %v4249_v44 = vrot.slane %v4248_v12, 2  ;;  %v4243_v11 = vmax.f32 %v4241_v55, %v4242_v7 }
 0x79d   : > { %v4647_v36 = vunpack.c.l.b16 %v4549_v6  ;;  %v4648_v57 = vunpack.c.l.b16 %v4550_v28  ;;  %v3840_v10 = vadd.f32 %v8611_v22, %v3811_v48  ;;  %v3687_v54 = vpack.c.bf16 %v3647_v23, %v8645_v45 }
 0x79e   : > { %v4695_v51 = vsel %vm4694_vm10, %v4646_v5, %v4645_v32  ;;  %v4649_v8 = vunpack.c.l.b16 %v4551_v37  ;;  %v4250_v58 = vmax.f32 %v4248_v12, %v4249_v44  ;;  %v4244_v35 = vrot.slane %v4243_v11, 1 }
 0x79f   : > { %v4696_v39 = vsel %vm486_vm2, %v4647_v36, %v4695_v51  ;;  %v4078_v3 = vsel %vm4056_vm9, %v3920_v16, -inf  ;;  %v3865_v56 = vmax.f32 %v3840_v10, 0.0  ;;  %v4081_v18 = vsel %vm4056_vm9, %v3921_v1, -inf }
 0x7a0   : > { %v4698_v52 = vsel %vm4697_vm11, %v4648_v57, %v4696_v39  ;;  %v4251_v17 = vrot.slane %v4250_v58, 1  ;;  %v4245_v34 = vmax.f32 %v4243_v11, %v4244_v35  ;;  %v3923_v53 = vrot.slane %v3864_v27, 4  ;;  %v4756_v57 = vld [vmem:[%s8694_s15] sm:$0xf] }
 0x7a1   : > { %v4699_v38 = vsel %vm488_vm4, %v4649_v8, %v4698_v52  ;;  %v3924_v40 = vrot.slane %v3864_v27, 6  ;;  %v3925_v13 = vrot.slane %v3865_v56, 2  ;;  %v3926_v19 = vrot.slane %v3865_v56, 4 }
 0x7a2   : > { %v3757_v21 = vpop.f32.mrf.mxu0  ;;  %v4252_v60 = vmax.f32 %v4250_v58, %v4251_v17  ;;  %v3927_v0 = vrot.slane %v3865_v56, 6  ;;  %v4552_v9 = vpack.c.bf16 %v4245_v34, %v4245_v34  ;;  %v3922_v2 = vrot.slane %v3864_v27, 2 }
 0x7a3   : > { %v4084_v45 = vsel %vm4056_vm9, %v3864_v27, -inf  ;;  %v3812_v42 = vadd.f32 %v3757_v21, %v10550_v30  ;;  %v4079_v14 = vsel %vm4056_vm9, %v3925_v13, -inf  ;;  %v4082_v26 = vsel %vm4056_vm9, %v3926_v19, -inf }
 0x7a4   : > { %v4553_v16 = vpack.c.bf16 %v4252_v60, %v4252_v60  ;;  %v4085_v24 = vsel %vm4056_vm9, %v3927_v0, -inf  ;;  %v4650_v32 = vunpack.c.l.b16 %v4552_v9  ;;  %v4080_v29 = vmax.f32 %v4078_v3, %v4079_v14 }
 0x7a5   : > { %4995 = vmatmul.msk.bf16.gmra.mxu0 %vm970_vm8, %v3687_v54  ;;  %v4083_v47 = vmax.f32 %v4081_v18, %v4082_v26  ;;  %v4086_v55 = vmax.f32 %v4084_v45, %v4085_v24  ;;  %v4090_v6 = vsel %vm4056_vm9, %v3923_v53, -inf  ;;  %v4093_v28 = vsel %vm4056_vm9, %v3924_v40, -inf }
 0x7a6   : > { %v4651_v25 = vunpack.c.l.b16 %v4553_v16  ;;  %v3841_v12 = vadd.f32 %v8611_v22, %v3812_v42  ;;  %v4701_v37 = vsel %vm4700_vm12, %v4650_v32, %v4699_v38  ;;  %v4253_v5 = vsel %vm4056_vm9, %v4080_v29, -inf  ;;  %v10553_v16 = vld [vmem:[#allocation290_spill] sm:$0xff] }
 0x7a7   : > { %v4260_v7 = vsel %vm4056_vm9, %v4083_v47, -inf  ;;  %v4267_v20 = vsel %vm4056_vm9, %v4086_v55, -inf  ;;  %v4254_v1 = vrot.slane %v4253_v5, 4  ;;  %v4087_v27 = vsel %vm4056_vm9, %v3922_v2, -inf }
 0x7a8   : > { %v4702_v48 = vsel %vm490_vm6, %v4651_v25, %v4701_v37  ;;  %v4261_v44 = vrot.slane %v4260_v7, 4  ;;  %v4268_v23 = vrot.slane %v4267_v20, 4  ;;  %v3866_v11 = vmax.f32 %v3841_v12, 0.0 }
 0x7a9   : > { %v4739_v51 = vpack.c.b16 %v4702_v48, %v4702_v48  ;;  %v3688_v8 = vpack.c.bf16 %v3650_v61, %v3650_v61  ;;  %v4096_v39 = vsel %vm4056_vm9, %v3865_v56, -inf  ;;  %v4255_v58 = vmax.f32 %v4253_v5, %v4254_v1 }
 0x7aa   : > { %v3759_v10 = vpop.f32.mrf.mxu0  ;;  %v4262_v52 = vmax.f32 %v4260_v7, %v4261_v44  ;;  %v4269_v35 = vmax.f32 %v4267_v20, %v4268_v23  ;;  %v3928_v38 = vrot.slane %v3866_v11, 2  ;;  %v3929_v3 = vrot.slane %v3866_v11, 4 }
 0x7ab   : > { %v4757_v54 = vsel %vm8706_vm15, %v4739_v51, %v4756_v57  ;;  %v3930_v17 = vrot.slane %v3866_v11, 6  ;;  %v4256_v18 = vrot.slane %v4255_v58, 2  ;;  %v4088_v40 = vsel %vm4056_vm9, %v3866_v11, -inf }
 0x7ac   : > { %4758 = vst [vmem:[%s8694_s15] sm:$0xf] %v4757_v54  ;;  %v4263_v34 = vrot.slane %v4262_v52, 2  ;;  %v4270_v53 = vrot.slane %v4269_v35, 2  ;;  %v4089_v21 = vmax.f32 %v4087_v27, %v4088_v40  ;;  %v4091_v60 = vsel %vm4056_vm9, %v3928_v38, -inf }
 0x7ad   : > { %v4094_v56 = vsel %vm4056_vm9, %v3929_v3, -inf  ;;  %v4097_v13 = vsel %vm4056_vm9, %v3930_v17, -inf  ;;  %v4257_v19 = vmax.f32 %v4255_v58, %v4256_v18  ;;  %v4092_v2 = vmax.f32 %v4090_v6, %v4091_v60 }
 0x7ae   : > { %v4264_v0 = vmax.f32 %v4262_v52, %v4263_v34  ;;  %v4271_v9 = vmax.f32 %v4269_v35, %v4270_v53  ;;  %v4095_v45 = vmax.f32 %v4093_v28, %v4094_v56  ;;  %v4098_v30 = vmax.f32 %v4096_v39, %v4097_v13  ;;  %v10554_v56 = vld [vmem:[#allocation307_spill] sm:$0xff] }
 0x7af   : > { %v4274_v42 = vsel %vm4056_vm9, %v4089_v21, -inf  ;;  %v3813_v14 = vadd.f32 %v3759_v10, %v10553_v16  ;;  %v4258_v26 = vrot.slane %v4257_v19, 1  ;;  %v4281_v47 = vsel %vm4056_vm9, %v4092_v2, -inf }
 0x7b0   : > { %v4265_v24 = vrot.slane %v4264_v0, 1  ;;  %v4272_v32 = vrot.slane %v4271_v9, 1  ;;  %v4275_v29 = vrot.slane %v4274_v42, 4  ;;  %v4288_v55 = vsel %vm4056_vm9, %v4095_v45, -inf }
 0x7b1   : > { %v4295_v25 = vsel %vm4056_vm9, %v4098_v30, -inf  ;;  %v4259_v61 = vmax.f32 %v4257_v19, %v4258_v26  ;;  %v4282_v5 = vrot.slane %v4281_v47, 4  ;;  %v4289_v7 = vrot.slane %v4288_v55, 4  ;;  %v10555_v19 = vld [vmem:[#allocation83_spill] sm:$0xff] }
 0x7b2   : > { %v3762_v12 = vpop.f32.mrf.mxu0  ;;  %v4266_v37 = vmax.f32 %v4264_v0, %v4265_v24  ;;  %v4273_v6 = vmax.f32 %v4271_v9, %v4272_v32  ;;  %v4276_v28 = vmax.f32 %v4274_v42, %v4275_v29  ;;  %v4296_v20 = vrot.slane %v4295_v25, 4 }
 0x7b3   : > { %v3842_v48 = vadd.f32 %v8611_v22, %v3813_v14  ;;  %v4554_v57 = vpack.c.bf16 %v4259_v61, %v4259_v61  ;;  %v4283_v51 = vmax.f32 %v4281_v47, %v4282_v5  ;;  %v4290_v11 = vmax.f32 %v4288_v55, %v4289_v7 }
 0x7b4   : > { %v4555_v1 = vpack.c.bf16 %v4266_v37, %v4266_v37  ;;  %v4556_v44 = vpack.c.bf16 %v4273_v6, %v4273_v6  ;;  %v4277_v23 = vrot.slane %v4276_v28, 2  ;;  %v4297_v27 = vmax.f32 %v4295_v25, %v4296_v20 }
 0x7b5   : > { %4996 = vmatmul.msk.bf16.gmra.mxu0 %vm970_vm8, %v3688_v8  ;;  %v4652_v10 = vunpack.c.l.b16 %v4554_v57  ;;  %v4284_v35 = vrot.slane %v4283_v51, 2  ;;  %v4291_v54 = vrot.slane %v4290_v11, 2  ;;  %v3867_v3 = vmax.f32 %v3842_v48, 0.0 }
 0x7b6   : > { %v4653_v39 = vunpack.c.l.b16 %v4555_v1  ;;  %v4654_v58 = vunpack.c.l.b16 %v4556_v44  ;;  %v4278_v52 = vmax.f32 %v4276_v28, %v4277_v23  ;;  %v4298_v38 = vrot.slane %v4297_v27, 2 }
 0x7b7   : > { %v4285_v53 = vmax.f32 %v4283_v51, %v4284_v35  ;;  %v4292_v40 = vmax.f32 %v4290_v11, %v4291_v54  ;;  %v3814_v13 = vadd.f32 %v3762_v12, %v10554_v56  ;;  %v3932_v30 = vrot.slane %v3867_v3, 4 }
 0x7b8   : > { %v4703_v17 = vsel %vm4694_vm10, %v4653_v39, %v4652_v10  ;;  %v4279_v18 = vrot.slane %v4278_v52, 1  ;;  %v4299_v21 = vmax.f32 %v4297_v27, %v4298_v38  ;;  %v3933_v16 = vrot.slane %v3867_v3, 6 }
 0x7b9   : > { %v4704_v34 = vsel %vm486_vm2, %v4654_v58, %v4703_v17  ;;  %v4286_v9 = vrot.slane %v4285_v53, 1  ;;  %v4293_v2 = vrot.slane %v4292_v40, 1  ;;  %v3843_v14 = vadd.f32 %v8611_v22, %v3814_v13 }
 0x7ba   : > { %v3764_v8 = vpop.f32.mrf.mxu0  ;;  %v4280_v60 = vmax.f32 %v4278_v52, %v4279_v18  ;;  %v4300_v45 = vrot.slane %v4299_v21, 1  ;;  %v3931_v47 = vrot.slane %v3867_v3, 2  ;;  %v4099_v28 = vsel %vm4056_vm9, %v3867_v3, -inf }
 0x7bb   : > { %v3815_v0 = vadd.f32 %v3764_v8, %v10555_v19  ;;  %v4287_v24 = vmax.f32 %v4285_v53, %v4286_v9  ;;  %v4294_v32 = vmax.f32 %v4292_v40, %v4293_v2  ;;  %v8733_v25 = vmax.f32 %v3843_v14, 0.0  ;;  %v4759_v53 = vld [vmem:[%s8694_s15 + $0x4] sm:$0xf] }
 0x7bc   : > { %v4557_v42 = vpack.c.bf16 %v4280_v60, %v4280_v60  ;;  %v4301_v29 = vmax.f32 %v4299_v21, %v4300_v45  ;;  %v4105_v7 = vsel %vm4056_vm9, %v3932_v30, -inf  ;;  %v4108_v20 = vsel %vm4056_vm9, %v3933_v16, -inf }
 0x7bd   : > { %v3844_v26 = vadd.f32 %v8611_v22, %v3815_v0  ;;  %v4558_v61 = vpack.c.bf16 %v4287_v24, %v4287_v24  ;;  %v4559_v37 = vpack.c.bf16 %v4294_v32, %v4294_v32  ;;  %v3936_v48 = vrot.slane %v8733_v25, 6  ;;  %v10556_v32 = vld [vmem:[#allocation249_spill] sm:$0xff] }
 0x7be   : > { %v4655_v55 = vunpack.c.l.b16 %v4557_v42  ;;  %v4560_v6 = vpack.c.bf16 %v4301_v29, %v4301_v29  ;;  %v4102_v23 = vsel %vm4056_vm9, %v3931_v47, -inf  ;;  %v4111_v27 = vsel %vm4056_vm9, %v8733_v25, -inf }
 0x7bf   : > { %v3869_v12 = vmax.f32 %v3844_v26, 0.0  ;;  %v4656_v57 = vunpack.c.l.b16 %v4558_v61  ;;  %v4657_v1 = vunpack.c.l.b16 %v4559_v37  ;;  %v4100_v11 = vsel %vm4056_vm9, %v3936_v48, -inf }
 0x7c0   : > { %v4705_v5 = vsel %vm4697_vm11, %v4655_v55, %v4704_v34  ;;  %v4658_v44 = vunpack.c.l.b16 %v4560_v6  ;;  %v4101_v52 = vmax.f32 %v4099_v28, %v4100_v11  ;;  %v3934_v6 = vrot.slane %v8733_v25, 2  ;;  %v10557_v11 = vld [vmem:[#allocation303_spill] sm:$0xff] }
 0x7c1   : > { %v3937_v10 = vrot.slane %v3869_v12, 2  ;;  %v3938_v39 = vrot.slane %v3869_v12, 4  ;;  %v4706_v58 = vsel %vm488_vm4, %v4656_v57, %v4705_v5  ;;  %v3939_v35 = vrot.slane %v3869_v12, 6 }
 0x7c2   : > { %v3767_v51 = vpop.f32.mrf.mxu0  ;;  %v4103_v54 = vsel %vm4056_vm9, %v3869_v12, -inf  ;;  %v4707_v38 = vsel %vm4700_vm12, %v4657_v1, %v4706_v58  ;;  %v4302_v40 = vsel %vm4056_vm9, %v4101_v52, -inf  ;;  %v3935_v28 = vrot.slane %v8733_v25, 4 }
 0x7c3   : > { %v4104_v3 = vmax.f32 %v4102_v23, %v4103_v54  ;;  %v4106_v17 = vsel %vm4056_vm9, %v3937_v10, -inf  ;;  %v4109_v18 = vsel %vm4056_vm9, %v3938_v39, -inf  ;;  %v4708_v34 = vsel %vm490_vm6, %v4658_v44, %v4707_v38 }
 0x7c4   : > { %v4107_v21 = vmax.f32 %v4105_v7, %v4106_v17  ;;  %v4110_v8 = vmax.f32 %v4108_v20, %v4109_v18  ;;  %v4740_v60 = vpack.c.b16 %v4708_v34, %v4708_v34  ;;  %v4303_v56 = vrot.slane %v4302_v40, 4 }
 0x7c5   : > { %v4112_v13 = vsel %vm4056_vm9, %v3939_v35, -inf  ;;  %v4309_v19 = vsel %vm4056_vm9, %v4104_v3, -inf  ;;  %v3816_v29 = vadd.f32 %v3767_v51, %v10556_v32  ;;  %v4117_v52 = vsel %vm4056_vm9, %v3935_v28, -inf }
 0x7c6   : > { %v4113_v0 = vmax.f32 %v4111_v27, %v4112_v13  ;;  %v4310_v9 = vrot.slane %v4309_v19, 4  ;;  %v4316_v2 = vsel %vm4056_vm9, %v4107_v21, -inf  ;;  %v4323_v45 = vsel %vm4056_vm9, %v4110_v8, -inf }
 0x7c7   : > { %v4760_v30 = vsel %vm8706_vm15, %v4740_v60, %v4759_v53  ;;  %v4304_v42 = vmax.f32 %v4302_v40, %v4303_v56  ;;  %v4317_v16 = vrot.slane %v4316_v2, 4  ;;  %v4324_v14 = vrot.slane %v4323_v45, 4 }
 0x7c8   : > { %4761 = vst [vmem:[%s8694_s15 + $0x4] sm:$0xf] %v4760_v30  ;;  %v4311_v26 = vmax.f32 %v4309_v19, %v4310_v9  ;;  %v4330_v24 = vsel %vm4056_vm9, %v4113_v0, -inf  ;;  %v3845_v7 = vadd.f32 %v8611_v22, %v3816_v29  ;;  %v4114_v25 = vsel %vm4056_vm9, %v3934_v6, -inf }
 0x7c9   : > { %v4305_v55 = vrot.slane %v4304_v42, 2  ;;  %v4318_v12 = vmax.f32 %v4316_v2, %v4317_v16  ;;  %v4325_v61 = vmax.f32 %v4323_v45, %v4324_v14  ;;  %v4331_v37 = vrot.slane %v4330_v24, 4 }
 0x7ca   : > { %v3769_v47 = vpop.f32.mrf.mxu0  ;;  %v4312_v5 = vrot.slane %v4311_v26, 2  ;;  %v3870_v23 = vmax.f32 %v3845_v7, 0.0 }
 0x7cb   : > { %v4306_v20 = vmax.f32 %v4304_v42, %v4305_v55  ;;  %v4319_v48 = vrot.slane %v4318_v12, 2  ;;  %v4326_v57 = vrot.slane %v4325_v61, 2  ;;  %v4332_v1 = vmax.f32 %v4330_v24, %v4331_v37 }
 0x7cc   : > { %v4313_v44 = vmax.f32 %v4311_v26, %v4312_v5  ;;  %v3817_v51 = vadd.f32 %v3769_v47, %v10557_v11  ;;  %v3940_v54 = vrot.slane %v3870_v23, 2  ;;  %v4115_v53 = vsel %vm4056_vm9, %v3870_v23, -inf }
 0x7cd   : > { %v4307_v27 = vrot.slane %v4306_v20, 1  ;;  %v4320_v10 = vmax.f32 %v4318_v12, %v4319_v48  ;;  %v4327_v39 = vmax.f32 %v4325_v61, %v4326_v57  ;;  %v4333_v58 = vrot.slane %v4332_v1, 2 }
 0x7ce   : > { %v4314_v35 = vrot.slane %v4313_v44, 1  ;;  %v4118_v40 = vsel %vm4056_vm9, %v3940_v54, -inf  ;;  %v3846_v21 = vadd.f32 %v8611_v22, %v3817_v51  ;;  %v4116_v9 = vmax.f32 %v4114_v25, %v4115_v53 }
 0x7cf   : > { %v4308_v38 = vmax.f32 %v4306_v20, %v4307_v27  ;;  %v4321_v3 = vrot.slane %v4320_v10, 1  ;;  %v4328_v17 = vrot.slane %v4327_v39, 1  ;;  %v4334_v18 = vmax.f32 %v4332_v1, %v4333_v58  ;;  %v10558_v27 = vld [vmem:[#allocation217_spill] sm:$0xff] }
 0x7d0   : > { %v4315_v34 = vmax.f32 %v4313_v44, %v4314_v35  ;;  %v4119_v2 = vmax.f32 %v4117_v52, %v4118_v40  ;;  %v4337_v26 = vsel %vm4056_vm9, %v4116_v9, -inf  ;;  %v3871_v32 = vmax.f32 %v3846_v21, 0.0 }
 0x7d1   : > { %v4561_v60 = vpack.c.bf16 %v4308_v38, %v4308_v38  ;;  %v4322_v56 = vmax.f32 %v4320_v10, %v4321_v3  ;;  %v4329_v13 = vmax.f32 %v4327_v39, %v4328_v17  ;;  %v4335_v19 = vrot.slane %v4334_v18, 1 }
 0x7d2   : > { %v3772_v8 = vpop.f32.mrf.mxu0  ;;  %v4562_v0 = vpack.c.bf16 %v4315_v34, %v4315_v34  ;;  %v4344_v24 = vsel %vm4056_vm9, %v4119_v2, -inf  ;;  %v4338_v12 = vrot.slane %v4337_v26, 4  ;;  %v3941_v20 = vrot.slane %v3870_v23, 4 }
 0x7d3   : > { %v4659_v45 = vunpack.c.l.b16 %v4561_v60  ;;  %v4336_v30 = vmax.f32 %v4334_v18, %v4335_v19  ;;  %v4563_v42 = vpack.c.bf16 %v4322_v56, %v4322_v56  ;;  %v4564_v16 = vpack.c.bf16 %v4329_v13, %v4329_v13 }
 0x7d4   : > { %v4660_v14 = vunpack.c.l.b16 %v4562_v0  ;;  %v4345_v37 = vrot.slane %v4344_v24, 4  ;;  %v4339_v5 = vmax.f32 %v4337_v26, %v4338_v12  ;;  %v3942_v48 = vrot.slane %v3870_v23, 6 }
 0x7d5   : > { %v4565_v29 = vpack.c.bf16 %v4336_v30, %v4336_v30  ;;  %v4661_v47 = vunpack.c.l.b16 %v4563_v42  ;;  %v4662_v55 = vunpack.c.l.b16 %v4564_v16  ;;  %v3944_v51 = vrot.slane %v3871_v32, 4 }
 0x7d6   : > { %v4709_v61 = vsel %vm4694_vm10, %v4660_v14, %v4659_v45  ;;  %v4346_v57 = vmax.f32 %v4344_v24, %v4345_v37  ;;  %v4340_v11 = vrot.slane %v4339_v5, 2  ;;  %v3818_v10 = vadd.f32 %v3772_v8, %v10558_v27  ;;  %v4762_v27 = vld [vmem:[%s8694_s15 + $0x8] sm:$0xf] }
 0x7d7   : > { %v4663_v6 = vunpack.c.l.b16 %v4565_v29  ;;  %v4710_v28 = vsel %vm486_vm2, %v4661_v47, %v4709_v61  ;;  %v3943_v58 = vrot.slane %v3871_v32, 2  ;;  %v3945_v52 = vrot.slane %v3871_v32, 6 }
 0x7d8   : > { %v4711_v7 = vsel %vm4697_vm11, %v4662_v55, %v4710_v28  ;;  %v4347_v39 = vrot.slane %v4346_v57, 2  ;;  %v4341_v54 = vmax.f32 %v4339_v5, %v4340_v11  ;;  %v3847_v25 = vadd.f32 %v8611_v22, %v3818_v10 }
 0x7d9   : > { %v4712_v44 = vsel %vm488_vm4, %v4663_v6, %v4711_v7  ;;  %v4120_v38 = vsel %vm4056_vm9, %v3941_v20, -inf  ;;  %v4123_v23 = vsel %vm4056_vm9, %v3942_v48, -inf  ;;  %v4126_v34 = vsel %vm4056_vm9, %v3871_v32, -inf }
 0x7da   : > { %v3774_v1 = vpop.f32.mrf.mxu0  ;;  %v4348_v3 = vmax.f32 %v4346_v57, %v4347_v39  ;;  %v4342_v18 = vrot.slane %v4341_v54, 1  ;;  %v4132_v53 = vsel %vm4056_vm9, %v3944_v51, -inf  ;;  %v3872_v40 = vmax.f32 %v3847_v25, 0.0 }
 0x7db   : > { %v3819_v35 = vadd.f32 %v3774_v1, %v8481_v62  ;;  %v4135_v8 = vsel %vm4056_vm9, %v3945_v52, -inf  ;;  %v4129_v60 = vsel %vm4056_vm9, %v3943_v58, -inf }
 0x7dc   : > { %v4349_v21 = vrot.slane %v4348_v3, 1  ;;  %v4343_v56 = vmax.f32 %v4341_v54, %v4342_v18  ;;  %v3946_v13 = vrot.slane %v3872_v40, 2  ;;  %v3947_v19 = vrot.slane %v3872_v40, 4 }
 0x7dd   : > { %v3848_v17 = vadd.f32 %v8611_v22, %v3819_v35  ;;  %v3948_v0 = vrot.slane %v3872_v40, 6  ;;  %v4138_v2 = vsel %vm4056_vm9, %v3872_v40, -inf }
 0x7de   : > { %v4350_v9 = vmax.f32 %v4348_v3, %v4349_v21  ;;  %v4566_v16 = vpack.c.bf16 %v4343_v56, %v4343_v56  ;;  %v4121_v14 = vsel %vm4056_vm9, %v3946_v13, -inf  ;;  %v4124_v26 = vsel %vm4056_vm9, %v3947_v19, -inf }
 0x7df   : > { %v3873_v62 = vmax.f32 %v3848_v17, 0.0  ;;  %v4127_v24 = vsel %vm4056_vm9, %v3948_v0, -inf  ;;  %v4122_v29 = vmax.f32 %v4120_v38, %v4121_v14  ;;  %v4125_v47 = vmax.f32 %v4123_v23, %v4124_v26 }
 0x7e0   : > { %v4567_v32 = vpack.c.bf16 %v4350_v9, %v4350_v9  ;;  %v4128_v55 = vmax.f32 %v4126_v34, %v4127_v24  ;;  %v4664_v12 = vunpack.c.l.b16 %v4566_v16 }
 0x7e1   : > { %v3949_v45 = vrot.slane %v3873_v62, 2  ;;  %v3950_v30 = vrot.slane %v3873_v62, 4  ;;  %v3951_v61 = vrot.slane %v3873_v62, 6  ;;  %v4130_v37 = vsel %vm4056_vm9, %v3873_v62, -inf }
 0x7e2   : > { %v3777_v42 = vpop.f32.mrf.mxu0  ;;  %v4665_v28 = vunpack.c.l.b16 %v4567_v32  ;;  %v4351_v5 = vsel %vm4056_vm9, %v4122_v29, -inf  ;;  %v4358_v7 = vsel %vm4056_vm9, %v4125_v47, -inf  ;;  %v4365_v20 = vsel %vm4056_vm9, %v4128_v55, -inf }
 0x7e3   : > { %v4133_v6 = vsel %vm4056_vm9, %v3949_v45, -inf  ;;  %v4713_v48 = vsel %vm4700_vm12, %v4664_v12, %v4712_v44  ;;  %v4352_v57 = vrot.slane %v4351_v5, 4  ;;  %v4359_v1 = vrot.slane %v4358_v7, 4 }
 0x7e4   : > { %v4366_v11 = vrot.slane %v4365_v20, 4  ;;  %v4714_v51 = vsel %vm490_vm6, %v4665_v28, %v4713_v48  ;;  %v4131_v10 = vmax.f32 %v4129_v60, %v4130_v37  ;;  %v4134_v39 = vmax.f32 %v4132_v53, %v4133_v6 }
 0x7e5   : > { %v4136_v58 = vsel %vm4056_vm9, %v3950_v30, -inf  ;;  %v4741_v52 = vpack.c.b16 %v4714_v51, %v4714_v51  ;;  %v4353_v35 = vmax.f32 %v4351_v5, %v4352_v57  ;;  %v4360_v54 = vmax.f32 %v4358_v7, %v4359_v1 }
 0x7e6   : > { %v4367_v25 = vmax.f32 %v4365_v20, %v4366_v11  ;;  %v4137_v38 = vmax.f32 %v4135_v8, %v4136_v58  ;;  %v4139_v23 = vsel %vm4056_vm9, %v3951_v61, -inf  ;;  %v4372_v44 = vsel %vm4056_vm9, %v4131_v10, -inf }
 0x7e7   : > { %v4379_v3 = vsel %vm4056_vm9, %v4134_v39, -inf  ;;  %v4763_v18 = vsel %vm8706_vm15, %v4741_v52, %v4762_v27  ;;  %v4354_v34 = vrot.slane %v4353_v35, 2  ;;  %v4361_v40 = vrot.slane %v4360_v54, 2 }
 0x7e8   : > { %v4368_v53 = vrot.slane %v4367_v25, 2  ;;  %4764 = vst [vmem:[%s8694_s15 + $0x8] sm:$0xf] %v4763_v18  ;;  %v4140_v21 = vmax.f32 %v4138_v2, %v4139_v23  ;;  %v4373_v62 = vrot.slane %v4372_v44, 4  ;;  %v4380_v60 = vrot.slane %v4379_v3, 4 }
 0x7e9   : > { %v4386_v56 = vsel %vm4056_vm9, %v4137_v38, -inf  ;;  %v4355_v8 = vmax.f32 %v4353_v35, %v4354_v34  ;;  %v4362_v13 = vmax.f32 %v4360_v54, %v4361_v40  ;;  %v3820_v16 = vadd.f32 %v3777_v42, %v8486_v41 }
 0x7ea   : > { %v3779_v17 = vpop.f32.mrf.mxu0  ;;  %v4369_v19 = vmax.f32 %v4367_v25, %v4368_v53  ;;  %v4387_v0 = vrot.slane %v4386_v56, 4  ;;  %v4374_v9 = vmax.f32 %v4372_v44, %v4373_v62  ;;  %v4381_v45 = vmax.f32 %v4379_v3, %v4380_v60 }
 0x7eb   : > { %v4393_v30 = vsel %vm4056_vm9, %v4140_v21, -inf  ;;  %v4356_v14 = vrot.slane %v4355_v8, 1  ;;  %v4363_v26 = vrot.slane %v4362_v13, 1  ;;  %v3849_v55 = vadd.f32 %v8611_v22, %v3820_v16 }
 0x7ec   : > { %v4370_v24 = vrot.slane %v4369_v19, 1  ;;  %v4388_v32 = vmax.f32 %v4386_v56, %v4387_v0  ;;  %v4375_v29 = vrot.slane %v4374_v9, 2  ;;  %v4382_v2 = vrot.slane %v4381_v45, 2 }
 0x7ed   : > { %v4394_v47 = vrot.slane %v4393_v30, 4  ;;  %v4357_v12 = vmax.f32 %v4355_v8, %v4356_v14  ;;  %v4364_v61 = vmax.f32 %v4362_v13, %v4363_v26  ;;  %v3874_v20 = vmax.f32 %v3849_v55, 0.0 }
 0x7ee   : > { %v4371_v37 = vmax.f32 %v4369_v19, %v4370_v24  ;;  %v4389_v6 = vrot.slane %v4388_v32, 2  ;;  %v4376_v28 = vmax.f32 %v4374_v9, %v4375_v29  ;;  %v4383_v5 = vmax.f32 %v4381_v45, %v4382_v2 }
 0x7ef   : > { %v4395_v7 = vmax.f32 %v4393_v30, %v4394_v47  ;;  %v4568_v57 = vpack.c.bf16 %v4357_v12, %v4357_v12  ;;  %v4569_v41 = vpack.c.bf16 %v4364_v61, %v4364_v61  ;;  %v3952_v44 = vrot.slane %v3874_v20, 2 }
 0x7f0   : > { %v4570_v42 = vpack.c.bf16 %v4371_v37, %v4371_v37  ;;  %v4390_v1 = vmax.f32 %v4388_v32, %v4389_v6  ;;  %v4377_v11 = vrot.slane %v4376_v28, 1  ;;  %v4384_v51 = vrot.slane %v4383_v5, 1 }
 0x7f1   : > { %v4396_v27 = vrot.slane %v4395_v7, 2  ;;  %v4666_v10 = vunpack.c.l.b16 %v4568_v57  ;;  %v4667_v39 = vunpack.c.l.b16 %v4569_v41  ;;  %v3953_v21 = vrot.slane %v3874_v20, 4 }
 0x7f2   : > { %v3782_v48 = vpop.f32.mrf.mxu0  ;;  %v4668_v58 = vunpack.c.l.b16 %v4570_v42  ;;  %v4391_v52 = vrot.slane %v4390_v1, 1  ;;  %v4378_v35 = vmax.f32 %v4376_v28, %v4377_v11  ;;  %v4385_v54 = vmax.f32 %v4383_v5, %v4384_v51  ;;  %v4765_v28 = vld [vmem:[%s8694_s15 + $0xc] sm:$0xf] }
 0x7f3   : > { %v4397_v25 = vmax.f32 %v4395_v7, %v4396_v27  ;;  %v4715_v38 = vsel %vm4694_vm10, %v4667_v39, %v4666_v10  ;;  %v3954_v62 = vrot.slane %v3874_v20, 6  ;;  %v3821_v60 = vadd.f32 %v3779_v17, %v8498_v46  ;;  %v8820_v46 = vld [vmem:[%s8957_s2] ss:$0 sm:$0xff] }
 0x7f4   : > { %v4392_v23 = vmax.f32 %v4390_v1, %v4391_v52  ;;  %v4716_v3 = vsel %vm486_vm2, %v4668_v58, %v4715_v38  ;;  %v4571_v34 = vpack.c.bf16 %v4378_v35, %v4378_v35  ;;  %v4572_v40 = vpack.c.bf16 %v4385_v54, %v4385_v54 }
 0x7f5   : > { %v4398_v18 = vrot.slane %v4397_v25, 1  ;;  %v3822_v19 = vadd.f32 %v3782_v48, %v8506_v4  ;;  %v3850_v45 = vadd.f32 %v8611_v22, %v3821_v60  ;;  %v4141_v26 = vsel %vm4056_vm9, %v3874_v20, -inf }
 0x7f6   : > { %v4573_v53 = vpack.c.bf16 %v4392_v23, %v4392_v23  ;;  %v4669_v8 = vunpack.c.l.b16 %v4571_v34  ;;  %v4670_v13 = vunpack.c.l.b16 %v4572_v40  ;;  %v4147_v24 = vsel %vm4056_vm9, %v3953_v21, -inf }
 0x7f7   : > { %v4399_v56 = vmax.f32 %v4397_v25, %v4398_v18  ;;  %v3851_v17 = vadd.f32 %v8820_v46, %v3822_v19  ;;  %v4150_v22 = vsel %vm4056_vm9, %v3954_v62, -inf  ;;  %v4144_v47 = vsel %vm4056_vm9, %v3952_v44, -inf }
 0x7f8   : > { %v4671_v9 = vunpack.c.l.b16 %v4573_v53  ;;  %v4717_v14 = vsel %vm4697_vm11, %v4669_v8, %v4716_v3 }
 0x7f9   : > { %v4574_v16 = vpack.c.bf16 %v4399_v56, %v4399_v56  ;;  %v4718_v4 = vsel %vm488_vm4, %v4670_v13, %v4717_v14  ;;  %v3876_v2 = vmax.f32 %v3851_v17, 0.0 }
 0x7fa   : > { %v3784_v0 = vpop.f32.mrf.mxu0  ;;  %v4719_v29 = vsel %vm4700_vm12, %v4671_v9, %v4718_v4 }
 0x7fb   : > { %v3823_v30 = vadd.f32 %v3784_v0, %v8515_v33  ;;  %v3875_v33 = vmax.f32 %v3850_v45, 0.0  ;;  %v4672_v32 = vunpack.c.l.b16 %v4574_v16  ;;  %v3958_v5 = vrot.slane %v3876_v2, 2 }
 0x7fc   : > { %v3959_v7 = vrot.slane %v3876_v2, 4  ;;  %v3960_v20 = vrot.slane %v3876_v2, 6  ;;  %v4145_v42 = vsel %vm4056_vm9, %v3876_v2, -inf }
 0x7fd   : > { %v3955_v55 = vrot.slane %v3875_v33, 2  ;;  %v3956_v12 = vrot.slane %v3875_v33, 4  ;;  %v3957_v61 = vrot.slane %v3875_v33, 6  ;;  %v3852_v37 = vadd.f32 %v8820_v46, %v3823_v30 }
 0x7fe   : > { %v4720_v6 = vsel %vm490_vm6, %v4672_v32, %v4719_v29  ;;  %v4153_v41 = vsel %vm4056_vm9, %v3875_v33, -inf  ;;  %v4146_v11 = vmax.f32 %v4144_v47, %v4145_v42  ;;  %v4148_v51 = vsel %vm4056_vm9, %v3958_v5, -inf }
 0x7ff   : > { %v4742_v48 = vpack.c.b16 %v4720_v6, %v4720_v6  ;;  %v4142_v57 = vsel %vm4056_vm9, %v3957_v61, -inf  ;;  %v4151_v27 = vsel %vm4056_vm9, %v3959_v7, -inf  ;;  %v4149_v58 = vmax.f32 %v4147_v24, %v4148_v51 }
 0x800   : > { %v4143_v1 = vmax.f32 %v4141_v26, %v4142_v57  ;;  %v4152_v52 = vmax.f32 %v4150_v22, %v4151_v27  ;;  %v4154_v35 = vsel %vm4056_vm9, %v3960_v20, -inf  ;;  %v4407_v38 = vsel %vm4056_vm9, %v4146_v11, -inf }
 0x801   : > { %v4766_v39 = vsel %vm8706_vm15, %v4742_v48, %v4765_v28  ;;  %v4155_v25 = vmax.f32 %v4153_v41, %v4154_v35  ;;  %v8842_v23 = vmax.f32 %v3852_v37, 0.0  ;;  %v4408_v3 = vrot.slane %v4407_v38, 4 }
 0x802   : > { %v3787_v10 = vpop.f32.mrf.mxu0  ;;  %4767 = vst [vmem:[%s8694_s15 + $0xc] sm:$0xf] %v4766_v39  ;;  %v4400_v54 = vsel %vm4056_vm9, %v4143_v1, -inf  ;;  %v4414_v18 = vsel %vm4056_vm9, %v4149_v58, -inf  ;;  %v4421_v34 = vsel %vm4056_vm9, %v4152_v52, -inf  ;;  %v4159_v13 = vsel %vm4056_vm9, %v3956_v12, -inf }
 0x803   : > { %v4401_v44 = vrot.slane %v4400_v54, 4  ;;  %v4415_v40 = vrot.slane %v4414_v18, 4  ;;  %v4422_v53 = vrot.slane %v4421_v34, 4  ;;  %v4428_v21 = vsel %vm4056_vm9, %v4155_v25, -inf }
 0x804   : > { %v3961_v62 = vrot.slane %v8842_v23, 2  ;;  %v4409_v56 = vmax.f32 %v4407_v38, %v4408_v3  ;;  %v4429_v8 = vrot.slane %v4428_v21, 4  ;;  %v4156_v9 = vsel %vm4056_vm9, %v3955_v55, -inf }
 0x805   : > { %v4402_v60 = vmax.f32 %v4400_v54, %v4401_v44  ;;  %v4416_v19 = vmax.f32 %v4414_v18, %v4415_v40  ;;  %v4423_v0 = vmax.f32 %v4421_v34, %v4422_v53  ;;  %v4157_v14 = vsel %vm4056_vm9, %v8842_v23, -inf }
 0x806   : > { %v4410_v30 = vrot.slane %v4409_v56, 2  ;;  %v4430_v16 = vmax.f32 %v4428_v21, %v4429_v8  ;;  %v4158_v4 = vmax.f32 %v4156_v9, %v4157_v14  ;;  %v4160_v24 = vsel %vm4056_vm9, %v3961_v62, -inf }
 0x807   : > { %v4403_v45 = vrot.slane %v4402_v60, 2  ;;  %v4417_v26 = vrot.slane %v4416_v19, 2  ;;  %v4424_v17 = vrot.slane %v4423_v0, 2  ;;  %v4161_v2 = vmax.f32 %v4159_v13, %v4160_v24 }
 0x808   : > { %v4411_v32 = vmax.f32 %v4409_v56, %v4410_v30  ;;  %v4431_v29 = vrot.slane %v4430_v16, 2  ;;  %v3962_v55 = vrot.slane %v8842_v23, 4  ;;  %v4435_v28 = vsel %vm4056_vm9, %v4158_v4, -inf }
 0x809   : > { %v4404_v33 = vmax.f32 %v4402_v60, %v4403_v45  ;;  %v4418_v47 = vmax.f32 %v4416_v19, %v4417_v26  ;;  %v4425_v12 = vmax.f32 %v4423_v0, %v4424_v17  ;;  %v4436_v20 = vrot.slane %v4435_v28, 4 }
 0x80a   : > { %v3789_v22 = vpop.f32.mrf.mxu0  ;;  %v4412_v37 = vrot.slane %v4411_v32, 1  ;;  %v4432_v6 = vmax.f32 %v4430_v16, %v4431_v29  ;;  %v4442_v48 = vsel %vm4056_vm9, %v4161_v2, -inf  ;;  %v3824_v39 = vadd.f32 %v3787_v10, %v8524_v50 }
 0x80b   : > { %v4405_v61 = vrot.slane %v4404_v33, 1  ;;  %v4419_v5 = vrot.slane %v4418_v47, 1  ;;  %v4426_v7 = vrot.slane %v4425_v12, 1  ;;  %v4443_v1 = vrot.slane %v4442_v48, 4 }
 0x80c   : > { %v4413_v41 = vmax.f32 %v4411_v32, %v4412_v37  ;;  %v4433_v42 = vrot.slane %v4432_v6, 1  ;;  %v4437_v27 = vmax.f32 %v4435_v28, %v4436_v20  ;;  %v3853_v3 = vadd.f32 %v8820_v46, %v3824_v39 }
 0x80d   : > { %v4406_v57 = vmax.f32 %v4404_v33, %v4405_v61  ;;  %v4420_v11 = vmax.f32 %v4418_v47, %v4419_v5  ;;  %v4427_v51 = vmax.f32 %v4425_v12, %v4426_v7  ;;  %v4444_v54 = vmax.f32 %v4442_v48, %v4443_v1 }
 0x80e   : > { %v4434_v52 = vmax.f32 %v4432_v6, %v4433_v42  ;;  %v4576_v35 = vpack.c.bf16 %v4413_v41, %v4413_v41  ;;  %v4438_v44 = vrot.slane %v4437_v27, 2  ;;  %v3878_v8 = vmax.f32 %v3853_v3, 0.0 }
 0x80f   : > { %v4575_v58 = vpack.c.bf16 %v4406_v57, %v4406_v57  ;;  %v4577_v25 = vpack.c.bf16 %v4420_v11, %v4420_v11  ;;  %v4578_v38 = vpack.c.bf16 %v4427_v51, %v4427_v51  ;;  %v4445_v21 = vrot.slane %v4444_v54, 2 }
 0x810   : > { %v4579_v40 = vpack.c.bf16 %v4434_v52, %v4434_v52  ;;  %v4674_v53 = vunpack.c.l.b16 %v4576_v35  ;;  %v4439_v56 = vmax.f32 %v4437_v27, %v4438_v44  ;;  %v3963_v10 = vrot.slane %v8842_v23, 6 }
 0x811   : > { %v4673_v34 = vunpack.c.l.b16 %v4575_v58  ;;  %v4675_v62 = vunpack.c.l.b16 %v4577_v25  ;;  %v4676_v60 = vunpack.c.l.b16 %v4578_v38  ;;  %v4446_v13 = vmax.f32 %v4444_v54, %v4445_v21  ;;  %v4768_v58 = vld [vmem:[%s8694_s15 + $0x10] sm:$0xf] }
 0x812   : > { %v3792_v18 = vpop.f32.mrf.mxu0  ;;  %v3825_v19 = vadd.f32 %v3789_v22, %v8535_v63  ;;  %v4677_v0 = vunpack.c.l.b16 %v4579_v40  ;;  %v4440_v45 = vrot.slane %v4439_v56, 1  ;;  %v3965_v30 = vrot.slane %v3878_v8, 4 }
 0x813   : > { %v4721_v50 = vsel %vm4694_vm10, %v4674_v53, %v4673_v34  ;;  %v4447_v14 = vrot.slane %v4446_v13, 1  ;;  %v3964_v26 = vrot.slane %v3878_v8, 2  ;;  %v3966_v17 = vrot.slane %v3878_v8, 6 }
 0x814   : > { %v4722_v9 = vsel %vm486_vm2, %v4675_v62, %v4721_v50  ;;  %v4162_v24 = vsel %vm4056_vm9, %v3962_v55, -inf  ;;  %v4441_v33 = vmax.f32 %v4439_v56, %v4440_v45  ;;  %v3854_v23 = vadd.f32 %v8820_v46, %v3825_v19 }
 0x815   : > { %v4723_v16 = vsel %vm4697_vm11, %v4676_v60, %v4722_v9  ;;  %v4165_v32 = vsel %vm4056_vm9, %v3963_v10, -inf  ;;  %v4448_v63 = vmax.f32 %v4446_v13, %v4447_v14  ;;  %v4168_v22 = vsel %vm4056_vm9, %v3878_v8, -inf }
 0x816   : > { %v4724_v4 = vsel %vm488_vm4, %v4677_v0, %v4723_v16  ;;  %v3826_v29 = vadd.f32 %v3792_v18, %v8543_v31  ;;  %v4580_v2 = vpack.c.bf16 %v4441_v33, %v4441_v33  ;;  %v4174_v47 = vsel %vm4056_vm9, %v3965_v30, -inf }
 0x817   : > { %v4177_v12 = vsel %vm4056_vm9, %v3966_v17, -inf  ;;  %v3879_v61 = vmax.f32 %v3854_v23, 0.0  ;;  %v4581_v6 = vpack.c.bf16 %v4448_v63, %v4448_v63  ;;  %v4171_v28 = vsel %vm4056_vm9, %v3964_v26, -inf }
 0x818   : > { %v3855_v55 = vadd.f32 %v8820_v46, %v3826_v29  ;;  %v4678_v7 = vunpack.c.l.b16 %v4580_v2 }
 0x819   : > { %v3967_v20 = vrot.slane %v3879_v61, 2  ;;  %v3968_v48 = vrot.slane %v3879_v61, 4  ;;  %v3969_v57 = vrot.slane %v3879_v61, 6  ;;  %v4679_v31 = vunpack.c.l.b16 %v4581_v6 }
 0x81a   : > { %v3794_v37 = vpop.f32.mrf.mxu0  ;;  %v4180_v41 = vsel %vm4056_vm9, %v3879_v61, -inf  ;;  %v3880_v42 = vmax.f32 %v3855_v55, 0.0  ;;  %v4725_v11 = vsel %vm4700_vm12, %v4678_v7, %v4724_v4 }
 0x81b   : > { %v3827_v5 = vadd.f32 %v3794_v37, %v8552_v15  ;;  %v4163_v51 = vsel %vm4056_vm9, %v3967_v20, -inf  ;;  %v4166_v27 = vsel %vm4056_vm9, %v3968_v48, -inf  ;;  %v4169_v39 = vsel %vm4056_vm9, %v3969_v57, -inf }
 0x81c   : > { %v4726_v15 = vsel %vm490_vm6, %v4679_v31, %v4725_v11  ;;  %v4164_v52 = vmax.f32 %v4162_v24, %v4163_v51  ;;  %v4167_v35 = vmax.f32 %v4165_v32, %v4166_v27  ;;  %v4170_v54 = vmax.f32 %v4168_v22, %v4169_v39 }
 0x81d   : > { %v3856_v1 = vadd.f32 %v8820_v46, %v3827_v5  ;;  %v4743_v25 = vpack.c.b16 %v4726_v15, %v4726_v15  ;;  %v3970_v38 = vrot.slane %v3880_v42, 2  ;;  %v3971_v44 = vrot.slane %v3880_v42, 4 }
 0x81e   : > { %v3972_v3 = vrot.slane %v3880_v42, 6  ;;  %v4449_v18 = vsel %vm4056_vm9, %v4164_v52, -inf  ;;  %v4456_v34 = vsel %vm4056_vm9, %v4167_v35, -inf  ;;  %v4463_v40 = vsel %vm4056_vm9, %v4170_v54, -inf }
 0x81f   : > { %v4172_v53 = vsel %vm4056_vm9, %v3880_v42, -inf  ;;  %v4769_v21 = vsel %vm8706_vm15, %v4743_v25, %v4768_v58  ;;  %v4450_v62 = vrot.slane %v4449_v18, 4  ;;  %v4457_v60 = vrot.slane %v4456_v34, 4 }
 0x820   : > { %v4464_v56 = vrot.slane %v4463_v40, 4  ;;  %4770 = vst [vmem:[%s8694_s15 + $0x10] sm:$0xf] %v4769_v21  ;;  %v4173_v50 = vmax.f32 %v4171_v28, %v4172_v53  ;;  %v4175_v10 = vsel %vm4056_vm9, %v3970_v38, -inf  ;;  %v4178_v13 = vsel %vm4056_vm9, %v3971_v44, -inf }
 0x821   : > { %v4181_v19 = vsel %vm4056_vm9, %v3972_v3, -inf  ;;  %v4451_v0 = vmax.f32 %v4449_v18, %v4450_v62  ;;  %v4458_v9 = vmax.f32 %v4456_v34, %v4457_v60  ;;  %v4176_v30 = vmax.f32 %v4174_v47, %v4175_v10 }
 0x822   : > { %v8888_v8 = vpop.f32.mrf.mxu0  ;;  %v4465_v45 = vmax.f32 %v4463_v40, %v4464_v56  ;;  %v4179_v16 = vmax.f32 %v4177_v12, %v4178_v13  ;;  %v4182_v14 = vmax.f32 %v4180_v41, %v4181_v19  ;;  %v4470_v26 = vsel %vm4056_vm9, %v4173_v50, -inf }
 0x823   : > { %v8895_v17 = vmax.f32 %v3856_v1, 0.0  ;;  %v4452_v4 = vrot.slane %v4451_v0, 2  ;;  %v4459_v24 = vrot.slane %v4458_v9, 2  ;;  %v4471_v23 = vrot.slane %v4470_v26, 4 }
 0x824   : > { %v4466_v33 = vrot.slane %v4465_v45, 2  ;;  %v4477_v32 = vsel %vm4056_vm9, %v4176_v30, -inf  ;;  %v4484_v63 = vsel %vm4056_vm9, %v4179_v16, -inf  ;;  %v4491_v22 = vsel %vm4056_vm9, %v4182_v14, -inf }
 0x825   : > { %v4453_v29 = vmax.f32 %v4451_v0, %v4452_v4  ;;  %v4460_v2 = vmax.f32 %v4458_v9, %v4459_v24  ;;  %v4472_v47 = vmax.f32 %v4470_v26, %v4471_v23  ;;  %v4478_v12 = vrot.slane %v4477_v32, 4 }
 0x826   : > { %v4467_v61 = vmax.f32 %v4465_v45, %v4466_v33  ;;  %v4485_v37 = vrot.slane %v4484_v63, 4  ;;  %v4492_v6 = vrot.slane %v4491_v22, 4  ;;  %v3973_v55 = vrot.slane %v8895_v17, 2 }
 0x827   : > { %v4454_v28 = vrot.slane %v4453_v29, 1  ;;  %v4461_v5 = vrot.slane %v4460_v2, 1  ;;  %v4473_v20 = vrot.slane %v4472_v47, 2  ;;  %v4479_v57 = vmax.f32 %v4477_v32, %v4478_v12 }
 0x828   : > { %v4468_v7 = vrot.slane %v4467_v61, 1  ;;  %v4486_v31 = vmax.f32 %v4484_v63, %v4485_v37  ;;  %v4493_v41 = vmax.f32 %v4491_v22, %v4492_v6  ;;  %v3974_v42 = vrot.slane %v8895_v17, 4 }
 0x829   : > { %v4455_v1 = vmax.f32 %v4453_v29, %v4454_v28  ;;  %v4462_v11 = vmax.f32 %v4460_v2, %v4461_v5  ;;  %v4474_v27 = vmax.f32 %v4472_v47, %v4473_v20  ;;  %v4480_v39 = vrot.slane %v4479_v57, 2 }
 0x82a   : > { %v3799_v48 = vpop.f32.mrf.mxu0  ;;  %v4469_v51 = vmax.f32 %v4467_v61, %v4468_v7  ;;  %v4487_v15 = vrot.slane %v4486_v31, 2  ;;  %v4494_v58 = vrot.slane %v4493_v41, 2  ;;  %v3975_v52 = vrot.slane %v8895_v17, 6 }
 0x82b   : > { %v4582_v35 = vpack.c.bf16 %v4455_v1, %v4455_v1  ;;  %v4583_v54 = vpack.c.bf16 %v4462_v11, %v4462_v11  ;;  %v4475_v38 = vrot.slane %v4474_v27, 1  ;;  %v4481_v44 = vmax.f32 %v4479_v57, %v4480_v39  ;;  %v4771_v1 = vld [vmem:[%s8694_s15 + $0x14] sm:$0xf] }
 0x82c   : > { %v4584_v25 = vpack.c.bf16 %v4469_v51, %v4469_v51  ;;  %v4488_v3 = vmax.f32 %v4486_v31, %v4487_v15  ;;  %v4495_v18 = vmax.f32 %v4493_v41, %v4494_v58  ;;  %v4183_v34 = vsel %vm4056_vm9, %v8895_v17, -inf }
 0x82d   : > { %v4680_v40 = vunpack.c.l.b16 %v4582_v35  ;;  %v4681_v53 = vunpack.c.l.b16 %v4583_v54  ;;  %v4476_v62 = vmax.f32 %v4474_v27, %v4475_v38  ;;  %v4482_v60 = vrot.slane %v4481_v44, 1 }
 0x82e   : > { %v4682_v21 = vunpack.c.l.b16 %v4584_v25  ;;  %v4489_v56 = vrot.slane %v4488_v3, 1  ;;  %v4496_v50 = vrot.slane %v4495_v18, 1  ;;  %v4189_v10 = vsel %vm4056_vm9, %v3974_v42, -inf }
 0x82f   : > { %v4727_v13 = vsel %vm4694_vm10, %v4681_v53, %v4680_v40  ;;  %v4585_v19 = vpack.c.bf16 %v4476_v62, %v4476_v62  ;;  %v3828_v0 = vadd.f32 %v8888_v8, %v8562_v43  ;;  %v3829_v9 = vadd.f32 %v3799_v48, %v8572_v49 }
 0x830   : > { %v4728_v30 = vsel %vm486_vm2, %v4682_v21, %v4727_v13  ;;  %v4483_v16 = vmax.f32 %v4481_v44, %v4482_v60  ;;  %v4490_v14 = vmax.f32 %v4488_v3, %v4489_v56  ;;  %v4497_v26 = vmax.f32 %v4495_v18, %v4496_v50 }
 0x831   : > { %v4683_v17 = vunpack.c.l.b16 %v4585_v19  ;;  %v4192_v4 = vsel %vm4056_vm9, %v3975_v52, -inf  ;;  %v3857_v24 = vadd.f32 %v8820_v46, %v3828_v0  ;;  %v3858_v33 = vadd.f32 %v8820_v46, %v3829_v9 }
 0x832   : > { %v3802_v45 = vpop.f32.mrf.mxu0  ;;  %v4586_v23 = vpack.c.bf16 %v4483_v16, %v4483_v16  ;;  %v4587_v32 = vpack.c.bf16 %v4490_v14, %v4490_v14  ;;  %v4588_v63 = vpack.c.bf16 %v4497_v26, %v4497_v26  ;;  %v4186_v29 = vsel %vm4056_vm9, %v3973_v55, -inf }
 0x833   : > { %v3830_v43 = vadd.f32 %v3802_v45, %v8579_v59  ;;  %v4729_v49 = vsel %vm4697_vm11, %v4683_v17, %v4728_v30  ;;  %v3882_v8 = vmax.f32 %v3857_v24, 0.0  ;;  %v3883_v22 = vmax.f32 %v3858_v33, 0.0 }
 0x834   : > { %v4684_v2 = vunpack.c.l.b16 %v4586_v23  ;;  %v4685_v61 = vunpack.c.l.b16 %v4587_v32  ;;  %v4686_v47 = vunpack.c.l.b16 %v4588_v63 }
 0x835   : > { %v3859_v12 = vadd.f32 %v8820_v46, %v3830_v43  ;;  %v3978_v37 = vrot.slane %v3882_v8, 6  ;;  %v4195_v6 = vsel %vm4056_vm9, %v3882_v8, -inf  ;;  %v3979_v28 = vrot.slane %v3883_v22, 2 }
 0x836   : > { %v3980_v5 = vrot.slane %v3883_v22, 4  ;;  %v4730_v7 = vsel %vm488_vm4, %v4684_v2, %v4729_v49  ;;  %v3981_v59 = vrot.slane %v3883_v22, 6  ;;  %v4187_v20 = vsel %vm4056_vm9, %v3883_v22, -inf }
 0x837   : > { %v3884_v48 = vmax.f32 %v3859_v12, 0.0  ;;  %v4731_v57 = vsel %vm4700_vm12, %v4685_v61, %v4730_v7  ;;  %v4184_v55 = vsel %vm4056_vm9, %v3978_v37, -inf  ;;  %v4188_v31 = vmax.f32 %v4186_v29, %v4187_v20 }
 0x838   : > { %v4190_v41 = vsel %vm4056_vm9, %v3979_v28, -inf  ;;  %v4732_v46 = vsel %vm490_vm6, %v4686_v47, %v4731_v57  ;;  %v4185_v11 = vmax.f32 %v4183_v34, %v4184_v55  ;;  %v4193_v27 = vsel %vm4056_vm9, %v3980_v5, -inf }
 0x839   : > { %v4191_v51 = vmax.f32 %v4189_v10, %v4190_v41  ;;  %v4744_v39 = vpack.c.b16 %v4732_v46, %v4732_v46  ;;  %v4194_v15 = vmax.f32 %v4192_v4, %v4193_v27  ;;  %v4196_v58 = vsel %vm4056_vm9, %v3981_v59, -inf }
 0x83a   : > { %v3804_v42 = vpop.f32.mrf.mxu0  ;;  %v4505_v52 = vsel %vm4056_vm9, %v4188_v31, -inf  ;;  %v4498_v35 = vsel %vm4056_vm9, %v4185_v11, -inf  ;;  %v4197_v54 = vmax.f32 %v4195_v6, %v4196_v58  ;;  %v3976_v62 = vrot.slane %v3882_v8, 2 }
 0x83b   : > { %v4506_v25 = vrot.slane %v4505_v52, 4  ;;  %v4512_v38 = vsel %vm4056_vm9, %v4191_v51, -inf  ;;  %v4772_v44 = vsel %vm8706_vm15, %v4744_v39, %v4771_v1  ;;  %v4499_v3 = vrot.slane %v4498_v35, 4 }
 0x83c   : > { %v4513_v18 = vrot.slane %v4512_v38, 4  ;;  %v4519_v34 = vsel %vm4056_vm9, %v4194_v15, -inf  ;;  %4773 = vst [vmem:[%s8694_s15 + $0x14] sm:$0xf] %v4772_v44  ;;  %v4526_v21 = vsel %vm4056_vm9, %v4197_v54, -inf  ;;  %v3977_v10 = vrot.slane %v3882_v8, 4 }
 0x83d   : > { %v4507_v40 = vmax.f32 %v4505_v52, %v4506_v25  ;;  %v4520_v53 = vrot.slane %v4519_v34, 4  ;;  %v4500_v60 = vmax.f32 %v4498_v35, %v4499_v3  ;;  %v4527_v50 = vrot.slane %v4526_v21, 4 }
 0x83e   : > { %v4514_v56 = vmax.f32 %v4512_v38, %v4513_v18  ;;  %v3982_v0 = vrot.slane %v3884_v48, 2  ;;  %v4198_v9 = vsel %vm4056_vm9, %v3976_v62, -inf  ;;  %v4199_v14 = vsel %vm4056_vm9, %v3884_v48, -inf }
 0x83f   : > { %v4508_v13 = vrot.slane %v4507_v40, 2  ;;  %v4521_v19 = vmax.f32 %v4519_v34, %v4520_v53  ;;  %v4501_v45 = vrot.slane %v4500_v60, 2  ;;  %v4528_v16 = vmax.f32 %v4526_v21, %v4527_v50 }
 0x840   : > { %v4515_v30 = vrot.slane %v4514_v56, 2  ;;  %v4200_v4 = vmax.f32 %v4198_v9, %v4199_v14  ;;  %v4201_v24 = vsel %vm4056_vm9, %v3977_v10, -inf  ;;  %v4202_v63 = vsel %vm4056_vm9, %v3982_v0, -inf }
 0x841   : > { %v4509_v26 = vmax.f32 %v4507_v40, %v4508_v13  ;;  %v4522_v17 = vrot.slane %v4521_v19, 2  ;;  %v4502_v33 = vmax.f32 %v4500_v60, %v4501_v45  ;;  %v4529_v32 = vrot.slane %v4528_v16, 2  ;;  %v4774_v13 = vld [vmem:[%s8694_s15 + $0x18] sm:$0xf] }
 0x842   : > { %v4516_v23 = vmax.f32 %v4514_v56, %v4515_v30  ;;  %v4203_v8 = vmax.f32 %v4201_v24, %v4202_v63  ;;  %v4533_v22 = vsel %vm4056_vm9, %v4200_v4, -inf }
 0x843   : > { %v4510_v43 = vrot.slane %v4509_v26, 1  ;;  %v4523_v49 = vmax.f32 %v4521_v19, %v4522_v17  ;;  %v4503_v29 = vrot.slane %v4502_v33, 1  ;;  %v4530_v61 = vmax.f32 %v4528_v16, %v4529_v32 }
 0x844   : > { %v4517_v2 = vrot.slane %v4516_v23, 1  ;;  %v4534_v47 = vrot.slane %v4533_v22, 4  ;;  %v4540_v6 = vsel %vm4056_vm9, %v4203_v8, -inf }
 0x845   : > { %v4511_v12 = vmax.f32 %v4509_v26, %v4510_v43  ;;  %v4524_v37 = vrot.slane %v4523_v49, 1  ;;  %v4504_v28 = vmax.f32 %v4502_v33, %v4503_v29  ;;  %v4531_v7 = vrot.slane %v4530_v61, 1 }
 0x846   : > { %v4518_v5 = vmax.f32 %v4516_v23, %v4517_v2  ;;  %v4535_v59 = vmax.f32 %v4533_v22, %v4534_v47  ;;  %v4541_v57 = vrot.slane %v4540_v6, 4 }
 0x847   : > { %v4525_v20 = vmax.f32 %v4523_v49, %v4524_v37  ;;  %v4590_v48 = vpack.c.bf16 %v4511_v12, %v4511_v12  ;;  %v4589_v55 = vpack.c.bf16 %v4504_v28, %v4504_v28  ;;  %v4532_v31 = vmax.f32 %v4530_v61, %v4531_v7 }
 0x848   : > { %v4591_v41 = vpack.c.bf16 %v4518_v5, %v4518_v5  ;;  %v4536_v42 = vrot.slane %v4535_v59, 2  ;;  %v4542_v11 = vmax.f32 %v4540_v6, %v4541_v57 }
 0x849   : > { %v4592_v46 = vpack.c.bf16 %v4525_v20, %v4525_v20  ;;  %v4688_v1 = vunpack.c.l.b16 %v4590_v48  ;;  %v4687_v51 = vunpack.c.l.b16 %v4589_v55  ;;  %v4593_v27 = vpack.c.bf16 %v4532_v31, %v4532_v31 }
 0x84a   : > { %v4689_v39 = vunpack.c.l.b16 %v4591_v41  ;;  %v4537_v15 = vmax.f32 %v4535_v59, %v4536_v42  ;;  %v4543_v52 = vrot.slane %v4542_v11, 2 }
 0x84b   : > { %v4690_v58 = vunpack.c.l.b16 %v4592_v46  ;;  %v4733_v35 = vsel %vm4694_vm10, %v4688_v1, %v4687_v51  ;;  %v4691_v25 = vunpack.c.l.b16 %v4593_v27 }
 0x84c   : > { %v4538_v54 = vrot.slane %v4537_v15, 1  ;;  %v4544_v38 = vmax.f32 %v4542_v11, %v4543_v52  ;;  %v4734_v44 = vsel %vm486_vm2, %v4689_v39, %v4733_v35 }
 0x84d   : > { %v4735_v18 = vsel %vm4697_vm11, %v4690_v58, %v4734_v44 }
 0x84e   : > { %v4539_v3 = vmax.f32 %v4537_v15, %v4538_v54  ;;  %v4545_v34 = vrot.slane %v4544_v38, 1  ;;  %v4736_v40 = vsel %vm488_vm4, %v4691_v25, %v4735_v18 }
 0x850   : > { %v4594_v53 = vpack.c.bf16 %v4539_v3, %v4539_v3  ;;  %v4546_v21 = vmax.f32 %v4544_v38, %v4545_v34 }
 0x852   : > { %v4692_v62 = vunpack.c.l.b16 %v4594_v53  ;;  %v4595_v60 = vpack.c.bf16 %v4546_v21, %v4546_v21 }
 0x854   : > { %v4737_v56 = vsel %vm4700_vm12, %v4692_v62, %v4736_v40  ;;  %v4693_v50 = vunpack.c.l.b16 %v4595_v60 }
 0x856   : > { %v4738_v10 = vsel %vm490_vm6, %v4693_v50, %v4737_v56 }
 0x857   : > { %v4745_v19 = vpack.c.b16 %v4738_v10, %v4738_v10 }
 0x859   : > { %v4775_v0 = vsel %vm8706_vm15, %v4745_v19, %v4774_v13 }
 0x85a   : > { %4776 = vst [vmem:[%s8694_s15 + $0x18] sm:$0xf] %v4775_v0 }
 0x85b PF: > { %s13_s12 = sadd.s32 1, %s5020_s12  }
 0x85c   : > { %p10_p4 = scmp.ge.s32.totalorder %s13_s12, 4  }
 0x85e   :  { %12 = sbr.rel (!%p10_p4) target bundleno = 1 (0x1), region = 154 }

</bundles_post_ra>
